<compile_context>
chip_gen: v6e
topology: v6e:2x2x1
jax: 0.10.0
libtpu: 0.0.40
codegen_flags: <defaults>
</compile_context>

<pallas_src>
import numpy as np
import jax
import jax.numpy as jnp
from jax.experimental import pallas as pl
from jax.experimental.pallas import tpu as pltpu

_BN_EPS = 1e-5


# ------------------------------ in-kernel math -------------------------------

def _mm(a, b):
    """bf16 x bf16 -> f32 MXU matmul (f32 accumulation)."""
    return jnp.dot(a.astype(jnp.bfloat16), b.astype(jnp.bfloat16),
                   preferred_element_type=jnp.float32)


def _dp_branch_kernel(x_ref,
                      w1_ref, b1_ref, g1_ref, be1_ref,
                      w2_ref, b2_ref, g2_ref, be2_ref,
                      w3_ref, b3_ref, g3_ref, be3_ref,
                      w4_ref, b4_ref, g4_ref, be4_ref,
                      w5_ref, b5_ref,
                      G1_ref, G2_ref, G3_ref, G4_ref,
                      o_ref):
    """One DP_network branch.  Activations are (C, M), M = n*HW + hw (lane-dense)."""
    N = x_ref.shape[0]

    def bn(y, gamma, beta):
        # PyTorch training-mode BatchNorm (batch stats, biased variance),
        # centered two-pass variance for f32 stability.
        m = y.shape[1]
        mean = jnp.sum(y, axis=1, keepdims=True) * (1.0 / m)
        d = y - mean
        var = jnp.sum(d * d, axis=1, keepdims=True) * (1.0 / m)
        return d * jax.lax.rsqrt(var + _BN_EPS) * gamma + beta

    def conv_bn(a, w_ref, G_ref, b_ref, g_ref, be_ref):
        # Conv2d(k, s, p):  per image n:
        #   Q_n = A_n^T (Cin,HWi) @ G_hstack (HWi, KK*HWo)      -- 1 gather GEMM
        #   P_n (KK*Cin, HWo)  from lane-blocks of Q_n
        #   Y   = W_flat (Cout, KK*Cin) @ [P_0 | P_1 | ...]      -- 1 weight GEMM
        cin = a.shape[0]
        kk = w_ref.shape[1] // cin
        hwi = a.shape[1] // N
        hwo = G_ref.shape[1] // kk
        a16 = a.astype(jnp.bfloat16)
        cols = []
        for n in range(N):
            q = _mm(a16[:, n * hwi:(n + 1) * hwi], G_ref[...]).astype(jnp.bfloat16)
            cols.append(jnp.concatenate(
                [q[:, t * hwo:(t + 1) * hwo] for t in range(kk)], axis=0))
        p = jnp.concatenate(cols, axis=1)                       # (KK*Cin, N*HWo)
        y = _mm(w_ref[...], p) + b_ref[...]
        return bn(y, g_ref[...], be_ref[...])

    def convt_bn(a, w_ref, G_ref, b_ref, g_ref, be_ref):
        # ConvTranspose2d(k, s, p):
        #   R   = W_stack (KK*Cout, Cin) @ A^T (Cin, N*HWi)      -- 1 weight GEMM
        #   per image n: R_h_n (Cout, KK*HWi) from sublane-blocks of R
        #   Y_n = R_h_n @ G_vstack (KK*HWi, HWo)                 -- 1 scatter GEMM
        cout = b_ref.shape[0]
        kk = w_ref.shape[0] // cout
        hwi = a.shape[1] // N
        r = _mm(w_ref[...], a).astype(jnp.bfloat16)              # (KK*Cout, N*HWi)
        cols = []
        for n in range(N):
            rn = r[:, n * hwi:(n + 1) * hwi]
            rh = jnp.concatenate(
                [rn[t * cout:(t + 1) * cout, :] for t in range(kk)], axis=1)
            cols.append(_mm(rh, G_ref[...]))                     # (Cout, HWo)
        y = jnp.concatenate(cols, axis=1) + b_ref[...]
        return bn(y, g_ref[...], be_ref[...])

    # layout: (N, C, HW) -> (C, N*HW), batch on the lane axis.
    xb = x_ref[...]
    a0 = jnp.concatenate([xb[n] for n in range(N)], axis=1)      # (4,   N*256)
    a1 = conv_bn(a0, w1_ref, G1_ref, b1_ref, g1_ref, be1_ref)    # (32,  N*64)
    a2 = conv_bn(a1, w2_ref, G2_ref, b2_ref, g2_ref, be2_ref)    # (256, N*16)
    a3 = convt_bn(a2, w3_ref, G3_ref, b3_ref, g3_ref, be3_ref)   # (32,  N*64)
    a4 = convt_bn(a3, w4_ref, G4_ref, b4_ref, g4_ref, be4_ref)   # (4,   N*256)
    # layer 5 (1x1 conv, 4 -> 1) folded into the epilogue; output is lane-dense.
    o_ref[...] = _mm(w5_ref[...], a4) + b5_ref[...]              # (1,   N*256)


# ------------------ host-side constants (built exactly once) ------------------

def _conv_gather_hstack(H, W, K, stride, pad):
    """Per-image 0/1 gather, lane-stacked: (H*W, K*K*OH*OW) for Conv2d."""
    OH = (H + 2 * pad - K) // stride + 1
    OW = (W + 2 * pad - K) // stride + 1
    G = np.zeros((K * K, H * W, OH * OW), np.float32)
    for kh in range(K):
        for kw in range(K):
            t = kh * K + kw
            for oh in range(OH):
                ih = oh * stride + kh - pad
                if ih < 0 or ih >= H:
                    continue
                for ow in range(OW):
                    iw = ow * stride + kw - pad
                    if iw < 0 or iw >= W:
                        continue
                    G[t, ih * W + iw, oh * OW + ow] = 1.0
    Gh = np.transpose(G, (1, 0, 2)).reshape(H * W, K * K * OH * OW)
    return Gh, OH, OW


def _convt_gather_vstack(H, W, K, stride, pad):
    """Per-image 0/1 scatter, sublane-stacked: (K*K*H*W, OH*OW) for ConvTranspose2d."""
    OH = (H - 1) * stride - 2 * pad + K
    OW = (W - 1) * stride - 2 * pad + K
    G = np.zeros((K * K, H * W, OH * OW), np.float32)
    for kh in range(K):
        for kw in range(K):
            t = kh * K + kw
            for oh in range(OH):
                num = oh + pad - kh
                if num % stride != 0:
                    continue
                ih = num // stride
                if ih < 0 or ih >= H:
                    continue
                for ow in range(OW):
                    num2 = ow + pad - kw
                    if num2 % stride != 0:
                        continue
                    iw = num2 // stride
                    if iw < 0 or iw >= W:
                        continue
                    G[t, ih * W + iw, oh * OW + ow] = 1.0
    return G.reshape(K * K * H * W, OH * OW), OH, OW


def make_gather_constants(H, W):
    """Batch-independent gather/scatter matrices, shared by both branches."""
    G1, H1, W1 = _conv_gather_hstack(H, W, 3, 2, 1)      # 16x16 -> 8x8
    G2, H2, W2 = _conv_gather_hstack(H1, W1, 3, 2, 1)    # 8x8   -> 4x4
    G3, H3, W3 = _convt_gather_vstack(H2, W2, 4, 2, 1)   # 4x4   -> 8x8
    G4, H4, W4 = _convt_gather_vstack(H3, W3, 4, 2, 1)   # 8x8   -> 16x16
    assert (H4, W4) == (H, W)
    return [jnp.asarray(g, jnp.bfloat16) for g in (G1, G2, G3, G4)]


# ------------------------- parameter packing (run once) -----------------------

def _conv_w_flat(w):     # Conv2d (Cout,Cin,K,K) -> (Cout, K*K*Cin), col = t*Cin+ci
    co, ci, kh, kw = w.shape
    return jnp.transpose(w, (0, 2, 3, 1)).reshape(co, kh * kw * ci).astype(jnp.bfloat16)


def _convt_w_stack(w):   # ConvT (Cin,Cout,K,K) -> (K*K*Cout, Cin), row = t*Cout+co
    ci, co, kh, kw = w.shape
    return jnp.transpose(w, (2, 3, 1, 0)).reshape(kh * kw * co, ci).astype(jnp.bfloat16)


def _col(v):
    return v.reshape(-1, 1).astype(jnp.float32)


def pack_dp_params(params_distant, params_local):
    """Pack + branch-stack all parameters ONCE, outside the per-call path."""
    def one(p):
        return [
            _conv_w_flat(p["w1"]), _col(p["b1"]), _col(p["g1"]), _col(p["be1"]),
            _conv_w_flat(p["w2"]), _col(p["b2"]), _col(p["g2"]), _col(p["be2"]),
            _convt_w_stack(p["w3"]), _col(p["b3"]), _col(p["g3"]), _col(p["be3"]),
            _convt_w_stack(p["w4"]), _col(p["b4"]), _col(p["g4"]), _col(p["be4"]),
            p["w5"].reshape(1, 4).astype(jnp.bfloat16), _col(p["b5"]),
        ]
    d, l = one(params_distant), one(params_local)
    return [jnp.stack([a, b], axis=0) for a, b in zip(d, l)]


# --------------------------------- specs --------------------------------------

def _branch_spec(a):
    nd = a.ndim
    return pl.BlockSpec((None,) + tuple(a.shape[1:]),
                        lambda b: (b,) + (0,) * (nd - 1))


def _shared_spec(a):
    nd = a.ndim
    return pl.BlockSpec(tuple(a.shape), lambda b: (0,) * nd)


# -------------------------------- DP_network -----------------------------------

def dp_network_forward(distant_region, distant_gauss, local_region, attention_map,
                       packed_params, gather_mats):
    # TODO(synk): the .cuda() transfer in the PyTorch forward has no Pallas
    # equivalent (JAX arrays are already device-resident); it is a no-op here.
    N, _, H, W = distant_region.shape
    input1 = jnp.concatenate([distant_region, distant_gauss], axis=1)   # (N,4,H,W)
    input2 = jnp.concatenate([local_region, attention_map], axis=1)     # (N,4,H,W)
    x_all = jnp.stack([input1, input2], axis=0).reshape(2, N, 4, H * W)

    m_out = N * H * W
    out = pl.pallas_call(
        _dp_branch_kernel,
        out_shape=jax.ShapeDtypeStruct((2, 1, m_out), jnp.float32),
        grid=(2,),                        # one grid step per branch
        in_specs=([_branch_spec(x_all)]
                  + [_branch_spec(a) for a in packed_params]
                  + [_shared_spec(g) for g in gather_mats]),
        out_specs=pl.BlockSpec((None, 1, m_out), lambda b: (b, 0, 0)),
        compiler_params=pltpu.CompilerParams(
            dimension_semantics=("parallel",),
            vmem_limit_bytes=32 * 1024 * 1024),
    )(x_all, *packed_params, *gather_mats)

    o = out.reshape(2, 1, N, H, W)
    out1 = jnp.transpose(o[0], (1, 0, 2, 3))                            # (N,1,H,W)
    out2 = jnp.transpose(o[1], (1, 0, 2, 3))
    return out1, out2


# ------------------------------ param creation ---------------------------------

def _make_branch_params(key):
    ks = jax.random.split(key, 10)

    def u(k, shape, fan_in):
        b = 1.0 / np.sqrt(fan_in)
        return jax.random.uniform(k, shape, jnp.float32, -b, b)

    p = {}
    p["w1"], p["b1"] = u(ks[0], (32, 4, 3, 3), 4 * 9), u(ks[1], (32,), 4 * 9)
    p["g1"], p["be1"] = jnp.ones((32,), jnp.float32), jnp.zeros((32,), jnp.float32)
    p["w2"], p["b2"] = u(ks[2], (256, 32, 3, 3), 32 * 9), u(ks[3], (256,), 32 * 9)
    p["g2"], p["be2"] = jnp.ones((256,), jnp.float32), jnp.zeros((256,), jnp.float32)
    # ConvTranspose2d weight layout: (in_channels, out_channels, kH, kW)
    p["w3"], p["b3"] = u(ks[4], (256, 32, 4, 4), 32 * 16), u(ks[5], (32,), 32 * 16)
    p["g3"], p["be3"] = jnp.ones((32,), jnp.float32), jnp.zeros((32,), jnp.float32)
    p["w4"], p["b4"] = u(ks[6], (32, 4, 4, 4), 4 * 16), u(ks[7], (4,), 4 * 16)
    p["g4"], p["be4"] = jnp.ones((4,), jnp.float32), jnp.zeros((4,), jnp.float32)
    p["w5"], p["b5"] = u(ks[8], (1, 4, 1, 1), 4), u(ks[9], (1,), 4)
    return p


# ----------------------------------- main ---------------------------------------

if __name__ == "__main__":
    key = jax.random.PRNGKey(0)
    k_in, k_pd, k_plc = jax.random.split(key, 3)
    ki = jax.random.split(k_in, 4)

    N, H, W = 2, 16, 16
    distant_region = jax.random.normal(ki[0], (N, 3, H, W), jnp.float32)
    distant_gauss = jax.random.normal(ki[1], (N, 1, H, W), jnp.float32)
    local_region = jax.random.normal(ki[2], (N, 3, H, W), jnp.float32)
    attention_map = jax.random.normal(ki[3], (N, 1, H, W), jnp.float32)

    params_d = _make_branch_params(k_pd)
    params_l = _make_branch_params(k_plc)

    # One-time packing (outside the jitted per-call path).
    packed_params = pack_dp_params(params_d, params_l)
    gather_mats = make_gather_constants(H, W)

    fwd = jax.jit(dp_network_forward)
    out1, out2 = fwd(distant_region, distant_gauss, local_region, attention_map,
                     packed_params, gather_mats)
    jax.block_until_ready((out1, out2))

    assert out1.shape == (N, 1, H, W), out1.shape
    assert out2.shape == (N, 1, H, W), out2.shape
    assert bool(jnp.all(jnp.isfinite(out1))) and bool(jnp.all(jnp.isfinite(out2)))
    print("KERNEL_OK")
</pallas_src>

<mosaic_0001>
module attributes {stable_mosaic.version = 11 : i64} {
  func.func @_dp_branch_kernel(%arg0: i32, %arg1: memref<1x2x4x256xf32, #tpu.memory_space<vmem>>, %arg2: memref<1x32x36xbf16, #tpu.memory_space<vmem>>, %arg3: memref<1x32x1xf32, #tpu.memory_space<vmem>>, %arg4: memref<1x32x1xf32, #tpu.memory_space<vmem>>, %arg5: memref<1x32x1xf32, #tpu.memory_space<vmem>>, %arg6: memref<1x256x288xbf16, #tpu.memory_space<vmem>>, %arg7: memref<1x256x1xf32, #tpu.memory_space<vmem>>, %arg8: memref<1x256x1xf32, #tpu.memory_space<vmem>>, %arg9: memref<1x256x1xf32, #tpu.memory_space<vmem>>, %arg10: memref<1x512x256xbf16, #tpu.memory_space<vmem>>, %arg11: memref<1x32x1xf32, #tpu.memory_space<vmem>>, %arg12: memref<1x32x1xf32, #tpu.memory_space<vmem>>, %arg13: memref<1x32x1xf32, #tpu.memory_space<vmem>>, %arg14: memref<1x64x32xbf16, #tpu.memory_space<vmem>>, %arg15: memref<1x4x1xf32, #tpu.memory_space<vmem>>, %arg16: memref<1x4x1xf32, #tpu.memory_space<vmem>>, %arg17: memref<1x4x1xf32, #tpu.memory_space<vmem>>, %arg18: memref<1x1x4xbf16, #tpu.memory_space<vmem>>, %arg19: memref<1x1x1xf32, #tpu.memory_space<vmem>>, %arg20: memref<256x576xbf16, #tpu.memory_space<vmem>>, %arg21: memref<64x144xbf16, #tpu.memory_space<vmem>>, %arg22: memref<256x64xbf16, #tpu.memory_space<vmem>>, %arg23: memref<1024x256xbf16, #tpu.memory_space<vmem>>, %arg24: memref<1x1x512xf32, #tpu.memory_space<vmem>>) attributes {dimension_semantics = [#tpu.dimension_semantics<parallel>], iteration_bounds = array<i64: 2>, scalar_prefetch = 0 : i64, scratch_operands = 0 : i64, tpu.core_type = #tpu.core_type<tc>, window_params = [{transform_indices = @transform_0, window_bounds = array<i64: 1, 2, 4, 256>}, {transform_indices = @transform_1, window_bounds = array<i64: 1, 32, 36>}, {transform_indices = @transform_2, window_bounds = array<i64: 1, 32, 1>}, {transform_indices = @transform_3, window_bounds = array<i64: 1, 32, 1>}, {transform_indices = @transform_4, window_bounds = array<i64: 1, 32, 1>}, {transform_indices = @transform_5, window_bounds = array<i64: 1, 256, 288>}, {transform_indices = @transform_6, window_bounds = array<i64: 1, 256, 1>}, {transform_indices = @transform_7, window_bounds = array<i64: 1, 256, 1>}, {transform_indices = @transform_8, window_bounds = array<i64: 1, 256, 1>}, {transform_indices = @transform_9, window_bounds = array<i64: 1, 512, 256>}, {transform_indices = @transform_10, window_bounds = array<i64: 1, 32, 1>}, {transform_indices = @transform_11, window_bounds = array<i64: 1, 32, 1>}, {transform_indices = @transform_12, window_bounds = array<i64: 1, 32, 1>}, {transform_indices = @transform_13, window_bounds = array<i64: 1, 64, 32>}, {transform_indices = @transform_14, window_bounds = array<i64: 1, 4, 1>}, {transform_indices = @transform_15, window_bounds = array<i64: 1, 4, 1>}, {transform_indices = @transform_16, window_bounds = array<i64: 1, 4, 1>}, {transform_indices = @transform_17, window_bounds = array<i64: 1, 1, 4>}, {transform_indices = @transform_18, window_bounds = array<i64: 1, 1, 1>}, {pipeline_mode = #tpu.pipeline_mode<synchronous>, transform_indices = @transform_19, window_bounds = array<i64: 256, 576>}, {pipeline_mode = #tpu.pipeline_mode<synchronous>, transform_indices = @transform_20, window_bounds = array<i64: 64, 144>}, {pipeline_mode = #tpu.pipeline_mode<synchronous>, transform_indices = @transform_21, window_bounds = array<i64: 256, 64>}, {pipeline_mode = #tpu.pipeline_mode<synchronous>, transform_indices = @transform_22, window_bounds = array<i64: 1024, 256>}, {transform_indices = @transform_23, window_bounds = array<i64: 1, 1, 512>}]} {
    %c0 = arith.constant 0 : index
    %c0_0 = arith.constant 0 : index
    %c0_1 = arith.constant 0 : index
    %c0_2 = arith.constant 0 : index
    %0 = vector.load %arg1[%c0, %c0_0, %c0_1, %c0_2] : memref<1x2x4x256xf32, #tpu.memory_space<vmem>>, vector<1x2x4x256xf32>
    %1 = vector.shape_cast %0 : vector<1x2x4x256xf32> to vector<2x4x256xf32>
    %2 = vector.extract_strided_slice %1 {offsets = [0, 0, 0], sizes = [1, 4, 256], strides = [1, 1, 1]} : vector<2x4x256xf32> to vector<1x4x256xf32>
    %3 = vector.shape_cast %2 : vector<1x4x256xf32> to vector<4x256xf32>
    %4 = vector.extract_strided_slice %1 {offsets = [1, 0, 0], sizes = [1, 4, 256], strides = [1, 1, 1]} : vector<2x4x256xf32> to vector<1x4x256xf32>
    %5 = vector.shape_cast %4 : vector<1x4x256xf32> to vector<4x256xf32>
    %6 = tpu.concatenate %3, %5 in 1 : vector<4x256xf32>, vector<4x256xf32> -> vector<4x512xf32>
    %7 = arith.truncf %6 : vector<4x512xf32> to vector<4x512xbf16>
    %8 = vector.extract_strided_slice %7 {offsets = [0, 0], sizes = [4, 256], strides = [1, 1]} : vector<4x512xbf16> to vector<4x256xbf16>
    %c0_3 = arith.constant 0 : index
    %c0_4 = arith.constant 0 : index
    %9 = vector.load %arg20[%c0_3, %c0_4] : memref<256x576xbf16, #tpu.memory_space<vmem>>, vector<256x576xbf16>
    %cst = arith.constant dense<0.000000e+00> : vector<4x576xf32>
    %10 = tpu.matmul %8, %9, %cst {dimension_numbers = #tpu.dot_dimension_numbers<[1], [0], [0], [1], [0, 0, 1, 1], [], []>} : vector<4x256xbf16>, vector<256x576xbf16>, vector<4x576xf32> -> vector<4x576xf32>
    %11 = arith.truncf %10 : vector<4x576xf32> to vector<4x576xbf16>
    %12 = vector.extract_strided_slice %11 {offsets = [0, 0], sizes = [4, 64], strides = [1, 1]} : vector<4x576xbf16> to vector<4x64xbf16>
    %13 = vector.extract_strided_slice %11 {offsets = [0, 64], sizes = [4, 64], strides = [1, 1]} : vector<4x576xbf16> to vector<4x64xbf16>
    %14 = vector.extract_strided_slice %11 {offsets = [0, 128], sizes = [4, 64], strides = [1, 1]} : vector<4x576xbf16> to vector<4x64xbf16>
    %15 = vector.extract_strided_slice %11 {offsets = [0, 192], sizes = [4, 64], strides = [1, 1]} : vector<4x576xbf16> to vector<4x64xbf16>
    %16 = vector.extract_strided_slice %11 {offsets = [0, 256], sizes = [4, 64], strides = [1, 1]} : vector<4x576xbf16> to vector<4x64xbf16>
    %17 = vector.extract_strided_slice %11 {offsets = [0, 320], sizes = [4, 64], strides = [1, 1]} : vector<4x576xbf16> to vector<4x64xbf16>
    %18 = vector.extract_strided_slice %11 {offsets = [0, 384], sizes = [4, 64], strides = [1, 1]} : vector<4x576xbf16> to vector<4x64xbf16>
    %19 = vector.extract_strided_slice %11 {offsets = [0, 448], sizes = [4, 64], strides = [1, 1]} : vector<4x576xbf16> to vector<4x64xbf16>
    %20 = vector.extract_strided_slice %11 {offsets = [0, 512], sizes = [4, 64], strides = [1, 1]} : vector<4x576xbf16> to vector<4x64xbf16>
    %21 = tpu.concatenate %12, %13, %14, %15, %16, %17, %18, %19, %20 in 0 : vector<4x64xbf16>, vector<4x64xbf16>, vector<4x64xbf16>, vector<4x64xbf16>, vector<4x64xbf16>, vector<4x64xbf16>, vector<4x64xbf16>, vector<4x64xbf16>, vector<4x64xbf16> -> vector<36x64xbf16>
    %22 = vector.extract_strided_slice %7 {offsets = [0, 256], sizes = [4, 256], strides = [1, 1]} : vector<4x512xbf16> to vector<4x256xbf16>
    %c0_5 = arith.constant 0 : index
    %c0_6 = arith.constant 0 : index
    %23 = vector.load %arg20[%c0_5, %c0_6] : memref<256x576xbf16, #tpu.memory_space<vmem>>, vector<256x576xbf16>
    %cst_7 = arith.constant dense<0.000000e+00> : vector<4x576xf32>
    %24 = tpu.matmul %22, %23, %cst_7 {dimension_numbers = #tpu.dot_dimension_numbers<[1], [0], [0], [1], [0, 0, 1, 1], [], []>} : vector<4x256xbf16>, vector<256x576xbf16>, vector<4x576xf32> -> vector<4x576xf32>
    %25 = arith.truncf %24 : vector<4x576xf32> to vector<4x576xbf16>
    %26 = vector.extract_strided_slice %25 {offsets = [0, 0], sizes = [4, 64], strides = [1, 1]} : vector<4x576xbf16> to vector<4x64xbf16>
    %27 = vector.extract_strided_slice %25 {offsets = [0, 64], sizes = [4, 64], strides = [1, 1]} : vector<4x576xbf16> to vector<4x64xbf16>
    %28 = vector.extract_strided_slice %25 {offsets = [0, 128], sizes = [4, 64], strides = [1, 1]} : vector<4x576xbf16> to vector<4x64xbf16>
    %29 = vector.extract_strided_slice %25 {offsets = [0, 192], sizes = [4, 64], strides = [1, 1]} : vector<4x576xbf16> to vector<4x64xbf16>
    %30 = vector.extract_strided_slice %25 {offsets = [0, 256], sizes = [4, 64], strides = [1, 1]} : vector<4x576xbf16> to vector<4x64xbf16>
    %31 = vector.extract_strided_slice %25 {offsets = [0, 320], sizes = [4, 64], strides = [1, 1]} : vector<4x576xbf16> to vector<4x64xbf16>
    %32 = vector.extract_strided_slice %25 {offsets = [0, 384], sizes = [4, 64], strides = [1, 1]} : vector<4x576xbf16> to vector<4x64xbf16>
    %33 = vector.extract_strided_slice %25 {offsets = [0, 448], sizes = [4, 64], strides = [1, 1]} : vector<4x576xbf16> to vector<4x64xbf16>
    %34 = vector.extract_strided_slice %25 {offsets = [0, 512], sizes = [4, 64], strides = [1, 1]} : vector<4x576xbf16> to vector<4x64xbf16>
    %35 = tpu.concatenate %26, %27, %28, %29, %30, %31, %32, %33, %34 in 0 : vector<4x64xbf16>, vector<4x64xbf16>, vector<4x64xbf16>, vector<4x64xbf16>, vector<4x64xbf16>, vector<4x64xbf16>, vector<4x64xbf16>, vector<4x64xbf16>, vector<4x64xbf16> -> vector<36x64xbf16>
    %36 = tpu.concatenate %21, %35 in 1 : vector<36x64xbf16>, vector<36x64xbf16> -> vector<36x128xbf16>
    %c0_8 = arith.constant 0 : index
    %c0_9 = arith.constant 0 : index
    %c0_10 = arith.constant 0 : index
    %37 = vector.load %arg2[%c0_8, %c0_9, %c0_10] : memref<1x32x36xbf16, #tpu.memory_space<vmem>>, vector<1x32x36xbf16>
    %38 = vector.shape_cast %37 : vector<1x32x36xbf16> to vector<32x36xbf16>
    %cst_11 = arith.constant dense<0.000000e+00> : vector<32x128xf32>
    %39 = tpu.matmul %38, %36, %cst_11 {dimension_numbers = #tpu.dot_dimension_numbers<[1], [0], [0], [1], [0, 0, 1, 1], [], []>} : vector<32x36xbf16>, vector<36x128xbf16>, vector<32x128xf32> -> vector<32x128xf32>
    %c0_12 = arith.constant 0 : index
    %c0_13 = arith.constant 0 : index
    %c0_14 = arith.constant 0 : index
    %40 = vector.load %arg3[%c0_12, %c0_13, %c0_14] : memref<1x32x1xf32, #tpu.memory_space<vmem>>, vector<1x32x1xf32>
    %41 = vector.shape_cast %40 : vector<1x32x1xf32> to vector<32x1xf32>
    %42 = vector.broadcast %41 : vector<32x1xf32> to vector<32x128xf32>
    %43 = arith.addf %39, %42 : vector<32x128xf32>
    %c0_15 = arith.constant 0 : index
    %c0_16 = arith.constant 0 : index
    %c0_17 = arith.constant 0 : index
    %44 = vector.load %arg4[%c0_15, %c0_16, %c0_17] : memref<1x32x1xf32, #tpu.memory_space<vmem>>, vector<1x32x1xf32>
    %45 = vector.shape_cast %44 : vector<1x32x1xf32> to vector<32x1xf32>
    %c0_18 = arith.constant 0 : index
    %c0_19 = arith.constant 0 : index
    %c0_20 = arith.constant 0 : index
    %46 = vector.load %arg5[%c0_18, %c0_19, %c0_20] : memref<1x32x1xf32, #tpu.memory_space<vmem>>, vector<1x32x1xf32>
    %47 = vector.shape_cast %46 : vector<1x32x1xf32> to vector<32x1xf32>
    %cst_21 = arith.constant dense<0.000000e+00> : vector<32xf32>
    %48 = vector.multi_reduction <add>, %43, %cst_21 [1] : vector<32x128xf32> to vector<32xf32>
    %49 = vector.shape_cast %48 : vector<32xf32> to vector<32x1xf32>
    %cst_22 = arith.constant 7.812500e-03 : f32
    %50 = vector.broadcast %cst_22 : f32 to vector<32x1xf32>
    %51 = arith.mulf %49, %50 : vector<32x1xf32>
    %52 = vector.broadcast %51 : vector<32x1xf32> to vector<32x128xf32>
    %53 = arith.subf %43, %52 : vector<32x128xf32>
    %54 = arith.mulf %53, %53 : vector<32x128xf32>
    %cst_23 = arith.constant dense<0.000000e+00> : vector<32xf32>
    %55 = vector.multi_reduction <add>, %54, %cst_23 [1] : vector<32x128xf32> to vector<32xf32>
    %56 = vector.shape_cast %55 : vector<32xf32> to vector<32x1xf32>
    %cst_24 = arith.constant 7.812500e-03 : f32
    %57 = vector.broadcast %cst_24 : f32 to vector<32x1xf32>
    %58 = arith.mulf %56, %57 : vector<32x1xf32>
    %cst_25 = arith.constant 9.99999974E-6 : f32
    %59 = vector.broadcast %cst_25 : f32 to vector<32x1xf32>
    %60 = arith.addf %58, %59 : vector<32x1xf32>
    %61 = math.rsqrt %60 : vector<32x1xf32>
    %62 = vector.broadcast %61 : vector<32x1xf32> to vector<32x128xf32>
    %63 = arith.mulf %53, %62 : vector<32x128xf32>
    %64 = vector.broadcast %45 : vector<32x1xf32> to vector<32x128xf32>
    %65 = arith.mulf %63, %64 : vector<32x128xf32>
    %66 = vector.broadcast %47 : vector<32x1xf32> to vector<32x128xf32>
    %67 = arith.addf %65, %66 : vector<32x128xf32>
    %68 = arith.truncf %67 : vector<32x128xf32> to vector<32x128xbf16>
    %69 = vector.extract_strided_slice %68 {offsets = [0, 0], sizes = [32, 64], strides = [1, 1]} : vector<32x128xbf16> to vector<32x64xbf16>
    %c0_26 = arith.constant 0 : index
    %c0_27 = arith.constant 0 : index
    %70 = vector.load %arg21[%c0_26, %c0_27] : memref<64x144xbf16, #tpu.memory_space<vmem>>, vector<64x144xbf16>
    %cst_28 = arith.constant dense<0.000000e+00> : vector<32x144xf32>
    %71 = tpu.matmul %69, %70, %cst_28 {dimension_numbers = #tpu.dot_dimension_numbers<[1], [0], [0], [1], [0, 0, 1, 1], [], []>} : vector<32x64xbf16>, vector<64x144xbf16>, vector<32x144xf32> -> vector<32x144xf32>
    %72 = arith.truncf %71 : vector<32x144xf32> to vector<32x144xbf16>
    %73 = vector.extract_strided_slice %72 {offsets = [0, 0], sizes = [32, 16], strides = [1, 1]} : vector<32x144xbf16> to vector<32x16xbf16>
    %74 = vector.extract_strided_slice %72 {offsets = [0, 16], sizes = [32, 16], strides = [1, 1]} : vector<32x144xbf16> to vector<32x16xbf16>
    %75 = vector.extract_strided_slice %72 {offsets = [0, 32], sizes = [32, 16], strides = [1, 1]} : vector<32x144xbf16> to vector<32x16xbf16>
    %76 = vector.extract_strided_slice %72 {offsets = [0, 48], sizes = [32, 16], strides = [1, 1]} : vector<32x144xbf16> to vector<32x16xbf16>
    %77 = vector.extract_strided_slice %72 {offsets = [0, 64], sizes = [32, 16], strides = [1, 1]} : vector<32x144xbf16> to vector<32x16xbf16>
    %78 = vector.extract_strided_slice %72 {offsets = [0, 80], sizes = [32, 16], strides = [1, 1]} : vector<32x144xbf16> to vector<32x16xbf16>
    %79 = vector.extract_strided_slice %72 {offsets = [0, 96], sizes = [32, 16], strides = [1, 1]} : vector<32x144xbf16> to vector<32x16xbf16>
    %80 = vector.extract_strided_slice %72 {offsets = [0, 112], sizes = [32, 16], strides = [1, 1]} : vector<32x144xbf16> to vector<32x16xbf16>
    %81 = vector.extract_strided_slice %72 {offsets = [0, 128], sizes = [32, 16], strides = [1, 1]} : vector<32x144xbf16> to vector<32x16xbf16>
    %82 = tpu.concatenate %73, %74, %75, %76, %77, %78, %79, %80, %81 in 0 : vector<32x16xbf16>, vector<32x16xbf16>, vector<32x16xbf16>, vector<32x16xbf16>, vector<32x16xbf16>, vector<32x16xbf16>, vector<32x16xbf16>, vector<32x16xbf16>, vector<32x16xbf16> -> vector<288x16xbf16>
    %83 = vector.extract_strided_slice %68 {offsets = [0, 64], sizes = [32, 64], strides = [1, 1]} : vector<32x128xbf16> to vector<32x64xbf16>
    %c0_29 = arith.constant 0 : index
    %c0_30 = arith.constant 0 : index
    %84 = vector.load %arg21[%c0_29, %c0_30] : memref<64x144xbf16, #tpu.memory_space<vmem>>, vector<64x144xbf16>
    %cst_31 = arith.constant dense<0.000000e+00> : vector<32x144xf32>
    %85 = tpu.matmul %83, %84, %cst_31 {dimension_numbers = #tpu.dot_dimension_numbers<[1], [0], [0], [1], [0, 0, 1, 1], [], []>} : vector<32x64xbf16>, vector<64x144xbf16>, vector<32x144xf32> -> vector<32x144xf32>
    %86 = arith.truncf %85 : vector<32x144xf32> to vector<32x144xbf16>
    %87 = vector.extract_strided_slice %86 {offsets = [0, 0], sizes = [32, 16], strides = [1, 1]} : vector<32x144xbf16> to vector<32x16xbf16>
    %88 = vector.extract_strided_slice %86 {offsets = [0, 16], sizes = [32, 16], strides = [1, 1]} : vector<32x144xbf16> to vector<32x16xbf16>
    %89 = vector.extract_strided_slice %86 {offsets = [0, 32], sizes = [32, 16], strides = [1, 1]} : vector<32x144xbf16> to vector<32x16xbf16>
    %90 = vector.extract_strided_slice %86 {offsets = [0, 48], sizes = [32, 16], strides = [1, 1]} : vector<32x144xbf16> to vector<32x16xbf16>
    %91 = vector.extract_strided_slice %86 {offsets = [0, 64], sizes = [32, 16], strides = [1, 1]} : vector<32x144xbf16> to vector<32x16xbf16>
    %92 = vector.extract_strided_slice %86 {offsets = [0, 80], sizes = [32, 16], strides = [1, 1]} : vector<32x144xbf16> to vector<32x16xbf16>
    %93 = vector.extract_strided_slice %86 {offsets = [0, 96], sizes = [32, 16], strides = [1, 1]} : vector<32x144xbf16> to vector<32x16xbf16>
    %94 = vector.extract_strided_slice %86 {offsets = [0, 112], sizes = [32, 16], strides = [1, 1]} : vector<32x144xbf16> to vector<32x16xbf16>
    %95 = vector.extract_strided_slice %86 {offsets = [0, 128], sizes = [32, 16], strides = [1, 1]} : vector<32x144xbf16> to vector<32x16xbf16>
    %96 = tpu.concatenate %87, %88, %89, %90, %91, %92, %93, %94, %95 in 0 : vector<32x16xbf16>, vector<32x16xbf16>, vector<32x16xbf16>, vector<32x16xbf16>, vector<32x16xbf16>, vector<32x16xbf16>, vector<32x16xbf16>, vector<32x16xbf16>, vector<32x16xbf16> -> vector<288x16xbf16>
    %97 = tpu.concatenate %82, %96 in 1 : vector<288x16xbf16>, vector<288x16xbf16> -> vector<288x32xbf16>
    %c0_32 = arith.constant 0 : index
    %c0_33 = arith.constant 0 : index
    %c0_34 = arith.constant 0 : index
    %98 = vector.load %arg6[%c0_32, %c0_33, %c0_34] : memref<1x256x288xbf16, #tpu.memory_space<vmem>>, vector<1x256x288xbf16>
    %99 = vector.shape_cast %98 : vector<1x256x288xbf16> to vector<256x288xbf16>
    %cst_35 = arith.constant dense<0.000000e+00> : vector<256x32xf32>
    %100 = tpu.matmul %99, %97, %cst_35 {dimension_numbers = #tpu.dot_dimension_numbers<[1], [0], [0], [1], [0, 0, 1, 1], [], []>} : vector<256x288xbf16>, vector<288x32xbf16>, vector<256x32xf32> -> vector<256x32xf32>
    %c0_36 = arith.constant 0 : index
    %c0_37 = arith.constant 0 : index
    %c0_38 = arith.constant 0 : index
    %101 = vector.load %arg7[%c0_36, %c0_37, %c0_38] : memref<1x256x1xf32, #tpu.memory_space<vmem>>, vector<1x256x1xf32>
    %102 = vector.shape_cast %101 : vector<1x256x1xf32> to vector<256x1xf32>
    %103 = vector.broadcast %102 : vector<256x1xf32> to vector<256x32xf32>
    %104 = arith.addf %100, %103 : vector<256x32xf32>
    %c0_39 = arith.constant 0 : index
    %c0_40 = arith.constant 0 : index
    %c0_41 = arith.constant 0 : index
    %105 = vector.load %arg8[%c0_39, %c0_40, %c0_41] : memref<1x256x1xf32, #tpu.memory_space<vmem>>, vector<1x256x1xf32>
    %106 = vector.shape_cast %105 : vector<1x256x1xf32> to vector<256x1xf32>
    %c0_42 = arith.constant 0 : index
    %c0_43 = arith.constant 0 : index
    %c0_44 = arith.constant 0 : index
    %107 = vector.load %arg9[%c0_42, %c0_43, %c0_44] : memref<1x256x1xf32, #tpu.memory_space<vmem>>, vector<1x256x1xf32>
    %108 = vector.shape_cast %107 : vector<1x256x1xf32> to vector<256x1xf32>
    %cst_45 = arith.constant dense<0.000000e+00> : vector<256xf32>
    %109 = vector.multi_reduction <add>, %104, %cst_45 [1] : vector<256x32xf32> to vector<256xf32>
    %110 = vector.shape_cast %109 : vector<256xf32> to vector<256x1xf32>
    %cst_46 = arith.constant 3.125000e-02 : f32
    %111 = vector.broadcast %cst_46 : f32 to vector<256x1xf32>
    %112 = arith.mulf %110, %111 : vector<256x1xf32>
    %113 = vector.broadcast %112 : vector<256x1xf32> to vector<256x32xf32>
    %114 = arith.subf %104, %113 : vector<256x32xf32>
    %115 = arith.mulf %114, %114 : vector<256x32xf32>
    %cst_47 = arith.constant dense<0.000000e+00> : vector<256xf32>
    %116 = vector.multi_reduction <add>, %115, %cst_47 [1] : vector<256x32xf32> to vector<256xf32>
    %117 = vector.shape_cast %116 : vector<256xf32> to vector<256x1xf32>
    %cst_48 = arith.constant 3.125000e-02 : f32
    %118 = vector.broadcast %cst_48 : f32 to vector<256x1xf32>
    %119 = arith.mulf %117, %118 : vector<256x1xf32>
    %cst_49 = arith.constant 9.99999974E-6 : f32
    %120 = vector.broadcast %cst_49 : f32 to vector<256x1xf32>
    %121 = arith.addf %119, %120 : vector<256x1xf32>
    %122 = math.rsqrt %121 : vector<256x1xf32>
    %123 = vector.broadcast %122 : vector<256x1xf32> to vector<256x32xf32>
    %124 = arith.mulf %114, %123 : vector<256x32xf32>
    %125 = vector.broadcast %106 : vector<256x1xf32> to vector<256x32xf32>
    %126 = arith.mulf %124, %125 : vector<256x32xf32>
    %127 = vector.broadcast %108 : vector<256x1xf32> to vector<256x32xf32>
    %128 = arith.addf %126, %127 : vector<256x32xf32>
    %c0_50 = arith.constant 0 : index
    %c0_51 = arith.constant 0 : index
    %c0_52 = arith.constant 0 : index
    %129 = vector.load %arg10[%c0_50, %c0_51, %c0_52] : memref<1x512x256xbf16, #tpu.memory_space<vmem>>, vector<1x512x256xbf16>
    %130 = vector.shape_cast %129 : vector<1x512x256xbf16> to vector<512x256xbf16>
    %131 = arith.truncf %128 : vector<256x32xf32> to vector<256x32xbf16>
    %cst_53 = arith.constant dense<0.000000e+00> : vector<512x32xf32>
    %132 = tpu.matmul %130, %131, %cst_53 {dimension_numbers = #tpu.dot_dimension_numbers<[1], [0], [0], [1], [0, 0, 1, 1], [], []>} : vector<512x256xbf16>, vector<256x32xbf16>, vector<512x32xf32> -> vector<512x32xf32>
    %133 = arith.truncf %132 : vector<512x32xf32> to vector<512x32xbf16>
    %134 = vector.extract_strided_slice %133 {offsets = [0, 0], sizes = [512, 16], strides = [1, 1]} : vector<512x32xbf16> to vector<512x16xbf16>
    %135 = vector.extract_strided_slice %134 {offsets = [0, 0], sizes = [32, 16], strides = [1, 1]} : vector<512x16xbf16> to vector<32x16xbf16>
    %136 = vector.extract_strided_slice %134 {offsets = [32, 0], sizes = [32, 16], strides = [1, 1]} : vector<512x16xbf16> to vector<32x16xbf16>
    %137 = vector.extract_strided_slice %134 {offsets = [64, 0], sizes = [32, 16], strides = [1, 1]} : vector<512x16xbf16> to vector<32x16xbf16>
    %138 = vector.extract_strided_slice %134 {offsets = [96, 0], sizes = [32, 16], strides = [1, 1]} : vector<512x16xbf16> to vector<32x16xbf16>
    %139 = vector.extract_strided_slice %134 {offsets = [128, 0], sizes = [32, 16], strides = [1, 1]} : vector<512x16xbf16> to vector<32x16xbf16>
    %140 = vector.extract_strided_slice %134 {offsets = [160, 0], sizes = [32, 16], strides = [1, 1]} : vector<512x16xbf16> to vector<32x16xbf16>
    %141 = vector.extract_strided_slice %134 {offsets = [192, 0], sizes = [32, 16], strides = [1, 1]} : vector<512x16xbf16> to vector<32x16xbf16>
    %142 = vector.extract_strided_slice %134 {offsets = [224, 0], sizes = [32, 16], strides = [1, 1]} : vector<512x16xbf16> to vector<32x16xbf16>
    %143 = vector.extract_strided_slice %134 {offsets = [256, 0], sizes = [32, 16], strides = [1, 1]} : vector<512x16xbf16> to vector<32x16xbf16>
    %144 = vector.extract_strided_slice %134 {offsets = [288, 0], sizes = [32, 16], strides = [1, 1]} : vector<512x16xbf16> to vector<32x16xbf16>
    %145 = vector.extract_strided_slice %134 {offsets = [320, 0], sizes = [32, 16], strides = [1, 1]} : vector<512x16xbf16> to vector<32x16xbf16>
    %146 = vector.extract_strided_slice %134 {offsets = [352, 0], sizes = [32, 16], strides = [1, 1]} : vector<512x16xbf16> to vector<32x16xbf16>
    %147 = vector.extract_strided_slice %134 {offsets = [384, 0], sizes = [32, 16], strides = [1, 1]} : vector<512x16xbf16> to vector<32x16xbf16>
    %148 = vector.extract_strided_slice %134 {offsets = [416, 0], sizes = [32, 16], strides = [1, 1]} : vector<512x16xbf16> to vector<32x16xbf16>
    %149 = vector.extract_strided_slice %134 {offsets = [448, 0], sizes = [32, 16], strides = [1, 1]} : vector<512x16xbf16> to vector<32x16xbf16>
    %150 = vector.extract_strided_slice %134 {offsets = [480, 0], sizes = [32, 16], strides = [1, 1]} : vector<512x16xbf16> to vector<32x16xbf16>
    %151 = tpu.concatenate %135, %136, %137, %138, %139, %140, %141, %142, %143, %144, %145, %146, %147, %148, %149, %150 in 1 : vector<32x16xbf16>, vector<32x16xbf16>, vector<32x16xbf16>, vector<32x16xbf16>, vector<32x16xbf16>, vector<32x16xbf16>, vector<32x16xbf16>, vector<32x16xbf16>, vector<32x16xbf16>, vector<32x16xbf16>, vector<32x16xbf16>, vector<32x16xbf16>, vector<32x16xbf16>, vector<32x16xbf16>, vector<32x16xbf16>, vector<32x16xbf16> -> vector<32x256xbf16>
    %c0_54 = arith.constant 0 : index
    %c0_55 = arith.constant 0 : index
    %152 = vector.load %arg22[%c0_54, %c0_55] : memref<256x64xbf16, #tpu.memory_space<vmem>>, vector<256x64xbf16>
    %cst_56 = arith.constant dense<0.000000e+00> : vector<32x64xf32>
    %153 = tpu.matmul %151, %152, %cst_56 {dimension_numbers = #tpu.dot_dimension_numbers<[1], [0], [0], [1], [0, 0, 1, 1], [], []>} : vector<32x256xbf16>, vector<256x64xbf16>, vector<32x64xf32> -> vector<32x64xf32>
    %154 = vector.extract_strided_slice %133 {offsets = [0, 16], sizes = [512, 16], strides = [1, 1]} : vector<512x32xbf16> to vector<512x16xbf16>
    %155 = vector.extract_strided_slice %154 {offsets = [0, 0], sizes = [32, 16], strides = [1, 1]} : vector<512x16xbf16> to vector<32x16xbf16>
    %156 = vector.extract_strided_slice %154 {offsets = [32, 0], sizes = [32, 16], strides = [1, 1]} : vector<512x16xbf16> to vector<32x16xbf16>
    %157 = vector.extract_strided_slice %154 {offsets = [64, 0], sizes = [32, 16], strides = [1, 1]} : vector<512x16xbf16> to vector<32x16xbf16>
    %158 = vector.extract_strided_slice %154 {offsets = [96, 0], sizes = [32, 16], strides = [1, 1]} : vector<512x16xbf16> to vector<32x16xbf16>
    %159 = vector.extract_strided_slice %154 {offsets = [128, 0], sizes = [32, 16], strides = [1, 1]} : vector<512x16xbf16> to vector<32x16xbf16>
    %160 = vector.extract_strided_slice %154 {offsets = [160, 0], sizes = [32, 16], strides = [1, 1]} : vector<512x16xbf16> to vector<32x16xbf16>
    %161 = vector.extract_strided_slice %154 {offsets = [192, 0], sizes = [32, 16], strides = [1, 1]} : vector<512x16xbf16> to vector<32x16xbf16>
    %162 = vector.extract_strided_slice %154 {offsets = [224, 0], sizes = [32, 16], strides = [1, 1]} : vector<512x16xbf16> to vector<32x16xbf16>
    %163 = vector.extract_strided_slice %154 {offsets = [256, 0], sizes = [32, 16], strides = [1, 1]} : vector<512x16xbf16> to vector<32x16xbf16>
    %164 = vector.extract_strided_slice %154 {offsets = [288, 0], sizes = [32, 16], strides = [1, 1]} : vector<512x16xbf16> to vector<32x16xbf16>
    %165 = vector.extract_strided_slice %154 {offsets = [320, 0], sizes = [32, 16], strides = [1, 1]} : vector<512x16xbf16> to vector<32x16xbf16>
    %166 = vector.extract_strided_slice %154 {offsets = [352, 0], sizes = [32, 16], strides = [1, 1]} : vector<512x16xbf16> to vector<32x16xbf16>
    %167 = vector.extract_strided_slice %154 {offsets = [384, 0], sizes = [32, 16], strides = [1, 1]} : vector<512x16xbf16> to vector<32x16xbf16>
    %168 = vector.extract_strided_slice %154 {offsets = [416, 0], sizes = [32, 16], strides = [1, 1]} : vector<512x16xbf16> to vector<32x16xbf16>
    %169 = vector.extract_strided_slice %154 {offsets = [448, 0], sizes = [32, 16], strides = [1, 1]} : vector<512x16xbf16> to vector<32x16xbf16>
    %170 = vector.extract_strided_slice %154 {offsets = [480, 0], sizes = [32, 16], strides = [1, 1]} : vector<512x16xbf16> to vector<32x16xbf16>
    %171 = tpu.concatenate %155, %156, %157, %158, %159, %160, %161, %162, %163, %164, %165, %166, %167, %168, %169, %170 in 1 : vector<32x16xbf16>, vector<32x16xbf16>, vector<32x16xbf16>, vector<32x16xbf16>, vector<32x16xbf16>, vector<32x16xbf16>, vector<32x16xbf16>, vector<32x16xbf16>, vector<32x16xbf16>, vector<32x16xbf16>, vector<32x16xbf16>, vector<32x16xbf16>, vector<32x16xbf16>, vector<32x16xbf16>, vector<32x16xbf16>, vector<32x16xbf16> -> vector<32x256xbf16>
    %c0_57 = arith.constant 0 : index
    %c0_58 = arith.constant 0 : index
    %172 = vector.load %arg22[%c0_57, %c0_58] : memref<256x64xbf16, #tpu.memory_space<vmem>>, vector<256x64xbf16>
    %cst_59 = arith.constant dense<0.000000e+00> : vector<32x64xf32>
    %173 = tpu.matmul %171, %172, %cst_59 {dimension_numbers = #tpu.dot_dimension_numbers<[1], [0], [0], [1], [0, 0, 1, 1], [], []>} : vector<32x256xbf16>, vector<256x64xbf16>, vector<32x64xf32> -> vector<32x64xf32>
    %174 = tpu.concatenate %153, %173 in 1 : vector<32x64xf32>, vector<32x64xf32> -> vector<32x128xf32>
    %c0_60 = arith.constant 0 : index
    %c0_61 = arith.constant 0 : index
    %c0_62 = arith.constant 0 : index
    %175 = vector.load %arg11[%c0_60, %c0_61, %c0_62] : memref<1x32x1xf32, #tpu.memory_space<vmem>>, vector<1x32x1xf32>
    %176 = vector.shape_cast %175 : vector<1x32x1xf32> to vector<32x1xf32>
    %177 = vector.broadcast %176 : vector<32x1xf32> to vector<32x128xf32>
    %178 = arith.addf %174, %177 : vector<32x128xf32>
    %c0_63 = arith.constant 0 : index
    %c0_64 = arith.constant 0 : index
    %c0_65 = arith.constant 0 : index
    %179 = vector.load %arg12[%c0_63, %c0_64, %c0_65] : memref<1x32x1xf32, #tpu.memory_space<vmem>>, vector<1x32x1xf32>
    %180 = vector.shape_cast %179 : vector<1x32x1xf32> to vector<32x1xf32>
    %c0_66 = arith.constant 0 : index
    %c0_67 = arith.constant 0 : index
    %c0_68 = arith.constant 0 : index
    %181 = vector.load %arg13[%c0_66, %c0_67, %c0_68] : memref<1x32x1xf32, #tpu.memory_space<vmem>>, vector<1x32x1xf32>
    %182 = vector.shape_cast %181 : vector<1x32x1xf32> to vector<32x1xf32>
    %cst_69 = arith.constant dense<0.000000e+00> : vector<32xf32>
    %183 = vector.multi_reduction <add>, %178, %cst_69 [1] : vector<32x128xf32> to vector<32xf32>
    %184 = vector.shape_cast %183 : vector<32xf32> to vector<32x1xf32>
    %cst_70 = arith.constant 7.812500e-03 : f32
    %185 = vector.broadcast %cst_70 : f32 to vector<32x1xf32>
    %186 = arith.mulf %184, %185 : vector<32x1xf32>
    %187 = vector.broadcast %186 : vector<32x1xf32> to vector<32x128xf32>
    %188 = arith.subf %178, %187 : vector<32x128xf32>
    %189 = arith.mulf %188, %188 : vector<32x128xf32>
    %cst_71 = arith.constant dense<0.000000e+00> : vector<32xf32>
    %190 = vector.multi_reduction <add>, %189, %cst_71 [1] : vector<32x128xf32> to vector<32xf32>
    %191 = vector.shape_cast %190 : vector<32xf32> to vector<32x1xf32>
    %cst_72 = arith.constant 7.812500e-03 : f32
    %192 = vector.broadcast %cst_72 : f32 to vector<32x1xf32>
    %193 = arith.mulf %191, %192 : vector<32x1xf32>
    %cst_73 = arith.constant 9.99999974E-6 : f32
    %194 = vector.broadcast %cst_73 : f32 to vector<32x1xf32>
    %195 = arith.addf %193, %194 : vector<32x1xf32>
    %196 = math.rsqrt %195 : vector<32x1xf32>
    %197 = vector.broadcast %196 : vector<32x1xf32> to vector<32x128xf32>
    %198 = arith.mulf %188, %197 : vector<32x128xf32>
    %199 = vector.broadcast %180 : vector<32x1xf32> to vector<32x128xf32>
    %200 = arith.mulf %198, %199 : vector<32x128xf32>
    %201 = vector.broadcast %182 : vector<32x1xf32> to vector<32x128xf32>
    %202 = arith.addf %200, %201 : vector<32x128xf32>
    %c0_74 = arith.constant 0 : index
    %c0_75 = arith.constant 0 : index
    %c0_76 = arith.constant 0 : index
    %203 = vector.load %arg14[%c0_74, %c0_75, %c0_76] : memref<1x64x32xbf16, #tpu.memory_space<vmem>>, vector<1x64x32xbf16>
    %204 = vector.shape_cast %203 : vector<1x64x32xbf16> to vector<64x32xbf16>
    %205 = arith.truncf %202 : vector<32x128xf32> to vector<32x128xbf16>
    %cst_77 = arith.constant dense<0.000000e+00> : vector<64x128xf32>
    %206 = tpu.matmul %204, %205, %cst_77 {dimension_numbers = #tpu.dot_dimension_numbers<[1], [0], [0], [1], [0, 0, 1, 1], [], []>} : vector<64x32xbf16>, vector<32x128xbf16>, vector<64x128xf32> -> vector<64x128xf32>
    %207 = arith.truncf %206 : vector<64x128xf32> to vector<64x128xbf16>
    %208 = vector.extract_strided_slice %207 {offsets = [0, 0], sizes = [64, 64], strides = [1, 1]} : vector<64x128xbf16> to vector<64x64xbf16>
    %209 = vector.extract_strided_slice %208 {offsets = [0, 0], sizes = [4, 64], strides = [1, 1]} : vector<64x64xbf16> to vector<4x64xbf16>
    %210 = vector.extract_strided_slice %208 {offsets = [4, 0], sizes = [4, 64], strides = [1, 1]} : vector<64x64xbf16> to vector<4x64xbf16>
    %211 = vector.extract_strided_slice %208 {offsets = [8, 0], sizes = [4, 64], strides = [1, 1]} : vector<64x64xbf16> to vector<4x64xbf16>
    %212 = vector.extract_strided_slice %208 {offsets = [12, 0], sizes = [4, 64], strides = [1, 1]} : vector<64x64xbf16> to vector<4x64xbf16>
    %213 = vector.extract_strided_slice %208 {offsets = [16, 0], sizes = [4, 64], strides = [1, 1]} : vector<64x64xbf16> to vector<4x64xbf16>
    %214 = vector.extract_strided_slice %208 {offsets = [20, 0], sizes = [4, 64], strides = [1, 1]} : vector<64x64xbf16> to vector<4x64xbf16>
    %215 = vector.extract_strided_slice %208 {offsets = [24, 0], sizes = [4, 64], strides = [1, 1]} : vector<64x64xbf16> to vector<4x64xbf16>
    %216 = vector.extract_strided_slice %208 {offsets = [28, 0], sizes = [4, 64], strides = [1, 1]} : vector<64x64xbf16> to vector<4x64xbf16>
    %217 = vector.extract_strided_slice %208 {offsets = [32, 0], sizes = [4, 64], strides = [1, 1]} : vector<64x64xbf16> to vector<4x64xbf16>
    %218 = vector.extract_strided_slice %208 {offsets = [36, 0], sizes = [4, 64], strides = [1, 1]} : vector<64x64xbf16> to vector<4x64xbf16>
    %219 = vector.extract_strided_slice %208 {offsets = [40, 0], sizes = [4, 64], strides = [1, 1]} : vector<64x64xbf16> to vector<4x64xbf16>
    %220 = vector.extract_strided_slice %208 {offsets = [44, 0], sizes = [4, 64], strides = [1, 1]} : vector<64x64xbf16> to vector<4x64xbf16>
    %221 = vector.extract_strided_slice %208 {offsets = [48, 0], sizes = [4, 64], strides = [1, 1]} : vector<64x64xbf16> to vector<4x64xbf16>
    %222 = vector.extract_strided_slice %208 {offsets = [52, 0], sizes = [4, 64], strides = [1, 1]} : vector<64x64xbf16> to vector<4x64xbf16>
    %223 = vector.extract_strided_slice %208 {offsets = [56, 0], sizes = [4, 64], strides = [1, 1]} : vector<64x64xbf16> to vector<4x64xbf16>
    %224 = vector.extract_strided_slice %208 {offsets = [60, 0], sizes = [4, 64], strides = [1, 1]} : vector<64x64xbf16> to vector<4x64xbf16>
    %225 = tpu.concatenate %209, %210, %211, %212, %213, %214, %215, %216, %217, %218, %219, %220, %221, %222, %223, %224 in 1 : vector<4x64xbf16>, vector<4x64xbf16>, vector<4x64xbf16>, vector<4x64xbf16>, vector<4x64xbf16>, vector<4x64xbf16>, vector<4x64xbf16>, vector<4x64xbf16>, vector<4x64xbf16>, vector<4x64xbf16>, vector<4x64xbf16>, vector<4x64xbf16>, vector<4x64xbf16>, vector<4x64xbf16>, vector<4x64xbf16>, vector<4x64xbf16> -> vector<4x1024xbf16>
    %c0_78 = arith.constant 0 : index
    %c0_79 = arith.constant 0 : index
    %226 = vector.load %arg23[%c0_78, %c0_79] : memref<1024x256xbf16, #tpu.memory_space<vmem>>, vector<1024x256xbf16>
    %cst_80 = arith.constant dense<0.000000e+00> : vector<4x256xf32>
    %227 = tpu.matmul %225, %226, %cst_80 {dimension_numbers = #tpu.dot_dimension_numbers<[1], [0], [0], [1], [0, 0, 1, 1], [], []>} : vector<4x1024xbf16>, vector<1024x256xbf16>, vector<4x256xf32> -> vector<4x256xf32>
    %228 = vector.extract_strided_slice %207 {offsets = [0, 64], sizes = [64, 64], strides = [1, 1]} : vector<64x128xbf16> to vector<64x64xbf16>
    %229 = vector.extract_strided_slice %228 {offsets = [0, 0], sizes = [4, 64], strides = [1, 1]} : vector<64x64xbf16> to vector<4x64xbf16>
    %230 = vector.extract_strided_slice %228 {offsets = [4, 0], sizes = [4, 64], strides = [1, 1]} : vector<64x64xbf16> to vector<4x64xbf16>
    %231 = vector.extract_strided_slice %228 {offsets = [8, 0], sizes = [4, 64], strides = [1, 1]} : vector<64x64xbf16> to vector<4x64xbf16>
    %232 = vector.extract_strided_slice %228 {offsets = [12, 0], sizes = [4, 64], strides = [1, 1]} : vector<64x64xbf16> to vector<4x64xbf16>
    %233 = vector.extract_strided_slice %228 {offsets = [16, 0], sizes = [4, 64], strides = [1, 1]} : vector<64x64xbf16> to vector<4x64xbf16>
    %234 = vector.extract_strided_slice %228 {offsets = [20, 0], sizes = [4, 64], strides = [1, 1]} : vector<64x64xbf16> to vector<4x64xbf16>
    %235 = vector.extract_strided_slice %228 {offsets = [24, 0], sizes = [4, 64], strides = [1, 1]} : vector<64x64xbf16> to vector<4x64xbf16>
    %236 = vector.extract_strided_slice %228 {offsets = [28, 0], sizes = [4, 64], strides = [1, 1]} : vector<64x64xbf16> to vector<4x64xbf16>
    %237 = vector.extract_strided_slice %228 {offsets = [32, 0], sizes = [4, 64], strides = [1, 1]} : vector<64x64xbf16> to vector<4x64xbf16>
    %238 = vector.extract_strided_slice %228 {offsets = [36, 0], sizes = [4, 64], strides = [1, 1]} : vector<64x64xbf16> to vector<4x64xbf16>
    %239 = vector.extract_strided_slice %228 {offsets = [40, 0], sizes = [4, 64], strides = [1, 1]} : vector<64x64xbf16> to vector<4x64xbf16>
    %240 = vector.extract_strided_slice %228 {offsets = [44, 0], sizes = [4, 64], strides = [1, 1]} : vector<64x64xbf16> to vector<4x64xbf16>
    %241 = vector.extract_strided_slice %228 {offsets = [48, 0], sizes = [4, 64], strides = [1, 1]} : vector<64x64xbf16> to vector<4x64xbf16>
    %242 = vector.extract_strided_slice %228 {offsets = [52, 0], sizes = [4, 64], strides = [1, 1]} : vector<64x64xbf16> to vector<4x64xbf16>
    %243 = vector.extract_strided_slice %228 {offsets = [56, 0], sizes = [4, 64], strides = [1, 1]} : vector<64x64xbf16> to vector<4x64xbf16>
    %244 = vector.extract_strided_slice %228 {offsets = [60, 0], sizes = [4, 64], strides = [1, 1]} : vector<64x64xbf16> to vector<4x64xbf16>
    %245 = tpu.concatenate %229, %230, %231, %232, %233, %234, %235, %236, %237, %238, %239, %240, %241, %242, %243, %244 in 1 : vector<4x64xbf16>, vector<4x64xbf16>, vector<4x64xbf16>, vector<4x64xbf16>, vector<4x64xbf16>, vector<4x64xbf16>, vector<4x64xbf16>, vector<4x64xbf16>, vector<4x64xbf16>, vector<4x64xbf16>, vector<4x64xbf16>, vector<4x64xbf16>, vector<4x64xbf16>, vector<4x64xbf16>, vector<4x64xbf16>, vector<4x64xbf16> -> vector<4x1024xbf16>
    %c0_81 = arith.constant 0 : index
    %c0_82 = arith.constant 0 : index
    %246 = vector.load %arg23[%c0_81, %c0_82] : memref<1024x256xbf16, #tpu.memory_space<vmem>>, vector<1024x256xbf16>
    %cst_83 = arith.constant dense<0.000000e+00> : vector<4x256xf32>
    %247 = tpu.matmul %245, %246, %cst_83 {dimension_numbers = #tpu.dot_dimension_numbers<[1], [0], [0], [1], [0, 0, 1, 1], [], []>} : vector<4x1024xbf16>, vector<1024x256xbf16>, vector<4x256xf32> -> vector<4x256xf32>
    %248 = tpu.concatenate %227, %247 in 1 : vector<4x256xf32>, vector<4x256xf32> -> vector<4x512xf32>
    %c0_84 = arith.constant 0 : index
    %c0_85 = arith.constant 0 : index
    %c0_86 = arith.constant 0 : index
    %249 = vector.load %arg15[%c0_84, %c0_85, %c0_86] : memref<1x4x1xf32, #tpu.memory_space<vmem>>, vector<1x4x1xf32>
    %250 = vector.shape_cast %249 : vector<1x4x1xf32> to vector<4x1xf32>
    %251 = vector.broadcast %250 : vector<4x1xf32> to vector<4x512xf32>
    %252 = arith.addf %248, %251 : vector<4x512xf32>
    %c0_87 = arith.constant 0 : index
    %c0_88 = arith.constant 0 : index
    %c0_89 = arith.constant 0 : index
    %253 = vector.load %arg16[%c0_87, %c0_88, %c0_89] : memref<1x4x1xf32, #tpu.memory_space<vmem>>, vector<1x4x1xf32>
    %254 = vector.shape_cast %253 : vector<1x4x1xf32> to vector<4x1xf32>
    %c0_90 = arith.constant 0 : index
    %c0_91 = arith.constant 0 : index
    %c0_92 = arith.constant 0 : index
    %255 = vector.load %arg17[%c0_90, %c0_91, %c0_92] : memref<1x4x1xf32, #tpu.memory_space<vmem>>, vector<1x4x1xf32>
    %256 = vector.shape_cast %255 : vector<1x4x1xf32> to vector<4x1xf32>
    %cst_93 = arith.constant dense<0.000000e+00> : vector<4xf32>
    %257 = vector.multi_reduction <add>, %252, %cst_93 [1] : vector<4x512xf32> to vector<4xf32>
    %258 = vector.shape_cast %257 : vector<4xf32> to vector<4x1xf32>
    %cst_94 = arith.constant 0.001953125 : f32
    %259 = vector.broadcast %cst_94 : f32 to vector<4x1xf32>
    %260 = arith.mulf %258, %259 : vector<4x1xf32>
    %261 = vector.broadcast %260 : vector<4x1xf32> to vector<4x512xf32>
    %262 = arith.subf %252, %261 : vector<4x512xf32>
    %263 = arith.mulf %262, %262 : vector<4x512xf32>
    %cst_95 = arith.constant dense<0.000000e+00> : vector<4xf32>
    %264 = vector.multi_reduction <add>, %263, %cst_95 [1] : vector<4x512xf32> to vector<4xf32>
    %265 = vector.shape_cast %264 : vector<4xf32> to vector<4x1xf32>
    %cst_96 = arith.constant 0.001953125 : f32
    %266 = vector.broadcast %cst_96 : f32 to vector<4x1xf32>
    %267 = arith.mulf %265, %266 : vector<4x1xf32>
    %cst_97 = arith.constant 9.99999974E-6 : f32
    %268 = vector.broadcast %cst_97 : f32 to vector<4x1xf32>
    %269 = arith.addf %267, %268 : vector<4x1xf32>
    %270 = math.rsqrt %269 : vector<4x1xf32>
    %271 = vector.broadcast %270 : vector<4x1xf32> to vector<4x512xf32>
    %272 = arith.mulf %262, %271 : vector<4x512xf32>
    %273 = vector.broadcast %254 : vector<4x1xf32> to vector<4x512xf32>
    %274 = arith.mulf %272, %273 : vector<4x512xf32>
    %275 = vector.broadcast %256 : vector<4x1xf32> to vector<4x512xf32>
    %276 = arith.addf %274, %275 : vector<4x512xf32>
    %c0_98 = arith.constant 0 : index
    %c0_99 = arith.constant 0 : index
    %c0_100 = arith.constant 0 : index
    %277 = vector.load %arg18[%c0_98, %c0_99, %c0_100] : memref<1x1x4xbf16, #tpu.memory_space<vmem>>, vector<1x1x4xbf16>
    %278 = vector.shape_cast %277 : vector<1x1x4xbf16> to vector<1x4xbf16>
    %279 = arith.truncf %276 : vector<4x512xf32> to vector<4x512xbf16>
    %cst_101 = arith.constant dense<0.000000e+00> : vector<1x512xf32>
    %280 = tpu.matmul %278, %279, %cst_101 {dimension_numbers = #tpu.dot_dimension_numbers<[1], [0], [0], [1], [0, 0, 1, 1], [], []>} : vector<1x4xbf16>, vector<4x512xbf16>, vector<1x512xf32> -> vector<1x512xf32>
    %c0_102 = arith.constant 0 : index
    %c0_103 = arith.constant 0 : index
    %c0_104 = arith.constant 0 : index
    %281 = vector.load %arg19[%c0_102, %c0_103, %c0_104] : memref<1x1x1xf32, #tpu.memory_space<vmem>>, vector<1x1x1xf32>
    %282 = vector.shape_cast %281 : vector<1x1x1xf32> to vector<1x1xf32>
    %283 = vector.broadcast %282 : vector<1x1xf32> to vector<1x512xf32>
    %284 = arith.addf %280, %283 : vector<1x512xf32>
    %c0_105 = arith.constant 0 : index
    %c0_106 = arith.constant 0 : index
    %c0_107 = arith.constant 0 : index
    %285 = vector.load %arg24[%c0_105, %c0_106, %c0_107] : memref<1x1x512xf32, #tpu.memory_space<vmem>>, vector<1x1x512xf32>
    %286 = vector.shape_cast %285 : vector<1x1x512xf32> to vector<1x512xf32>
    %287 = vector.shape_cast %284 : vector<1x512xf32> to vector<1x1x512xf32>
    tpu.vector_store %arg24[%c0_105, %c0_106, %c0_107], %287 {strides = array<i32>} : memref<1x1x512xf32, #tpu.memory_space<vmem>>, vector<1x1x512xf32>,
    return
  }
  func.func @transform_0(%arg0: i32) -> (i32, i32, i32, i32) {
    %c0_i32 = arith.constant 0 : i32
    %c0_i32_0 = arith.constant 0 : i32
    %c0_i32_1 = arith.constant 0 : i32
    %c0_i32_2 = arith.constant 0 : i32
    return %arg0, %c0_i32, %c0_i32_0, %c0_i32_1 : i32, i32, i32, i32
  }
  func.func @transform_1(%arg0: i32) -> (i32, i32, i32) {
    %c0_i32 = arith.constant 0 : i32
    %c0_i32_0 = arith.constant 0 : i32
    %c0_i32_1 = arith.constant 0 : i32
    return %arg0, %c0_i32, %c0_i32_0 : i32, i32, i32
  }
  func.func @transform_2(%arg0: i32) -> (i32, i32, i32) {
    %c0_i32 = arith.constant 0 : i32
    %c0_i32_0 = arith.constant 0 : i32
    %c0_i32_1 = arith.constant 0 : i32
    return %arg0, %c0_i32, %c0_i32_0 : i32, i32, i32
  }
  func.func @transform_3(%arg0: i32) -> (i32, i32, i32) {
    %c0_i32 = arith.constant 0 : i32
    %c0_i32_0 = arith.constant 0 : i32
    %c0_i32_1 = arith.constant 0 : i32
    return %arg0, %c0_i32, %c0_i32_0 : i32, i32, i32
  }
  func.func @transform_4(%arg0: i32) -> (i32, i32, i32) {
    %c0_i32 = arith.constant 0 : i32
    %c0_i32_0 = arith.constant 0 : i32
    %c0_i32_1 = arith.constant 0 : i32
    return %arg0, %c0_i32, %c0_i32_0 : i32, i32, i32
  }
  func.func @transform_5(%arg0: i32) -> (i32, i32, i32) {
    %c0_i32 = arith.constant 0 : i32
    %c0_i32_0 = arith.constant 0 : i32
    %c0_i32_1 = arith.constant 0 : i32
    return %arg0, %c0_i32, %c0_i32_0 : i32, i32, i32
  }
  func.func @transform_6(%arg0: i32) -> (i32, i32, i32) {
    %c0_i32 = arith.constant 0 : i32
    %c0_i32_0 = arith.constant 0 : i32
    %c0_i32_1 = arith.constant 0 : i32
    return %arg0, %c0_i32, %c0_i32_0 : i32, i32, i32
  }
  func.func @transform_7(%arg0: i32) -> (i32, i32, i32) {
    %c0_i32 = arith.constant 0 : i32
    %c0_i32_0 = arith.constant 0 : i32
    %c0_i32_1 = arith.constant 0 : i32
    return %arg0, %c0_i32, %c0_i32_0 : i32, i32, i32
  }
  func.func @transform_8(%arg0: i32) -> (i32, i32, i32) {
    %c0_i32 = arith.constant 0 : i32
    %c0_i32_0 = arith.constant 0 : i32
    %c0_i32_1 = arith.constant 0 : i32
    return %arg0, %c0_i32, %c0_i32_0 : i32, i32, i32
  }
  func.func @transform_9(%arg0: i32) -> (i32, i32, i32) {
    %c0_i32 = arith.constant 0 : i32
    %c0_i32_0 = arith.constant 0 : i32
    %c0_i32_1 = arith.constant 0 : i32
    return %arg0, %c0_i32, %c0_i32_0 : i32, i32, i32
  }
  func.func @transform_10(%arg0: i32) -> (i32, i32, i32) {
    %c0_i32 = arith.constant 0 : i32
    %c0_i32_0 = arith.constant 0 : i32
    %c0_i32_1 = arith.constant 0 : i32
    return %arg0, %c0_i32, %c0_i32_0 : i32, i32, i32
  }
  func.func @transform_11(%arg0: i32) -> (i32, i32, i32) {
    %c0_i32 = arith.constant 0 : i32
    %c0_i32_0 = arith.constant 0 : i32
    %c0_i32_1 = arith.constant 0 : i32
    return %arg0, %c0_i32, %c0_i32_0 : i32, i32, i32
  }
  func.func @transform_12(%arg0: i32) -> (i32, i32, i32) {
    %c0_i32 = arith.constant 0 : i32
    %c0_i32_0 = arith.constant 0 : i32
    %c0_i32_1 = arith.constant 0 : i32
    return %arg0, %c0_i32, %c0_i32_0 : i32, i32, i32
  }
  func.func @transform_13(%arg0: i32) -> (i32, i32, i32) {
    %c0_i32 = arith.constant 0 : i32
    %c0_i32_0 = arith.constant 0 : i32
    %c0_i32_1 = arith.constant 0 : i32
    return %arg0, %c0_i32, %c0_i32_0 : i32, i32, i32
  }
  func.func @transform_14(%arg0: i32) -> (i32, i32, i32) {
    %c0_i32 = arith.constant 0 : i32
    %c0_i32_0 = arith.constant 0 : i32
    %c0_i32_1 = arith.constant 0 : i32
    return %arg0, %c0_i32, %c0_i32_0 : i32, i32, i32
  }
  func.func @transform_15(%arg0: i32) -> (i32, i32, i32) {
    %c0_i32 = arith.constant 0 : i32
    %c0_i32_0 = arith.constant 0 : i32
    %c0_i32_1 = arith.constant 0 : i32
    return %arg0, %c0_i32, %c0_i32_0 : i32, i32, i32
  }
  func.func @transform_16(%arg0: i32) -> (i32, i32, i32) {
    %c0_i32 = arith.constant 0 : i32
    %c0_i32_0 = arith.constant 0 : i32
    %c0_i32_1 = arith.constant 0 : i32
    return %arg0, %c0_i32, %c0_i32_0 : i32, i32, i32
  }
  func.func @transform_17(%arg0: i32) -> (i32, i32, i32) {
    %c0_i32 = arith.constant 0 : i32
    %c0_i32_0 = arith.constant 0 : i32
    %c0_i32_1 = arith.constant 0 : i32
    return %arg0, %c0_i32, %c0_i32_0 : i32, i32, i32
  }
  func.func @transform_18(%arg0: i32) -> (i32, i32, i32) {
    %c0_i32 = arith.constant 0 : i32
    %c0_i32_0 = arith.constant 0 : i32
    %c0_i32_1 = arith.constant 0 : i32
    return %arg0, %c0_i32, %c0_i32_0 : i32, i32, i32
  }
  func.func @transform_19(%arg0: i32) -> (i32, i32) {
    %c0_i32 = arith.constant 0 : i32
    %c0_i32_0 = arith.constant 0 : i32
    %c0_i32_1 = arith.constant 0 : i32
    return %c0_i32, %c0_i32_0 : i32, i32
  }
  func.func @transform_20(%arg0: i32) -> (i32, i32) {
    %c0_i32 = arith.constant 0 : i32
    %c0_i32_0 = arith.constant 0 : i32
    %c0_i32_1 = arith.constant 0 : i32
    return %c0_i32, %c0_i32_0 : i32, i32
  }
  func.func @transform_21(%arg0: i32) -> (i32, i32) {
    %c0_i32 = arith.constant 0 : i32
    %c0_i32_0 = arith.constant 0 : i32
    %c0_i32_1 = arith.constant 0 : i32
    return %c0_i32, %c0_i32_0 : i32, i32
  }
  func.func @transform_22(%arg0: i32) -> (i32, i32) {
    %c0_i32 = arith.constant 0 : i32
    %c0_i32_0 = arith.constant 0 : i32
    %c0_i32_1 = arith.constant 0 : i32
    return %c0_i32, %c0_i32_0 : i32, i32
  }
  func.func @transform_23(%arg0: i32) -> (i32, i32, i32) {
    %c0_i32 = arith.constant 0 : i32
    %c0_i32_0 = arith.constant 0 : i32
    %c0_i32_1 = arith.constant 0 : i32
    return %arg0, %c0_i32, %c0_i32_0 : i32, i32, i32
  }
}

</mosaic_0001>

<bundles_post_ra>
// kernel: squeeze.2
= control target key start
LH: loop header
LB: loop body
LE: loop exit
PB: predicated region body
PF: predicated region fallthrough
CT: control target
= control target key end

     0   :  { %s125_s0 = inlined_call_operand.vmem [shape: f32[512], index: 0, kind: input, shape index: {}]   ;;  %s126_s1 = inlined_call_operand.hbm [shape: f32[2,1,16,16], index: 1, kind: output, shape index: {}]  }
   0x1   :  { %v6_v0 = vld [vmem:[%s125_s0] sm:$0xf] }
   0x2   :  { %7 = vst [vmem:[#allocation2] sm:$0xf] %v6_v0 }
   0x3   :  { %2 = vsyncpa [#allocation1], 0  ;;  %s93_s0 = smov 112   ;;  %s94_s8 = smov 80   ;;  %vm9_vm0 = vcmask 130048  }
   0x4   :  { %s95_s9 = smov 96   ;;  %s96_s10 = smov 64  }
   0x5   :  { %s97_s11 = smov 48   ;;  %s98_s12 = smov 32  }
   0x6   :  { %s99_s13 = smov 16   ;;  %s100_s14 = smov [#allocation0]  }
   0x7   :  { %s57_s15 = sshll.u32 %s100_s14, 4  ;;  %s58_s15 = int_to_ptr.vmem [resolvable:$true] %s57_s15 }
   0x8   :  { %s71_s16 = scalar_lea.vmem %s58_s15, 512  ;;  %p76_p1 = scmp.lt.s32.totalorder %s58_s15, %s58_s15 }
   0x9   :  { %v11_v1 = vld [vmem:[#allocation2] sm:$0xf]   ;;  %p72_p0 = scmp.ne.s32.totalorder %s58_s15, %s71_s16  ;;  %p77_p2 = scmp.lt.s32.totalorder %s71_s16, %s71_s16 }
   0xa   :  { %v23_v2 = vld [vmem:[#allocation2] sm:$0xf]   ;;  %12 = vrot.lane.b32.xlu0 %v11_v1, %s93_s0 }
   0xb   :  { %24 = vrot.lane.b32.xlu1 %v23_v2, %s94_s8  ;;  %v17_v3 = vld [vmem:[#allocation2] sm:$0xf]   ;;  %p78_p3 = por %p77_p2, %p76_p1 }
   0xc   :  { %v29_v4 = vld [vmem:[#allocation2] sm:$0xf]  }
   0xd   :  { %v8_v5 = vld [vmem:[#allocation2] sm:$0xf]   ;;  %p79_p4 = pnand %p78_p3, %p72_p0 }
   0xe   :  { %10 = vst.msk [vmem:[#allocation0] ss:$8 sm:$0xf] %vm9_vm0, %v8_v5   ;;  %18 = vrot.lane.b32.xlu0 %v17_v3, %s95_s9  ;;  %v35_v6 = vld [vmem:[#allocation2] sm:$0xf]  }
   0xf   :  { %30 = vrot.lane.b32.xlu1 %v29_v4, %s96_s10  ;;  %v41_v7 = vld [vmem:[#allocation2] sm:$0xf]  }
  0x10   :  { %v47_v8 = vld [vmem:[#allocation2] sm:$0xf]  }
  0x12   :  { %36 = vrot.lane.b32.xlu0 %v35_v6, %s97_s11 }
  0x13   :  { %42 = vrot.lane.b32.xlu1 %v41_v7, %s98_s12 }
  0x16   :  { %48 = vrot.lane.b32.xlu0 %v47_v8, %s99_s13 }
  0x7c   :  { %v13_v9 = vpop.permute.xlu0 %12  }
  0x7d   :  { %v25_v10 = vpop.permute.xlu1 %24   ;;  %16 = vst.msk [vmem:[#allocation0 + $0x1] ss:$8 sm:$0xf] %vm9_vm0, %v13_v9  }
  0x7e   :  { %28 = vst.msk [vmem:[#allocation0 + $0x3] ss:$8 sm:$0xf] %vm9_vm0, %v25_v10  }
  0x80   :  { %v19_v11 = vpop.permute.xlu0 %18  }
  0x81   :  { %v31_v12 = vpop.permute.xlu1 %30   ;;  %22 = vst.msk [vmem:[#allocation0 + $0x2] ss:$8 sm:$0xf] %vm9_vm0, %v19_v11  }
  0x82   :  { %34 = vst.msk [vmem:[#allocation0 + $0x4] ss:$8 sm:$0xf] %vm9_vm0, %v31_v12  }
  0x84   :  { %v37_v13 = vpop.permute.xlu0 %36  }
  0x85   :  { %v43_v14 = vpop.permute.xlu1 %42   ;;  %40 = vst.msk [vmem:[#allocation0 + $0x5] ss:$8 sm:$0xf] %vm9_vm0, %v37_v13  }
  0x86   :  { %46 = vst.msk [vmem:[#allocation0 + $0x6] ss:$8 sm:$0xf] %vm9_vm0, %v43_v14  }
  0x88   :  { %v49_v15 = vpop.permute.xlu0 %48  }
  0x89   :  { %52 = vst.msk [vmem:[#allocation0 + $0x7] ss:$8 sm:$0xf] %vm9_vm0, %v49_v15  }
  0x8a   :  { %82 = shalt.err (!%p79_p4)
}
  0x8b   :  { %60 = dma.vmem_to_hbm [thread:$0]  %s58_s15, 512, %s126_s1, [#allocation1]  }
  0x8c   :  { %91 = dma.done.wait [#allocation1], 512  }
  0x8d   :  { %92 = vsyncadd [#allocation1], 4294966784 }
  0x8e   :  { %62 = vsyncpa [#allocation1], 1 }

// kernel: dp_network_forward.1
= control target key start
LH: loop header
LB: loop body
LE: loop exit
PB: predicated region body
PF: predicated region fallthrough
CT: control target
= control target key end

     0   :  { %s12020_s0 = inlined_call_operand.vmem [shape: f32[2,2,4,256], index: 0, kind: input, shape index: {}]   ;;  %s12021_s1 = inlined_call_operand.vmem [shape: bf16[2,32,36], index: 1, kind: input, shape index: {}]   ;;  %s12022_s2 = inlined_call_operand.vmem [shape: f32[2,32,1], index: 2, kind: input, shape index: {}]   ;;  %s12023_s3 = inlined_call_operand.vmem [shape: f32[2,32,1], index: 3, kind: input, shape index: {}]   ;;  %s12024_s4 = inlined_call_operand.vmem [shape: f32[2,32,1], index: 4, kind: input, shape index: {}]   ;;  %s12025_s5 = inlined_call_operand.vmem [shape: bf16[2,256,288], index: 5, kind: input, shape index: {}]   ;;  %s12026_s6 = inlined_call_operand.vmem [shape: f32[2,256,1], index: 6, kind: input, shape index: {}]   ;;  %s12027_s7 = inlined_call_operand.vmem [shape: f32[2,256,1], index: 7, kind: input, shape index: {}]   ;;  %s12028_s8 = inlined_call_operand.vmem [shape: f32[2,256,1], index: 8, kind: input, shape index: {}]   ;;  %s12029_s9 = inlined_call_operand.vmem [shape: bf16[2,512,256], index: 9, kind: input, shape index: {}]   ;;  %s12030_s10 = inlined_call_operand.vmem [shape: f32[2,32,1], index: 10, kind: input, shape index: {}]   ;;  %s12031_s11 = inlined_call_operand.vmem [shape: f32[2,32,1], index: 11, kind: input, shape index: {}]   ;;  %s12032_s12 = inlined_call_operand.vmem [shape: f32[2,32,1], index: 12, kind: input, shape index: {}]   ;;  %s12033_s13 = inlined_call_operand.vmem [shape: bf16[2,64,32], index: 13, kind: input, shape index: {}]   ;;  %s12034_s14 = inlined_call_operand.vmem [shape: f32[2,4,1], index: 14, kind: input, shape index: {}]   ;;  %s12035_s15 = inlined_call_operand.vmem [shape: f32[2,4,1], index: 15, kind: input, shape index: {}]   ;;  %s12036_s16 = inlined_call_operand.vmem [shape: f32[2,4,1], index: 16, kind: input, shape index: {}]   ;;  %s12037_s17 = inlined_call_operand.vmem [shape: bf16[2,1,4], index: 17, kind: input, shape index: {}]   ;;  %s12038_s18 = inlined_call_operand.vmem [shape: f32[2,1,1], index: 18, kind: input, shape index: {}]   ;;  %s12039_s19 = inlined_call_operand.vmem [shape: bf16[256,576], index: 19, kind: input, shape index: {}]   ;;  %s12040_s20 = inlined_call_operand.vmem [shape: bf16[64,144], index: 20, kind: input, shape index: {}]   ;;  %s12041_s21 = inlined_call_operand.vmem [shape: bf16[256,64], index: 21, kind: input, shape index: {}]   ;;  %s12042_s22 = inlined_call_operand.vmem [shape: bf16[1024,256], index: 22, kind: input, shape index: {}]   ;;  %s12043_s23 = inlined_call_operand.vmem [shape: f32[2,1,512], index: 23, kind: output, shape index: {}]  }
   0x1   :  { %12123 = sst [smem:[#allocation48_spill]] %s12020_s0 }
   0x2   :  { %12124 = sst [smem:[#allocation49_spill]] %s12021_s1 }
   0x3   :  { %12125 = sst [smem:[#allocation50_spill]] %s12022_s2 }
   0x4   :  { %12126 = sst [smem:[#allocation51_spill]] %s12023_s3 }
   0x5   :  { %12127 = sst [smem:[#allocation52_spill]] %s12024_s4  ;;  %s8823_s4 = smov 0  }
   0x6   :  { %12128 = sst [smem:[#allocation53_spill]] %s12025_s5 }
   0x7   :  { %12129 = sst [smem:[#allocation54_spill]] %s12026_s6 }
   0x8   :  { %12130 = sst [smem:[#allocation55_spill]] %s12027_s7 }
   0x9   :  { %12131 = sst [smem:[#allocation56_spill]] %s12028_s8 }
   0xa LB: > { %s7353_s30 = sadd.s32 4294967295, %s8692_s4   ;;  %p7357_p0 = scmp.ge.s32.totalorder %s8692_s4, 1  ;;  %s8692_s4 = sphi %s8823_s4, %s33_s4  }
   0xb   : > { %p810_p1 = scmp.lt.s32.totalorder %s8692_s4, 3 }
   0xd   : > { %p811_p2 = pnand %p7357_p0, %p810_p1 }
   0xf   : > { %814 = sbr.rel (%p811_p2) target bundleno = 5014 (0x1396), region = 112 }
  0x14   : > { %v8834_v0 = vld [vmem:[%s12039_s19 + $0x11c] ss:$20 sps:$4 sm:$0xff]   ;;  %v8839_v1 = vld [vmem:[%s12039_s19 + $0x124] ss:$20 sps:$4 sm:$0xff]   ;;  %v8850_v3 = vld [vmem:[%s12039_s19 + $0x120] ss:$20 sps:$4 sm:$0xff]  }
  0x15   : > { %1573 = vmatprep.subr.bf16.mxu0 %v8834_v0  ;;  %v8845_v2 = vld [vmem:[%s12039_s19 + $0x118] ss:$20 sps:$4 sm:$0xff]   ;;  %1614 = vmatprep.subr.bf16.mxu1 %v8839_v1  ;;  %v8856_v4 = vld [vmem:[%s12039_s19 + $0xf4] ss:$20 sps:$4 sm:$0xff]   ;;  %v8863_v5 = vld [vmem:[%s12039_s19 + $0xfc] ss:$20 sps:$4 sm:$0xff]  }
  0x16   : > { %1574 = vmatpush1.bf16.msra.mxu0 %v8845_v2  ;;  %1615 = vmatpush1.bf16.msra.mxu1 %v8850_v3  ;;  %v8868_v6 = vld [vmem:[%s12039_s19 + $0xf0] ss:$20 sps:$4 sm:$0xff]   ;;  %v8874_v7 = vld [vmem:[%s12039_s19 + $0xf8] ss:$20 sps:$4 sm:$0xff]   ;;  %v8885_v9 = vld [vmem:[%s12039_s19 + $0xd4] ss:$20 sps:$4 sm:$0xff]  }
  0x17   : > { %1575 = vmatprep.subr.bf16.mxu0 %v8856_v4  ;;  %1616 = vmatprep.subr.bf16.mxu1 %v8863_v5  ;;  %v8880_v8 = vld [vmem:[%s12039_s19 + $0xcc] ss:$20 sps:$4 sm:$0xff]   ;;  %v8890_v10 = vld [vmem:[%s12039_s19 + $0xc8] ss:$20 sps:$4 sm:$0xff]   ;;  %v8895_v11 = vld [vmem:[%s12039_s19 + $0xd0] ss:$20 sps:$4 sm:$0xff]  }
  0x18   : > { %v8902_v12 = vld [vmem:[%s12039_s19 + $0xa4] ss:$20 sps:$4 sm:$0xff]   ;;  %v8909_v13 = vld [vmem:[%s12039_s19 + $0xac] ss:$20 sps:$4 sm:$0xff]   ;;  %v8921_v15 = vld [vmem:[%s12039_s19 + $0xa8] ss:$20 sps:$4 sm:$0xff]  }
  0x19   : > { %v8914_v14 = vld [vmem:[%s12039_s19 + $0xa0] ss:$20 sps:$4 sm:$0xff]   ;;  %v8926_v16 = vld [vmem:[%s12039_s19 + $0x7c] ss:$20 sps:$4 sm:$0xff]   ;;  %v8933_v17 = vld [vmem:[%s12039_s19 + $0x84] ss:$20 sps:$4 sm:$0xff]  }
  0x1a   : > { %1576 = vmatpush1.bf16.msra.mxu0 %v8868_v6  ;;  %1617 = vmatpush1.bf16.msra.mxu1 %v8874_v7  ;;  %v8938_v18 = vld [vmem:[%s12039_s19 + $0x78] ss:$20 sps:$4 sm:$0xff]   ;;  %v8943_v19 = vld [vmem:[%s12039_s19 + $0x80] ss:$20 sps:$4 sm:$0xff]   ;;  %v8957_v21 = vld [vmem:[%s12039_s19 + $0x5c] ss:$20 sps:$4 sm:$0xff]  }
  0x1b   : > { %1577 = vmatprep.subr.bf16.mxu0 %v8880_v8  ;;  %1618 = vmatprep.subr.bf16.mxu1 %v8885_v9  ;;  %v8950_v20 = vld [vmem:[%s12039_s19 + $0x54] ss:$20 sps:$4 sm:$0xff]   ;;  %v8962_v22 = vld [vmem:[%s12039_s19 + $0x50] ss:$20 sps:$4 sm:$0xff]   ;;  %v8969_v23 = vld [vmem:[%s12039_s19 + $0x58] ss:$20 sps:$4 sm:$0xff]  }
  0x1c   : > { %v8974_v24 = vld [vmem:[%s12039_s19 + $0x2c] ss:$20 sps:$4 sm:$0xff]   ;;  %v8981_v25 = vld [vmem:[%s12039_s19 + $0x34] ss:$20 sps:$4 sm:$0xff]   ;;  %v8991_v27 = vld [vmem:[%s12039_s19 + $0x30] ss:$20 sps:$4 sm:$0xff]  }
  0x1d   : > { %v8986_v26 = vld [vmem:[%s12039_s19 + $0x28] ss:$20 sps:$4 sm:$0xff]   ;;  %v8998_v28 = vld [vmem:[%s12039_s19 + $0x4] ss:$20 sps:$4 sm:$0xff]   ;;  %v9005_v29 = vld [vmem:[%s12039_s19 + $0xc] ss:$20 sps:$4 sm:$0xff]  }
  0x1e   : > { %1578 = vmatpush1.bf16.msra.mxu0 %v8890_v10  ;;  %1619 = vmatpush1.bf16.msra.mxu1 %v8895_v11  ;;  %v9010_v30 = vld [vmem:[%s12039_s19] ss:$20 sps:$4 sm:$0xff]   ;;  %v9017_v31 = vld [vmem:[%s12039_s19 + $0x8] ss:$20 sps:$4 sm:$0xff]   ;;  %p956_p3 = scmp.lt.s32.totalorder %s7353_s30, 1  ;;  %s12133_s24 = sld [smem:[#allocation48_spill]] }
  0x1f   : > { %1579 = vmatprep.subr.bf16.mxu0 %v8902_v12  ;;  %1620 = vmatprep.subr.bf16.mxu1 %v8909_v13  ;;  %v9022_v32 = vld [vmem:[%s12039_s19 + $0x25c] ss:$20 sps:$4 sm:$0xff]   ;;  %v9031_v33 = vld [vmem:[%s12039_s19 + $0x264] ss:$20 sps:$4 sm:$0xff]   ;;  %v9041_v35 = vld [vmem:[%s12039_s19 + $0x260] ss:$20 sps:$4 sm:$0xff]  }
  0x20   : > { %v9036_v34 = vld [vmem:[%s12039_s19 + $0x258] ss:$20 sps:$4 sm:$0xff]   ;;  %v9048_v36 = vld [vmem:[%s12039_s19 + $0x234] ss:$20 sps:$4 sm:$0xff]   ;;  %s12330_s30 = smov (!%p956_p3, %s7353_s30), 1  ;;  %s12144_s29 = sld [smem:[#allocation53_spill]] }
  0x21   : > { %v9059_v37 = vld [vmem:[%s12039_s19 + $0x23c] ss:$20 sps:$4 sm:$0xff]   ;;  %v9071_v39 = vld [vmem:[%s12039_s19 + $0x238] ss:$20 sps:$4 sm:$0xff]   ;;  %s7771_s26 = sshll.u32 %s12330_s30, 4  ;;  %s8084_s1 = smul.u32 384, %s12330_s30 }
  0x22   : > { %1580 = vmatpush1.bf16.msra.mxu0 %v8914_v14  ;;  %1621 = vmatpush1.bf16.msra.mxu1 %v8921_v15  ;;  %v9064_v38 = vld [vmem:[%s12039_s19 + $0x230] ss:$20 sps:$4 sm:$0xff]   ;;  %v9076_v40 = vld [vmem:[%s12039_s19 + $0x20c] ss:$20 sps:$4 sm:$0xff]   ;;  %v9084_v41 = vld [vmem:[%s12039_s19 + $0x214] ss:$20 sps:$4 sm:$0xff]  }
  0x23   : > { %1581 = vmatprep.subr.bf16.mxu0 %v8926_v16  ;;  %1622 = vmatprep.subr.bf16.mxu1 %v8933_v17  ;;  %v9089_v42 = vld [vmem:[%s12039_s19 + $0x208] ss:$20 sps:$4 sm:$0xff]   ;;  %v9094_v43 = vld [vmem:[%s12039_s19 + $0x210] ss:$20 sps:$4 sm:$0xff]   ;;  %v9113_v45 = vld [vmem:[%s12039_s19 + $0x1ec] ss:$20 sps:$4 sm:$0xff]  }
  0x24   : > { %12132 = vst [vmem:[#allocation2_spill] sm:$0xff] %v9094_v43  ;;  %s9099_s25 = scalar_lea.vmem %s12133_s24, %s7771_s26  ;;  %v9106_v44 = vld [vmem:[%s12039_s19 + $0x1e4] ss:$20 sps:$4 sm:$0xff]   ;;  %12134 = vst [vmem:[#allocation3_spill] sm:$0xff] %v9113_v45  ;;  %v9118_v46 = vld [vmem:[%s12039_s19 + $0x1e0] ss:$20 sps:$4 sm:$0xff]  }
  0x25   : > { %v9123_v47 = vld [vmem:[%s12039_s19 + $0x1e8] ss:$20 sps:$4 sm:$0xff]   ;;  %s12136_s24 = sld [smem:[#allocation49_spill]]  ;;  %v1049_v48 = vld [vmem:[%s9099_s25] sm:$0xff]  ;;  %v9149_v53 = vld [vmem:[%s12039_s19 + $0x1b8] ss:$20 sps:$4 sm:$0xff]  }
  0x26   : > { %1582 = vmatpush1.bf16.msra.mxu0 %v8938_v18  ;;  %1623 = vmatpush1.bf16.msra.mxu1 %v8943_v19  ;;  %12135 = vst [vmem:[#allocation4_spill] sm:$0xff] %v9123_v47  ;;  %v1052_v49 = vcombine.high %v1049_v48, %v1049_v48  ;;  %v9137_v50 = vld [vmem:[%s12039_s19 + $0x1bc] ss:$20 sps:$4 sm:$0xff]   ;;  %v9144_v51 = vld [vmem:[%s12039_s19 + $0x1c4] ss:$20 sps:$4 sm:$0xff]   ;;  %s9245_s3 = scalar_lea.vmem %s12144_s29, %s8084_s1  ;;  %s7779_s7 = sshll.u32 %s12330_s30, 9 }
  0x27   : > { %1583 = vmatprep.subr.bf16.mxu0 %v8950_v20  ;;  %1624 = vmatprep.subr.bf16.mxu1 %v8957_v21  ;;  %12137 = vst [vmem:[#allocation5_spill] sm:$0xff] %v9144_v51  ;;  %v9154_v54 = vld [vmem:[%s12039_s19 + $0x1c0] ss:$20 sps:$4 sm:$0xff]   ;;  %v9168_v56 = vld [vmem:[%s12039_s19 + $0x19c] ss:$20 sps:$4 sm:$0xff]   ;;  %s9331_s2 = scalar_lea.vmem %s12029_s9, %s7779_s7  ;;  %vm1718_vm0 = vcmask 1041408  }
  0x28   : > { %v1058_v52 = vpack.c.bf16 %v1052_v49, %v1052_v49  ;;  %12138 = vst [vmem:[#allocation6_spill] sm:$0xff] %v9154_v54  ;;  %v9161_v55 = vld [vmem:[%s12039_s19 + $0x194] ss:$20 sps:$4 sm:$0xff]   ;;  %12139 = vst [vmem:[#allocation7_spill] sm:$0xff] %v9168_v56  ;;  %v9173_v57 = vld [vmem:[%s12039_s19 + $0x190] ss:$20 sps:$4 sm:$0xff]  }
  0x29   : > { %v9178_v58 = vld [vmem:[%s12039_s19 + $0x198] ss:$20 sps:$4 sm:$0xff]   ;;  %v9192_v60 = vld [vmem:[%s12039_s19 + $0x174] ss:$20 sps:$4 sm:$0xff]   ;;  %v9202_v62 = vld [vmem:[%s12039_s19 + $0x170] ss:$20 sps:$4 sm:$0xff]  }
  0x2a   : > { %1584 = vmatpush1.bf16.msra.mxu0 %v8962_v22  ;;  %1625 = vmatpush1.bf16.msra.mxu1 %v8969_v23  ;;  %12140 = vst [vmem:[#allocation8_spill] sm:$0xff] %v9178_v58  ;;  %v9185_v59 = vld [vmem:[%s12039_s19 + $0x16c] ss:$20 sps:$4 sm:$0xff]   ;;  %12141 = vst [vmem:[#allocation9_spill] sm:$0xff] %v9192_v60  ;;  %v9197_v61 = vld [vmem:[%s12039_s19 + $0x168] ss:$20 sps:$4 sm:$0xff]  }
  0x2b   : > { %1585 = vmatprep.subr.bf16.mxu0 %v8974_v24  ;;  %1626 = vmatprep.subr.bf16.mxu1 %v8981_v25  ;;  %s9128_s5 = scalar_lea.vmem %s12136_s24, %s7771_s26  ;;  %12142 = vst [vmem:[#allocation10_spill] sm:$0xff] %v9202_v62  ;;  %v9209_v63 = vld [vmem:[%s12039_s19 + $0x144] ss:$20 sps:$4 sm:$0xff]   ;;  %v9216_v49 = vld [vmem:[%s12039_s19 + $0x14c] ss:$20 sps:$4 sm:$0xff]   ;;  %s12058_s24 = smov 64  }
  0x2c   : > { %1605 = vmatprep.mubr.bf16.mxu0 %v1058_v52  ;;  %1646 = vmatprep.mubr.bf16.mxu1 %v1058_v52  ;;  %12143 = vst [vmem:[#allocation11_spill] sm:$0xff] %v9216_v49  ;;  %vm1722_vm1 = vcmask 1043456   ;;  %vm1725_vm2 = vcmask 1045504   ;;  %vm1951_vm3 = vcmask 293888   ;;  %s12155_s27 = sld [smem:[#allocation50_spill]]  ;;  %vm1903_vm4 = vcmask 523264  }
  0x2d   : > { %s12156_s28 = sld [smem:[#allocation51_spill]]  ;;  %s12054_s7 = smov 96   ;;  %vm2954_vm5 = vcmask 261120   ;;  %vm2385_vm6 = vcmask 130048   ;;  %vm5004_vm7 = vcmask 392192   ;;  %vm5013_vm8 = vcmask 654336  }
  0x2e   : > { %1586 = vmatpush1.bf16.msra.mxu0 %v8986_v26  ;;  %1627 = vmatpush1.bf16.msra.mxu1 %v8991_v27  ;;  %s12157_s6 = sld [smem:[#allocation52_spill]]  ;;  %s12060_s0 = smov 48   ;;  %vm5018_vm9 = vcmask 785408   ;;  %vm5023_vm10 = vcmask 916480   ;;  %vm6958_vm11 = vcmask 31744  }
  0x2f   : > { %1587 = vmatprep.subr.bf16.mxu0 %v8998_v28  ;;  %1628 = vmatprep.subr.bf16.mxu1 %v9005_v29  ;;  %s9625_s1 = sshll.u32 %s12330_s30, 8  ;;  %s12160_s8 = sld [smem:[#allocation56_spill]] }
  0x32   : > { %1588 = vmatpush1.bf16.msra.mxu0 %v9010_v30  ;;  %1629 = vmatpush1.bf16.msra.mxu1 %v9017_v31 }
  0x33   : > { %1589 = vmatprep.subr.bf16.mxu0 %v9022_v32  ;;  %1630 = vmatprep.subr.bf16.mxu1 %v9031_v33 }
  0x36   : > { %1590 = vmatpush2.bf16.msra.mxu0 %v9036_v34  ;;  %1631 = vmatpush2.bf16.msra.mxu1 %v9041_v35 }
  0x37   : > { %1591 = vmatprep.subr.bf16.mxu0 %v9048_v36  ;;  %1632 = vmatprep.subr.bf16.mxu1 %v9059_v37 }
  0x3a   : > { %1592 = vmatpush2.bf16.msra.mxu0 %v9064_v38  ;;  %1633 = vmatpush2.bf16.msra.mxu1 %v9071_v39 }
  0x3b   : > { %1593 = vmatprep.subr.bf16.mxu0 %v9076_v40  ;;  %1634 = vmatprep.subr.bf16.mxu1 %v9084_v41 }
  0x3e   : > { %1594 = vmatpush2.bf16.msra.mxu0 %v9089_v42  ;;  %1635 = vmatpush2.bf16.msra.mxu1 %v9094_v43 }
  0x3f   : > { %1595 = vmatprep.subr.bf16.mxu0 %v9106_v44  ;;  %1636 = vmatprep.subr.bf16.mxu1 %v9113_v45  ;;  %v1057_v45 = vpack.c.bf16 %v1049_v48, %v1049_v48  ;;  %v9273_v48 = vld [vmem:[%s12039_s19 + $0x218] ss:$20 sps:$4 sm:$0xff]  }
  0x42   : > { %1596 = vmatpush2.bf16.msra.mxu0 %v9118_v46  ;;  %1637 = vmatpush2.bf16.msra.mxu1 %v9123_v47 }
  0x43   : > { %1597 = vmatprep.subr.bf16.mxu0 %v9137_v50  ;;  %1638 = vmatprep.subr.bf16.mxu1 %v9144_v51  ;;  %v9250_v51 = vld [vmem:[%s12039_s19 + $0x128] ss:$20 sps:$4 sm:$0xff]  }
  0x46   : > { %1598 = vmatpush2.bf16.msra.mxu0 %v9149_v53  ;;  %1639 = vmatpush2.bf16.msra.mxu1 %v9154_v54  ;;  %v9231_v54 = vld [vmem:[%s12039_s19 + $0x268] ss:$20 sps:$4 sm:$0xff]  }
  0x47   : > { %1599 = vmatprep.subr.bf16.mxu0 %v9161_v55  ;;  %1640 = vmatprep.subr.bf16.mxu1 %v9168_v56  ;;  %v9221_v56 = vld [vmem:[%s12039_s19 + $0x140] ss:$20 sps:$4 sm:$0xff]  }
  0x4a   : > { %1600 = vmatpush2.bf16.msra.mxu0 %v9173_v57  ;;  %1641 = vmatpush2.bf16.msra.mxu1 %v9178_v58  ;;  %v9226_v58 = vld [vmem:[%s12039_s19 + $0x148] ss:$20 sps:$4 sm:$0xff]  }
  0x4b   : > { %1601 = vmatprep.subr.bf16.mxu0 %v9185_v59  ;;  %1642 = vmatprep.subr.bf16.mxu1 %v9192_v60  ;;  %v9234_v60 = vld [vmem:[%s9099_s25 + $0x8] sm:$0xff]  ;;  %s9458_s25 = sshll.u32 %s12330_s30, 5 }
  0x4c   : > { %v1055_v47 = vcombine.high %v9234_v60, %v9234_v60  ;;  %s970_s26 = scalar_lea.vmem %s12155_s27, %s9458_s25  ;;  %s9493_s29 = scalar_lea.vmem %s12156_s28, %s9458_s25 }
  0x4d   : > { %s980_s27 = scalar_lea.vmem %s12157_s6, %s9458_s25  ;;  %s12064_s28 = smov 112  }
  0x4e   : > { %1602 = vmatpush2.bf16.msra.mxu0 %v9197_v61  ;;  %1643 = vmatpush2.bf16.msra.mxu1 %v9202_v62  ;;  %v9257_v62 = vld [vmem:[%s12039_s19 + $0x240] ss:$20 sps:$4 sm:$0xff]   ;;  %v9268_v43 = vpack.c.bf16 %v1055_v47, %v1055_v47  ;;  %v9288_v47 = vld [vmem:[%s12039_s19 + $0x1f0] ss:$20 sps:$4 sm:$0xff]   ;;  %s10962_s6 = scalar_lea.vmem %s12033_s13, %s9458_s25 }
  0x4f   : > { %1603 = vmatprep.subr.bf16.mxu0 %v9209_v63  ;;  %1644 = vmatprep.subr.bf16.mxu1 %v9216_v49  ;;  %v9266_v49 = vld [vmem:[%s12039_s19 + $0x100] ss:$20 sps:$4 sm:$0xff]  }
  0x52   : > { %1604 = vmatpush2.bf16.msra.mxu0 %v9221_v56  ;;  %1645 = vmatpush2.bf16.msra.mxu1 %v9226_v58 }
  0x53   : > { %7784 = vmatprep.subr.bf16.mxu0 %v9231_v54  ;;  %1735 = vmatprep.subr.bf16.mxu1 %v8834_v0  ;;  %v9282_v0 = vld [vmem:[%s12039_s19 + $0xd8] ss:$20 sps:$4 sm:$0xff]  }
  0x55   : > { %1606 = vmatmul.mubr.bf16.vlgmr.msra.gmra.mxu0 %v1057_v45  ;;  %1647 = vmatmul.mubr.bf16.vlgmr.msra.gmra.mxu1 %v1057_v45 }
  0x56   : > { %7785 = vmatpush3.bf16.msra.mxu0 %v9250_v51  ;;  %1736 = vmatpush1.bf16.msra.mxu1 %v8845_v2  ;;  %v9297_v2 = vld [vmem:[%s12039_s19 + $0xb0] ss:$20 sps:$4 sm:$0xff]  }
  0x57   : > { %7786 = vmatprep.subr.bf16.mxu0 %v9257_v62  ;;  %1737 = vmatprep.subr.bf16.mxu1 %v8856_v4  ;;  %v9302_v4 = vld [vmem:[%s12039_s19 + $0x1c8] ss:$20 sps:$4 sm:$0xff]  }
  0x58   : > { %1687 = vmatprep.mubr.bf16.mxu0 %v1058_v52  ;;  %1767 = vmatprep.mubr.bf16.mxu1 %v9268_v43 }
  0x5a   : > { %7787 = vmatpush3.bf16.msra.mxu0 %v9266_v49  ;;  %1738 = vmatpush1.bf16.msra.mxu1 %v8868_v6  ;;  %v9311_v6 = vld [vmem:[%s12039_s19 + $0x88] ss:$20 sps:$4 sm:$0xff]  }
  0x5b   : > { %7788 = vmatprep.subr.bf16.mxu0 %v9273_v48  ;;  %1739 = vmatprep.subr.bf16.mxu1 %v8880_v8  ;;  %v9317_v8 = vld [vmem:[%s12039_s19 + $0x1a0] ss:$20 sps:$4 sm:$0xff]  }
  0x5e   : > { %7789 = vmatpush3.bf16.msra.mxu0 %v9282_v0  ;;  %1740 = vmatpush1.bf16.msra.mxu1 %v8890_v10  ;;  %v9326_v10 = vld [vmem:[%s12039_s19 + $0x60] ss:$20 sps:$4 sm:$0xff]  }
  0x5f   : > { %7790 = vmatprep.subr.bf16.mxu0 %v9288_v47  ;;  %1741 = vmatprep.subr.bf16.mxu1 %v8902_v12  ;;  %v9336_v12 = vld [vmem:[%s12039_s19 + $0x178] ss:$20 sps:$4 sm:$0xff]  }
  0x62   : > { %7791 = vmatpush3.bf16.msra.mxu0 %v9297_v2  ;;  %1742 = vmatpush1.bf16.msra.mxu1 %v8914_v14  ;;  %v9345_v14 = vld [vmem:[%s12039_s19 + $0x38] ss:$20 sps:$4 sm:$0xff]  }
  0x63   : > { %7792 = vmatprep.subr.bf16.mxu0 %v9302_v4  ;;  %1743 = vmatprep.subr.bf16.mxu1 %v8926_v16  ;;  %v9350_v16 = vld [vmem:[%s12039_s19 + $0x150] ss:$20 sps:$4 sm:$0xff]  }
  0x66   : > { %7793 = vmatpush3.bf16.msra.mxu0 %v9311_v6  ;;  %1744 = vmatpush1.bf16.msra.mxu1 %v8938_v18  ;;  %v9359_v18 = vld [vmem:[%s12039_s19 + $0x10] ss:$20 sps:$4 sm:$0xff]  }
  0x67   : > { %7794 = vmatprep.subr.bf16.mxu0 %v9317_v8  ;;  %1745 = vmatprep.subr.bf16.mxu1 %v8950_v20  ;;  %v12154_v20 = vld [vmem:[#allocation11_spill] sm:$0xff] }
  0x6a   : > { %7795 = vmatpush3.bf16.msra.mxu0 %v9326_v10  ;;  %1746 = vmatpush1.bf16.msra.mxu1 %v8962_v22 }
  0x6b   : > { %7796 = vmatprep.subr.bf16.mxu0 %v9336_v12  ;;  %1747 = vmatprep.subr.bf16.mxu1 %v8974_v24 }
  0x6e   : > { %7797 = vmatpush3.bf16.msra.mxu0 %v9345_v14  ;;  %1748 = vmatpush1.bf16.msra.mxu1 %v8986_v26 }
  0x6f   : > { %7798 = vmatprep.subr.bf16.mxu0 %v9350_v16  ;;  %1749 = vmatprep.subr.bf16.mxu1 %v8998_v28 }
  0x72   : > { %7799 = vmatpush3.bf16.msra.mxu0 %v9359_v18  ;;  %1750 = vmatpush1.bf16.msra.mxu1 %v9010_v30 }
  0x73   : > { %1751 = vmatprep.subr.bf16.mxu1 %v9022_v32  ;;  %1776 = vmatprep.subr.bf16.mxu0 %v8839_v1  ;;  %v1059_v1 = vpack.c.bf16 %v9234_v60, %v9234_v60 }
  0x75   : > { %1688 = vmatmul.mubr.bf16.vlgmr.msra.gmra.mxu0 %v1057_v45 }
  0x76   : > { %1752 = vmatpush2.bf16.msra.mxu1 %v9036_v34  ;;  %1777 = vmatpush1.bf16.msra.mxu0 %v8850_v3  ;;  %v12145_v3 = vld [vmem:[#allocation2_spill] sm:$0xff] }
  0x77   : > { %1753 = vmatprep.subr.bf16.mxu1 %v9048_v36  ;;  %1778 = vmatprep.subr.bf16.mxu0 %v8863_v5  ;;  %v12146_v5 = vld [vmem:[#allocation3_spill] sm:$0xff] }
  0x78   : > { %1808 = vmatprep.mubr.bf16.mxu0 %v9268_v43 }
  0x7a   : > { %1754 = vmatpush2.bf16.msra.mxu1 %v9064_v38  ;;  %1779 = vmatpush1.bf16.msra.mxu0 %v8874_v7  ;;  %v12147_v7 = vld [vmem:[#allocation4_spill] sm:$0xff] }
  0x7b   : > { %1755 = vmatprep.subr.bf16.mxu1 %v9076_v40  ;;  %1780 = vmatprep.subr.bf16.mxu0 %v8885_v9  ;;  %v12148_v9 = vld [vmem:[#allocation5_spill] sm:$0xff] }
  0x7e   : > { %1756 = vmatpush2.bf16.msra.mxu1 %v9089_v42  ;;  %1781 = vmatpush1.bf16.msra.mxu0 %v8895_v11  ;;  %v12149_v11 = vld [vmem:[#allocation6_spill] sm:$0xff] }
  0x7f   : > { %1757 = vmatprep.subr.bf16.mxu1 %v9106_v44  ;;  %1782 = vmatprep.subr.bf16.mxu0 %v8909_v13  ;;  %v12150_v13 = vld [vmem:[#allocation7_spill] sm:$0xff] }
  0x82   : > { %1758 = vmatpush2.bf16.msra.mxu1 %v9118_v46  ;;  %1783 = vmatpush1.bf16.msra.mxu0 %v8921_v15  ;;  %v12151_v15 = vld [vmem:[#allocation8_spill] sm:$0xff] }
  0x83   : > { %1759 = vmatprep.subr.bf16.mxu1 %v9137_v50  ;;  %1784 = vmatprep.subr.bf16.mxu0 %v8933_v17  ;;  %v12152_v17 = vld [vmem:[#allocation9_spill] sm:$0xff] }
  0x86   : > { %1760 = vmatpush2.bf16.msra.mxu1 %v9149_v53  ;;  %1785 = vmatpush1.bf16.msra.mxu0 %v8943_v19  ;;  %v12153_v19 = vld [vmem:[#allocation10_spill] sm:$0xff] }
  0x87   : > { %1761 = vmatprep.subr.bf16.mxu1 %v9161_v55  ;;  %1786 = vmatprep.subr.bf16.mxu0 %v8957_v21 }
  0x8a   : > { %1762 = vmatpush2.bf16.msra.mxu1 %v9173_v57  ;;  %1787 = vmatpush1.bf16.msra.mxu0 %v8969_v23 }
  0x8b   : > { %1763 = vmatprep.subr.bf16.mxu1 %v9185_v59  ;;  %1788 = vmatprep.subr.bf16.mxu0 %v8981_v25 }
  0x8e   : > { %1764 = vmatpush2.bf16.msra.mxu1 %v9197_v61  ;;  %1789 = vmatpush1.bf16.msra.mxu0 %v8991_v27 }
  0x8f   : > { %1765 = vmatprep.subr.bf16.mxu1 %v9209_v63  ;;  %1790 = vmatprep.subr.bf16.mxu0 %v9005_v29 }
  0x92   : > { %1766 = vmatpush2.bf16.msra.mxu1 %v9221_v56  ;;  %1791 = vmatpush1.bf16.msra.mxu0 %v9017_v31 }
  0x93   : > { %1792 = vmatprep.subr.bf16.mxu0 %v9031_v33  ;;  %7806 = vmatprep.subr.bf16.mxu1 %v9231_v54 }
  0x95   : > { %1768 = vmatmul.mubr.bf16.vlgmr.msra.gmra.mxu1 %v1059_v1 }
  0x96   : > { %1793 = vmatpush2.bf16.msra.mxu0 %v9041_v35  ;;  %7807 = vmatpush3.bf16.msra.mxu1 %v9250_v51 }
  0x97   : > { %1794 = vmatprep.subr.bf16.mxu0 %v9059_v37  ;;  %7808 = vmatprep.subr.bf16.mxu1 %v9257_v62 }
  0x98   : > { %1849 = vmatprep.mubr.bf16.mxu1 %v9268_v43 }
  0x9a   : > { %1795 = vmatpush2.bf16.msra.mxu0 %v9071_v39  ;;  %7809 = vmatpush3.bf16.msra.mxu1 %v9266_v49 }
  0x9b   : > { %1796 = vmatprep.subr.bf16.mxu0 %v9084_v41  ;;  %7810 = vmatprep.subr.bf16.mxu1 %v9273_v48 }
  0x9e   : > { %1797 = vmatpush2.bf16.msra.mxu0 %v12145_v3  ;;  %7811 = vmatpush3.bf16.msra.mxu1 %v9282_v0  ;;  %v12066_v3 = vmov 0  }
  0x9f   : > { %1798 = vmatprep.subr.bf16.mxu0 %v12146_v5  ;;  %7812 = vmatprep.subr.bf16.mxu1 %v9288_v47 }
  0xa0   : > { %8102 = vset.pattern.permute.xlu1 %v12066_v3  ;;  %8103 = vset.pattern.permute.xlu0 %v12066_v3 }
  0xa2   : > { %1799 = vmatpush2.bf16.msra.mxu0 %v12147_v7  ;;  %7813 = vmatpush3.bf16.msra.mxu1 %v9297_v2  ;;  %v1918_v7 = vld [vmem:[%s970_s26 + $0x8] sm:$0xff] }
  0xa3   : > { %1800 = vmatprep.subr.bf16.mxu0 %v12148_v9  ;;  %7814 = vmatprep.subr.bf16.mxu1 %v9302_v4 }
  0xa6   : > { %1801 = vmatpush2.bf16.msra.mxu0 %v12149_v11  ;;  %7815 = vmatpush3.bf16.msra.mxu1 %v9311_v6 }
  0xa7   : > { %1802 = vmatprep.subr.bf16.mxu0 %v12150_v13  ;;  %7816 = vmatprep.subr.bf16.mxu1 %v9317_v8 }
  0xaa   : > { %1803 = vmatpush2.bf16.msra.mxu0 %v12151_v15  ;;  %7817 = vmatpush3.bf16.msra.mxu1 %v9326_v10  ;;  %v8218_v10 = vld [vmem:[%s9128_s5] sm:$0xff]  }
  0xab   : > { %1804 = vmatprep.subr.bf16.mxu0 %v12152_v17  ;;  %7818 = vmatprep.subr.bf16.mxu1 %v9336_v12  ;;  %v1917_v15 = vld [vmem:[%s970_s26] sm:$0xff] }
  0xae   : > { %1805 = vmatpush2.bf16.msra.mxu0 %v12153_v19  ;;  %7819 = vmatpush3.bf16.msra.mxu1 %v9345_v14 }
  0xaf   : > { %1806 = vmatprep.subr.bf16.mxu0 %v12154_v20  ;;  %7820 = vmatprep.subr.bf16.mxu1 %v9350_v16 }
  0xb2   : > { %1807 = vmatpush2.bf16.msra.mxu0 %v9226_v58  ;;  %7821 = vmatpush3.bf16.msra.mxu1 %v9359_v18 }
  0xb5   : > { %1809 = vmatmul.mubr.bf16.vlgmr.msra.gmra.mxu0 %v1059_v1  ;;  %1850 = vmatmul.mubr.bf16.vlgmr.msra.gmra.mxu1 %v1059_v1 }
  0xb6   : > { %8031 = vmatprep.mubr.msk.bf16.mxu0 %vm1951_vm3, %v8218_v10  ;;  %v2014_v10 = vld [vmem:[%s980_s27 + $0x8] sm:$0xff] }
 0x115   : > { %v1607_v21 = vpop.f32.mrf.mxu0  ;;  %v1648_v22 = vpop.f32.mrf.mxu1 }
 0x116   : > { %v9440_v42 = vpack.c.bf16 %v1648_v22, %v1648_v22  ;;  %v1695_v63 = vpack.c.bf16 %v1607_v21, %v1607_v21  ;;  %v1919_v21 = vld [vmem:[%s970_s26 + $0x10] sm:$0xff]  ;;  %v1920_v22 = vld [vmem:[%s970_s26 + $0x18] sm:$0xff]  ;;  %s12159_s26 = sld [smem:[#allocation55_spill]] }
 0x117   : > { %v9435_v23 = vpop.f32.mrf.mxu0  ;;  %v1650_v24 = vpop.f32.mrf.mxu1 }
 0x118   : > { %v1710_v43 = vrot.slane %v9440_v42, 6  ;;  %v1698_v58 = vpack.c.bf16 %v1650_v24, %v1650_v24  ;;  %v1701_v49 = vrot.slane %v1695_v63, 6  ;;  %v1696_v16 = vpack.c.bf16 %v9435_v23, %v9435_v23 }
 0x119   : > { %v1611_v25 = vpop.f32.mrf.mxu0  ;;  %v1652_v26 = vpop.f32.mrf.mxu1 }
 0x11a   : > { %v1715_v61 = vrot.slane %v1698_v58, 2  ;;  %v1706_v9 = vrot.slane %v1696_v16, 2  ;;  %v1714_v25 = vrot.slane %v1698_v58, 4 }
 0x11b   : > { %v1612_v27 = vpop.f32.mrf.mxu0  ;;  %v1653_v28 = vpop.f32.mrf.mxu1 }
 0x135   : > { %v7800_v29 = vpop.f32.mrf.mxu0 }
 0x137   : > { %v7801_v30 = vpop.f32.mrf.mxu0 }
 0x138   : > { %v9437_v31 = vadd.f32 %v7801_v30, %v7800_v29 }
 0x139   : > { %v7803_v32 = vpop.f32.mrf.mxu0 }
 0x13a   : > { %v1699_v13 = vpack.c.bf16 %v9437_v31, %v9437_v31  ;;  %v1705_v32 = vrot.slane %v1696_v16, 4  ;;  %v8222_v16 = vld [vmem:[%s12040_s20 + $0x34] ss:$8 sps:$4 sm:$0xff]  }
 0x13b   : > { %v7804_v33 = vpop.f32.mrf.mxu0 }
 0x155   : > { %v1769_v34 = vpop.f32.mrf.mxu1 }
 0x156   : > { %v1857_v35 = vpack.c.bf16 %v1769_v34, %v1769_v34 }
 0x157   : > { %v1771_v36 = vpop.f32.mrf.mxu1 }
 0x158   : > { %v1858_v37 = vpack.c.bf16 %v1771_v36, %v1771_v36  ;;  %v1863_v38 = vrot.slane %v1857_v35, 6 }
 0x159   : > { %v1773_v39 = vpop.f32.mrf.mxu1 }
 0x15a   : > { %v1868_v40 = vrot.slane %v1858_v37, 2  ;;  %1864 = vrot.lane.b32.xlu1 %v1863_v38, %s12058_s24  ;;  %v1867_v47 = vrot.slane %v1858_v37, 4  ;;  %v8219_v38 = vld [vmem:[%s9128_s5 + $0x8] sm:$0xff]   ;;  %s12082_s5 = smov 16  }
 0x15b   : > { %v1774_v41 = vpop.f32.mrf.mxu1 }
 0x15e   : > { %1869 = vrot.lane.b32.xlu1 %v1868_v40, %s12058_s24 }
 0x162   : > { %1711 = vrot.lane.b32.xlu1 %v1710_v43, %s12058_s24 }
 0x175   : > { %v1810_v44 = vpop.f32.mrf.mxu0  ;;  %v7822_v45 = vpop.f32.mrf.mxu1 }
 0x176   : > { %v1859_v46 = vpack.c.bf16 %v1810_v44, %v1810_v44 }
 0x177   : > { %v1812_v50 = vpop.f32.mrf.mxu0  ;;  %v7823_v51 = vpop.f32.mrf.mxu1 }
 0x178   : > { %v1860_v52 = vpack.c.bf16 %v1812_v50, %v1812_v50  ;;  %v1872_v53 = vrot.slane %v1859_v46, 6  ;;  %v7824_v60 = vadd.f32 %v7823_v51, %v7822_v45 }
 0x179   : > { %v1814_v54 = vpop.f32.mrf.mxu0  ;;  %v7825_v55 = vpop.f32.mrf.mxu1 }
 0x17a   : > { %1873 = vrot.lane.b32.xlu0 %v1872_v53, %s12058_s24  ;;  %v1877_v59 = vrot.slane %v1860_v52, 2  ;;  %v1861_v62 = vpack.c.bf16 %v7824_v60, %v7824_v60  ;;  %v1876_v14 = vrot.slane %v1860_v52, 4  ;;  %v2009_v54 = vld [vmem:[%s9493_s29] sm:$0xff] }
 0x17b   : > { %v1815_v56 = vpop.f32.mrf.mxu0  ;;  %v7826_v57 = vpop.f32.mrf.mxu1 }
 0x17e   : > { %1878 = vrot.lane.b32.xlu0 %v1877_v59, %s12058_s24 }
 0x182   : > { %1716 = vrot.lane.b32.xlu0 %v1715_v61, %s12058_s24 }
 0x186   : > { %1901 = vrot.lane.b32.xlu0 %v1861_v62, %s12058_s24 }
 0x18a   : > { %1702 = vrot.lane.b32.xlu0 %v1701_v49, %s12058_s24 }
 0x1cc   : > { %v1865_v48 = vpop.permute.xlu1 %1864 }
 0x1cd   : > { %v1882_v0 = vsel %vm1718_vm0, %v1857_v35, %v1865_v48 }
 0x1ce   : > { %v1884_v4 = vsel %vm1722_vm1, %v1882_v0, %v1867_v47 }
 0x1d0   : > { %v1870_v2 = vpop.permute.xlu1 %1869 }
 0x1d1   : > { %v1886_v6 = vsel %vm1725_vm2, %v1884_v4, %v1870_v2 }
 0x1d2   : > { %1897 = vrot.lane.b32.xlu0 %v1886_v6, %s12058_s24 }
 0x1d4   : > { %v1712_v23 = vpop.permute.xlu1 %1711 }
 0x1d5   : > { %v1730_v24 = vsel %vm1718_vm0, %v9440_v42, %v1712_v23 }
 0x1d6   : > { %1928 = vperm.xlu0 %8103, %v1918_v7   ;;  %v1732_v27 = vsel %vm1722_vm1, %v1730_v24, %v1714_v25  ;;  %v9531_v7 = vld [vmem:[%s12040_s20 + $0x24] ss:$8 sps:$4 sm:$0xff]  }
 0x1ec   : > { %v1874_v8 = vpop.permute.xlu0 %1873 }
 0x1ed   : > { %v1889_v12 = vsel %vm1718_vm0, %v1859_v46, %v1874_v8  ;;  %v2013_v8 = vld [vmem:[%s980_s27] sm:$0xff] }
 0x1ee   : > { %v1891_v1 = vsel %vm1722_vm1, %v1889_v12, %v1876_v14  ;;  %v2012_v12 = vld [vmem:[%s9493_s29 + $0x18] sm:$0xff]  ;;  %v2010_v14 = vld [vmem:[%s9493_s29 + $0x8] sm:$0xff] }
 0x1f0   : > { %v1879_v18 = vpop.permute.xlu0 %1878 }
 0x1f1   : > { %v1893_v5 = vsel %vm1725_vm2, %v1891_v1, %v1879_v18  ;;  %v9524_v18 = vld [vmem:[%s12040_s20 + $0x30] ss:$8 sps:$4 sm:$0xff]  }
 0x1f2   : > { %1899 = vrot.lane.b32.xlu1 %v1893_v5, %s12058_s24  ;;  %v2016_v1 = vld [vmem:[%s980_s27 + $0x18] sm:$0xff]  ;;  %v2011_v5 = vld [vmem:[%s9493_s29 + $0x10] sm:$0xff]  ;;  %s12062_s29 = smov 32  }
 0x1f4   : > { %v1717_v11 = vpop.permute.xlu0 %1716 }
 0x1f5   : > { %v1734_v28 = vsel %vm1725_vm2, %v1732_v27, %v1717_v11  ;;  %v2015_v11 = vld [vmem:[%s980_s27 + $0x10] sm:$0xff]  ;;  %s12056_s27 = smov 80  }
 0x1f6   : > { %1707 = vrot.lane.b32.xlu1 %v1706_v9, %s12058_s24  ;;  %v9536_v9 = vld [vmem:[%s12040_s20 + $0x20] ss:$8 sps:$4 sm:$0xff]  }
 0x1f8   : > { %v1902_v17 = vpop.permute.xlu0 %1901 }
 0x1f9   : > { %v1912_v19 = vsel %vm1903_vm4, %v1699_v13, %v1902_v17  ;;  %v8228_v13 = vld [vmem:[%s12040_s20 + $0x14] ss:$8 sps:$4 sm:$0xff]   ;;  %v8231_v17 = vld [vmem:[%s12040_s20 + $0x4] ss:$8 sps:$4 sm:$0xff]  }
 0x1fa   : > { %v1958_v20 = vsel %vm1718_vm0, %v1912_v19, 0  ;;  %8083 = vmatprep.subr.msk.bf16.mxu0 %vm1718_vm0, %v1912_v19  ;;  %1923 = vperm.xlu1 %8102, %v1917_v15   ;;  %v8226_v15 = vld [vmem:[%s12040_s20 + $0x10] ss:$8 sps:$4 sm:$0xff]   ;;  %v8229_v19 = vld [vmem:[%s12040_s20] ss:$8 sps:$4 sm:$0xff]  }
 0x1fb   : > { %8026 = vmatpush3.bf16.msra.mxu0 %v1958_v20 }
 0x1fc   : > { %v1703_v26 = vpop.permute.xlu0 %1702 }
 0x1fd   : > { %v1721_v30 = vsel %vm1718_vm0, %v1695_v63, %v1703_v26 }
 0x1fe   : > { %1933 = vperm.xlu1 %8102, %v1919_v21   ;;  %v1724_v33 = vsel %vm1722_vm1, %v1721_v30, %v1705_v32 }
 0x202   : > { %1938 = vperm.xlu1 %8102, %v1920_v22  }
 0x244   : > { %v1898_v35 = vpop.permute.xlu0 %1897 }
 0x251   : > { %v1929_v45 = vpop.permute.xlu0 %1928 }
 0x264   : > { %v1900_v29 = vpop.permute.xlu1 %1899 }
 0x265   : > { %v1908_v31 = vsel %vm1903_vm4, %v1734_v28, %v1900_v29 }
 0x266   : > { %8027 = vmatprep.subr.bf16.mxu0 %v1908_v31 }
 0x267   : > { %8028 = vmatpush3.bf16.msra.mxu0 %v1908_v31 }
 0x268   : > { %v1708_v34 = vpop.permute.xlu1 %1707 }
 0x269   : > { %v1727_v36 = vsel %vm1725_vm2, %v1724_v33, %v1708_v34 }
 0x26a   : > { %v1905_v37 = vsel %vm1903_vm4, %v1727_v36, %v1898_v35 }
 0x26b   : > { %8029 = vmatprep.subr.bf16.mxu0 %v1905_v37 }
 0x26c   : > { %8030 = vmatpush3.bf16.msra.mxu0 %v1905_v37 }
 0x26d   : > { %2173 = vmatprep.subr.bf16.mxu0 %v8222_v16 }
 0x26f   : > { %8032 = vmatmul.mubr.msk.bf16.vlgmr.msra.gmra.mxu0 %vm1951_vm3, %v8219_v38 }
 0x270   : > { %2197 = vmatprep.mubr.bf16.mxu0 %v12066_v3  ;;  %2174 = vmatpush1.bf16.msra.mxu0 %v9524_v18 }
 0x271   : > { %2175 = vmatprep.subr.bf16.mxu0 %v9531_v7 }
 0x274   : > { %2176 = vmatpush1.bf16.msra.mxu0 %v9536_v9 }
 0x275   : > { %v1924_v39 = vpop.permute.xlu1 %1923  ;;  %2177 = vmatprep.subr.bf16.mxu0 %v8228_v13 }
 0x278   : > { %2178 = vmatpush1.bf16.msra.mxu0 %v8226_v15 }
 0x279   : > { %v1934_v42 = vpop.permute.xlu1 %1933  ;;  %2179 = vmatprep.subr.bf16.mxu0 %v8231_v17 }
 0x27c   : > { %2180 = vmatpush1.bf16.msra.mxu0 %v8229_v19 }
 0x27d   : > { %v1939_v52 = vpop.permute.xlu1 %1938  ;;  %2272 = vmatprep.subr.bf16.mxu0 %v8222_v16 }
 0x32f   : > { %v8033_v40 = vpop.f32.mrf.mxu0 }
 0x330   : > { %v2003_v50 = vadd.f32 %v8033_v40, %v1934_v42 }
 0x331   : > { %v1994_v41 = vpop.f32.mrf.mxu0 }
 0x332   : > { %v1995_v43 = vadd.f32 %v1994_v41, %v1924_v39 }
 0x333   : > { %v8034_v44 = vpop.f32.mrf.mxu0 }
 0x334   : > { %2017 = vadd.xlane.f32.xlu0 %v1995_v43  ;;  %v2006_v53 = vadd.f32 %v8034_v44, %v1939_v52 }
 0x335   : > { %v1997_v46 = vpop.f32.mrf.mxu0 }
 0x336   : > { %v1998_v51 = vadd.f32 %v1997_v46, %v1929_v45 }
 0x338   : > { %2019 = vadd.xlane.f32.xlu1 %v1998_v51  ;;  %2021 = vadd.xlane.f32.xlu0 %v2003_v50 }
 0x33c   : > { %2023 = vadd.xlane.f32.xlu0 %v2006_v53 }
 0x349   : > { %2063 = vperm.xlu1 %8102, %v2009_v54  }
 0x3bd   : > { %v2018_v55 = vpop.xlane.xlu0 %2017 }
 0x3be   : > { %v2025_v57 = vmul.f32 0.0078125, %v2018_v55 }
 0x3c0   : > { %v9500_v48 = vsub.f32 %v1995_v43, %v2025_v57 }
 0x3c1   : > { %v2022_v56 = vpop.xlane.xlu0 %2021  ;;  %v2020_v59 = vpop.xlane.xlu1 %2019 }
 0x3c2   : > { %v2027_v58 = vmul.f32 0.0078125, %v2022_v56  ;;  %v2026_v62 = vmul.f32 0.0078125, %v2020_v59  ;;  %v2033_v47 = vmul.f32 %v9500_v48, %v9500_v48 }
 0x3c4   : > { %v9496_v60 = vsub.f32 %v2003_v50, %v2027_v58  ;;  %v9508_v4 = vsub.f32 %v1998_v51, %v2026_v62 }
 0x3c5   : > { %v2024_v61 = vpop.xlane.xlu0 %2023  ;;  %v2064_v20 = vpop.permute.xlu1 %2063 }
 0x3c6   : > { %v2028_v63 = vmul.f32 0.0078125, %v2024_v61  ;;  %v2035_v49 = vmul.f32 %v9496_v60, %v9496_v60  ;;  %v2034_v6 = vmul.f32 %v9508_v4, %v9508_v4 }
 0x3c8   : > { %2041 = vadd.xlane.f32.xlu1 %v2035_v49  ;;  %v9502_v0 = vsub.f32 %v2006_v53, %v2028_v63 }
 0x3ca   : > { %v2036_v2 = vmul.f32 %v9502_v0, %v9502_v0 }
 0x3cc   : > { %2037 = vadd.xlane.f32.xlu1 %v2033_v47  ;;  %2043 = vadd.xlane.f32.xlu0 %v2036_v2 }
 0x3d0   : > { %2039 = vadd.xlane.f32.xlu0 %v2034_v6 }
 0x3dd   : > { %2087 = vperm.xlu1 %8102, %v2013_v8  }
 0x3e1   : > { %2092 = vperm.xlu1 %8102, %v2014_v10  }
 0x3e5   : > { %2078 = vperm.xlu1 %8102, %v2012_v12  }
 0x3e6   : > { %2068 = vperm.xlu0 %8103, %v2010_v14  }
 0x3e9   : > { %2102 = vperm.xlu1 %8102, %v2016_v1  }
 0x3ea   : > { %2073 = vperm.xlu0 %8103, %v2011_v5  }
 0x3ee   : > { %2097 = vperm.xlu0 %8103, %v2015_v11  }
 0x451   : > { %v2042_v21 = vpop.xlane.xlu1 %2041 }
 0x452   : > { %v2047_v22 = vmul.f32 0.0078125, %v2042_v21 }
 0x454   : > { %v2051_v23 = vadd.f32 1e-05, %v2047_v22 }
 0x455   : > { %v2038_v24 = vpop.xlane.xlu1 %2037  ;;  %v2044_v25 = vpop.xlane.xlu0 %2043 }
 0x456   : > { %v2045_v26 = vmul.f32 0.0078125, %v2038_v24  ;;  %v2048_v27 = vmul.f32 0.0078125, %v2044_v25  ;;  %8604 = vrsqrt.f32 %v2051_v23 }
 0x458   : > { %v2049_v28 = vadd.f32 1e-05, %v2045_v26  ;;  %v2052_v29 = vadd.f32 1e-05, %v2048_v27 }
 0x459   : > { %v2040_v30 = vpop.xlane.xlu0 %2039  ;;  %v2088_v31 = vpop.permute.xlu1 %2087 }
 0x45a   : > { %8606 = vrsqrt.f32 %v2049_v28  ;;  %v2046_v32 = vmul.f32 0.0078125, %v2040_v30 }
 0x45b   : > { %8608 = vrsqrt.f32 %v2052_v29 }
 0x45c   : > { %v2050_v33 = vadd.f32 1e-05, %v2046_v32 }
 0x45d   : > { %v2093_v34 = vpop.permute.xlu1 %2092 }
 0x45e   : > { %8610 = vrsqrt.f32 %v2050_v33 }
 0x461   : > { %v2069_v35 = vpop.permute.xlu0 %2068  ;;  %v2079_v38 = vpop.permute.xlu1 %2078 }
 0x463   : > { %v8605_v36 = vpop.eup %8604 }
 0x464   : > { %v2059_v40 = vmul.f32 %v8605_v36, %v9496_v60 }
 0x465   : > { %v2074_v37 = vpop.permute.xlu0 %2073  ;;  %v2103_v53 = vpop.permute.xlu1 %2102 }
 0x466   : > { %v2083_v50 = vmul.f32 %v2074_v37, %v2059_v40 }
 0x467   : > { %v8607_v39 = vpop.eup %8606 }
 0x468   : > { %v8609_v41 = vpop.eup %8608  ;;  %v2057_v42 = vmul.f32 %v8607_v39, %v9500_v48 }
 0x469   : > { %v2060_v43 = vmul.f32 %v8609_v41, %v9502_v0  ;;  %v2098_v44 = vpop.permute.xlu0 %2097 }
 0x46a   : > { %v2081_v51 = vmul.f32 %v2064_v20, %v2057_v42  ;;  %v2107_v55 = vadd.f32 %v2098_v44, %v2083_v50 }
 0x46b   : > { %v8611_v45 = vpop.eup %8610  ;;  %v2084_v46 = vmul.f32 %v2079_v38, %v2060_v43 }
 0x46c   : > { %v2058_v52 = vmul.f32 %v8611_v45, %v9508_v4  ;;  %v2105_v58 = vadd.f32 %v2088_v31, %v2081_v51 }
 0x46d   : > { %v2108_v54 = vadd.f32 %v2103_v53, %v2084_v46 }
 0x46e   : > { %v2082_v56 = vmul.f32 %v2069_v35, %v2058_v52 }
 0x46f   : > { %v2110_v57 = vpack.c.bf16 %v2108_v54, %v2107_v55 }
 0x470   : > { %v2106_v59 = vadd.f32 %v2093_v34, %v2082_v56 }
 0x471   : > { %2256 = vrot.lane.b32.xlu1 %v2110_v57, %s12058_s24 }
 0x472   : > { %v2109_v60 = vpack.c.bf16 %v2106_v59, %v2105_v58  ;;  %v8234_v58 = vld [vmem:[%s9245_s3 + $0x4] ss:$12 sps:$4 sm:$0xff]  }
 0x473   : > { %3035 = vmatprep.mubr.bf16.mxu1 %v8234_v58 }
 0x474   : > { %2254 = vrot.lane.b32.xlu0 %v2109_v60, %s12058_s24  ;;  %7481 = vmatmul.mubr.msk.bf16.vlgmr.msra.gmra.mxu0 %vm1903_vm4, %v2109_v60 }
 0x475   : > { %2207 = vmatprep.mubr.bf16.mxu0 %v12066_v3  ;;  %2273 = vmatpush1.bf16.msra.mxu0 %v9524_v18 }
 0x476   : > { %2274 = vmatprep.subr.bf16.mxu0 %v9531_v7 }
 0x479   : > { %2275 = vmatpush1.bf16.msra.mxu0 %v9536_v9 }
 0x47a   : > { %2276 = vmatprep.subr.bf16.mxu0 %v8228_v13 }
 0x47c   : > { %7482 = vmatmul.mubr.msk.bf16.gmra.mxu0 %vm1903_vm4, %v2110_v57 }
 0x47d   : > { %2277 = vmatpush1.bf16.msra.mxu0 %v8226_v15  ;;  %2296 = vmatprep.mubr.bf16.mxu0 %v12066_v3 }
 0x47e   : > { %2278 = vmatprep.subr.bf16.mxu0 %v8231_v17 }
 0x481   : > { %2279 = vmatpush1.bf16.msra.mxu0 %v8229_v19 }
 0x4e3   : > { %v2257_v62 = vpop.permute.xlu1 %2256 }
 0x4e6   : > { %v2255_v61 = vpop.permute.xlu0 %2254 }
 0x4e7   : > { %7483 = vmatmul.mubr.msk.bf16.vlgmr.msra.gmra.mxu0 %vm1903_vm4, %v2255_v61 }
 0x4e8   : > { %2306 = vmatprep.mubr.bf16.mxu0 %v12066_v3 }
 0x4ef   : > { %7484 = vmatmul.mubr.msk.bf16.gmra.mxu0 %vm1903_vm4, %v2257_v62  ;;  %v8235_v62 = vld [vmem:[%s9245_s3 + $0x8] ss:$12 sps:$4 sm:$0xff]  }
 0x4f0   : > { %8039 = vmatprep.mubr.msk.bf16.mxu0 %vm2954_vm5, %v8235_v62 }
 0x534   : > { %v2199_v63 = vpop.f32.mrf.mxu0 }
 0x536   : > { %v9568_v49 = vpop.f32.mrf.mxu0 }
 0x538   : > { %v2203_v48 = vpop.f32.mrf.mxu0 }
 0x539   : > { %v9600_v11 = vpack.c.bf16 %v2203_v48, %v2199_v63 }
 0x53a   : > { %v9570_v0 = vpop.f32.mrf.mxu0 }
 0x53c   : > { %v2209_v47 = vpop.f32.mrf.mxu0 }
 0x53e   : > { %v9572_v2 = vpop.f32.mrf.mxu0 }
 0x540   : > { %v2213_v4 = vpop.f32.mrf.mxu0 }
 0x541   : > { %v9594_v9 = vpack.c.bf16 %v2213_v4, %v2209_v47 }
 0x542   : > { %v9574_v6 = vpop.f32.mrf.mxu0 }
 0x5a7   : > { %v2298_v8 = vpop.f32.mrf.mxu0 }
 0x5a9   : > { %v9576_v10 = vpop.f32.mrf.mxu0 }
 0x5ab   : > { %v2302_v12 = vpop.f32.mrf.mxu0 }
 0x5ac   : > { %v2317_v7 = vpack.c.bf16 %v2302_v12, %v2298_v8 }
 0x5ad   : > { %v9578_v14 = vpop.f32.mrf.mxu0 }
 0x5ae   : > { %v2318_v8 = vpack.c.bf16 %v9578_v14, %v9576_v10 }
 0x5af   : > { %v2308_v16 = vpop.f32.mrf.mxu0 }
 0x5b1   : > { %v2310_v18 = vpop.f32.mrf.mxu0 }
 0x5b3   : > { %v2312_v1 = vpop.f32.mrf.mxu0 }
 0x5b4   : > { %v2319_v5 = vpack.c.bf16 %v2312_v1, %v2308_v16 }
 0x5b5   : > { %v2314_v13 = vpop.f32.mrf.mxu0 }
 0x5b6   : > { %2333 = vrot.lane.b32.xlu1 %v2319_v5, %s12056_s27  ;;  %2349 = vrot.lane.b32.xlu0 %v2319_v5, %s12082_s5  ;;  %v2320_v15 = vpack.c.bf16 %v2314_v13, %v2310_v18 }
 0x5ba   : > { %2331 = vrot.lane.b32.xlu1 %v2317_v7, %s12056_s27  ;;  %2347 = vrot.lane.b32.xlu0 %v2317_v7, %s12082_s5 }
 0x5be   : > { %2329 = vrot.lane.b32.xlu1 %v2319_v5, %s12054_s7  ;;  %2345 = vrot.lane.b32.xlu0 %v2319_v5, %s12062_s29 }
 0x5c2   : > { %2327 = vrot.lane.b32.xlu1 %v2317_v7, %s12054_s7  ;;  %2343 = vrot.lane.b32.xlu0 %v2317_v7, %s12062_s29 }
 0x5c6   : > { %2325 = vrot.lane.b32.xlu1 %v2319_v5, %s12064_s28  ;;  %2341 = vrot.lane.b32.xlu0 %v2319_v5, %s12060_s0 }
 0x5ca   : > { %2323 = vrot.lane.b32.xlu1 %v2317_v7, %s12064_s28  ;;  %2339 = vrot.lane.b32.xlu0 %v2317_v7, %s12060_s0 }
 0x5ce   : > { %2335 = vrot.lane.b32.xlu1 %v2317_v7, %s12058_s24  ;;  %2337 = vrot.lane.b32.xlu0 %v2319_v5, %s12058_s24 }
 0x5d2   : > { %2250 = vrot.lane.b32.xlu0 %v9594_v9, %s12082_s5 }
 0x5d6   : > { %2234 = vrot.lane.b32.xlu0 %v9594_v9, %s12056_s27 }
 0x5da   : > { %2248 = vrot.lane.b32.xlu0 %v9600_v11, %s12082_s5 }
 0x5de   : > { %2232 = vrot.lane.b32.xlu0 %v9600_v11, %s12056_s27 }
 0x5e2   : > { %2246 = vrot.lane.b32.xlu0 %v9594_v9, %s12062_s29 }
 0x5e6   : > { %2230 = vrot.lane.b32.xlu0 %v9594_v9, %s12054_s7 }
 0x5ea   : > { %2244 = vrot.lane.b32.xlu0 %v9600_v11, %s12062_s29  ;;  %s12258_s29 = smov 80  }
 0x5ee   : > { %2228 = vrot.lane.b32.xlu0 %v9600_v11, %s12054_s7  ;;  %s12158_s7 = sld [smem:[#allocation54_spill]] }
 0x5f2   : > { %2242 = vrot.lane.b32.xlu0 %v9594_v9, %s12060_s0 }
 0x5f4   : > { %s9633_s27 = scalar_lea.vmem %s12158_s7, %s9625_s1 }
 0x5f5   : > { %v2536_v17 = vld [vmem:[%s9633_s27 + $0x70] sm:$0xff]  ;;  %v2534_v19 = vld [vmem:[%s9633_s27 + $0x60] sm:$0xff]  ;;  %v2537_v18 = vld [vmem:[%s9633_s27 + $0x78] sm:$0xff] }
 0x5f6   : > { %2226 = vrot.lane.b32.xlu0 %v9594_v9, %s12064_s28  ;;  %v2532_v20 = vld [vmem:[%s9633_s27 + $0x50] sm:$0xff]  ;;  %v2530_v21 = vld [vmem:[%s9633_s27 + $0x40] sm:$0xff]  ;;  %v2535_v7 = vld [vmem:[%s9633_s27 + $0x68] sm:$0xff] }
 0x5f7   : > { %v2528_v22 = vld [vmem:[%s9633_s27 + $0x30] sm:$0xff]  ;;  %v2526_v23 = vld [vmem:[%s9633_s27 + $0x20] sm:$0xff]  ;;  %v2533_v14 = vld [vmem:[%s9633_s27 + $0x58] sm:$0xff] }
 0x5f8   : > { %v2524_v24 = vld [vmem:[%s9633_s27 + $0x10] sm:$0xff]  ;;  %v2522_v25 = vld [vmem:[%s9633_s27] sm:$0xff] }
 0x5f9   : > { %v2552_v28 = vld [vmem:[%s9633_s27 + $0xf0] sm:$0xff]  ;;  %v2550_v31 = vld [vmem:[%s9633_s27 + $0xe0] sm:$0xff] }
 0x5fa   : > { %2240 = vrot.lane.b32.xlu0 %v9600_v11, %s12060_s0  ;;  %v2548_v34 = vld [vmem:[%s9633_s27 + $0xd0] sm:$0xff]  ;;  %v2546_v36 = vld [vmem:[%s9633_s27 + $0xc0] sm:$0xff] }
 0x5fb   : > { %v2544_v39 = vld [vmem:[%s9633_s27 + $0xb0] sm:$0xff]  ;;  %v2542_v41 = vld [vmem:[%s9633_s27 + $0xa0] sm:$0xff] }
 0x5fc   : > { %v2540_v43 = vld [vmem:[%s9633_s27 + $0x90] sm:$0xff]  ;;  %v2538_v45 = vld [vmem:[%s9633_s27 + $0x80] sm:$0xff] }
 0x5fe   : > { %2224 = vrot.lane.b32.xlu0 %v9600_v11, %s12064_s28  ;;  %s9681_s28 = scalar_lea.vmem %s12160_s8, %s9625_s1  ;;  %s12260_s8 = smov 16  }
 0x5ff   : > { %v3372_v52 = vld [vmem:[%s9681_s28 + $0x78] sm:$0xff]  ;;  %v3369_v55 = vld [vmem:[%s9681_s28 + $0x60] sm:$0xff]  ;;  %v3367_v61 = vld [vmem:[%s9681_s28 + $0x50] sm:$0xff] }
 0x600   : > { %v3365_v12 = vld [vmem:[%s9681_s28 + $0x40] sm:$0xff]  ;;  %v3363_v13 = vld [vmem:[%s9681_s28 + $0x30] sm:$0xff] }
 0x601   : > { %v3371_v62 = vld [vmem:[%s9681_s28 + $0x70] sm:$0xff] }
 0x602   : > { %2238 = vrot.lane.b32.xlu0 %v9594_v9, %s12058_s24 }
 0x606   : > { %2236 = vrot.lane.b32.xlu0 %v9600_v11, %s12058_s24  ;;  %s9671_s24 = scalar_lea.vmem %s12159_s26, %s9625_s1  ;;  %s10704_s26 = scalar_lea.vmem %s12030_s10, %s9458_s25 }
 0x607   : > { %v3340_v50 = vld [vmem:[%s9671_s24 + $0x78] sm:$0xff]  ;;  %v3335_v57 = vld [vmem:[%s9671_s24 + $0x50] sm:$0xff]  ;;  %v3333_v48 = vld [vmem:[%s9671_s24 + $0x40] sm:$0xff] }
 0x608   : > { %v3331_v1 = vld [vmem:[%s9671_s24 + $0x30] sm:$0xff] }
 0x60a   : > { %2383 = vrot.lane.b32.xlu0 %v2320_v15, %s12082_s5  ;;  %v3329_v15 = vld [vmem:[%s9671_s24 + $0x20] sm:$0xff] }
 0x60e   : > { %2626 = vperm.xlu0 %8103, %v2536_v17  }
 0x612   : > { %2616 = vperm.xlu0 %8103, %v2534_v19   ;;  %v2531_v19 = vld [vmem:[%s9633_s27 + $0x48] sm:$0xff] }
 0x616   : > { %2606 = vperm.xlu0 %8103, %v2532_v20   ;;  %v3361_v20 = vld [vmem:[%s9681_s28 + $0x20] sm:$0xff] }
 0x61a   : > { %2596 = vperm.xlu0 %8103, %v2530_v21  }
 0x61e   : > { %2586 = vperm.xlu0 %8103, %v2528_v22   ;;  %v2529_v22 = vld [vmem:[%s9633_s27 + $0x38] sm:$0xff] }
 0x622   : > { %2576 = vperm.xlu0 %8103, %v2526_v23   ;;  %v3327_v23 = vld [vmem:[%s9671_s24 + $0x10] sm:$0xff] }
 0x626   : > { %2566 = vperm.xlu0 %8103, %v2524_v24  }
 0x628   : > { %v2334_v26 = vpop.permute.xlu1 %2333  ;;  %v9644_v27 = vpop.permute.xlu0 %2349 }
 0x62a   : > { %2556 = vperm.xlu0 %8103, %v2522_v25   ;;  %v2527_v25 = vld [vmem:[%s9633_s27 + $0x28] sm:$0xff] }
 0x62c   : > { %v2332_v29 = vpop.permute.xlu1 %2331  ;;  %v9647_v30 = vpop.permute.xlu0 %2347 }
 0x62d   : > { %2377 = vrot.lane.b32.xlu1 %v9647_v30, %s12082_s5 }
 0x62e   : > { %2706 = vperm.xlu0 %8103, %v2552_v28   ;;  %v3359_v28 = vld [vmem:[%s9681_s28 + $0x10] sm:$0xff] }
 0x630   : > { %v2346_v32 = vpop.permute.xlu0 %2345  ;;  %v2330_v33 = vpop.permute.xlu1 %2329 }
 0x631   : > { %2361 = vrot.lane.b32.xlu1 %v2332_v29, %s12082_s5 }
 0x632   : > { %2696 = vperm.xlu0 %8103, %v2550_v31  }
 0x634   : > { %v2344_v35 = vpop.permute.xlu0 %2343  ;;  %v2328_v37 = vpop.permute.xlu1 %2327 }
 0x635   : > { %2373 = vrot.lane.b32.xlu1 %v2344_v35, %s12082_s5  ;;  %v3355_v35 = vld [vmem:[%s9671_s24 + $0xf0] sm:$0xff] }
 0x636   : > { %2686 = vperm.xlu0 %8103, %v2548_v34   ;;  %v2553_v34 = vld [vmem:[%s9633_s27 + $0xf8] sm:$0xff] }
 0x638   : > { %v2342_v38 = vpop.permute.xlu0 %2341  ;;  %v2326_v54 = vpop.permute.xlu1 %2325 }
 0x639   : > { %2357 = vrot.lane.b32.xlu1 %v2328_v37, %s12082_s5  ;;  %v3387_v37 = vld [vmem:[%s9681_s28 + $0xf0] sm:$0xff] }
 0x63a   : > { %2676 = vperm.xlu0 %8103, %v2546_v36   ;;  %v2551_v36 = vld [vmem:[%s9633_s27 + $0xe8] sm:$0xff] }
 0x63c   : > { %v2340_v40 = vpop.permute.xlu0 %2339  ;;  %v2324_v59 = vpop.permute.xlu1 %2323 }
 0x63d   : > { %2369 = vrot.lane.b32.xlu1 %v2340_v40, %s12082_s5  ;;  %v2547_v40 = vld [vmem:[%s9633_s27 + $0xc8] sm:$0xff] }
 0x63e   : > { %2666 = vperm.xlu0 %8103, %v2544_v39   ;;  %v3353_v39 = vld [vmem:[%s9671_s24 + $0xe0] sm:$0xff] }
 0x640   : > { %v2338_v42 = vpop.permute.xlu0 %2337  ;;  %v2336_v47 = vpop.permute.xlu1 %2335 }
 0x641   : > { %2379 = vrot.lane.b32.xlu1 %v9644_v27, %s12082_s5 }
 0x642   : > { %2656 = vperm.xlu0 %8103, %v2542_v41   ;;  %v3385_v41 = vld [vmem:[%s9681_s28 + $0xe0] sm:$0xff] }
 0x644   : > { %v9663_v44 = vpop.permute.xlu0 %2250 }
 0x645   : > { %2363 = vrot.lane.b32.xlu1 %v2334_v26, %s12082_s5  ;;  %v2221_v26 = vpack.c.bf16 %v9574_v6, %v9572_v2  ;;  %v2523_v2 = vld [vmem:[%s9633_s27 + $0x8] sm:$0xff]  ;;  %v3357_v6 = vld [vmem:[%s9681_s28] sm:$0xff] }
 0x646   : > { %2646 = vperm.xlu0 %8103, %v2540_v43   ;;  %v3351_v43 = vld [vmem:[%s9671_s24 + $0xd0] sm:$0xff] }
 0x648   : > { %v9673_v46 = vpop.permute.xlu0 %2234 }
 0x649   : > { %2375 = vrot.lane.b32.xlu1 %v2346_v32, %s12082_s5  ;;  %v2525_v32 = vld [vmem:[%s9633_s27 + $0x18] sm:$0xff] }
 0x64a   : > { %2636 = vperm.xlu0 %8103, %v2538_v45   ;;  %v2543_v45 = vld [vmem:[%s9633_s27 + $0xa8] sm:$0xff] }
 0x64c   : > { %v9683_v51 = vpop.permute.xlu0 %2248 }
 0x64d   : > { %2359 = vrot.lane.b32.xlu1 %v2330_v33, %s12082_s5  ;;  %v3325_v33 = vld [vmem:[%s9671_s24] sm:$0xff] }
 0x64e   : > { %3882 = vperm.xlu0 %8103, %v3340_v50   ;;  %v3383_v50 = vld [vmem:[%s9681_s28 + $0xd0] sm:$0xff] }
 0x650   : > { %v9687_v53 = vpop.permute.xlu0 %2232 }
 0x651   : > { %2371 = vrot.lane.b32.xlu1 %v2342_v38, %s12082_s5  ;;  %v2549_v38 = vld [vmem:[%s9633_s27 + $0xd8] sm:$0xff] }
 0x652   : > { %4074 = vperm.xlu0 %8103, %v3372_v52   ;;  %v2541_v52 = vld [vmem:[%s9633_s27 + $0x98] sm:$0xff] }
 0x654   : > { %v9691_v56 = vpop.permute.xlu0 %2246 }
 0x655   : > { %2355 = vrot.lane.b32.xlu1 %v2326_v54, %s12082_s5 }
 0x656   : > { %4059 = vperm.xlu0 %8103, %v3369_v55   ;;  %v3349_v55 = vld [vmem:[%s9671_s24 + $0xc0] sm:$0xff] }
 0x658   : > { %v9696_v60 = vpop.permute.xlu0 %2230 }
 0x659   : > { %2353 = vrot.lane.b32.xlu1 %v2324_v59, %s12082_s5  ;;  %v3339_v59 = vld [vmem:[%s9671_s24 + $0x70] sm:$0xff] }
 0x65a   : > { %3857 = vperm.xlu0 %8103, %v3335_v57   ;;  %v2539_v57 = vld [vmem:[%s9633_s27 + $0x88] sm:$0xff] }
 0x65c   : > { %v9701_v63 = vpop.permute.xlu0 %2244 }
 0x65d   : > { %2367 = vrot.lane.b32.xlu1 %v2338_v42, %s12082_s5  ;;  %v2545_v42 = vld [vmem:[%s9633_s27 + $0xb8] sm:$0xff]  ;;  %s12256_s27 = smov 48  }
 0x65e   : > { %4049 = vperm.xlu0 %8103, %v3367_v61  }
 0x660   : > { %v9706_v4 = vpop.permute.xlu0 %2228 }
 0x661   : > { %2365 = vrot.lane.b32.xlu1 %v2336_v47, %s12082_s5  ;;  %v3337_v47 = vld [vmem:[%s9671_s24 + $0x60] sm:$0xff] }
 0x662   : > { %3847 = vperm.xlu0 %8103, %v3333_v48  }
 0x664   : > { %v9712_v16 = vpop.permute.xlu0 %2242 }
 0x665   : > { %2381 = vrot.lane.b32.xlu1 %v2318_v8, %s12082_s5 }
 0x666   : > { %4039 = vperm.xlu0 %8103, %v3365_v12   ;;  %v3338_v12 = vld [vmem:[%s9671_s24 + $0x68] sm:$0xff] }
 0x668   : > { %v9717_v5 = vpop.permute.xlu0 %2226 }
 0x669   : > { %2631 = vperm.xlu1 %8102, %v2537_v18  }
 0x66a   : > { %3837 = vperm.xlu0 %8103, %v3331_v1  }
 0x66c   : > { %v9721_v10 = vpop.permute.xlu0 %2240 }
 0x66d   : > { %2621 = vperm.xlu1 %8102, %v2535_v7   ;;  %v3370_v7 = vld [vmem:[%s9681_s28 + $0x68] sm:$0xff] }
 0x66e   : > { %4029 = vperm.xlu0 %8103, %v3363_v13  }
 0x670   : > { %v9725_v17 = vpop.permute.xlu0 %2224 }
 0x671   : > { %2611 = vperm.xlu1 %8102, %v2533_v14  }
 0x672   : > { %3827 = vperm.xlu0 %8103, %v3329_v15  }
 0x674   : > { %v9729_v21 = vpop.permute.xlu0 %2238 }
 0x675   : > { %2601 = vperm.xlu1 %8102, %v2531_v19   ;;  %v3336_v19 = vld [vmem:[%s9671_s24 + $0x58] sm:$0xff] }
 0x676   : > { %4019 = vperm.xlu0 %8103, %v3361_v20  }
 0x678   : > { %v9733_v24 = vpop.permute.xlu0 %2236 }
 0x679   : > { %2591 = vperm.xlu1 %8102, %v2529_v22  }
 0x67a   : > { %3817 = vperm.xlu0 %8103, %v3327_v23  }
 0x67c   : > { %v2384_v29 = vpop.permute.xlu0 %2383 }
 0x67d   : > { %2581 = vperm.xlu1 %8102, %v2527_v25   ;;  %v2456_v31 = vsel %vm2385_vm6, %v2221_v26, %v2384_v29 }
 0x67e   : > { %4009 = vperm.xlu0 %8103, %v3359_v28   ;;  %8035 = vmatprep.subr.bf16.mxu0 %v2456_v31 }
 0x67f   : > { %8036 = vmatpush3.bf16.msra.mxu0 %v2456_v31 }
 0x681   : > { %2571 = vperm.xlu1 %8102, %v2525_v32  }
 0x682   : > { %3807 = vperm.xlu0 %8103, %v3325_v33   ;;  %v3364_v33 = vld [vmem:[%s9681_s28 + $0x38] sm:$0xff] }
 0x685   : > { %2561 = vperm.xlu1 %8102, %v2523_v2  }
 0x686   : > { %3999 = vperm.xlu0 %8103, %v3357_v6   ;;  %v3330_v6 = vld [vmem:[%s9671_s24 + $0x28] sm:$0xff] }
 0x689   : > { %2711 = vperm.xlu1 %8102, %v2553_v34  }
 0x68a   : > { %3957 = vperm.xlu0 %8103, %v3355_v35   ;;  %v8232_v35 = vld [vmem:[%s9245_s3] ss:$12 sps:$4 sm:$0xff]  }
 0x68d   : > { %2701 = vperm.xlu1 %8102, %v2551_v36   ;;  %v2219_v36 = vpack.c.bf16 %v9570_v0, %v9568_v49  ;;  %v8243_v49 = vld [vmem:[%s9245_s3 + $0x38] ss:$12 sps:$4 sm:$0xff]  }
 0x68e   : > { %4149 = vperm.xlu0 %8103, %v3387_v37   ;;  %v8239_v0 = vld [vmem:[%s9245_s3 + $0x18] ss:$12 sps:$4 sm:$0xff]  }
 0x691   : > { %2691 = vperm.xlu1 %8102, %v2549_v38   ;;  %v3328_v38 = vld [vmem:[%s9671_s24 + $0x18] sm:$0xff] }
 0x692   : > { %3947 = vperm.xlu0 %8103, %v3353_v39   ;;  %v8240_v39 = vld [vmem:[%s9245_s3 + $0x34] ss:$12 sps:$4 sm:$0xff]  }
 0x695   : > { %2681 = vperm.xlu1 %8102, %v2547_v40   ;;  %v3326_v40 = vld [vmem:[%s9671_s24 + $0x8] sm:$0xff] }
 0x696   : > { %4139 = vperm.xlu0 %8103, %v3385_v41   ;;  %v8244_v41 = vld [vmem:[%s9245_s3 + $0x50] ss:$12 sps:$4 sm:$0xff]  }
 0x699   : > { %2671 = vperm.xlu1 %8102, %v2545_v42   ;;  %v8251_v42 = vld [vmem:[%s9245_s3 + $0x68] ss:$12 sps:$4 sm:$0xff]  }
 0x69a   : > { %3937 = vperm.xlu0 %8103, %v3351_v43   ;;  %v8242_v43 = vld [vmem:[%s9245_s3 + $0x30] ss:$12 sps:$4 sm:$0xff]  }
 0x69d   : > { %2661 = vperm.xlu1 %8102, %v2543_v45   ;;  %v3358_v45 = vld [vmem:[%s9681_s28 + $0x8] sm:$0xff] }
 0x69e   : > { %4129 = vperm.xlu0 %8103, %v3383_v50   ;;  %v8245_v50 = vld [vmem:[%s9245_s3 + $0x4c] ss:$12 sps:$4 sm:$0xff]  }
 0x69f   : > { %v2378_v54 = vpop.permute.xlu1 %2377 }
 0x6a0   : > { %v2444_v15 = vsel %vm2385_vm6, %v9683_v51, %v2378_v54  ;;  %v8252_v54 = vld [vmem:[%s9245_s3 + $0x80] ss:$12 sps:$4 sm:$0xff]  }
 0x6a1   : > { %2651 = vperm.xlu1 %8102, %v2541_v52   ;;  %v3356_v52 = vld [vmem:[%s9671_s24 + $0xf8] sm:$0xff] }
 0x6a2   : > { %3927 = vperm.xlu0 %8103, %v3349_v55   ;;  %v8259_v55 = vld [vmem:[%s9245_s3 + $0x98] ss:$12 sps:$4 sm:$0xff]  }
 0x6a3   : > { %v2362_v58 = vpop.permute.xlu1 %2361 }
 0x6a5   : > { %2641 = vperm.xlu1 %8102, %v2539_v57   ;;  %v8247_v57 = vld [vmem:[%s9245_s3 + $0x48] ss:$12 sps:$4 sm:$0xff]  }
 0x6a7   : > { %v2374_v61 = vpop.permute.xlu1 %2373 }
 0x6a8   : > { %v2436_v51 = vsel %vm2385_vm6, %v9701_v63, %v2374_v61  ;;  %v3354_v61 = vld [vmem:[%s9671_s24 + $0xe8] sm:$0xff] }
 0x6a9   : > { %3877 = vperm.xlu1 %8102, %v3339_v59   ;;  %v8248_v59 = vld [vmem:[%s9245_s3 + $0x64] ss:$12 sps:$4 sm:$0xff]  }
 0x6ab   : > { %v2358_v48 = vpop.permute.xlu1 %2357 }
 0x6ad   : > { %4069 = vperm.xlu1 %8102, %v3371_v62   ;;  %v8260_v62 = vld [vmem:[%s9245_s3 + $0xb0] ss:$12 sps:$4 sm:$0xff]  }
 0x6af   : > { %v2370_v8 = vpop.permute.xlu1 %2369 }
 0x6b0   : > { %v2428_v63 = vsel %vm2385_vm6, %v9721_v10, %v2370_v8  ;;  %v2392_v10 = vsel %vm2385_vm6, %v9594_v9, %v9644_v27  ;;  %v3362_v9 = vld [vmem:[%s9681_s28 + $0x28] sm:$0xff] }
 0x6b1   : > { %3867 = vperm.xlu1 %8102, %v3337_v47   ;;  %v8237_v27 = vld [vmem:[%s9245_s3 + $0x1c] ss:$12 sps:$4 sm:$0xff]   ;;  %v8250_v47 = vld [vmem:[%s9245_s3 + $0x60] ss:$12 sps:$4 sm:$0xff]  }
 0x6b2   : > { %v3386_v8 = vld [vmem:[%s9681_s28 + $0xe8] sm:$0xff] }
 0x6b3   : > { %v2380_v18 = vpop.permute.xlu1 %2379 }
 0x6b4   : > { %v2448_v1 = vsel %vm2385_vm6, %v9663_v44, %v2380_v18  ;;  %v2412_v44 = vsel %vm2385_vm6, %v9687_v53, %v2362_v58  ;;  %v3334_v53 = vld [vmem:[%s9671_s24 + $0x48] sm:$0xff]  ;;  %v3388_v58 = vld [vmem:[%s9681_s28 + $0xf8] sm:$0xff] }
 0x6b5   : > { %3872 = vperm.xlu1 %8102, %v3338_v12   ;;  %7833 = vmatprep.subr.bf16.mxu1 %v2448_v1  ;;  %v8253_v12 = vld [vmem:[%s9245_s3 + $0x7c] ss:$12 sps:$4 sm:$0xff]   ;;  %v8268_v1 = vld [vmem:[%s9245_s3 + $0xe0] ss:$12 sps:$4 sm:$0xff]  }
 0x6b6   : > { %v3352_v18 = vld [vmem:[%s9671_s24 + $0xd8] sm:$0xff] }
 0x6b7   : > { %v2364_v13 = vpop.permute.xlu1 %2363 }
 0x6b8   : > { %v2416_v14 = vsel %vm2385_vm6, %v9673_v46, %v2364_v13  ;;  %v3368_v46 = vld [vmem:[%s9681_s28 + $0x58] sm:$0xff] }
 0x6b9   : > { %4064 = vperm.xlu1 %8102, %v3370_v7   ;;  %7834 = vmatpush3.bf16.msra.mxu1 %v2416_v14  ;;  %v8275_v7 = vld [vmem:[%s9245_s3 + $0xf8] ss:$12 sps:$4 sm:$0xff]  }
 0x6ba   : > { %7835 = vmatprep.subr.bf16.mxu1 %v2444_v15  ;;  %v8255_v13 = vld [vmem:[%s9245_s3 + $0x78] ss:$12 sps:$4 sm:$0xff]   ;;  %v8256_v15 = vld [vmem:[%s9245_s3 + $0x94] ss:$12 sps:$4 sm:$0xff]  }
 0x6bb   : > { %v2376_v20 = vpop.permute.xlu1 %2375  ;;  %v3384_v14 = vld [vmem:[%s9681_s28 + $0xd8] sm:$0xff] }
 0x6bc   : > { %v2440_v22 = vsel %vm2385_vm6, %v9691_v56, %v2376_v20  ;;  %v2404_v56 = vsel %vm2385_vm6, %v9706_v4, %v2358_v48  ;;  %v3332_v4 = vld [vmem:[%s9671_s24 + $0x38] sm:$0xff]  ;;  %v8267_v48 = vld [vmem:[%s9245_s3 + $0xc8] ss:$12 sps:$4 sm:$0xff]  }
 0x6bd   : > { %3862 = vperm.xlu1 %8102, %v3336_v19   ;;  %7836 = vmatpush3.bf16.msra.mxu1 %v2412_v44  ;;  %v3350_v19 = vld [vmem:[%s9671_s24 + $0xc8] sm:$0xff]  ;;  %v8276_v20 = vld [vmem:[%s9245_s3 + $0x110] ss:$12 sps:$4 sm:$0xff]  }
 0x6be   : > { %7837 = vmatprep.subr.bf16.mxu1 %v2440_v22  ;;  %v8283_v44 = vld [vmem:[%s9245_s3 + $0x128] ss:$12 sps:$4 sm:$0xff]   ;;  %v8258_v22 = vld [vmem:[%s9245_s3 + $0x90] ss:$12 sps:$4 sm:$0xff]  }
 0x6bf   : > { %v2360_v23 = vpop.permute.xlu1 %2359 }
 0x6c0   : > { %v2408_v25 = vsel %vm2385_vm6, %v9696_v60, %v2360_v23  ;;  %v3366_v60 = vld [vmem:[%s9681_s28 + $0x48] sm:$0xff] }
 0x6c1   : > { %4054 = vperm.xlu1 %8102, %v3368_v46   ;;  %7838 = vmatpush3.bf16.msra.mxu1 %v2408_v25  ;;  %v8261_v46 = vld [vmem:[%s9245_s3 + $0xac] ss:$12 sps:$4 sm:$0xff]  }
 0x6c2   : > { %7839 = vmatprep.subr.bf16.mxu1 %v2436_v51  ;;  %v8284_v23 = vld [vmem:[%s9245_s3 + $0x140] ss:$12 sps:$4 sm:$0xff]   ;;  %v8288_v25 = vld [vmem:[%s9245_s3 + $0x158] ss:$12 sps:$4 sm:$0xff]   ;;  %v8263_v51 = vld [vmem:[%s9245_s3 + $0xa8] ss:$12 sps:$4 sm:$0xff]  }
 0x6c3   : > { %v2372_v26 = vpop.permute.xlu1 %2371 }
 0x6c4   : > { %v2432_v28 = vsel %vm2385_vm6, %v9712_v16, %v2372_v26  ;;  %v8289_v26 = vld [vmem:[%s9245_s3 + $0x170] ss:$12 sps:$4 sm:$0xff]  }
 0x6c5   : > { %3852 = vperm.xlu1 %8102, %v3334_v53   ;;  %7840 = vmatpush3.bf16.msra.mxu1 %v2404_v56  ;;  %v8264_v53 = vld [vmem:[%s9245_s3 + $0xc4] ss:$12 sps:$4 sm:$0xff]   ;;  %v8266_v56 = vld [vmem:[%s9245_s3 + $0xc0] ss:$12 sps:$4 sm:$0xff]  }
 0x6c6   : > { %7841 = vmatprep.subr.bf16.mxu1 %v2432_v28  ;;  %v8269_v28 = vld [vmem:[%s9245_s3 + $0xdc] ss:$12 sps:$4 sm:$0xff]  }
 0x6c7   : > { %v2356_v29 = vpop.permute.xlu1 %2355 }
 0x6c8   : > { %v2400_v31 = vsel %vm2385_vm6, %v9717_v5, %v2356_v29  ;;  %v8272_v29 = vld [vmem:[%s9245_s3 + $0xf4] ss:$12 sps:$4 sm:$0xff]  }
 0x6c9   : > { %4044 = vperm.xlu1 %8102, %v3366_v60   ;;  %7842 = vmatpush3.bf16.msra.mxu1 %v2400_v31  ;;  %v8271_v60 = vld [vmem:[%s9245_s3 + $0xd8] ss:$12 sps:$4 sm:$0xff]   ;;  %v8274_v31 = vld [vmem:[%s9245_s3 + $0xf0] ss:$12 sps:$4 sm:$0xff]  }
 0x6ca   : > { %7843 = vmatprep.subr.bf16.mxu1 %v2428_v63  ;;  %v8277_v63 = vld [vmem:[%s9245_s3 + $0x10c] ss:$12 sps:$4 sm:$0xff]  }
 0x6cb   : > { %v2354_v32 = vpop.permute.xlu1 %2353 }
 0x6cc   : > { %v2396_v16 = vsel %vm2385_vm6, %v9725_v17, %v2354_v32  ;;  %v8280_v32 = vld [vmem:[%s9245_s3 + $0x124] ss:$12 sps:$4 sm:$0xff]  }
 0x6cd   : > { %3842 = vperm.xlu1 %8102, %v3332_v4   ;;  %7844 = vmatpush3.bf16.msra.mxu1 %v2396_v16  ;;  %v8279_v4 = vld [vmem:[%s9245_s3 + $0x108] ss:$12 sps:$4 sm:$0xff]   ;;  %v8282_v16 = vld [vmem:[%s9245_s3 + $0x120] ss:$12 sps:$4 sm:$0xff]  }
 0x6cf   : > { %v2368_v2 = vpop.permute.xlu1 %2367 }
 0x6d0   : > { %v2424_v5 = vsel %vm2385_vm6, %v9729_v21, %v2368_v2  ;;  %v2388_v21 = vsel %vm2385_vm6, %v9600_v11, %v9647_v30  ;;  %v8236_v11 = vld [vmem:[%s9245_s3 + $0x20] ss:$12 sps:$4 sm:$0xff]   ;;  %v3360_v30 = vld [vmem:[%s9681_s28 + $0x18] sm:$0xff] }
 0x6d1   : > { %4034 = vperm.xlu1 %8102, %v3364_v33   ;;  %7845 = vmatprep.subr.bf16.mxu1 %v2424_v5  ;;  %v8285_v33 = vld [vmem:[%s9245_s3 + $0x13c] ss:$12 sps:$4 sm:$0xff]   ;;  %v8287_v2 = vld [vmem:[%s9245_s3 + $0x138] ss:$12 sps:$4 sm:$0xff]   ;;  %v8290_v5 = vld [vmem:[%s9245_s3 + $0x154] ss:$12 sps:$4 sm:$0xff]  }
 0x6d2   : > { %7846 = vmatpush3.bf16.msra.mxu1 %v2392_v10  ;;  %v8292_v10 = vld [vmem:[%s9245_s3 + $0x150] ss:$12 sps:$4 sm:$0xff]  }
 0x6d3   : > { %v2366_v17 = vpop.permute.xlu1 %2365 }
 0x6d4   : > { %v2420_v34 = vsel %vm2385_vm6, %v9733_v24, %v2366_v17  ;;  %v8295_v17 = vld [vmem:[%s9245_s3 + $0x168] ss:$12 sps:$4 sm:$0xff]  }
 0x6d5   : > { %3832 = vperm.xlu1 %8102, %v3330_v6   ;;  %7847 = vmatprep.subr.bf16.mxu1 %v2420_v34  ;;  %v8293_v6 = vld [vmem:[%s9245_s3 + $0x16c] ss:$12 sps:$4 sm:$0xff]   ;;  %s12254_s3 = smov 112  }
 0x6d6   : > { %7848 = vmatpush3.bf16.msra.mxu1 %v2388_v21 }
 0x6d7   : > { %v2382_v37 = vpop.permute.xlu1 %2381 }
 0x6d8   : > { %v2452_v24 = vsel %vm2385_vm6, %v2219_v36, %v2382_v37  ;;  %v9888_v36 = vpop.permute.xlu0 %2626 }
 0x6d9   : > { %4024 = vperm.xlu1 %8102, %v3362_v9   ;;  %3036 = vmatmul.mubr.bf16.vlgmr.msra.gmra.mxu1 %v8232_v35 }
 0x6da   : > { %8037 = vmatprep.subr.bf16.mxu0 %v2452_v24  ;;  %3043 = vmatprep.mubr.bf16.mxu1 %v8237_v27 }
 0x6db   : > { %8038 = vmatpush3.bf16.msra.mxu0 %v2452_v24 }
 0x6dc   : > { %4589 = vmatprep.subr.bf16.mxu0 %v12066_v3  ;;  %v9892_v27 = vpop.permute.xlu0 %2616 }
 0x6dd   : > { %3822 = vperm.xlu1 %8102, %v3328_v38  }
 0x6de   : > { %8040 = vmatmul.mubr.msk.bf16.vlgmr.msra.gmra.mxu0 %vm2954_vm5, %v8236_v11 }
 0x6df   : > { %8043 = vmatprep.mubr.msk.bf16.mxu0 %vm2954_vm5, %v8243_v49 }
 0x6e0   : > { %v9896_v24 = vpop.permute.xlu0 %2606 }
 0x6e1   : > { %4014 = vperm.xlu1 %8102, %v3360_v30   ;;  %3044 = vmatmul.mubr.bf16.gmra.mxu1 %v8239_v0 }
 0x6e2   : > { %3051 = vmatprep.mubr.bf16.mxu1 %v8240_v39 }
 0x6e4   : > { %v9882_v34 = vpop.permute.xlu1 %2631  ;;  %v9900_v11 = vpop.permute.xlu0 %2596 }
 0x6e5   : > { %3812 = vperm.xlu1 %8102, %v3326_v40  }
 0x6e6   : > { %8044 = vmatmul.mubr.msk.bf16.gmra.mxu0 %vm2954_vm5, %v8244_v41 }
 0x6e7   : > { %8047 = vmatprep.mubr.msk.bf16.mxu0 %vm2954_vm5, %v8251_v42 }
 0x6e8   : > { %v9884_v21 = vpop.permute.xlu1 %2621  ;;  %v9902_v0 = vpop.permute.xlu0 %2586 }
 0x6e9   : > { %4004 = vperm.xlu1 %8102, %v3358_v45   ;;  %3052 = vmatmul.mubr.bf16.gmra.mxu1 %v8242_v43 }
 0x6ea   : > { %3059 = vmatprep.mubr.bf16.mxu1 %v8245_v50 }
 0x6ec   : > { %v9886_v35 = vpop.permute.xlu1 %2611  ;;  %v2577_v39 = vpop.permute.xlu0 %2576 }
 0x6ed   : > { %3962 = vperm.xlu1 %8102, %v3356_v52  }
 0x6ee   : > { %8048 = vmatmul.mubr.msk.bf16.gmra.mxu0 %vm2954_vm5, %v8252_v54 }
 0x6ef   : > { %8051 = vmatprep.mubr.msk.bf16.mxu0 %vm2954_vm5, %v8259_v55 }
 0x6f0   : > { %v9890_v9 = vpop.permute.xlu1 %2601  ;;  %v2567_v41 = vpop.permute.xlu0 %2566 }
 0x6f1   : > { %4154 = vperm.xlu1 %8102, %v3388_v58   ;;  %3060 = vmatmul.mubr.bf16.gmra.mxu1 %v8247_v57 }
 0x6f2   : > { %3067 = vmatprep.mubr.bf16.mxu1 %v8248_v59 }
 0x6f4   : > { %v9894_v37 = vpop.permute.xlu1 %2591  ;;  %v2557_v43 = vpop.permute.xlu0 %2556 }
 0x6f5   : > { %3952 = vperm.xlu1 %8102, %v3354_v61  }
 0x6f6   : > { %8052 = vmatmul.mubr.msk.bf16.gmra.mxu0 %vm2954_vm5, %v8260_v62 }
 0x6f7   : > { %8055 = vmatprep.mubr.msk.bf16.mxu0 %vm2954_vm5, %v8267_v48 }
 0x6f8   : > { %v9898_v38 = vpop.permute.xlu1 %2581  ;;  %v9910_v50 = vpop.permute.xlu0 %2706 }
 0x6f9   : > { %4144 = vperm.xlu1 %8102, %v3386_v8   ;;  %3068 = vmatmul.mubr.bf16.gmra.mxu1 %v8250_v47 }
 0x6fa   : > { %3075 = vmatprep.mubr.bf16.mxu1 %v8253_v12 }
 0x6fc   : > { %v2572_v49 = vpop.permute.xlu1 %2571  ;;  %v9914_v54 = vpop.permute.xlu0 %2696 }
 0x6fd   : > { %3942 = vperm.xlu1 %8102, %v3352_v18  }
 0x6fe   : > { %8056 = vmatmul.mubr.msk.bf16.gmra.mxu0 %vm2954_vm5, %v8268_v1 }
 0x6ff   : > { %8059 = vmatprep.mubr.msk.bf16.mxu0 %vm2954_vm5, %v8275_v7 }
 0x700   : > { %v2562_v30 = vpop.permute.xlu1 %2561  ;;  %v9918_v59 = vpop.permute.xlu0 %2686 }
 0x701   : > { %4134 = vperm.xlu1 %8102, %v3384_v14   ;;  %3076 = vmatmul.mubr.bf16.gmra.mxu1 %v8255_v13 }
 0x702   : > { %3083 = vmatprep.mubr.bf16.mxu1 %v8256_v15 }
 0x704   : > { %v9904_v40 = vpop.permute.xlu1 %2711  ;;  %v9924_v14 = vpop.permute.xlu0 %2676 }
 0x705   : > { %3932 = vperm.xlu1 %8102, %v3350_v19  }
 0x706   : > { %8060 = vmatmul.mubr.msk.bf16.gmra.mxu0 %vm2954_vm5, %v8276_v20 }
 0x707   : > { %8063 = vmatprep.mubr.msk.bf16.mxu0 %vm2954_vm5, %v8283_v44 }
 0x708   : > { %v9906_v42 = vpop.permute.xlu1 %2701 }
 0x709   : > { %3084 = vmatmul.mubr.bf16.gmra.mxu1 %v8258_v22 }
 0x70a   : > { %3091 = vmatprep.mubr.bf16.mxu1 %v8261_v46 }
 0x70c   : > { %v9908_v45 = vpop.permute.xlu1 %2691 }
 0x70e   : > { %8064 = vmatmul.mubr.msk.bf16.gmra.mxu0 %vm2954_vm5, %v8284_v23 }
 0x70f   : > { %8067 = vmatprep.mubr.msk.bf16.mxu0 %vm2954_vm5, %v8288_v25 }
 0x710   : > { %v9912_v52 = vpop.permute.xlu1 %2681 }
 0x711   : > { %3092 = vmatmul.mubr.bf16.gmra.mxu1 %v8263_v51 }
 0x712   : > { %3099 = vmatprep.mubr.bf16.mxu1 %v8264_v53 }
 0x714   : > { %v9916_v57 = vpop.permute.xlu1 %2671 }
 0x716   : > { %8068 = vmatmul.mubr.msk.bf16.gmra.mxu0 %vm2954_vm5, %v8289_v26 }
 0x718   : > { %v9920_v12 = vpop.permute.xlu1 %2661 }
 0x719   : > { %3100 = vmatmul.mubr.bf16.gmra.mxu1 %v8266_v56 }
 0x71a   : > { %3107 = vmatprep.mubr.bf16.mxu1 %v8269_v28 }
 0x71c   : > { %v9930_v51 = vpop.permute.xlu1 %2651 }
 0x721   : > { %3108 = vmatmul.mubr.bf16.gmra.mxu1 %v8271_v60  ;;  %v9934_v60 = vpop.permute.xlu0 %2666 }
 0x722   : > { %3115 = vmatprep.mubr.bf16.mxu1 %v8272_v29 }
 0x729   : > { %3116 = vmatmul.mubr.bf16.gmra.mxu1 %v8274_v31 }
 0x72a   : > { %3123 = vmatprep.mubr.bf16.mxu1 %v8277_v63 }
 0x731   : > { %3124 = vmatmul.mubr.bf16.gmra.mxu1 %v8279_v4 }
 0x732   : > { %3131 = vmatprep.mubr.bf16.mxu1 %v8280_v32 }
 0x739   : > { %3132 = vmatmul.mubr.bf16.gmra.mxu1 %v8282_v16 }
 0x73a   : > { %3139 = vmatprep.mubr.bf16.mxu1 %v8285_v33 }
 0x741   : > { %3140 = vmatmul.mubr.bf16.gmra.mxu1 %v8287_v2  ;;  %v9940_v2 = vpop.permute.xlu1 %2641 }
 0x742   : > { %3147 = vmatprep.mubr.bf16.mxu1 %v8290_v5 }
 0x749   : > { %3148 = vmatmul.mubr.bf16.gmra.mxu1 %v8292_v10 }
 0x74a   : > { %3155 = vmatprep.mubr.bf16.mxu1 %v8293_v6 }
 0x751   : > { %3156 = vmatmul.mubr.bf16.gmra.mxu1 %v8295_v17 }
 0x799   : > { %v7849_v55 = vpop.f32.mrf.mxu1 }
 0x79b   : > { %v7850_v58 = vpop.f32.mrf.mxu1 }
 0x79c   : > { %v7851_v61 = vadd.f32 %v7850_v58, %v7849_v55 }
 0x79d   : > { %v7852_v62 = vpop.f32.mrf.mxu1 }
 0x79e   : > { %v8041_v48 = vpop.f32.mrf.mxu0  ;;  %v3038_v47 = vadd.f32 %v7851_v61, %v2557_v43 }
 0x79f   : > { %v7853_v8 = vpop.f32.mrf.mxu1 }
 0x7a0   : > { %v7854_v18 = vadd.f32 %v7853_v8, %v7852_v62  ;;  %v3198_v1 = vpop.f32.mrf.mxu0 }
 0x7a1   : > { %v9922_v7 = vadd.f32 %v3198_v1, %v3038_v47  ;;  %v7855_v13 = vpop.f32.mrf.mxu1 }
 0x7a2   : > { %v3041_v15 = vadd.f32 %v7854_v18, %v2562_v30  ;;  %v8042_v19 = vpop.f32.mrf.mxu0  ;;  %v9944_v30 = vpop.permute.xlu0 %2656 }
 0x7a3   : > { %v7856_v20 = vpop.f32.mrf.mxu1  ;;  %v3389_v44 = vsel %vm2954_vm5, %v9922_v7, 0.0 }
 0x7a4   : > { %v7857_v22 = vadd.f32 %v7856_v20, %v7855_v13  ;;  %v3201_v46 = vpop.f32.mrf.mxu0  ;;  %3390 = vadd.xlane.f32.xlu1 %v3389_v44 }
 0x7a5   : > { %v9928_v23 = vadd.f32 %v3201_v46, %v3041_v15  ;;  %v7858_v25 = vpop.f32.mrf.mxu1 }
 0x7a6   : > { %v3046_v53 = vadd.f32 %v7857_v22, %v2567_v41  ;;  %v8045_v26 = vpop.f32.mrf.mxu0 }
 0x7a7   : > { %v7859_v56 = vpop.f32.mrf.mxu1  ;;  %v3392_v28 = vsel %vm2954_vm5, %v9928_v23, 0.0 }
 0x7a8   : > { %v7860_v29 = vadd.f32 %v7859_v56, %v7858_v25  ;;  %3393 = vadd.xlane.f32.xlu0 %v3392_v28  ;;  %v9936_v31 = vadd.f32 %v8041_v48, %v3046_v53  ;;  %v3214_v4 = vpop.f32.mrf.mxu0  ;;  %v9950_v48 = vpop.permute.xlu1 %3877 }
 0x7a9   : > { %v7861_v63 = vpop.f32.mrf.mxu1 }
 0x7aa   : > { %v3049_v32 = vadd.f32 %v7860_v29, %v2572_v49  ;;  %v3395_v16 = vsel %vm2954_vm5, %v9936_v31, 0.0  ;;  %v8046_v17 = vpop.f32.mrf.mxu0 }
 0x7ab   : > { %v7862_v33 = vpop.f32.mrf.mxu1  ;;  %3396 = vadd.xlane.f32.xlu1 %v3395_v16 }
 0x7ac   : > { %v7863_v5 = vadd.f32 %v7862_v33, %v7861_v63  ;;  %v9942_v10 = vadd.f32 %v8042_v19, %v3049_v32  ;;  %v3217_v62 = vpop.f32.mrf.mxu0 }
 0x7ad   : > { %v7864_v6 = vpop.f32.mrf.mxu1 }
 0x7ae   : > { %v3054_v41 = vadd.f32 %v7863_v5, %v2577_v39  ;;  %v3398_v43 = vsel %vm2954_vm5, %v9942_v10, 0.0  ;;  %v9955_v39 = vpop.permute.xlu0 %2646  ;;  %v8049_v19 = vpop.f32.mrf.mxu0 }
 0x7af   : > { %v7865_v55 = vpop.f32.mrf.mxu1  ;;  %3399 = vadd.xlane.f32.xlu0 %v3398_v43 }
 0x7b0   : > { %v7866_v49 = vadd.f32 %v7865_v55, %v7864_v6  ;;  %v9948_v58 = vadd.f32 %v3214_v4, %v3054_v41  ;;  %v3230_v56 = vpop.f32.mrf.mxu0 }
 0x7b1   : > { %v7867_v61 = vpop.f32.mrf.mxu1 }
 0x7b2   : > { %v3057_v47 = vadd.f32 %v7866_v49, %v9898_v38  ;;  %v3401_v8 = vsel %vm2954_vm5, %v9948_v58, 0.0  ;;  %v9962_v38 = vpop.permute.xlu1 %4069  ;;  %v9966_v28 = vpop.permute.xlu0 %2636 }
 0x7b3   : > { %v7868_v18 = vpop.f32.mrf.mxu1  ;;  %3402 = vadd.xlane.f32.xlu1 %v3401_v8  ;;  %v8050_v33 = vpop.f32.mrf.mxu0 }
 0x7b4   : > { %v7869_v1 = vadd.f32 %v7868_v18, %v7867_v61  ;;  %v9957_v13 = vadd.f32 %v3217_v62, %v3057_v47 }
 0x7b5   : > { %v7870_v15 = vpop.f32.mrf.mxu1  ;;  %v3233_v61 = vpop.f32.mrf.mxu0 }
 0x7b6   : > { %v3062_v20 = vadd.f32 %v7869_v1, %v9902_v0  ;;  %v3404_v44 = vsel %vm2954_vm5, %v9957_v13, 0.0  ;;  %v9973_v5 = vpop.permute.xlu1 %3867 }
 0x7b7   : > { %v7871_v22 = vpop.f32.mrf.mxu1  ;;  %3405 = vadd.xlane.f32.xlu0 %v3404_v44 }
 0x7b8   : > { %v7872_v46 = vadd.f32 %v7871_v22, %v7870_v15  ;;  %v9964_v25 = vadd.f32 %v8045_v26, %v3062_v20  ;;  %v8053_v15 = vpop.f32.mrf.mxu0 }
 0x7b9   : > { %v7873_v53 = vpop.f32.mrf.mxu1 }
 0x7ba   : > { %v3065_v29 = vadd.f32 %v7872_v46, %v9894_v37  ;;  %v3407_v63 = vsel %vm2954_vm5, %v9964_v25, 0.0  ;;  %v9978_v37 = vpop.permute.xlu0 %3882 }
 0x7bb   : > { %v7874_v0 = vpop.f32.mrf.mxu1  ;;  %3408 = vadd.xlane.f32.xlu1 %v3407_v63 }
 0x7bc   : > { %v7875_v4 = vadd.f32 %v7874_v0, %v7873_v53  ;;  %v9971_v32 = vadd.f32 %v8046_v17, %v3065_v29  ;;  %v3246_v29 = vpop.f32.mrf.mxu0 }
 0x7bd   : > { %v7876_v16 = vpop.f32.mrf.mxu1 }
 0x7be   : > { %v3070_v26 = vadd.f32 %v7875_v4, %v9900_v11  ;;  %v3410_v6 = vsel %vm2954_vm5, %v9971_v32, 0.0  ;;  %v9985_v11 = vpop.permute.xlu1 %3872  ;;  %v9989_v20 = vpop.permute.xlu0 %4074 }
 0x7bf   : > { %v7877_v41 = vpop.f32.mrf.mxu1  ;;  %3411 = vadd.xlane.f32.xlu0 %v3410_v6 }
 0x7c0   : > { %v7878_v43 = vadd.f32 %v7877_v41, %v7876_v16  ;;  %v9980_v55 = vadd.f32 %v3230_v56, %v3070_v26 }
 0x7c1   : > { %v7879_v49 = vpop.f32.mrf.mxu1 }
 0x7c2   : > { %v3073_v17 = vadd.f32 %v7878_v43, %v9890_v9  ;;  %v3413_v62 = vsel %vm2954_vm5, %v9980_v55, 0.0  ;;  %v9996_v63 = vpop.permute.xlu1 %4064  ;;  %v8054_v43 = vpop.f32.mrf.mxu0 }
 0x7c3   : > { %v7880_v47 = vpop.f32.mrf.mxu1  ;;  %3414 = vadd.xlane.f32.xlu1 %v3413_v62 }
 0x7c4   : > { %v7881_v8 = vadd.f32 %v7880_v47, %v7879_v49  ;;  %v9987_v18 = vadd.f32 %v3233_v61, %v3073_v17 }
 0x7c5   : > { %v7882_v1 = vpop.f32.mrf.mxu1 }
 0x7c6   : > { %v3078_v44 = vadd.f32 %v7881_v8, %v9896_v24  ;;  %v3416_v22 = vsel %vm2954_vm5, %v9987_v18, 0.0  ;;  %v10001_v24 = vpop.permute.xlu0 %4059  ;;  %v3249_v8 = vpop.f32.mrf.mxu0 }
 0x7c7   : > { %v7883_v9 = vpop.f32.mrf.mxu1  ;;  %3417 = vadd.xlane.f32.xlu0 %v3416_v22 }
 0x7c8   : > { %v7884_v46 = vadd.f32 %v7883_v9, %v7882_v1  ;;  %v9994_v53 = vadd.f32 %v8049_v19, %v3078_v44 }
 0x7c9   : > { %v7885_v56 = vpop.f32.mrf.mxu1 }
 0x7ca   : > { %v3081_v0 = vadd.f32 %v7884_v46, %v9886_v35  ;;  %v3419_v4 = vsel %vm2954_vm5, %v9994_v53, 0.0  ;;  %v10008_v35 = vpop.permute.xlu1 %3862  ;;  %v10012_v1 = vpop.permute.xlu0 %3857 }
 0x7cb   : > { %v7886_v16 = vpop.f32.mrf.mxu1  ;;  %3420 = vadd.xlane.f32.xlu1 %v3419_v4 }
 0x7cc   : > { %v7887_v26 = vadd.f32 %v7886_v16, %v7885_v56  ;;  %v10003_v6 = vadd.f32 %v8050_v33, %v3081_v0  ;;  %v8057_v56 = vpop.f32.mrf.mxu0 }
 0x7cd   : > { %v7888_v41 = vpop.f32.mrf.mxu1 }
 0x7ce   : > { %v3086_v19 = vadd.f32 %v7887_v26, %v9892_v27  ;;  %v3422_v49 = vsel %vm2954_vm5, %v10003_v6, 0.0  ;;  %v10019_v0 = vpop.permute.xlu1 %4054 }
 0x7cf   : > { %v7889_v61 = vpop.f32.mrf.mxu1  ;;  %3423 = vadd.xlane.f32.xlu0 %v3422_v49  ;;  %v3262_v49 = vpop.f32.mrf.mxu0 }
 0x7d0   : > { %v7890_v17 = vadd.f32 %v7889_v61, %v7888_v41  ;;  %v10010_v62 = vadd.f32 %v3246_v29, %v3086_v19 }
 0x7d1   : > { %v7891_v47 = vpop.f32.mrf.mxu1 }
 0x7d2   : > { %v3089_v33 = vadd.f32 %v7890_v17, %v9884_v21  ;;  %v3425_v44 = vsel %vm2954_vm5, %v10010_v62, 0.0  ;;  %v10024_v21 = vpop.permute.xlu0 %4049 }
 0x7d3   : > { %v7892_v27 = vpop.f32.mrf.mxu1  ;;  %3426 = vadd.xlane.f32.xlu0 %v3425_v44 }
 0x7d4   : > { %v7893_v22 = vadd.f32 %v7892_v27, %v7891_v47  ;;  %v10017_v9 = vadd.f32 %v3249_v8, %v3089_v33  ;;  %v8058_v27 = vpop.f32.mrf.mxu0 }
 0x7d5   : > { %v7894_v46 = vpop.f32.mrf.mxu1 }
 0x7d6   : > { %v3094_v29 = vadd.f32 %v7893_v22, %v9888_v36  ;;  %v3428_v4 = vsel %vm2954_vm5, %v10017_v9, 0.0  ;;  %v10031_v36 = vpop.permute.xlu1 %3852  ;;  %v10035_v22 = vpop.permute.xlu0 %3847 }
 0x7d7   : > { %v7895_v16 = vpop.f32.mrf.mxu1  ;;  %3429 = vadd.xlane.f32.xlu0 %v3428_v4 }
 0x7d8   : > { %v7896_v26 = vadd.f32 %v7895_v16, %v7894_v46  ;;  %v10026_v41 = vadd.f32 %v8053_v15, %v3094_v29 }
 0x7d9   : > { %v7897_v19 = vpop.f32.mrf.mxu1 }
 0x7da   : > { %v3097_v61 = vadd.f32 %v7896_v26, %v9882_v34  ;;  %v3431_v17 = vsel %vm2954_vm5, %v10026_v41, 0.0  ;;  %v3265_v26 = vpop.f32.mrf.mxu0 }
 0x7db   : > { %v7898_v47 = vpop.f32.mrf.mxu1  ;;  %3432 = vadd.xlane.f32.xlu0 %v3431_v17  ;;  %v10042_v17 = vpop.permute.xlu1 %4044 }
 0x7dc   : > { %v7899_v8 = vadd.f32 %v7898_v47, %v7897_v19  ;;  %v10033_v33 = vadd.f32 %v8054_v43, %v3097_v61  ;;  %12161 = vst [vmem:[#allocation2_spill] sm:$0xff] %v10042_v17 }
 0x7dd   : > { %v7900_v44 = vpop.f32.mrf.mxu1 }
 0x7de   : > { %v3102_v15 = vadd.f32 %v7899_v8, %v9966_v28  ;;  %v3434_v46 = vsel %vm2954_vm5, %v10033_v33, 0.0  ;;  %v10047_v28 = vpop.permute.xlu0 %4039 }
 0x7df   : > { %v7901_v34 = vpop.f32.mrf.mxu1  ;;  %3435 = vadd.xlane.f32.xlu1 %v3434_v46  ;;  %12162 = vst [vmem:[#allocation3_spill] sm:$0xff] %v10047_v28 }
 0x7e0   : > { %v7902_v29 = vadd.f32 %v7901_v34, %v7900_v44  ;;  %v10040_v4 = vadd.f32 %v3262_v49, %v3102_v15  ;;  %v8061_v44 = vpop.f32.mrf.mxu0 }
 0x7e1   : > { %v7903_v16 = vpop.f32.mrf.mxu1 }
 0x7e2   : > { %v3105_v43 = vadd.f32 %v7902_v29, %v9940_v2  ;;  %v3437_v19 = vsel %vm2954_vm5, %v10040_v4, 0.0  ;;  %v10054_v2 = vpop.permute.xlu1 %3842  ;;  %v3278_v17 = vpop.f32.mrf.mxu0 }
 0x7e3   : > { %v7904_v61 = vpop.f32.mrf.mxu1  ;;  %3438 = vadd.xlane.f32.xlu1 %v3437_v19  ;;  %12163 = vst [vmem:[#allocation4_spill] sm:$0xff] %v10054_v2  ;;  %v10058_v28 = vpop.permute.xlu0 %3837 }
 0x7e4   : > { %v7905_v47 = vadd.f32 %v7904_v61, %v7903_v16  ;;  %v10049_v8 = vadd.f32 %v3265_v26, %v3105_v43  ;;  %12164 = vst [vmem:[#allocation5_spill] sm:$0xff] %v10058_v28 }
 0x7e5   : > { %v7906_v46 = vpop.f32.mrf.mxu1 }
 0x7e6   : > { %v3110_v49 = vadd.f32 %v7905_v47, %v9955_v39  ;;  %v3440_v15 = vsel %vm2954_vm5, %v10049_v8, 0.0  ;;  %v10065_v2 = vpop.permute.xlu1 %4034 }
 0x7e7   : > { %v7907_v34 = vpop.f32.mrf.mxu1  ;;  %3441 = vadd.xlane.f32.xlu0 %v3440_v15  ;;  %v8062_v15 = vpop.f32.mrf.mxu0  ;;  %12165 = vst [vmem:[#allocation6_spill] sm:$0xff] %v10065_v2 }
 0x7e8   : > { %v7908_v29 = vadd.f32 %v7907_v34, %v7906_v46  ;;  %v10056_v3 = vadd.f32 %v8057_v56, %v3110_v49 }
 0x7e9   : > { %v7909_v19 = vpop.f32.mrf.mxu1 }
 0x7ea   : > { %v3113_v16 = vadd.f32 %v7908_v29, %v9930_v51  ;;  %v3443_v26 = vsel %vm2954_vm5, %v10056_v3, 0.0  ;;  %v10070_v51 = vpop.permute.xlu0 %4029 }
 0x7eb   : > { %v7910_v39 = vpop.f32.mrf.mxu1  ;;  %3444 = vadd.xlane.f32.xlu1 %v3443_v26  ;;  %12166 = vst [vmem:[#allocation7_spill] sm:$0xff] %v10070_v51 }
 0x7ec   : > { %v7911_v43 = vadd.f32 %v7910_v39, %v7909_v19  ;;  %v10063_v61 = vadd.f32 %v8058_v27, %v3113_v16  ;;  %v3281_v19 = vpop.f32.mrf.mxu0 }
 0x7ed   : > { %v7912_v47 = vpop.f32.mrf.mxu1 }
 0x7ee   : > { %v3118_v56 = vadd.f32 %v7911_v43, %v9944_v30  ;;  %v3446_v46 = vsel %vm2954_vm5, %v10063_v61, 0.0  ;;  %v10077_v30 = vpop.permute.xlu1 %3832  ;;  %v8065_v28 = vpop.f32.mrf.mxu0 }
 0x7ef   : > { %v7913_v49 = vpop.f32.mrf.mxu1  ;;  %3447 = vadd.xlane.f32.xlu0 %v3446_v46  ;;  %12167 = vst [vmem:[#allocation8_spill] sm:$0xff] %v10077_v30  ;;  %v10081_v51 = vpop.permute.xlu0 %3827 }
 0x7f0   : > { %v7914_v34 = vadd.f32 %v7913_v49, %v7912_v47  ;;  %v10072_v29 = vadd.f32 %v3278_v17, %v3118_v56  ;;  %12168 = vst [vmem:[#allocation9_spill] sm:$0xff] %v10081_v51 }
 0x7f1   : > { %v7915_v26 = vpop.f32.mrf.mxu1 }
 0x7f2   : > { %v3121_v27 = vadd.f32 %v7914_v34, %v9920_v12  ;;  %v3449_v16 = vsel %vm2954_vm5, %v10072_v29, 0.0  ;;  %v10088_v30 = vpop.permute.xlu1 %4024 }
 0x7f3   : > { %v7916_v39 = vpop.f32.mrf.mxu1  ;;  %3450 = vadd.xlane.f32.xlu1 %v3449_v16  ;;  %v3294_v16 = vpop.f32.mrf.mxu0  ;;  %12169 = vst [vmem:[#allocation10_spill] sm:$0xff] %v10088_v30 }
 0x7f4   : > { %v7917_v43 = vadd.f32 %v7916_v39, %v7915_v26  ;;  %v10079_v2 = vadd.f32 %v3281_v19, %v3121_v27 }
 0x7f5   : > { %v7918_v46 = vpop.f32.mrf.mxu1 }
 0x7f6   : > { %v3126_v17 = vadd.f32 %v7917_v43, %v9934_v60  ;;  %v3452_v47 = vsel %vm2954_vm5, %v10079_v2, 0.0  ;;  %v10093_v60 = vpop.permute.xlu0 %4019 }
 0x7f7   : > { %v7919_v12 = vpop.f32.mrf.mxu1  ;;  %3453 = vadd.xlane.f32.xlu0 %v3452_v47  ;;  %12170 = vst [vmem:[#allocation11_spill] sm:$0xff] %v10093_v60 }
 0x7f8   : > { %v7920_v56 = vadd.f32 %v7919_v12, %v7918_v46  ;;  %v10086_v49 = vadd.f32 %v8061_v44, %v3126_v17  ;;  %v8066_v46 = vpop.f32.mrf.mxu0 }
 0x7f9   : > { %v7921_v34 = vpop.f32.mrf.mxu1 }
 0x7fa   : > { %v3129_v26 = vadd.f32 %v7920_v56, %v9916_v57  ;;  %v3455_v19 = vsel %vm2954_vm5, %v10086_v49, 0.0  ;;  %v10100_v57 = vpop.permute.xlu1 %3822  ;;  %v3297_v51 = vpop.f32.mrf.mxu0 }
 0x7fb   : > { %v7922_v27 = vpop.f32.mrf.mxu1  ;;  %3456 = vadd.xlane.f32.xlu1 %v3455_v19  ;;  %12171 = vst [vmem:[#allocation12_spill] sm:$0xff] %v10100_v57  ;;  %v10104_v60 = vpop.permute.xlu0 %3817 }
 0x7fc   : > { %v7923_v39 = vadd.f32 %v7922_v27, %v7921_v34  ;;  %v10095_v43 = vadd.f32 %v8062_v15, %v3129_v26  ;;  %12172 = vst [vmem:[#allocation13_spill] sm:$0xff] %v10104_v60 }
 0x7fd   : > { %v7924_v47 = vpop.f32.mrf.mxu1 }
 0x7fe   : > { %v3134_v44 = vadd.f32 %v7923_v39, %v9924_v14  ;;  %v3458_v17 = vsel %vm2954_vm5, %v10095_v43, 0.0 }
 0x7ff   : > { %v7925_v12 = vpop.f32.mrf.mxu1  ;;  %3459 = vadd.xlane.f32.xlu0 %v3458_v17  ;;  %v10111_v17 = vpop.permute.xlu1 %4014 }
 0x800   : > { %v7926_v56 = vadd.f32 %v7925_v12, %v7924_v47  ;;  %v10102_v30 = vadd.f32 %v3294_v16, %v3134_v44  ;;  %12173 = vst [vmem:[#allocation14_spill] sm:$0xff] %v10111_v17  ;;  %v8069_v12 = vpop.f32.mrf.mxu0 }
 0x801   : > { %v7927_v19 = vpop.f32.mrf.mxu1 }
 0x802   : > { %v3137_v15 = vadd.f32 %v7926_v56, %v9912_v52  ;;  %v3461_v34 = vsel %vm2954_vm5, %v10102_v30, 0.0  ;;  %v10116_v52 = vpop.permute.xlu0 %4009 }
 0x803   : > { %v7928_v14 = vpop.f32.mrf.mxu1  ;;  %3462 = vadd.xlane.f32.xlu1 %v3461_v34  ;;  %12174 = vst [vmem:[#allocation15_spill] sm:$0xff] %v10116_v52 }
 0x804   : > { %v7929_v26 = vadd.f32 %v7928_v14, %v7927_v19  ;;  %v10109_v27 = vadd.f32 %v3297_v51, %v3137_v15  ;;  %v3310_v15 = vpop.f32.mrf.mxu0 }
 0x805   : > { %v7930_v39 = vpop.f32.mrf.mxu1 }
 0x806   : > { %v3142_v16 = vadd.f32 %v7929_v26, %v9918_v59  ;;  %v3464_v47 = vsel %vm2954_vm5, %v10109_v27, 0.0  ;;  %v10123_v59 = vpop.permute.xlu1 %3812  ;;  %v10127_v57 = vpop.permute.xlu0 %3807 }
 0x807   : > { %v7931_v44 = vpop.f32.mrf.mxu1  ;;  %3465 = vadd.xlane.f32.xlu0 %v3464_v47  ;;  %12175 = vst [vmem:[#allocation16_spill] sm:$0xff] %v10127_v57 }
 0x808   : > { %v7932_v56 = vadd.f32 %v7931_v44, %v7930_v39  ;;  %v10118_v60 = vadd.f32 %v8065_v28, %v3142_v16 }
 0x809   : > { %v7933_v34 = vpop.f32.mrf.mxu1 }
 0x80a   : > { %v3145_v51 = vadd.f32 %v7932_v56, %v9908_v45  ;;  %v3467_v19 = vsel %vm2954_vm5, %v10118_v60, 0.0  ;;  %v8070_v45 = vpop.f32.mrf.mxu0  ;;  %v10134_v52 = vpop.permute.xlu1 %4004 }
 0x80b   : > { %v7934_v14 = vpop.f32.mrf.mxu1  ;;  %3468 = vadd.xlane.f32.xlu1 %v3467_v19  ;;  %v10141_v57 = vpop.permute.xlu0 %3999 }
 0x80c   : > { %v7935_v26 = vadd.f32 %v7934_v14, %v7933_v34  ;;  %v10125_v17 = vadd.f32 %v8066_v46, %v3145_v51  ;;  %v3313_v51 = vpop.f32.mrf.mxu0  ;;  %12176 = vst [vmem:[#allocation17_spill] sm:$0xff] %v10141_v57 }
 0x80d   : > { %v7936_v47 = vpop.f32.mrf.mxu1 }
 0x80e   : > { %v3150_v28 = vadd.f32 %v7935_v26, %v9914_v54  ;;  %v3470_v39 = vsel %vm2954_vm5, %v10125_v17, 0.0 }
 0x80f   : > { %v7937_v16 = vpop.f32.mrf.mxu1  ;;  %3471 = vadd.xlane.f32.xlu0 %v3470_v39 }
 0x810   : > { %v7938_v44 = vadd.f32 %v7937_v16, %v7936_v47  ;;  %v10132_v56 = vadd.f32 %v3310_v15, %v3150_v28 }
 0x811   : > { %v7939_v19 = vpop.f32.mrf.mxu1 }
 0x812   : > { %v3153_v46 = vadd.f32 %v7938_v44, %v9906_v42  ;;  %v3473_v34 = vsel %vm2954_vm5, %v10132_v56, 0.0  ;;  %v10146_v42 = vpop.permute.xlu1 %3962 }
 0x813   : > { %v7940_v14 = vpop.f32.mrf.mxu1  ;;  %3474 = vadd.xlane.f32.xlu1 %v3473_v34  ;;  %12177 = vst [vmem:[#allocation18_spill] sm:$0xff] %v10146_v42  ;;  %v10153_v34 = vpop.permute.xlu0 %3957 }
 0x814   : > { %v7941_v54 = vadd.f32 %v7940_v14, %v7939_v19  ;;  %v10139_v26 = vadd.f32 %v3313_v51, %v3153_v46  ;;  %12178 = vst [vmem:[#allocation19_spill] sm:$0xff] %v10153_v34 }
 0x815   : > { %v7942_v39 = vpop.f32.mrf.mxu1 }
 0x816   : > { %v3158_v15 = vadd.f32 %v7941_v54, %v9910_v50  ;;  %v3476_v47 = vsel %vm2954_vm5, %v10139_v26, 0.0  ;;  %v10157_v51 = vpop.permute.xlu1 %4154 }
 0x817   : > { %v7943_v28 = vpop.f32.mrf.mxu1  ;;  %3477 = vadd.xlane.f32.xlu0 %v3476_v47  ;;  %12179 = vst [vmem:[#allocation20_spill] sm:$0xff] %v10157_v51  ;;  %v10161_v54 = vpop.permute.xlu0 %4149 }
 0x818   : > { %v7944_v16 = vadd.f32 %v7943_v28, %v7942_v39  ;;  %v10148_v44 = vadd.f32 %v8069_v12, %v3158_v15  ;;  %12180 = vst [vmem:[#allocation21_spill] sm:$0xff] %v10161_v54  ;;  %v3382_v39 = vld [vmem:[%s9681_s28 + $0xc8] sm:$0xff]  ;;  %v3381_v28 = vld [vmem:[%s9681_s28 + $0xc0] sm:$0xff] }
 0x81a   : > { %v3161_v19 = vadd.f32 %v7944_v16, %v9904_v40  ;;  %v3479_v46 = vsel %vm2954_vm5, %v10148_v44, 0.0  ;;  %v10163_v12 = vpop.permute.xlu1 %3952 }
 0x81b   : > { %3480 = vadd.xlane.f32.xlu1 %v3479_v46  ;;  %12181 = vst [vmem:[#allocation22_spill] sm:$0xff] %v10163_v12  ;;  %v10165_v40 = vpop.permute.xlu0 %3947 }
 0x81c   : > { %v10155_v50 = vadd.f32 %v8070_v45, %v3161_v19  ;;  %12182 = vst [vmem:[#allocation23_spill] sm:$0xff] %v10165_v40 }
 0x81e   : > { %v3482_v14 = vsel %vm2954_vm5, %v10155_v50, 0.0  ;;  %v10168_v15 = vpop.permute.xlu1 %4144 }
 0x81f   : > { %3483 = vadd.xlane.f32.xlu0 %v3482_v14  ;;  %12183 = vst [vmem:[#allocation24_spill] sm:$0xff] %v10168_v15  ;;  %v10170_v47 = vpop.permute.xlu0 %4139 }
 0x820   : > { %12184 = vst [vmem:[#allocation25_spill] sm:$0xff] %v10170_v47 }
 0x822   : > { %v10172_v45 = vpop.permute.xlu1 %3942 }
 0x823   : > { %12185 = vst [vmem:[#allocation26_spill] sm:$0xff] %v10172_v45  ;;  %v10175_v16 = vpop.permute.xlu0 %3937 }
 0x824   : > { %12186 = vst [vmem:[#allocation27_spill] sm:$0xff] %v10175_v16 }
 0x826   : > { %v10177_v19 = vpop.permute.xlu1 %4134 }
 0x827   : > { %12187 = vst [vmem:[#allocation28_spill] sm:$0xff] %v10177_v19  ;;  %v10179_v46 = vpop.permute.xlu0 %4129 }
 0x828   : > { %12188 = vst [vmem:[#allocation29_spill] sm:$0xff] %v10179_v46 }
 0x82a   : > { %v10181_v14 = vpop.permute.xlu1 %3932 }
 0x82b   : > { %12189 = vst [vmem:[#allocation30_spill] sm:$0xff] %v10181_v14  ;;  %v10183_v51 = vpop.permute.xlu0 %3927 }
 0x82c   : > { %4124 = vperm.xlu1 %8102, %v3382_v39   ;;  %12190 = vst [vmem:[#allocation31_spill] sm:$0xff] %v10183_v51 }
 0x82e   : > { %v3391_v40 = vpop.xlane.xlu1 %3390 }
 0x82f   : > { %v3485_v54 = vmul.f32 0.03125, %v3391_v40 }
 0x831   : > { %v3394_v15 = vpop.xlane.xlu0 %3393  ;;  %v10186_v47 = vsub.f32 %v9922_v7, %v3485_v54 }
 0x832   : > { %v3486_v12 = vmul.f32 0.03125, %v3394_v15 }
 0x833   : > { %v3549_v40 = vmul.f32 %v10186_v47, %v10186_v47 }
 0x834   : > { %v3397_v39 = vpop.xlane.xlu1 %3396 }
 0x835   : > { %4119 = vperm.xlu0 %8103, %v3381_v28   ;;  %v3487_v45 = vmul.f32 0.03125, %v3397_v39  ;;  %v10189_v28 = vsub.f32 %v9928_v23, %v3486_v12 }
 0x837   : > { %v10192_v46 = vsub.f32 %v9936_v31, %v3487_v45  ;;  %v3550_v54 = vmul.f32 %v10189_v28, %v10189_v28  ;;  %v3581_v31 = vsel %vm2954_vm5, %v3549_v40, 0.0 }
 0x838   : > { %v3400_v42 = vpop.xlane.xlu0 %3399 }
 0x839   : > { %v3488_v19 = vmul.f32 0.03125, %v3400_v42  ;;  %v3551_v45 = vmul.f32 %v10192_v46, %v10192_v46 }
 0x83b   : > { %v10197_v15 = vsub.f32 %v9942_v10, %v3488_v19  ;;  %v3587_v40 = vsel %vm2954_vm5, %v3551_v45, 0.0 }
 0x83c   : > { %v3403_v16 = vpop.xlane.xlu1 %3402 }
 0x83d   : > { %v3489_v14 = vmul.f32 0.03125, %v3403_v16  ;;  %v3552_v19 = vmul.f32 %v10197_v15, %v10197_v15 }
 0x83f   : > { %v10202_v23 = vsub.f32 %v9948_v58, %v3489_v14 }
 0x840   : > { %v3406_v51 = vpop.xlane.xlu0 %3405 }
 0x841   : > { %v3490_v7 = vmul.f32 0.03125, %v3406_v51  ;;  %v3584_v51 = vsel %vm2954_vm5, %v3550_v54, 0.0  ;;  %v3553_v57 = vmul.f32 %v10202_v23, %v10202_v23  ;;  %v3590_v54 = vsel %vm2954_vm5, %v3552_v19, 0.0 }
 0x843   : > { %v10208_v39 = vsub.f32 %v9957_v13, %v3490_v7  ;;  %v3593_v45 = vsel %vm2954_vm5, %v3553_v57, 0.0 }
 0x844   : > { %v3409_v34 = vpop.xlane.xlu1 %3408 }
 0x845   : > { %v3491_v42 = vmul.f32 0.03125, %v3409_v34 }
 0x847   : > { %v10214_v58 = vsub.f32 %v9964_v25, %v3491_v42  ;;  %v3554_v25 = vmul.f32 %v10208_v39, %v10208_v39 }
 0x848   : > { %v3412_v12 = vpop.xlane.xlu0 %3411 }
 0x849   : > { %v3492_v10 = vmul.f32 0.03125, %v3412_v12 }
 0x84b   : > { %v10220_v13 = vsub.f32 %v9971_v32, %v3492_v10  ;;  %v3596_v10 = vsel %vm2954_vm5, %v3554_v25, 0.0 }
 0x84c   : > { %v3415_v16 = vpop.xlane.xlu1 %3414 }
 0x84d   : > { %v3493_v34 = vmul.f32 0.03125, %v3415_v16  ;;  %v3555_v16 = vmul.f32 %v10214_v58, %v10214_v58  ;;  %v3556_v19 = vmul.f32 %v10220_v13, %v10220_v13 }
 0x84f   : > { %v10226_v42 = vsub.f32 %v9980_v55, %v3493_v34  ;;  %v3599_v57 = vsel %vm2954_vm5, %v3555_v16, 0.0 }
 0x850   : > { %3582 = vadd.xlane.f32.xlu1 %v3581_v31  ;;  %v3418_v14 = vpop.xlane.xlu0 %3417 }
 0x851   : > { %v3494_v7 = vmul.f32 0.03125, %v3418_v14  ;;  %v3557_v14 = vmul.f32 %v10226_v42, %v10226_v42 }
 0x853   : > { %v10232_v32 = vsub.f32 %v9987_v18, %v3494_v7  ;;  %v3602_v18 = vsel %vm2954_vm5, %v3556_v19, 0.0  ;;  %v3605_v25 = vsel %vm2954_vm5, %v3557_v14, 0.0 }
 0x854   : > { %v3421_v31 = vpop.xlane.xlu1 %3420  ;;  %3588 = vadd.xlane.f32.xlu1 %v3587_v40  ;;  %3585 = vadd.xlane.f32.xlu0 %v3584_v51 }
 0x855   : > { %v3495_v12 = vmul.f32 0.03125, %v3421_v31  ;;  %v3558_v7 = vmul.f32 %v10232_v32, %v10232_v32 }
 0x857   : > { %v10238_v55 = vsub.f32 %v9994_v53, %v3495_v12 }
 0x858   : > { %3594 = vadd.xlane.f32.xlu1 %v3593_v45  ;;  %3591 = vadd.xlane.f32.xlu0 %v3590_v54  ;;  %v3424_v51 = vpop.xlane.xlu0 %3423 }
 0x859   : > { %v3496_v34 = vmul.f32 0.03125, %v3424_v51  ;;  %v3559_v12 = vmul.f32 %v10238_v55, %v10238_v55  ;;  %v3608_v51 = vsel %vm2954_vm5, %v3558_v7, 0.0 }
 0x85b   : > { %v10247_v54 = vsub.f32 %v10003_v6, %v3496_v34  ;;  %v3611_v6 = vsel %vm2954_vm5, %v3559_v12, 0.0 }
 0x85c   : > { %3600 = vadd.xlane.f32.xlu1 %v3599_v57  ;;  %3597 = vadd.xlane.f32.xlu0 %v3596_v10  ;;  %v3427_v40 = vpop.xlane.xlu0 %3426 }
 0x85d   : > { %v3497_v31 = vmul.f32 0.03125, %v3427_v40 }
 0x85f   : > { %v10250_v53 = vsub.f32 %v10010_v62, %v3497_v31  ;;  %v3560_v62 = vmul.f32 %v10247_v54, %v10247_v54 }
 0x860   : > { %3606 = vadd.xlane.f32.xlu1 %v3605_v25  ;;  %3603 = vadd.xlane.f32.xlu0 %v3602_v18  ;;  %v3430_v45 = vpop.xlane.xlu0 %3429 }
 0x861   : > { %v3498_v16 = vmul.f32 0.03125, %v3430_v45  ;;  %v3561_v19 = vmul.f32 %v10250_v53, %v10250_v53  ;;  %v3614_v40 = vsel %vm2954_vm5, %v3560_v62, 0.0 }
 0x863   : > { %v10257_v10 = vsub.f32 %v10017_v9, %v3498_v16  ;;  %v3617_v9 = vsel %vm2954_vm5, %v3561_v19, 0.0 }
 0x864   : > { %3612 = vadd.xlane.f32.xlu1 %v3611_v6  ;;  %3609 = vadd.xlane.f32.xlu0 %v3608_v51  ;;  %v3433_v34 = vpop.xlane.xlu0 %3432 }
 0x865   : > { %v3499_v57 = vmul.f32 0.03125, %v3433_v34  ;;  %v3562_v31 = vmul.f32 %v10257_v10, %v10257_v10 }
 0x867   : > { %v10265_v14 = vsub.f32 %v10026_v41, %v3499_v57  ;;  %v3620_v41 = vsel %vm2954_vm5, %v3562_v31, 0.0 }
 0x868   : > { %v3436_v18 = vpop.xlane.xlu1 %3435  ;;  %3615 = vadd.xlane.f32.xlu0 %v3614_v40  ;;  %3618 = vadd.xlane.f32.xlu1 %v3617_v9 }
 0x869   : > { %v3500_v7 = vmul.f32 0.03125, %v3436_v18  ;;  %v3563_v25 = vmul.f32 %v10265_v14, %v10265_v14 }
 0x86b   : > { %v10274_v12 = vsub.f32 %v10033_v33, %v3500_v7  ;;  %v3623_v45 = vsel %vm2954_vm5, %v3563_v25, 0.0 }
 0x86c   : > { %v3439_v16 = vpop.xlane.xlu1 %3438  ;;  %3621 = vadd.xlane.f32.xlu0 %v3620_v41  ;;  %3624 = vadd.xlane.f32.xlu1 %v3623_v45 }
 0x86d   : > { %v3501_v51 = vmul.f32 0.03125, %v3439_v16  ;;  %v3564_v6 = vmul.f32 %v10274_v12, %v10274_v12 }
 0x86f   : > { %v10281_v62 = vsub.f32 %v10040_v4, %v3501_v51  ;;  %v3626_v19 = vsel %vm2954_vm5, %v3564_v6, 0.0 }
 0x870   : > { %3627 = vadd.xlane.f32.xlu0 %v3626_v19  ;;  %v3442_v34 = vpop.xlane.xlu0 %3441 }
 0x871   : > { %12191 = vst [vmem:[#allocation32_spill] sm:$0xff] %v10281_v62  ;;  %v3502_v33 = vmul.f32 0.03125, %v3442_v34  ;;  %v3565_v57 = vmul.f32 %v10281_v62, %v10281_v62 }
 0x873   : > { %v10287_v40 = vsub.f32 %v10049_v8, %v3502_v33  ;;  %v3629_v9 = vsel %vm2954_vm5, %v3565_v57, 0.0 }
 0x874   : > { %v3445_v31 = vpop.xlane.xlu1 %3444  ;;  %3630 = vadd.xlane.f32.xlu0 %v3629_v9 }
 0x875   : > { %12192 = vst [vmem:[#allocation33_spill] sm:$0xff] %v10287_v40  ;;  %v3503_v18 = vmul.f32 0.03125, %v3445_v31  ;;  %v3566_v4 = vmul.f32 %v10287_v40, %v10287_v40  ;;  %v3346_v40 = vld [vmem:[%s9671_s24 + $0xa8] sm:$0xff] }
 0x877   : > { %v10293_v7 = vsub.f32 %v10056_v3, %v3503_v18  ;;  %v3632_v25 = vsel %vm2954_vm5, %v3566_v4, 0.0 }
 0x878   : > { %3633 = vadd.xlane.f32.xlu1 %v3632_v25  ;;  %v3448_v41 = vpop.xlane.xlu0 %3447 }
 0x879   : > { %12193 = vst [vmem:[#allocation34_spill] sm:$0xff] %v10293_v7  ;;  %v3504_v45 = vmul.f32 0.03125, %v3448_v41  ;;  %v3567_v8 = vmul.f32 %v10293_v7, %v10293_v7 }
 0x87b   : > { %v10299_v16 = vsub.f32 %v10063_v61, %v3504_v45  ;;  %v3635_v51 = vsel %vm2954_vm5, %v3567_v8, 0.0 }
 0x87c   : > { %v3451_v6 = vpop.xlane.xlu1 %3450  ;;  %3636 = vadd.xlane.f32.xlu0 %v3635_v51 }
 0x87d   : > { %12194 = vst [vmem:[#allocation35_spill] sm:$0xff] %v10299_v16  ;;  %v3505_v19 = vmul.f32 0.03125, %v3451_v6  ;;  %v3568_v3 = vmul.f32 %v10299_v16, %v10299_v16 }
 0x87f   : > { %v10305_v34 = vsub.f32 %v10072_v29, %v3505_v19  ;;  %v3638_v33 = vsel %vm2954_vm5, %v3568_v3, 0.0 }
 0x880   : > { %3639 = vadd.xlane.f32.xlu1 %v3638_v33  ;;  %v3454_v57 = vpop.xlane.xlu0 %3453 }
 0x881   : > { %12195 = vst [vmem:[#allocation36_spill] sm:$0xff] %v10305_v34  ;;  %v3506_v9 = vmul.f32 0.03125, %v3454_v57  ;;  %v3569_v61 = vmul.f32 %v10305_v34, %v10305_v34 }
 0x883   : > { %v10311_v31 = vsub.f32 %v10079_v2, %v3506_v9  ;;  %v3641_v18 = vsel %vm2954_vm5, %v3569_v61, 0.0 }
 0x884   : > { %v3457_v4 = vpop.xlane.xlu1 %3456  ;;  %3642 = vadd.xlane.f32.xlu0 %v3641_v18 }
 0x885   : > { %12196 = vst [vmem:[#allocation37_spill] sm:$0xff] %v10311_v31  ;;  %v3507_v25 = vmul.f32 0.03125, %v3457_v4  ;;  %v3570_v29 = vmul.f32 %v10311_v31, %v10311_v31 }
 0x887   : > { %v10317_v41 = vsub.f32 %v10086_v49, %v3507_v25  ;;  %v3644_v45 = vsel %vm2954_vm5, %v3570_v29, 0.0 }
 0x888   : > { %3645 = vadd.xlane.f32.xlu1 %v3644_v45  ;;  %v3460_v8 = vpop.xlane.xlu0 %3459 }
 0x889   : > { %12197 = vst [vmem:[#allocation38_spill] sm:$0xff] %v10317_v41  ;;  %v3508_v51 = vmul.f32 0.03125, %v3460_v8  ;;  %v3571_v2 = vmul.f32 %v10317_v41, %v10317_v41 }
 0x88b   : > { %v10323_v6 = vsub.f32 %v10095_v43, %v3508_v51  ;;  %v3647_v19 = vsel %vm2954_vm5, %v3571_v2, 0.0 }
 0x88c   : > { %v3463_v3 = vpop.xlane.xlu1 %3462  ;;  %3648 = vadd.xlane.f32.xlu0 %v3647_v19 }
 0x88d   : > { %12198 = vst [vmem:[#allocation39_spill] sm:$0xff] %v10323_v6  ;;  %v3509_v33 = vmul.f32 0.03125, %v3463_v3  ;;  %v3572_v49 = vmul.f32 %v10323_v6, %v10323_v6  ;;  %v3344_v6 = vld [vmem:[%s9671_s24 + $0x98] sm:$0xff] }
 0x88f   : > { %v10329_v57 = vsub.f32 %v10102_v30, %v3509_v33  ;;  %v3650_v9 = vsel %vm2954_vm5, %v3572_v49, 0.0 }
 0x890   : > { %3651 = vadd.xlane.f32.xlu1 %v3650_v9  ;;  %v3466_v61 = vpop.xlane.xlu0 %3465 }
 0x891   : > { %12199 = vst [vmem:[#allocation40_spill] sm:$0xff] %v10329_v57  ;;  %v3510_v18 = vmul.f32 0.03125, %v3466_v61  ;;  %v3573_v43 = vmul.f32 %v10329_v57, %v10329_v57 }
 0x893   : > { %v10335_v4 = vsub.f32 %v10109_v27, %v3510_v18  ;;  %v3653_v25 = vsel %vm2954_vm5, %v3573_v43, 0.0 }
 0x894   : > { %v3469_v29 = vpop.xlane.xlu1 %3468  ;;  %3654 = vadd.xlane.f32.xlu0 %v3653_v25 }
 0x895   : > { %12200 = vst [vmem:[#allocation41_spill] sm:$0xff] %v10335_v4  ;;  %v3511_v45 = vmul.f32 0.03125, %v3469_v29  ;;  %v3574_v30 = vmul.f32 %v10335_v4, %v10335_v4 }
 0x897   : > { %v10341_v8 = vsub.f32 %v10118_v60, %v3511_v45  ;;  %v3656_v51 = vsel %vm2954_vm5, %v3574_v30, 0.0 }
 0x898   : > { %3657 = vadd.xlane.f32.xlu1 %v3656_v51  ;;  %v3472_v2 = vpop.xlane.xlu0 %3471 }
 0x899   : > { %12201 = vst [vmem:[#allocation42_spill] sm:$0xff] %v10341_v8  ;;  %v3512_v19 = vmul.f32 0.03125, %v3472_v2  ;;  %v3575_v27 = vmul.f32 %v10341_v8, %v10341_v8 }
 0x89b   : > { %v10347_v3 = vsub.f32 %v10125_v17, %v3512_v19  ;;  %v3659_v33 = vsel %vm2954_vm5, %v3575_v27, 0.0 }
 0x89c   : > { %v3475_v49 = vpop.xlane.xlu1 %3474  ;;  %3660 = vadd.xlane.f32.xlu0 %v3659_v33  ;;  %v3348_v33 = vld [vmem:[%s9671_s24 + $0xb8] sm:$0xff] }
 0x89d   : > { %12202 = vst [vmem:[#allocation43_spill] sm:$0xff] %v10347_v3  ;;  %v3513_v9 = vmul.f32 0.03125, %v3475_v49  ;;  %v3576_v60 = vmul.f32 %v10347_v3, %v10347_v3  ;;  %v3347_v49 = vld [vmem:[%s9671_s24 + $0xb0] sm:$0xff] }
 0x89f   : > { %v10353_v61 = vsub.f32 %v10132_v56, %v3513_v9  ;;  %v3662_v18 = vsel %vm2954_vm5, %v3576_v60, 0.0  ;;  %v3379_v9 = vld [vmem:[%s9681_s28 + $0xb0] sm:$0xff]  ;;  %v3377_v60 = vld [vmem:[%s9681_s28 + $0xa0] sm:$0xff] }
 0x8a0   : > { %3663 = vadd.xlane.f32.xlu1 %v3662_v18  ;;  %v3478_v43 = vpop.xlane.xlu0 %3477 }
 0x8a1   : > { %12203 = vst [vmem:[#allocation44_spill] sm:$0xff] %v10353_v61  ;;  %v3514_v25 = vmul.f32 0.03125, %v3478_v43  ;;  %v3577_v17 = vmul.f32 %v10353_v61, %v10353_v61  ;;  %v3343_v43 = vld [vmem:[%s9671_s24 + $0x90] sm:$0xff] }
 0x8a3   : > { %v10359_v29 = vsub.f32 %v10139_v26, %v3514_v25  ;;  %v3665_v45 = vsel %vm2954_vm5, %v3577_v17, 0.0  ;;  %v3375_v17 = vld [vmem:[%s9681_s28 + $0x90] sm:$0xff] }
 0x8a4   : > { %v3481_v30 = vpop.xlane.xlu1 %3480  ;;  %3666 = vadd.xlane.f32.xlu0 %v3665_v45 }
 0x8a5   : > { %v3515_v56 = vmul.f32 0.03125, %v3481_v30  ;;  %v3578_v51 = vmul.f32 %v10359_v29, %v10359_v29 }
 0x8a7   : > { %v10365_v2 = vsub.f32 %v10148_v44, %v3515_v56  ;;  %v3668_v19 = vsel %vm2954_vm5, %v3578_v51, 0.0  ;;  %v3345_v44 = vld [vmem:[%s9671_s24 + $0xa0] sm:$0xff] }
 0x8a8   : > { %3669 = vadd.xlane.f32.xlu1 %v3668_v19  ;;  %v3484_v18 = vpop.xlane.xlu0 %3483  ;;  %v10381_v30 = vpop.permute.xlu1 %4124  ;;  %v3341_v56 = vld [vmem:[%s9671_s24 + $0x80] sm:$0xff] }
 0x8a9   : > { %v3579_v26 = vmul.f32 %v10365_v2, %v10365_v2  ;;  %v3516_v25 = vmul.f32 0.03125, %v3484_v18  ;;  %12205 = vst [vmem:[#allocation46_spill] sm:$0xff] %v10381_v30 }
 0x8ab   : > { %v3671_v27 = vsel %vm2954_vm5, %v3579_v26, 0.0  ;;  %v10379_v45 = vsub.f32 %v10155_v50, %v3516_v25 }
 0x8ac   : > { %3672 = vadd.xlane.f32.xlu0 %v3671_v27  ;;  %v3373_v27 = vld [vmem:[%s9681_s28 + $0x80] sm:$0xff] }
 0x8ad   : > { %12204 = vst [vmem:[#allocation45_spill] sm:$0xff] %v10379_v45  ;;  %v3580_v51 = vmul.f32 %v10379_v45, %v10379_v45 }
 0x8b0   : > { %v10386_v19 = vpop.permute.xlu0 %4119 }
 0x8b1   : > { %12206 = vst [vmem:[#allocation47_spill] sm:$0xff] %v10386_v19 }
 0x8b9   : > { %3922 = vperm.xlu1 %8102, %v3348_v33   ;;  %v3674_v33 = vsel %vm2954_vm5, %v3580_v51, 0.0 }
 0x8c2   : > { %3917 = vperm.xlu0 %8103, %v3347_v49  }
 0x8c6   : > { %4109 = vperm.xlu0 %8103, %v3379_v9  }
 0x8ca   : > { %3907 = vperm.xlu0 %8103, %v3345_v44  }
 0x8ce   : > { %4099 = vperm.xlu0 %8103, %v3377_v60  }
 0x8d2   : > { %3897 = vperm.xlu0 %8103, %v3343_v43  }
 0x8d6   : > { %4089 = vperm.xlu0 %8103, %v3375_v17   ;;  %v3380_v17 = vld [vmem:[%s9681_s28 + $0xb8] sm:$0xff] }
 0x8d9   : > { %v10388_v26 = vpop.xlane.xlu1 %3582 }
 0x8da   : > { %3887 = vperm.xlu0 %8103, %v3341_v56  }
 0x8dd   : > { %v10392_v49 = vpop.xlane.xlu1 %3588  ;;  %3675 = vadd.xlane.f32.xlu1 %v3674_v33  ;;  %v10394_v50 = vpop.xlane.xlu0 %3585  ;;  %v3378_v33 = vld [vmem:[%s9681_s28 + $0xa8] sm:$0xff] }
 0x8de   : > { %4079 = vperm.xlu0 %8103, %v3373_v27  }
 0x8e1   : > { %v3595_v9 = vpop.xlane.xlu1 %3594  ;;  %v3592_v44 = vpop.xlane.xlu0 %3591 }
 0x8e5   : > { %v3601_v60 = vpop.xlane.xlu1 %3600  ;;  %v3598_v18 = vpop.xlane.xlu0 %3597 }
 0x8e9   : > { %v3607_v43 = vpop.xlane.xlu1 %3606  ;;  %v3604_v25 = vpop.xlane.xlu0 %3603 }
 0x8ed   : > { %v3613_v62 = vpop.xlane.xlu1 %3612  ;;  %v3610_v56 = vpop.xlane.xlu0 %3609 }
 0x8ee   : > { %4114 = vperm.xlu1 %8102, %v3380_v17   ;;  %v3687_v30 = vmul.f32 0.03125, %v3613_v62  ;;  %v3686_v61 = vmul.f32 0.03125, %v3610_v56  ;;  %v3684_v62 = vmul.f32 0.03125, %v3604_v25 }
 0x8f0   : > { %v3719_v45 = vadd.f32 1e-05, %v3687_v30  ;;  %v3680_v30 = vmul.f32 0.03125, %v3592_v44 }
 0x8f1   : > { %v3619_v51 = vpop.xlane.xlu1 %3618  ;;  %v3616_v7 = vpop.xlane.xlu0 %3615 }
 0x8f2   : > { %3912 = vperm.xlu1 %8102, %v3346_v40   ;;  %v3689_v16 = vmul.f32 0.03125, %v3619_v51  ;;  %v3688_v34 = vmul.f32 0.03125, %v3616_v7  ;;  %v3376_v7 = vld [vmem:[%s9681_s28 + $0x98] sm:$0xff]  ;;  %v3685_v51 = vmul.f32 0.03125, %v3607_v43 }
 0x8f4   : > { %v3721_v57 = vadd.f32 1e-05, %v3689_v16  ;;  %v3720_v3 = vadd.f32 1e-05, %v3688_v34  ;;  %v3342_v16 = vld [vmem:[%s9671_s24 + $0x88] sm:$0xff]  ;;  %v3683_v34 = vmul.f32 0.03125, %v3601_v60 }
 0x8f5   : > { %v3625_v31 = vpop.xlane.xlu1 %3624  ;;  %v3622_v27 = vpop.xlane.xlu0 %3621  ;;  %s12255_s24 = smov 32  }
 0x8f6   : > { %v3691_v19 = vmul.f32 0.03125, %v3625_v31  ;;  %v3690_v41 = vmul.f32 0.03125, %v3622_v27  ;;  %4104 = vperm.xlu1 %8102, %v3378_v33   ;;  %v3718_v33 = vadd.f32 1e-05, %v3686_v61  ;;  %v3715_v43 = vadd.f32 1e-05, %v3683_v34 }
 0x8f7   : > { %v3679_v61 = vmul.f32 0.03125, %v10392_v49 }
 0x8f8   : > { %v3723_v4 = vadd.f32 1e-05, %v3691_v19  ;;  %v3722_v8 = vadd.f32 1e-05, %v3690_v41  ;;  %v3717_v41 = vadd.f32 1e-05, %v3685_v51 }
 0x8f9   : > { %v3628_v17 = vpop.xlane.xlu0 %3627  ;;  %v3682_v19 = vmul.f32 0.03125, %v3598_v18  ;;  %v3678_v18 = vmul.f32 0.03125, %v10394_v50 }
 0x8fa   : > { %8612 = vrsqrt.f32 %v3723_v4  ;;  %v3692_v40 = vmul.f32 0.03125, %v3628_v17  ;;  %3902 = vperm.xlu1 %8102, %v3344_v6   ;;  %v3716_v4 = vadd.f32 1e-05, %v3684_v62  ;;  %v3374_v6 = vld [vmem:[%s9681_s28 + $0x88] sm:$0xff]  ;;  %v3712_v17 = vadd.f32 1e-05, %v3680_v30 }
 0x8fb   : > { %8614 = vrsqrt.f32 %v3722_v8  ;;  %v3681_v8 = vmul.f32 0.03125, %v3595_v9  ;;  %v3710_v62 = vadd.f32 1e-05, %v3678_v18  ;;  %s12259_s28 = smov 96  }
 0x8fc   : > { %8616 = vrsqrt.f32 %v3721_v57  ;;  %v3724_v31 = vadd.f32 1e-05, %v3692_v40  ;;  %v3714_v57 = vadd.f32 1e-05, %v3682_v19  ;;  %v3677_v40 = vmul.f32 0.03125, %v10388_v26 }
 0x8fd   : > { %8618 = vrsqrt.f32 %v3720_v3  ;;  %v3713_v56 = vadd.f32 1e-05, %v3681_v8 }
 0x8fe   : > { %8620 = vrsqrt.f32 %v3724_v31  ;;  %4094 = vperm.xlu1 %8102, %v3376_v7   ;;  %v3711_v7 = vadd.f32 1e-05, %v3679_v61  ;;  %v3709_v34 = vadd.f32 1e-05, %v3677_v40  ;;  %v12213_v40 = vld [vmem:[#allocation8_spill] sm:$0xff] }
 0x8ff   : > { %8622 = vrsqrt.f32 %v3719_v45 }
 0x900   : > { %8624 = vrsqrt.f32 %v3718_v33 }
 0x901   : > { %8626 = vrsqrt.f32 %v3717_v41 }
 0x902   : > { %3892 = vperm.xlu1 %8102, %v3342_v16   ;;  %8628 = vrsqrt.f32 %v3716_v4 }
 0x903   : > { %8630 = vrsqrt.f32 %v3715_v43 }
 0x904   : > { %8632 = vrsqrt.f32 %v3714_v57 }
 0x905   : > { %8634 = vrsqrt.f32 %v3713_v56 }
 0x906   : > { %4084 = vperm.xlu1 %8102, %v3374_v6   ;;  %8636 = vrsqrt.f32 %v3712_v17 }
 0x907   : > { %v8613_v3 = vpop.eup %8612  ;;  %8638 = vrsqrt.f32 %v3711_v7 }
 0x908   : > { %v8615_v25 = vpop.eup %8614  ;;  %v3787_v45 = vmul.f32 %v8613_v3, %v10265_v14  ;;  %8640 = vrsqrt.f32 %v3710_v62  ;;  %v12208_v3 = vld [vmem:[#allocation2_spill] sm:$0xff] }
 0x909   : > { %v8617_v60 = vpop.eup %8616  ;;  %v3786_v9 = vmul.f32 %v8615_v25, %v10257_v10  ;;  %8642 = vrsqrt.f32 %v3709_v34 }
 0x90a   : > { %v8619_v27 = vpop.eup %8618  ;;  %v3979_v51 = vmul.f32 %v9950_v48, %v3787_v45  ;;  %v3785_v31 = vmul.f32 %v8617_v60, %v10250_v53  ;;  %v12210_v45 = vld [vmem:[#allocation3_spill] sm:$0xff]  ;;  %v12211_v60 = vld [vmem:[#allocation5_spill] sm:$0xff] }
 0x90b   : > { %v8621_v44 = vpop.eup %8620  ;;  %v3978_v33 = vmul.f32 %v9985_v11, %v3786_v9  ;;  %v3784_v10 = vmul.f32 %v8619_v27, %v10247_v54  ;;  %v12212_v9 = vld [vmem:[#allocation6_spill] sm:$0xff] }
 0x90c   : > { %v3788_v49 = vmul.f32 %v8621_v44, %v10274_v12  ;;  %v8623_v14 = vpop.eup %8622  ;;  %v4171_v26 = vadd.f32 %v9962_v38, %v3979_v51  ;;  %v3977_v48 = vmul.f32 %v9973_v5, %v3785_v31  ;;  %v12215_v31 = vld [vmem:[#allocation9_spill] sm:$0xff] }
 0x90d   : > { %v8625_v16 = vpop.eup %8624  ;;  %v3783_v53 = vmul.f32 %v8623_v14, %v10238_v55  ;;  %v3976_v11 = vmul.f32 %v10008_v35, %v3784_v10  ;;  %v12207_v55 = vmov 0  }
 0x90e   : > { %v3980_v50 = vmul.f32 %v9978_v37, %v3788_v49  ;;  %v8627_v41 = vpop.eup %8626  ;;  %v4170_v37 = vadd.f32 %v9996_v63, %v3978_v33  ;;  %v3782_v54 = vmul.f32 %v8625_v16, %v10232_v32  ;;  %v4169_v38 = vadd.f32 %v10001_v24, %v3977_v48  ;;  %v12214_v49 = vld [vmem:[#allocation7_spill] sm:$0xff]  ;;  %v12216_v33 = vld [vmem:[#allocation10_spill] sm:$0xff]  ;;  %v12217_v16 = vld [vmem:[#allocation12_spill] sm:$0xff] }
 0x90f   : > { %v8629_v4 = vpop.eup %8628  ;;  %v3781_v5 = vmul.f32 %v8627_v41, %v10226_v42  ;;  %v4168_v43 = vadd.f32 %v10019_v0, %v3976_v11  ;;  %v12209_v0 = vld [vmem:[#allocation4_spill] sm:$0xff]  ;;  %v12219_v48 = vld [vmem:[#allocation13_spill] sm:$0xff] }
 0x910   : > { %v4172_v12 = vadd.f32 %v9989_v20, %v3980_v50  ;;  %v3975_v20 = vmul.f32 %v10012_v1, %v3783_v53  ;;  %v8631_v6 = vpop.eup %8630  ;;  %v4259_v8 = vpack.c.bf16 %v4170_v37, %v4169_v38  ;;  %v3974_v63 = vmul.f32 %v10031_v36, %v3782_v54  ;;  %v12221_v54 = vld [vmem:[#allocation15_spill] sm:$0xff]  ;;  %v12222_v38 = vld [vmem:[#allocation16_spill] sm:$0xff] }
 0x911   : > { %v3780_v35 = vmul.f32 %v8629_v4, %v10220_v13  ;;  %v8633_v32 = vpop.eup %8632  ;;  %v3973_v24 = vmul.f32 %v10035_v22, %v3781_v5  ;;  %v3779_v1 = vmul.f32 %v8631_v6, %v10214_v58  ;;  %v8298_v58 = vld [vmem:[%s9331_s2 + $0x4] ss:$8 sps:$4 sm:$0xff]   ;;  %v12223_v6 = vld [vmem:[#allocation17_spill] sm:$0xff] }
 0x912   : > { %v4260_v19 = vpack.c.bf16 %v4172_v12, %v4171_v26  ;;  %v4167_v30 = vadd.f32 %v10024_v21, %v3975_v20  ;;  %v8635_v42 = vpop.eup %8634  ;;  %v4166_v61 = vadd.f32 %v12208_v3, %v3974_v63  ;;  %v3778_v36 = vmul.f32 %v8633_v32, %v10208_v39  ;;  %4621 = vmatprep.mubr.bf16.mxu0 %v8298_v58  ;;  %v10465_v63 = vpop.xlane.xlu1 %3633 }
 0x913   : > { %v3972_v25 = vmul.f32 %v12209_v0, %v3780_v35  ;;  %v8637_v13 = vpop.eup %8636  ;;  %v4165_v21 = vadd.f32 %v12210_v45, %v3973_v24  ;;  %v3971_v18 = vmul.f32 %v12211_v60, %v3779_v1  ;;  %v3777_v22 = vmul.f32 %v8635_v42, %v10202_v23 }
 0x914   : > { %4590 = vmatpush1.bf16.msra.mxu0 %v4260_v19  ;;  %v4258_v57 = vpack.c.bf16 %v4168_v43, %v4167_v30  ;;  %v8639_v56 = vpop.eup %8638  ;;  %v3970_v7 = vmul.f32 %v12213_v40, %v3778_v36  ;;  %v3776_v39 = vmul.f32 %v8637_v13, %v10197_v15  ;;  %v12218_v15 = vld [vmem:[#allocation11_spill] sm:$0xff]  ;;  %v12220_v19 = vld [vmem:[#allocation14_spill] sm:$0xff] }
 0x915   : > { %4591 = vmatprep.subr.bf16.mxu0 %v12207_v55  ;;  %v8641_v27 = vpop.eup %8640  ;;  %v4257_v17 = vpack.c.bf16 %v4166_v61, %v4165_v21  ;;  %v4164_v44 = vadd.f32 %v12212_v9, %v3972_v25  ;;  %v4163_v51 = vadd.f32 %v12214_v49, %v3971_v18  ;;  %v3969_v14 = vmul.f32 %v12215_v31, %v3777_v22 }
 0x916   : > { %v3775_v62 = vmul.f32 %v8639_v56, %v10192_v46  ;;  %v8643_v23 = vpop.eup %8642  ;;  %v4162_v10 = vadd.f32 %v12216_v33, %v3970_v7  ;;  %v3968_v34 = vmul.f32 %v12217_v16, %v3776_v39  ;;  %v3774_v26 = vmul.f32 %v8641_v27, %v10189_v28  ;;  %v3640_v32 = vpop.xlane.xlu1 %3639 }
 0x917   : > { %v4256_v50 = vpack.c.bf16 %v4164_v44, %v4163_v51  ;;  %v4161_v12 = vadd.f32 %v12218_v15, %v3969_v14  ;;  %v3773_v41 = vmul.f32 %v8643_v23, %v10186_v47 }
 0x918   : > { %4592 = vmatpush1.bf16.msra.mxu0 %v4259_v8  ;;  %v3967_v53 = vmul.f32 %v12219_v48, %v3775_v62  ;;  %v4160_v37 = vadd.f32 %v12220_v19, %v3968_v34  ;;  %v3966_v11 = vmul.f32 %v10123_v59, %v3774_v26  ;;  %v10463_v59 = vpop.xlane.xlu0 %3630 }
 0x919   : > { %4593 = vmatprep.subr.bf16.mxu0 %v12207_v55  ;;  %v4255_v46 = vpack.c.bf16 %v4162_v10, %v4161_v12  ;;  %v3965_v20 = vmul.f32 %v12222_v38, %v3773_v41 }
 0x91a   : > { %v4159_v4 = vadd.f32 %v12221_v54, %v3967_v53  ;;  %v4158_v5 = vadd.f32 %v10134_v52, %v3966_v11  ;;  %v3646_v24 = vpop.xlane.xlu1 %3645  ;;  %v3696_v53 = vmul.f32 0.03125, %v3640_v32 }
 0x91b   : > { %v4157_v47 = vadd.f32 %v12223_v6, %v3965_v20  ;;  %v3698_v10 = vmul.f32 0.03125, %v3646_v24  ;;  %v12224_v20 = vld [vmem:[#allocation45_spill] sm:$0xff] }
 0x91c   : > { %4594 = vmatpush1.bf16.msra.mxu0 %v4258_v57  ;;  %v4254_v28 = vpack.c.bf16 %v4160_v37, %v4159_v4  ;;  %v3637_v43 = vpop.xlane.xlu0 %3636  ;;  %v3728_v32 = vadd.f32 1e-05, %v3696_v53 }
 0x91d   : > { %4595 = vmatprep.subr.bf16.mxu0 %v12207_v55  ;;  %v4253_v8 = vpack.c.bf16 %v4158_v5, %v4157_v47  ;;  %v3730_v19 = vadd.f32 1e-05, %v3698_v10  ;;  %v3695_v54 = vmul.f32 0.03125, %v3637_v43  ;;  %v12225_v5 = vld [vmem:[#allocation19_spill] sm:$0xff] }
 0x91e   : > { %v3652_v52 = vpop.xlane.xlu1 %3651  ;;  %v12229_v43 = vld [vmem:[#allocation43_spill] sm:$0xff] }
 0x91f   : > { %v3700_v14 = vmul.f32 0.03125, %v3652_v52 }
 0x920   : > { %4596 = vmatpush1.bf16.msra.mxu0 %v4257_v17  ;;  %v3643_v35 = vpop.xlane.xlu0 %3642 }
 0x921   : > { %4597 = vmatprep.subr.bf16.mxu0 %v12207_v55  ;;  %v3732_v16 = vadd.f32 1e-05, %v3700_v14  ;;  %v3697_v26 = vmul.f32 0.03125, %v3643_v35  ;;  %v3694_v35 = vmul.f32 0.03125, %v10465_v63  ;;  %v12238_v14 = vld [vmem:[#allocation27_spill] sm:$0xff] }
 0x922   : > { %v3658_v57 = vpop.xlane.xlu1 %3657 }
 0x923   : > { %v3702_v9 = vmul.f32 0.03125, %v3658_v57  ;;  %v3729_v4 = vadd.f32 1e-05, %v3697_v26  ;;  %v3693_v57 = vmul.f32 0.03125, %v10463_v59  ;;  %v12240_v26 = vld [vmem:[#allocation28_spill] sm:$0xff] }
 0x924   : > { %4598 = vmatpush1.bf16.msra.mxu0 %v4256_v50  ;;  %v3649_v30 = vpop.xlane.xlu0 %3648 }
 0x925   : > { %4599 = vmatprep.subr.bf16.mxu0 %v12207_v55  ;;  %v3734_v49 = vadd.f32 1e-05, %v3702_v9  ;;  %v3699_v23 = vmul.f32 0.03125, %v3649_v30  ;;  %v12227_v30 = vld [vmem:[#allocation18_spill] sm:$0xff] }
 0x927   : > { %v3731_v15 = vadd.f32 1e-05, %v3699_v23 }
 0x928   : > { %4600 = vmatpush1.bf16.msra.mxu0 %v4255_v46  ;;  %v3655_v1 = vpop.xlane.xlu0 %3654 }
 0x929   : > { %4601 = vmatprep.subr.bf16.mxu0 %v12207_v55  ;;  %v3664_v61 = vpop.xlane.xlu1 %3663  ;;  %v3701_v40 = vmul.f32 0.03125, %v3655_v1 }
 0x92a   : > { %v3704_v21 = vmul.f32 0.03125, %v3664_v61 }
 0x92b   : > { %v3733_v31 = vadd.f32 1e-05, %v3701_v40  ;;  %v12236_v40 = vld [vmem:[#allocation41_spill] sm:$0xff] }
 0x92c   : > { %4602 = vmatpush1.bf16.msra.mxu0 %v4254_v28  ;;  %v3661_v42 = vpop.xlane.xlu0 %3660  ;;  %v3736_v27 = vadd.f32 1e-05, %v3704_v21 }
 0x92d   : > { %4603 = vmatprep.subr.bf16.mxu0 %v12207_v55  ;;  %v3703_v22 = vmul.f32 0.03125, %v3661_v42 }
 0x92f   : > { %v3735_v7 = vadd.f32 1e-05, %v3703_v22  ;;  %v3726_v22 = vadd.f32 1e-05, %v3694_v35 }
 0x930   : > { %4604 = vmatpush1.bf16.msra.mxu0 %v4253_v8  ;;  %v3667_v3 = vpop.xlane.xlu0 %3666 }
 0x931   : > { %4605 = vmatprep.subr.bf16.mxu0 %v12207_v55  ;;  %v3670_v25 = vpop.xlane.xlu1 %3669  ;;  %v3705_v56 = vmul.f32 0.03125, %v3667_v3  ;;  %v3727_v3 = vadd.f32 1e-05, %v3695_v54 }
 0x932   : > { %v3706_v13 = vmul.f32 0.03125, %v3670_v25 }
 0x933   : > { %v3737_v58 = vadd.f32 1e-05, %v3705_v56  ;;  %v12232_v56 = vld [vmem:[#allocation23_spill] sm:$0xff] }
 0x934   : > { %v3738_v18 = vadd.f32 1e-05, %v3706_v13 }
 0x935   : > { %v3673_v0 = vpop.xlane.xlu0 %3672  ;;  %v10467_v60 = vpop.permute.xlu1 %3922 }
 0x936   : > { %v3707_v36 = vmul.f32 0.03125, %v3673_v0  ;;  %v12230_v0 = vld [vmem:[#allocation21_spill] sm:$0xff] }
 0x938   : > { %v3739_v45 = vadd.f32 1e-05, %v3707_v36  ;;  %v12231_v36 = vld [vmem:[#allocation20_spill] sm:$0xff] }
 0x93a   : > { %8644 = vrsqrt.f32 %v3739_v45  ;;  %v12233_v45 = vld [vmem:[#allocation42_spill] sm:$0xff] }
 0x93b   : > { %8646 = vrsqrt.f32 %v3738_v18 }
 0x93c   : > { %8648 = vrsqrt.f32 %v3737_v58 }
 0x93d   : > { %8650 = vrsqrt.f32 %v3736_v27  ;;  %v10469_v51 = vpop.permute.xlu0 %3917 }
 0x941   : > { %v10473_v33 = vpop.permute.xlu0 %4109 }
 0x945   : > { %v10479_v38 = vpop.permute.xlu0 %3907 }
 0x947   : > { %v8645_v50 = vpop.eup %8644 }
 0x948   : > { %v8647_v34 = vpop.eup %8646  ;;  %v3803_v12 = vmul.f32 %v8645_v50, %v10365_v2  ;;  %v12226_v2 = vld [vmem:[#allocation44_spill] sm:$0xff] }
 0x949   : > { %v8649_v48 = vpop.eup %8648  ;;  %v3802_v37 = vmul.f32 %v8647_v34, %v10359_v29  ;;  %v12228_v29 = vld [vmem:[#allocation22_spill] sm:$0xff]  ;;  %v4100_v58 = vpop.permute.xlu0 %4099  ;;  %v12239_v50 = vld [vmem:[#allocation40_spill] sm:$0xff] }
 0x94a   : > { %v8651_v46 = vpop.eup %8650  ;;  %v3995_v6 = vmul.f32 %v12225_v5, %v3803_v12  ;;  %v3801_v47 = vmul.f32 %v8649_v48, %v12226_v2  ;;  %v12241_v12 = vld [vmem:[#allocation30_spill] sm:$0xff] }
 0x94b   : > { %v3994_v1 = vmul.f32 %v12228_v29, %v3802_v37  ;;  %v3800_v52 = vmul.f32 %v8651_v46, %v12229_v43  ;;  %v12247_v29 = vld [vmem:[#allocation47_spill] sm:$0xff] }
 0x94c   : > { %v4187_v25 = vadd.f32 %v12230_v0, %v3995_v6  ;;  %v3993_v63 = vmul.f32 %v12232_v56, %v3801_v47  ;;  %v12245_v6 = vld [vmem:[#allocation46_spill] sm:$0xff] }
 0x94d   : > { %v3898_v46 = vpop.permute.xlu0 %3897 }
 0x951   : > { %v4090_v43 = vpop.permute.xlu0 %4089 }
 0x966   : > { %v3676_v17 = vpop.xlane.xlu1 %3675 }
 0x967   : > { %v3708_v44 = vmul.f32 0.03125, %v3676_v17  ;;  %v12234_v17 = vld [vmem:[#allocation24_spill] sm:$0xff] }
 0x968   : > { %v4186_v9 = vadd.f32 %v12234_v17, %v3994_v1  ;;  %v3888_v17 = vpop.permute.xlu0 %3887 }
 0x969   : > { %v3740_v39 = vadd.f32 1e-05, %v3708_v44  ;;  %v12235_v44 = vld [vmem:[#allocation26_spill] sm:$0xff] }
 0x96a   : > { %v10471_v62 = vpop.permute.xlu1 %4114  ;;  %v3992_v59 = vmul.f32 %v12235_v44, %v3800_v52  ;;  %v12251_v44 = vld [vmem:[#allocation34_spill] sm:$0xff] }
 0x96b   : > { %8652 = vrsqrt.f32 %v3740_v39  ;;  %v3725_v39 = vadd.f32 1e-05, %v3693_v57 }
 0x96c   : > { %8654 = vrsqrt.f32 %v3735_v7 }
 0x96d   : > { %8656 = vrsqrt.f32 %v3734_v49  ;;  %v12237_v49 = vld [vmem:[#allocation25_spill] sm:$0xff] }
 0x96e   : > { %8658 = vrsqrt.f32 %v3733_v31  ;;  %v10476_v41 = vpop.permute.xlu1 %3912  ;;  %v4185_v31 = vadd.f32 %v12237_v49, %v3993_v63  ;;  %v12252_v49 = vld [vmem:[#allocation33_spill] sm:$0xff] }
 0x96f   : > { %8660 = vrsqrt.f32 %v3732_v16 }
 0x970   : > { %8662 = vrsqrt.f32 %v3731_v15  ;;  %v4267_v34 = vpack.c.bf16 %v4186_v9, %v4185_v31  ;;  %v4184_v15 = vadd.f32 %v12240_v26, %v3992_v59 }
 0x971   : > { %8664 = vrsqrt.f32 %v3730_v19  ;;  %v12242_v19 = vld [vmem:[#allocation29_spill] sm:$0xff] }
 0x972   : > { %8666 = vrsqrt.f32 %v3729_v4  ;;  %v4105_v61 = vpop.permute.xlu1 %4104 }
 0x973   : > { %8668 = vrsqrt.f32 %v3728_v32 }
 0x974   : > { %8670 = vrsqrt.f32 %v3727_v3  ;;  %v12248_v3 = vld [vmem:[#allocation37_spill] sm:$0xff] }
 0x975   : > { %8672 = vrsqrt.f32 %v3726_v22  ;;  %v12250_v22 = vld [vmem:[#allocation35_spill] sm:$0xff] }
 0x976   : > { %v3903_v16 = vpop.permute.xlu1 %3902  ;;  %8674 = vrsqrt.f32 %v3725_v39 }
 0x978   : > { %v8653_v11 = vpop.eup %8652 }
 0x979   : > { %v3804_v28 = vmul.f32 %v8653_v11, %v12224_v20  ;;  %v8655_v8 = vpop.eup %8654  ;;  %v12243_v11 = vld [vmem:[#allocation31_spill] sm:$0xff] }
 0x97a   : > { %v8657_v42 = vpop.eup %8656  ;;  %v3799_v21 = vmul.f32 %v8655_v8, %v12233_v45  ;;  %v12244_v20 = vld [vmem:[#allocation39_spill] sm:$0xff]  ;;  %v4095_v8 = vpop.permute.xlu1 %4094 }
 0x97b   : > { %v3996_v24 = vmul.f32 %v12227_v30, %v3804_v28  ;;  %v8659_v18 = vpop.eup %8658  ;;  %v3798_v7 = vmul.f32 %v8657_v42, %v12236_v40  ;;  %v12246_v30 = vld [vmem:[#allocation38_spill] sm:$0xff] }
 0x97c   : > { %v3991_v23 = vmul.f32 %v12238_v14, %v3799_v21  ;;  %v3797_v10 = vmul.f32 %v8659_v18, %v12239_v50  ;;  %v8661_v53 = vpop.eup %8660  ;;  %v12253_v14 = vld [vmem:[#allocation32_spill] sm:$0xff] }
 0x97d   : > { %v4188_v13 = vadd.f32 %v12231_v36, %v3996_v24  ;;  %v3990_v48 = vmul.f32 %v12241_v12, %v3798_v7  ;;  %v8663_v4 = vpop.eup %8662  ;;  %v3796_v28 = vmul.f32 %v8661_v53, %v12244_v20  ;;  %v8296_v12 = vld [vmem:[%s9331_s2] ss:$8 sps:$4 sm:$0xff]   ;;  %v8301_v53 = vld [vmem:[%s9331_s2 + $0x10] ss:$8 sps:$4 sm:$0xff]   ;;  %v8311_v20 = vld [vmem:[%s9331_s2 + $0x54] ss:$8 sps:$4 sm:$0xff]  }
 0x97e   : > { %v4183_v37 = vadd.f32 %v12242_v19, %v3991_v23  ;;  %v3989_v54 = vmul.f32 %v12243_v11, %v3797_v10  ;;  %v8665_v47 = vpop.eup %8664  ;;  %v3795_v24 = vmul.f32 %v8663_v4, %v12246_v30  ;;  %v3893_v45 = vpop.permute.xlu1 %3892  ;;  %v8304_v19 = vld [vmem:[%s9331_s2 + $0x20] ss:$8 sps:$4 sm:$0xff]   ;;  %v8307_v11 = vld [vmem:[%s9331_s2 + $0x30] ss:$8 sps:$4 sm:$0xff]  }
 0x97f   : > { %v4268_v27 = vpack.c.bf16 %v4188_v13, %v4187_v25  ;;  %v4182_v2 = vadd.f32 %v12245_v6, %v3990_v48  ;;  %v8667_v35 = vpop.eup %8666  ;;  %v3988_v32 = vmul.f32 %v10467_v60, %v3796_v28  ;;  %v3794_v0 = vmul.f32 %v8665_v47, %v12248_v3  ;;  %v12249_v13 = vld [vmem:[#allocation36_spill] sm:$0xff]  ;;  %v8310_v4 = vld [vmem:[%s9331_s2 + $0x40] ss:$8 sps:$4 sm:$0xff]  }
 0x980   : > { %v4266_v5 = vpack.c.bf16 %v4184_v15, %v4183_v37  ;;  %v4181_v1 = vadd.f32 %v12247_v29, %v3989_v54  ;;  %v8669_v52 = vpop.eup %8668  ;;  %v3987_v42 = vmul.f32 %v10469_v51, %v3795_v24  ;;  %v3793_v60 = vmul.f32 %v8667_v35, %v12249_v13  ;;  %v8299_v48 = vld [vmem:[%s9331_s2 + $0x14] ss:$8 sps:$4 sm:$0xff]   ;;  %v8308_v54 = vld [vmem:[%s9331_s2 + $0x44] ss:$8 sps:$4 sm:$0xff]   ;;  %v8313_v28 = vld [vmem:[%s9331_s2 + $0x50] ss:$8 sps:$4 sm:$0xff]  }
 0x981   : > { %4606 = vmatpush2.bf16.msra.mxu0 %v4268_v27  ;;  %v4180_v57 = vadd.f32 %v10471_v62, %v3988_v32  ;;  %v3986_v56 = vmul.f32 %v10476_v41, %v3794_v0  ;;  %v8671_v63 = vpop.eup %8670  ;;  %v3792_v62 = vmul.f32 %v8669_v52, %v12250_v22  ;;  %v8305_v37 = vld [vmem:[%s9331_s2 + $0x34] ss:$8 sps:$4 sm:$0xff]   ;;  %v8316_v6 = vld [vmem:[%s9331_s2 + $0x60] ss:$8 sps:$4 sm:$0xff]   ;;  %v8319_v47 = vld [vmem:[%s9331_s2 + $0x70] ss:$8 sps:$4 sm:$0xff]  }
 0x982   : > { %4607 = vmatprep.subr.bf16.mxu0 %v12207_v55  ;;  %v4265_v25 = vpack.c.bf16 %v4182_v2, %v4181_v1  ;;  %v4179_v36 = vadd.f32 %v10473_v33, %v3987_v42  ;;  %v3985_v21 = vmul.f32 %v10479_v38, %v3793_v60  ;;  %v8673_v27 = vpop.eup %8672  ;;  %v3791_v33 = vmul.f32 %v8671_v63, %v12251_v44  ;;  %v4085_v31 = vpop.permute.xlu1 %4084  ;;  %v8317_v2 = vld [vmem:[%s9331_s2 + $0x74] ss:$8 sps:$4 sm:$0xff]   ;;  %v8322_v35 = vld [vmem:[%s9331_s2 + $0x80] ss:$8 sps:$4 sm:$0xff]   ;;  %v8325_v30 = vld [vmem:[%s9331_s2 + $0x90] ss:$8 sps:$4 sm:$0xff]  }
 0x983   : > { %v4178_v51 = vadd.f32 %v4105_v61, %v3986_v56  ;;  %v3984_v59 = vmul.f32 %v3903_v16, %v3792_v62  ;;  %v8675_v40 = vpop.eup %8674  ;;  %v3790_v38 = vmul.f32 %v8673_v27, %v12252_v49  ;;  %v8323_v32 = vld [vmem:[%s9331_s2 + $0x94] ss:$8 sps:$4 sm:$0xff]   ;;  %v8326_v24 = vld [vmem:[%s9331_s2 + $0xa4] ss:$8 sps:$4 sm:$0xff]   ;;  %v8328_v29 = vld [vmem:[%s9331_s2 + $0xa0] ss:$8 sps:$4 sm:$0xff]  }
 0x984   : > { %v4264_v18 = vpack.c.bf16 %v4180_v57, %v4179_v36  ;;  %v4177_v9 = vadd.f32 %v4100_v58, %v3985_v21  ;;  %v3983_v41 = vmul.f32 %v3898_v46, %v3791_v33  ;;  %v3789_v23 = vmul.f32 %v8675_v40, %v12253_v14  ;;  %v4080_v58 = vpop.permute.xlu0 %4079  ;;  %v8302_v46 = vld [vmem:[%s9331_s2 + $0x24] ss:$8 sps:$4 sm:$0xff]   ;;  %v8329_v1 = vld [vmem:[%s9331_s2 + $0xb4] ss:$8 sps:$4 sm:$0xff]   ;;  %v8332_v42 = vld [vmem:[%s9331_s2 + $0xc0] ss:$8 sps:$4 sm:$0xff]  }
 0x985   : > { %4608 = vmatpush2.bf16.msra.mxu0 %v4267_v34  ;;  %v4176_v39 = vadd.f32 %v4095_v8, %v3984_v59  ;;  %v3982_v50 = vmul.f32 %v3893_v45, %v3790_v38  ;;  %v8320_v8 = vld [vmem:[%s9331_s2 + $0x84] ss:$8 sps:$4 sm:$0xff]   ;;  %v8337_v57 = vld [vmem:[%s9331_s2 + $0xd4] ss:$8 sps:$4 sm:$0xff]   ;;  %v8335_v3 = vld [vmem:[%s9331_s2 + $0xd0] ss:$8 sps:$4 sm:$0xff]  }
 0x986   : > { %4609 = vmatprep.subr.bf16.mxu0 %v12207_v55  ;;  %v4263_v7 = vpack.c.bf16 %v4178_v51, %v4177_v9  ;;  %v4175_v61 = vadd.f32 %v4090_v43, %v3983_v41  ;;  %v3981_v10 = vmul.f32 %v3888_v17, %v3789_v23  ;;  %v8331_v43 = vld [vmem:[%s9331_s2 + $0xb0] ss:$8 sps:$4 sm:$0xff]   ;;  %v8334_v52 = vld [vmem:[%s9331_s2 + $0xc4] ss:$8 sps:$4 sm:$0xff]   ;;  %v8343_v36 = vld [vmem:[%s9331_s2 + $0xf4] ss:$8 sps:$4 sm:$0xff]  }
 0x987   : > { %v4174_v34 = vadd.f32 %v4085_v31, %v3982_v50  ;;  %v8340_v0 = vld [vmem:[%s9331_s2 + $0xe4] ss:$8 sps:$4 sm:$0xff]   ;;  %v8341_v13 = vld [vmem:[%s9331_s2 + $0xf0] ss:$8 sps:$4 sm:$0xff]   ;;  %v8344_v56 = vld [vmem:[%s9331_s2 + $0x100] ss:$8 sps:$4 sm:$0xff]  }
 0x988   : > { %v4262_v16 = vpack.c.bf16 %v4176_v39, %v4175_v61  ;;  %v4173_v26 = vadd.f32 %v4080_v58, %v3981_v10  ;;  %v8346_v60 = vld [vmem:[%s9331_s2 + $0x104] ss:$8 sps:$4 sm:$0xff]   ;;  %v8349_v63 = vld [vmem:[%s9331_s2 + $0x114] ss:$8 sps:$4 sm:$0xff]   ;;  %v8347_v45 = vld [vmem:[%s9331_s2 + $0x110] ss:$8 sps:$4 sm:$0xff]  }
 0x989   : > { %4610 = vmatpush2.bf16.msra.mxu0 %v4266_v5  ;;  %v8314_v5 = vld [vmem:[%s9331_s2 + $0x64] ss:$8 sps:$4 sm:$0xff]   ;;  %v8355_v51 = vld [vmem:[%s9331_s2 + $0x134] ss:$8 sps:$4 sm:$0xff]   ;;  %v8353_v22 = vld [vmem:[%s9331_s2 + $0x130] ss:$8 sps:$4 sm:$0xff]  }
 0x98a   : > { %4611 = vmatprep.subr.bf16.mxu0 %v12207_v55  ;;  %v4261_v15 = vpack.c.bf16 %v4174_v34, %v4173_v26  ;;  %v8352_v21 = vld [vmem:[%s9331_s2 + $0x124] ss:$8 sps:$4 sm:$0xff]   ;;  %v8356_v27 = vld [vmem:[%s9331_s2 + $0x140] ss:$8 sps:$4 sm:$0xff]   ;;  %v8361_v17 = vld [vmem:[%s9331_s2 + $0x154] ss:$8 sps:$4 sm:$0xff]  }
 0x98b   : > { %v8358_v62 = vld [vmem:[%s9331_s2 + $0x144] ss:$8 sps:$4 sm:$0xff]   ;;  %v8359_v9 = vld [vmem:[%s9331_s2 + $0x150] ss:$8 sps:$4 sm:$0xff]   ;;  %v8362_v33 = vld [vmem:[%s9331_s2 + $0x160] ss:$8 sps:$4 sm:$0xff]  }
 0x98c   : > { %v8364_v44 = vld [vmem:[%s9331_s2 + $0x164] ss:$8 sps:$4 sm:$0xff]   ;;  %v8367_v59 = vld [vmem:[%s9331_s2 + $0x174] ss:$8 sps:$4 sm:$0xff]   ;;  %v8365_v40 = vld [vmem:[%s9331_s2 + $0x170] ss:$8 sps:$4 sm:$0xff]  }
 0x98d   : > { %4612 = vmatpush2.bf16.msra.mxu0 %v4265_v25  ;;  %v8338_v25 = vld [vmem:[%s9331_s2 + $0xe0] ss:$8 sps:$4 sm:$0xff]   ;;  %v8370_v41 = vld [vmem:[%s9331_s2 + $0x184] ss:$8 sps:$4 sm:$0xff]   ;;  %v8373_v39 = vld [vmem:[%s9331_s2 + $0x194] ss:$8 sps:$4 sm:$0xff]  }
 0x98e   : > { %4613 = vmatprep.subr.bf16.mxu0 %v12207_v55  ;;  %v8371_v61 = vld [vmem:[%s9331_s2 + $0x190] ss:$8 sps:$4 sm:$0xff]   ;;  %v8376_v23 = vld [vmem:[%s9331_s2 + $0x1a4] ss:$8 sps:$4 sm:$0xff]   ;;  %v8374_v34 = vld [vmem:[%s9331_s2 + $0x1a0] ss:$8 sps:$4 sm:$0xff]  }
 0x991   : > { %4614 = vmatpush2.bf16.msra.mxu0 %v4264_v18  ;;  %v8350_v18 = vld [vmem:[%s9331_s2 + $0x120] ss:$8 sps:$4 sm:$0xff]  }
 0x992   : > { %4615 = vmatprep.subr.bf16.mxu0 %v12207_v55 }
 0x995   : > { %4616 = vmatpush2.bf16.msra.mxu0 %v4263_v7  ;;  %v8368_v7 = vld [vmem:[%s9331_s2 + $0x180] ss:$8 sps:$4 sm:$0xff]  }
 0x996   : > { %4617 = vmatprep.subr.bf16.mxu0 %v12207_v55 }
 0x999   : > { %4618 = vmatpush2.bf16.msra.mxu0 %v4262_v16 }
 0x99a   : > { %4619 = vmatprep.subr.bf16.mxu0 %v12207_v55 }
 0x99d   : > { %4620 = vmatpush2.bf16.msra.mxu0 %v4261_v15  ;;  %v8379_v15 = vld [vmem:[%s9331_s2 + $0x1b4] ss:$8 sps:$4 sm:$0xff]  }
 0x9a0   : > { %4622 = vmatmul.mubr.bf16.vlgmr.msra.gmra.mxu0 %v8296_v12 }
 0x9a1   : > { %4629 = vmatprep.mubr.bf16.mxu0 %v8299_v48 }
 0x9a8   : > { %4630 = vmatmul.mubr.bf16.gmra.mxu0 %v8301_v53 }
 0x9a9   : > { %4637 = vmatprep.mubr.bf16.mxu0 %v8302_v46 }
 0x9b0   : > { %4638 = vmatmul.mubr.bf16.gmra.mxu0 %v8304_v19  ;;  %v8377_v19 = vld [vmem:[%s9331_s2 + $0x1b0] ss:$8 sps:$4 sm:$0xff]  }
 0x9b1   : > { %4645 = vmatprep.mubr.bf16.mxu0 %v8305_v37 }
 0x9b8   : > { %4646 = vmatmul.mubr.bf16.gmra.mxu0 %v8307_v11  ;;  %v8382_v11 = vld [vmem:[%s9331_s2 + $0x1c4] ss:$8 sps:$4 sm:$0xff]  }
 0x9b9   : > { %4653 = vmatprep.mubr.bf16.mxu0 %v8308_v54 }
 0x9c0   : > { %4654 = vmatmul.mubr.bf16.gmra.mxu0 %v8310_v4 }
 0x9c1   : > { %4661 = vmatprep.mubr.bf16.mxu0 %v8311_v20 }
 0x9c8   : > { %4662 = vmatmul.mubr.bf16.gmra.mxu0 %v8313_v28 }
 0x9c9   : > { %4669 = vmatprep.mubr.bf16.mxu0 %v8314_v5  ;;  %v8380_v5 = vld [vmem:[%s9331_s2 + $0x1c0] ss:$8 sps:$4 sm:$0xff]  }
 0x9d0   : > { %4670 = vmatmul.mubr.bf16.gmra.mxu0 %v8316_v6 }
 0x9d1   : > { %4677 = vmatprep.mubr.bf16.mxu0 %v8317_v2  ;;  %v8385_v2 = vld [vmem:[%s9331_s2 + $0x1d4] ss:$8 sps:$4 sm:$0xff]  }
 0x9d8   : > { %4678 = vmatmul.mubr.bf16.gmra.mxu0 %v8319_v47 }
 0x9d9   : > { %4685 = vmatprep.mubr.bf16.mxu0 %v8320_v8 }
 0x9e0   : > { %4686 = vmatmul.mubr.bf16.gmra.mxu0 %v8322_v35 }
 0x9e1   : > { %4693 = vmatprep.mubr.bf16.mxu0 %v8323_v32 }
 0x9e8   : > { %4694 = vmatmul.mubr.bf16.gmra.mxu0 %v8325_v30  ;;  %v8383_v30 = vld [vmem:[%s9331_s2 + $0x1d0] ss:$8 sps:$4 sm:$0xff]  }
 0x9e9   : > { %4701 = vmatprep.mubr.bf16.mxu0 %v8326_v24 }
 0x9f0   : > { %4702 = vmatmul.mubr.bf16.gmra.mxu0 %v8328_v29  ;;  %v8388_v29 = vld [vmem:[%s9331_s2 + $0x1e4] ss:$8 sps:$4 sm:$0xff]  }
 0x9f1   : > { %4709 = vmatprep.mubr.bf16.mxu0 %v8329_v1 }
 0x9f8   : > { %4710 = vmatmul.mubr.bf16.gmra.mxu0 %v8331_v43 }
 0x9f9   : > { %4717 = vmatprep.mubr.bf16.mxu0 %v8334_v52 }
 0xa00   : > { %4718 = vmatmul.mubr.bf16.gmra.mxu0 %v8332_v42 }
 0xa01   : > { %4725 = vmatprep.mubr.bf16.mxu0 %v8337_v57  ;;  %v8386_v57 = vld [vmem:[%s9331_s2 + $0x1e0] ss:$8 sps:$4 sm:$0xff]  }
 0xa08   : > { %4726 = vmatmul.mubr.bf16.gmra.mxu0 %v8335_v3 }
 0xa09   : > { %4733 = vmatprep.mubr.bf16.mxu0 %v8340_v0  ;;  %v8391_v0 = vld [vmem:[%s9331_s2 + $0x1f4] ss:$8 sps:$4 sm:$0xff]  }
 0xa10   : > { %4734 = vmatmul.mubr.bf16.gmra.mxu0 %v8338_v25 }
 0xa11   : > { %4741 = vmatprep.mubr.bf16.mxu0 %v8343_v36 }
 0xa18   : > { %4742 = vmatmul.mubr.bf16.gmra.mxu0 %v8341_v13 }
 0xa19   : > { %4749 = vmatprep.mubr.bf16.mxu0 %v8346_v60 }
 0xa20   : > { %4750 = vmatmul.mubr.bf16.gmra.mxu0 %v8344_v56  ;;  %v8389_v56 = vld [vmem:[%s9331_s2 + $0x1f0] ss:$8 sps:$4 sm:$0xff]   ;;  %s12257_s2 = smov 64  }
 0xa21   : > { %4757 = vmatprep.mubr.bf16.mxu0 %v8349_v63 }
 0xa28   : > { %4758 = vmatmul.mubr.bf16.gmra.mxu0 %v8347_v45 }
 0xa29   : > { %4765 = vmatprep.mubr.bf16.mxu0 %v8352_v21 }
 0xa30   : > { %4766 = vmatmul.mubr.bf16.gmra.mxu0 %v8350_v18 }
 0xa31   : > { %4773 = vmatprep.mubr.bf16.mxu0 %v8355_v51 }
 0xa38   : > { %4774 = vmatmul.mubr.bf16.gmra.mxu0 %v8353_v22 }
 0xa39   : > { %4781 = vmatprep.mubr.bf16.mxu0 %v8358_v62 }
 0xa40   : > { %4782 = vmatmul.mubr.bf16.gmra.mxu0 %v8356_v27 }
 0xa41   : > { %4789 = vmatprep.mubr.bf16.mxu0 %v8361_v17 }
 0xa48   : > { %4790 = vmatmul.mubr.bf16.gmra.mxu0 %v8359_v9 }
 0xa49   : > { %4797 = vmatprep.mubr.bf16.mxu0 %v8364_v44 }
 0xa50   : > { %4798 = vmatmul.mubr.bf16.gmra.mxu0 %v8362_v33 }
 0xa51   : > { %4805 = vmatprep.mubr.bf16.mxu0 %v8367_v59 }
 0xa58   : > { %4806 = vmatmul.mubr.bf16.gmra.mxu0 %v8365_v40 }
 0xa59   : > { %4813 = vmatprep.mubr.bf16.mxu0 %v8370_v41 }
 0xa60   : > { %v4623_v49 = vpop.f32.mrf.mxu0  ;;  %4814 = vmatmul.mubr.bf16.gmra.mxu0 %v8368_v7 }
 0xa61   : > { %4821 = vmatprep.mubr.bf16.mxu0 %v8373_v39 }
 0xa62   : > { %v4625_v38 = vpop.f32.mrf.mxu0 }
 0xa64   : > { %v4626_v31 = vpop.f32.mrf.mxu0 }
 0xa65   : > { %v10577_v14 = vpack.c.bf16 %v4626_v31, %v4623_v49 }
 0xa66   : > { %v4628_v50 = vpop.f32.mrf.mxu0 }
 0xa67   : > { %5241 = vrot.lane.b32.xlu1 %v10577_v14, %s12254_s3 }
 0xa68   : > { %v4631_v58 = vpop.f32.mrf.mxu0  ;;  %4822 = vmatmul.mubr.bf16.gmra.mxu0 %v8371_v61 }
 0xa69   : > { %4829 = vmatprep.mubr.bf16.mxu0 %v8376_v23 }
 0xa6a   : > { %v4633_v10 = vpop.f32.mrf.mxu0 }
 0xa6c   : > { %v4634_v16 = vpop.f32.mrf.mxu0 }
 0xa6d   : > { %v10583_v26 = vpack.c.bf16 %v4634_v16, %v4631_v58 }
 0xa6e   : > { %v4636_v12 = vpop.f32.mrf.mxu0 }
 0xa70   : > { %v4639_v48 = vpop.f32.mrf.mxu0  ;;  %4830 = vmatmul.mubr.bf16.gmra.mxu0 %v8374_v34 }
 0xa71   : > { %4837 = vmatprep.mubr.bf16.mxu0 %v8379_v15 }
 0xa72   : > { %v4641_v53 = vpop.f32.mrf.mxu0 }
 0xa74   : > { %v4642_v46 = vpop.f32.mrf.mxu0 }
 0xa75   : > { %v10587_v37 = vpack.c.bf16 %v4642_v46, %v4639_v48 }
 0xa76   : > { %v4644_v54 = vpop.f32.mrf.mxu0 }
 0xa77   : > { %4912 = vrot.lane.b32.xlu1 %v10587_v37, %s12082_s5 }
 0xa78   : > { %v4647_v4 = vpop.f32.mrf.mxu0  ;;  %4838 = vmatmul.mubr.bf16.gmra.mxu0 %v8377_v19 }
 0xa79   : > { %4845 = vmatprep.mubr.bf16.mxu0 %v8382_v11 }
 0xa7a   : > { %v4649_v20 = vpop.f32.mrf.mxu0 }
 0xa7c   : > { %v4650_v28 = vpop.f32.mrf.mxu0 }
 0xa7d   : > { %v10593_v6 = vpack.c.bf16 %v4650_v28, %v4647_v4 }
 0xa7e   : > { %v4652_v47 = vpop.f32.mrf.mxu0 }
 0xa7f   : > { %4914 = vrot.lane.b32.xlu1 %v10593_v6, %s12082_s5 }
 0xa80   : > { %v4655_v8 = vpop.f32.mrf.mxu0  ;;  %4846 = vmatmul.mubr.bf16.gmra.mxu0 %v8380_v5 }
 0xa81   : > { %4853 = vmatprep.mubr.bf16.mxu0 %v8385_v2 }
 0xa82   : > { %v4657_v35 = vpop.f32.mrf.mxu0 }
 0xa84   : > { %v4658_v32 = vpop.f32.mrf.mxu0 }
 0xa85   : > { %v4882_v24 = vpack.c.bf16 %v4658_v32, %v4655_v8  ;;  %v10632_v8 = vld [vmem:[%s12041_s21 + $0x78] sm:$0xff]  }
 0xa86   : > { %v4660_v1 = vpop.f32.mrf.mxu0  ;;  %v10637_v32 = vld [vmem:[%s12041_s21 + $0x38] sm:$0xff]   ;;  %7963 = vmatprep.subr.bf16.mxu1 %v10632_v8 }
 0xa87   : > { %4918 = vrot.lane.b32.xlu1 %v4882_v24, %s12255_s24  ;;  %7964 = vmatpush3.bf16.msra.mxu1 %v10637_v32 }
 0xa88   : > { %v4663_v43 = vpop.f32.mrf.mxu0  ;;  %4854 = vmatmul.mubr.bf16.gmra.mxu0 %v8383_v30 }
 0xa89   : > { %4861 = vmatprep.mubr.bf16.mxu0 %v8388_v29 }
 0xa8a   : > { %v4665_v52 = vpop.f32.mrf.mxu0 }
 0xa8b   : > { %5245 = vrot.lane.b32.xlu1 %v4882_v24, %s12082_s5 }
 0xa8c   : > { %v4666_v42 = vpop.f32.mrf.mxu0 }
 0xa8d   : > { %v10603_v3 = vpack.c.bf16 %v4666_v42, %v4663_v43 }
 0xa8e   : > { %v4668_v25 = vpop.f32.mrf.mxu0 }
 0xa8f   : > { %4920 = vrot.lane.b32.xlu1 %v10603_v3, %s12255_s24 }
 0xa90   : > { %v4671_v36 = vpop.f32.mrf.mxu0  ;;  %4862 = vmatmul.mubr.bf16.gmra.mxu0 %v8386_v57  ;;  %v10647_v57 = vld [vmem:[%s12041_s21 + $0x70] sm:$0xff]  }
 0xa91   : > { %4869 = vmatprep.mubr.bf16.mxu0 %v8391_v0  ;;  %7965 = vmatprep.subr.bf16.mxu1 %v10647_v57 }
 0xa92   : > { %v4673_v13 = vpop.f32.mrf.mxu0 }
 0xa93   : > { %v10655_v13 = vld [vmem:[%s12041_s21 + $0x30] sm:$0xff]  }
 0xa94   : > { %v4674_v60 = vpop.f32.mrf.mxu0  ;;  %7966 = vmatpush3.bf16.msra.mxu1 %v10655_v13 }
 0xa95   : > { %v4884_v63 = vpack.c.bf16 %v4674_v60, %v4671_v36 }
 0xa96   : > { %v4676_v45 = vpop.f32.mrf.mxu0 }
 0xa97   : > { %4924 = vrot.lane.b32.xlu1 %v4884_v63, %s12256_s27 }
 0xa98   : > { %v4679_v21 = vpop.f32.mrf.mxu0  ;;  %4870 = vmatmul.mubr.bf16.gmra.mxu0 %v8389_v56 }
 0xa9a   : > { %v4681_v18 = vpop.f32.mrf.mxu0 }
 0xa9b   : > { %5249 = vrot.lane.b32.xlu1 %v4884_v63, %s12255_s24 }
 0xa9c   : > { %v4682_v51 = vpop.f32.mrf.mxu0 }
 0xa9d   : > { %v10611_v22 = vpack.c.bf16 %v4682_v51, %v4679_v21 }
 0xa9e   : > { %v4684_v62 = vpop.f32.mrf.mxu0 }
 0xa9f   : > { %4926 = vrot.lane.b32.xlu1 %v10611_v22, %s12256_s27 }
 0xaa0   : > { %v4687_v27 = vpop.f32.mrf.mxu0 }
 0xaa2   : > { %v4689_v17 = vpop.f32.mrf.mxu0 }
 0xaa4   : > { %v4690_v9 = vpop.f32.mrf.mxu0 }
 0xaa5   : > { %v4886_v44 = vpack.c.bf16 %v4690_v9, %v4687_v27 }
 0xaa6   : > { %v4692_v33 = vpop.f32.mrf.mxu0 }
 0xaa7   : > { %4930 = vrot.lane.b32.xlu1 %v4886_v44, %s12257_s2 }
 0xaa8   : > { %v4695_v59 = vpop.f32.mrf.mxu0 }
 0xaaa   : > { %v4697_v40 = vpop.f32.mrf.mxu0 }
 0xaab   : > { %5253 = vrot.lane.b32.xlu1 %v4886_v44, %s12256_s27  ;;  %v10676_v44 = vld [vmem:[%s12041_s21 + $0x68] sm:$0xff]  }
 0xaac   : > { %v4698_v41 = vpop.f32.mrf.mxu0  ;;  %7967 = vmatprep.subr.bf16.mxu1 %v10676_v44 }
 0xaad   : > { %v10617_v7 = vpack.c.bf16 %v4698_v41, %v4695_v59 }
 0xaae   : > { %v4700_v39 = vpop.f32.mrf.mxu0 }
 0xaaf   : > { %4932 = vrot.lane.b32.xlu1 %v10617_v7, %s12257_s2 }
 0xab0   : > { %v4703_v49 = vpop.f32.mrf.mxu0 }
 0xab2   : > { %v4705_v38 = vpop.f32.mrf.mxu0 }
 0xab4   : > { %v4706_v31 = vpop.f32.mrf.mxu0 }
 0xab5   : > { %v4888_v61 = vpack.c.bf16 %v4706_v31, %v4703_v49 }
 0xab6   : > { %v4708_v23 = vpop.f32.mrf.mxu0 }
 0xab7   : > { %4936 = vrot.lane.b32.xlu1 %v4888_v61, %s12258_s29 }
 0xab8   : > { %v4711_v50 = vpop.f32.mrf.mxu0 }
 0xaba   : > { %v4713_v58 = vpop.f32.mrf.mxu0 }
 0xabb   : > { %5257 = vrot.lane.b32.xlu1 %v4888_v61, %s12257_s2  ;;  %v10713_v58 = vld [vmem:[%s12041_s21 + $0x60] sm:$0xff]  }
 0xabc   : > { %v4714_v10 = vpop.f32.mrf.mxu0 }
 0xabd   : > { %v10623_v16 = vpack.c.bf16 %v4714_v10, %v4711_v50  ;;  %v10718_v10 = vld [vmem:[%s12041_s21 + $0x20] sm:$0xff]  }
 0xabe   : > { %v4716_v34 = vpop.f32.mrf.mxu0 }
 0xabf   : > { %4938 = vrot.lane.b32.xlu1 %v10623_v16, %s12258_s29  ;;  %v5435_v34 = vld [vmem:[%s10704_s26 + $0x18] sm:$0xff] }
 0xac0   : > { %v4719_v15 = vpop.f32.mrf.mxu0 }
 0xac2   : > { %v4721_v12 = vpop.f32.mrf.mxu0 }
 0xac4   : > { %v4722_v48 = vpop.f32.mrf.mxu0 }
 0xac5   : > { %v4890_v53 = vpack.c.bf16 %v4722_v48, %v4719_v15 }
 0xac6   : > { %v4724_v46 = vpop.f32.mrf.mxu0 }
 0xac7   : > { %4942 = vrot.lane.b32.xlu1 %v4890_v53, %s12259_s28 }
 0xac8   : > { %v4727_v19 = vpop.f32.mrf.mxu0 }
 0xaca   : > { %v4729_v11 = vpop.f32.mrf.mxu0 }
 0xacc   : > { %v4730_v54 = vpop.f32.mrf.mxu0 }
 0xacd   : > { %v4891_v4 = vpack.c.bf16 %v4730_v54, %v4727_v19 }
 0xace   : > { %v4732_v20 = vpop.f32.mrf.mxu0 }
 0xacf   : > { %4944 = vrot.lane.b32.xlu1 %v4891_v4, %s12259_s28 }
 0xad0   : > { %v4735_v28 = vpop.f32.mrf.mxu0 }
 0xad2   : > { %v4737_v5 = vpop.f32.mrf.mxu0 }
 0xad4   : > { %v4738_v2 = vpop.f32.mrf.mxu0 }
 0xad5   : > { %v4892_v47 = vpack.c.bf16 %v4738_v2, %v4735_v28 }
 0xad6   : > { %v4740_v35 = vpop.f32.mrf.mxu0 }
 0xad7   : > { %4948 = vrot.lane.b32.xlu1 %v4892_v47, %s12254_s3 }
 0xad8   : > { %v4743_v30 = vpop.f32.mrf.mxu0 }
 0xad9   : > { %v5242_v56 = vpop.permute.xlu1 %5241 }
 0xada   : > { %v4745_v24 = vpop.f32.mrf.mxu0  ;;  %v5301_v11 = vsel %vm2385_vm6, %v5242_v56, %v10587_v37  ;;  %v10741_v37 = vld [vmem:[%s12041_s21 + $0x58] sm:$0xff]  }
 0xadc   : > { %v4746_v29 = vpop.f32.mrf.mxu0 }
 0xadd   : > { %v4893_v1 = vpack.c.bf16 %v4746_v29, %v4743_v30  ;;  %v10746_v30 = vld [vmem:[%s12041_s21 + $0x18] sm:$0xff]  }
 0xade   : > { %v4748_v43 = vpop.f32.mrf.mxu0 }
 0xadf   : > { %4950 = vrot.lane.b32.xlu1 %v4893_v1, %s12254_s3 }
 0xae0   : > { %v4751_v52 = vpop.f32.mrf.mxu0 }
 0xae2   : > { %v4753_v42 = vpop.f32.mrf.mxu0 }
 0xae3   : > { %5261 = vrot.lane.b32.xlu1 %v4890_v53, %s12258_s29  ;;  %v5433_v53 = vld [vmem:[%s10704_s26 + $0x8] sm:$0xff] }
 0xae4   : > { %v4754_v0 = vpop.f32.mrf.mxu0 }
 0xae5   : > { %v10649_v25 = vpack.c.bf16 %v4754_v0, %v4751_v52 }
 0xae6   : > { %v4756_v36 = vpop.f32.mrf.mxu0 }
 0xae7   : > { %5265 = vrot.lane.b32.xlu1 %v4892_v47, %s12259_s28  ;;  %5271 = vrot.lane.b32.xlu0 %v10649_v25, %s12254_s3 }
 0xae8   : > { %v4759_v60 = vpop.f32.mrf.mxu0 }
 0xae9   : > { %v10663_v21 = vpop.permute.xlu1 %4912 }
 0xaea   : > { %v4761_v63 = vpop.f32.mrf.mxu0 }
 0xaeb   : > { %5243 = vrot.lane.b32.xlu1 %v10583_v26, %s12254_s3  ;;  %v10759_v63 = vld [vmem:[%s12041_s21 + $0x50] sm:$0xff]  }
 0xaec   : > { %v4762_v45 = vpop.f32.mrf.mxu0 }
 0xaed   : > { %v10665_v18 = vpack.c.bf16 %v4762_v45, %v4759_v60  ;;  %v10764_v45 = vld [vmem:[%s12041_s21 + $0x10] sm:$0xff]  }
 0xaee   : > { %v4764_v51 = vpop.f32.mrf.mxu0 }
 0xaef   : > { %5247 = vrot.lane.b32.xlu1 %v10603_v3, %s12082_s5  ;;  %v10684_v3 = vld [vmem:[%s12041_s21 + $0x28] sm:$0xff]  }
 0xaf0   : > { %v4767_v62 = vpop.f32.mrf.mxu0  ;;  %7968 = vmatpush3.bf16.msra.mxu1 %v10684_v3 }
 0xaf1   : > { %v4915_v27 = vpop.permute.xlu1 %4914  ;;  %7969 = vmatprep.subr.bf16.mxu1 %v10713_v58 }
 0xaf2   : > { %v4999_v17 = vsel %vm2385_vm6, %v10583_v26, %v4915_v27  ;;  %v4769_v9 = vpop.f32.mrf.mxu0 }
 0xaf3   : > { %5251 = vrot.lane.b32.xlu1 %v10611_v22, %s12255_s24 }
 0xaf4   : > { %v4770_v33 = vpop.f32.mrf.mxu0  ;;  %7970 = vmatpush3.bf16.msra.mxu1 %v10718_v10 }
 0xaf5   : > { %v10678_v59 = vpack.c.bf16 %v4770_v33, %v4767_v62  ;;  %7971 = vmatprep.subr.bf16.mxu1 %v10741_v37 }
 0xaf6   : > { %v4772_v26 = vpop.f32.mrf.mxu0 }
 0xaf7   : > { %5255 = vrot.lane.b32.xlu1 %v10617_v7, %s12256_s27  ;;  %4954 = vrot.lane.b32.xlu0 %v10678_v59, %s12082_s5 }
 0xaf8   : > { %v4775_v22 = vpop.f32.mrf.mxu0  ;;  %7972 = vmatpush3.bf16.msra.mxu1 %v10746_v30 }
 0xaf9   : > { %v10691_v40 = vpop.permute.xlu1 %4918  ;;  %7973 = vmatprep.subr.bf16.mxu1 %v10759_v63 }
 0xafa   : > { %v4777_v41 = vpop.f32.mrf.mxu0 }
 0xafb   : > { %5259 = vrot.lane.b32.xlu1 %v10623_v16, %s12257_s2 }
 0xafc   : > { %v4778_v39 = vpop.f32.mrf.mxu0  ;;  %7974 = vmatpush3.bf16.msra.mxu1 %v10764_v45 }
 0xafd   : > { %v10695_v49 = vpack.c.bf16 %v4778_v39, %v4775_v22  ;;  %v5246_v38 = vpop.permute.xlu1 %5245 }
 0xafe   : > { %v4780_v31 = vpop.f32.mrf.mxu0 }
 0xaff   : > { %5263 = vrot.lane.b32.xlu1 %v4891_v4, %s12258_s29  ;;  %4956 = vrot.lane.b32.xlu0 %v10695_v49, %s12082_s5  ;;  %v5306_v4 = vsel %vm2954_vm5, %v5301_v11, %v5246_v38  ;;  %v10774_v38 = vld [vmem:[%s12041_s21 + $0x48] sm:$0xff]   ;;  %v10789_v11 = vld [vmem:[%s12041_s21 + $0x40] sm:$0xff]  }
 0xb00   : > { %v4783_v7 = vpop.f32.mrf.mxu0  ;;  %v10779_v31 = vld [vmem:[%s12041_s21 + $0x8] sm:$0xff]   ;;  %7975 = vmatprep.subr.bf16.mxu1 %v10774_v38 }
 0xb01   : > { %v4921_v61 = vpop.permute.xlu1 %4920  ;;  %7976 = vmatpush3.bf16.msra.mxu1 %v10779_v31 }
 0xb02   : > { %v10707_v23 = vsel %vm2954_vm5, %v4999_v17, %v4921_v61  ;;  %v4785_v50 = vpop.f32.mrf.mxu0  ;;  %7977 = vmatprep.subr.bf16.mxu1 %v10789_v11 }
 0xb03   : > { %5267 = vrot.lane.b32.xlu1 %v4893_v1, %s12259_s28 }
 0xb04   : > { %v4786_v16 = vpop.f32.mrf.mxu0 }
 0xb05   : > { %v4898_v15 = vpack.c.bf16 %v4786_v16, %v4783_v7 }
 0xb06   : > { %v4788_v12 = vpop.f32.mrf.mxu0 }
 0xb07   : > { %5453 = vperm.xlu1 %8102, %v5435_v34   ;;  %4960 = vrot.lane.b32.xlu0 %v4898_v15, %s12255_s24 }
 0xb08   : > { %v4791_v48 = vpop.f32.mrf.mxu0 }
 0xb09   : > { %v10725_v46 = vpop.permute.xlu1 %4924 }
 0xb0a   : > { %v4793_v19 = vpop.f32.mrf.mxu0 }
 0xb0b   : > { %5443 = vperm.xlu1 %8102, %v5433_v53   ;;  %5275 = vrot.lane.b32.xlu0 %v4898_v15, %s12260_s8 }
 0xb0c   : > { %v4794_v54 = vpop.f32.mrf.mxu0 }
 0xb0d   : > { %v10731_v20 = vpack.c.bf16 %v4794_v54, %v4791_v48  ;;  %v5250_v28 = vpop.permute.xlu1 %5249  ;;  %v10794_v54 = vld [vmem:[%s12041_s21] sm:$0xff]  }
 0xb0e   : > { %v10734_v5 = vsel %vm5004_vm7, %v5306_v4, %v5250_v28  ;;  %v4796_v2 = vpop.f32.mrf.mxu0  ;;  %7978 = vmatpush3.bf16.msra.mxu1 %v10794_v54 }
 0xb0f   : > { %4962 = vrot.lane.b32.xlu0 %v10731_v20, %s12255_s24  ;;  %7991 = vmatprep.subr.bf16.mxu1 %v10632_v8 }
 0xb10   : > { %v4799_v47 = vpop.f32.mrf.mxu0 }
 0xb12   : > { %v4801_v35 = vpop.f32.mrf.mxu0 }
 0xb14   : > { %v4802_v24 = vpop.f32.mrf.mxu0 }
 0xb15   : > { %v4900_v29 = vpack.c.bf16 %v4802_v24, %v4799_v47 }
 0xb16   : > { %v4804_v1 = vpop.f32.mrf.mxu0 }
 0xb17   : > { %4966 = vrot.lane.b32.xlu0 %v4900_v29, %s12256_s27 }
 0xb18   : > { %v4807_v43 = vpop.f32.mrf.mxu0 }
 0xb1a   : > { %v4809_v52 = vpop.f32.mrf.mxu0 }
 0xb1b   : > { %5279 = vrot.lane.b32.xlu0 %v4900_v29, %s12255_s24 }
 0xb1c   : > { %v4810_v42 = vpop.f32.mrf.mxu0 }
 0xb1d   : > { %v10752_v0 = vpack.c.bf16 %v4810_v42, %v4807_v43 }
 0xb1e   : > { %v4812_v36 = vpop.f32.mrf.mxu0 }
 0xb1f   : > { %4968 = vrot.lane.b32.xlu0 %v10752_v0, %s12256_s27 }
 0xb20   : > { %v4815_v60 = vpop.f32.mrf.mxu0 }
 0xb22   : > { %v4817_v56 = vpop.f32.mrf.mxu0 }
 0xb24   : > { %v4818_v51 = vpop.f32.mrf.mxu0 }
 0xb25   : > { %v4902_v62 = vpack.c.bf16 %v4818_v51, %v4815_v60 }
 0xb26   : > { %v4820_v27 = vpop.f32.mrf.mxu0 }
 0xb27   : > { %4972 = vrot.lane.b32.xlu0 %v4902_v62, %s12257_s2 }
 0xb28   : > { %v4823_v17 = vpop.f32.mrf.mxu0 }
 0xb2a   : > { %v4825_v9 = vpop.f32.mrf.mxu0 }
 0xb2b   : > { %5283 = vrot.lane.b32.xlu0 %v4902_v62, %s12256_s27 }
 0xb2c   : > { %v4826_v33 = vpop.f32.mrf.mxu0 }
 0xb2d   : > { %v4903_v26 = vpack.c.bf16 %v4826_v33, %v4823_v17 }
 0xb2e   : > { %v4828_v22 = vpop.f32.mrf.mxu0 }
 0xb2f   : > { %4974 = vrot.lane.b32.xlu0 %v4903_v26, %s12257_s2 }
 0xb30   : > { %v4831_v41 = vpop.f32.mrf.mxu0 }
 0xb32   : > { %v4833_v39 = vpop.f32.mrf.mxu0 }
 0xb34   : > { %v4834_v7 = vpop.f32.mrf.mxu0 }
 0xb35   : > { %v4904_v61 = vpack.c.bf16 %v4834_v7, %v4831_v41  ;;  %v5434_v41 = vld [vmem:[%s10704_s26 + $0x10] sm:$0xff] }
 0xb36   : > { %v4836_v50 = vpop.f32.mrf.mxu0 }
 0xb37   : > { %4978 = vrot.lane.b32.xlu0 %v4904_v61, %s12258_s29 }
 0xb38   : > { %v4839_v16 = vpop.f32.mrf.mxu0 }
 0xb3a   : > { %v4841_v34 = vpop.f32.mrf.mxu0 }
 0xb3b   : > { %5287 = vrot.lane.b32.xlu0 %v4904_v61, %s12257_s2  ;;  %v5432_v61 = vld [vmem:[%s10704_s26] sm:$0xff]  ;;  %s10949_s26 = scalar_lea.vmem %s12032_s12, %s9458_s25 }
 0xb3c   : > { %v4842_v15 = vpop.f32.mrf.mxu0 }
 0xb3d   : > { %v4905_v12 = vpack.c.bf16 %v4842_v15, %v4839_v16 }
 0xb3e   : > { %v4844_v48 = vpop.f32.mrf.mxu0 }
 0xb3f   : > { %4980 = vrot.lane.b32.xlu0 %v4905_v12, %s12258_s29 }
 0xb40   : > { %v4847_v53 = vpop.f32.mrf.mxu0 }
 0xb42   : > { %v4849_v19 = vpop.f32.mrf.mxu0 }
 0xb44   : > { %v4850_v4 = vpop.f32.mrf.mxu0 }
 0xb45   : > { %v4906_v28 = vpack.c.bf16 %v4850_v4, %v4847_v53 }
 0xb46   : > { %v4852_v2 = vpop.f32.mrf.mxu0 }
 0xb47   : > { %4984 = vrot.lane.b32.xlu0 %v4906_v28, %s12259_s28 }
 0xb48   : > { %v4855_v47 = vpop.f32.mrf.mxu0 }
 0xb4a   : > { %v4857_v35 = vpop.f32.mrf.mxu0 }
 0xb4c   : > { %v4858_v24 = vpop.f32.mrf.mxu0 }
 0xb4d   : > { %v4907_v29 = vpack.c.bf16 %v4858_v24, %v4855_v47 }
 0xb4e   : > { %v4860_v1 = vpop.f32.mrf.mxu0 }
 0xb4f   : > { %4986 = vrot.lane.b32.xlu0 %v4907_v29, %s12259_s28 }
 0xb50   : > { %v4863_v43 = vpop.f32.mrf.mxu0 }
 0xb52   : > { %v4865_v52 = vpop.f32.mrf.mxu0 }
 0xb54   : > { %v4866_v42 = vpop.f32.mrf.mxu0 }
 0xb55   : > { %v4908_v36 = vpack.c.bf16 %v4866_v42, %v4863_v43 }
 0xb56   : > { %v4868_v60 = vpop.f32.mrf.mxu0 }
 0xb57   : > { %4990 = vrot.lane.b32.xlu0 %v4908_v36, %s12254_s3 }
 0xb58   : > { %v4871_v56 = vpop.f32.mrf.mxu0 }
 0xb59   : > { %v10809_v27 = vpop.permute.xlu0 %5271 }
 0xb5a   : > { %v4873_v51 = vpop.f32.mrf.mxu0 }
 0xb5b   : > { %5291 = vrot.lane.b32.xlu0 %v4906_v28, %s12258_s29 }
 0xb5c   : > { %v4874_v8 = vpop.f32.mrf.mxu0 }
 0xb5d   : > { %v4909_v17 = vpack.c.bf16 %v4874_v8, %v4871_v56  ;;  %v4996_v56 = vsel %vm2385_vm6, %v10577_v14, %v10663_v21 }
 0xb5e   : > { %v4876_v62 = vpop.f32.mrf.mxu0 }
 0xb5f   : > { %5273 = vrot.lane.b32.xlu0 %v10665_v18, %s12254_s3  ;;  %v5001_v62 = vsel %vm2954_vm5, %v4996_v56, %v10691_v40 }
 0xb63   : > { %5277 = vrot.lane.b32.xlu0 %v10731_v20, %s12260_s8  ;;  %s1040_s8 = scalar_lea.vmem %s12037_s17, %s12330_s30 }
 0xb67   : > { %5281 = vrot.lane.b32.xlu0 %v10752_v0, %s12255_s24  ;;  %s1043_s24 = scalar_lea.vmem %s12038_s18, %s12330_s30 }
 0xb69   : > { %v4955_v9 = vpop.permute.xlu0 %4954 }
 0xb6a   : > { %v5032_v60 = vsel %vm2385_vm6, %v10649_v25, %v4955_v9 }
 0xb6b   : > { %5295 = vrot.lane.b32.xlu0 %v4908_v36, %s12259_s28 }
 0xb6f   : > { %4992 = vrot.lane.b32.xlu0 %v4909_v17, %s12254_s3 }
 0xb71   : > { %v4957_v33 = vpop.permute.xlu0 %4956 }
 0xb72   : > { %v5035_v22 = vsel %vm2385_vm6, %v10665_v18, %v4957_v33  ;;  %v10826_v18 = vpop.permute.xlu1 %4926 }
 0xb73   : > { %5285 = vrot.lane.b32.xlu0 %v4903_v26, %s12256_s27  ;;  %s10942_s27 = scalar_lea.vmem %s12031_s11, %s9458_s25  ;;  %s11413_s25 = sshll.u32 %s12330_s30, 2 }
 0xb74   : > { %s1029_s5 = scalar_lea.vmem %s12034_s14, %s11413_s25  ;;  %s1037_s1 = scalar_lea.vmem %s12036_s16, %s11413_s25 }
 0xb76   : > { %v4931_v26 = vpop.permute.xlu1 %4930 }
 0xb77   : > { %5289 = vrot.lane.b32.xlu0 %v4905_v12, %s12257_s2 }
 0xb79   : > { %v4961_v20 = vpop.permute.xlu0 %4960 }
 0xb7a   : > { %v10828_v16 = vpop.permute.xlu1 %5253  ;;  %v5037_v51 = vsel %vm2954_vm5, %v5032_v60, %v4961_v20 }
 0xb7b   : > { %5293 = vrot.lane.b32.xlu0 %v4907_v29, %s12258_s29 }
 0xb7d   : > { %v10818_v0 = vpop.permute.xlu0 %5275 }
 0xb7e   : > { %v10832_v15 = vpop.permute.xlu1 %4932 }
 0xb7f   : > { %5297 = vrot.lane.b32.xlu0 %v4909_v17, %s12259_s28 }
 0xb81   : > { %v4963_v39 = vpop.permute.xlu0 %4962 }
 0xb82   : > { %v10823_v7 = vsel %vm2954_vm5, %v5035_v22, %v4963_v39  ;;  %v4937_v48 = vpop.permute.xlu1 %4936  ;;  %v5006_v22 = vsel %vm5004_vm7, %v5001_v62, %v10725_v46 }
 0xb83   : > { %5448 = vperm.xlu0 %8103, %v5434_v41   ;;  %v5010_v9 = vsel %vm1903_vm4, %v5006_v22, %v4931_v26 }
 0xb84   : > { %v5015_v21 = vsel %vm5013_vm8, %v5010_v9, %v4937_v48 }
 0xb86   : > { %v10834_v19 = vpop.permute.xlu1 %5257 }
 0xb87   : > { %5438 = vperm.xlu0 %8103, %v5432_v61  }
 0xb89   : > { %v4967_v50 = vpop.permute.xlu0 %4966 }
 0xb8a   : > { %v4939_v28 = vpop.permute.xlu1 %4938  ;;  %v5041_v33 = vsel %vm5004_vm7, %v5037_v51, %v4967_v50 }
 0xb8d   : > { %v10830_v34 = vpop.permute.xlu0 %5279 }
 0xb8e   : > { %v4943_v47 = vpop.permute.xlu1 %4942 }
 0xb8f   : > { %v5020_v41 = vsel %vm5018_vm9, %v5015_v21, %v4943_v47 }
 0xb91   : > { %v4969_v12 = vpop.permute.xlu0 %4968 }
 0xb92   : > { %v4945_v24 = vpop.permute.xlu1 %4944 }
 0xb96   : > { %v4949_v29 = vpop.permute.xlu1 %4948 }
 0xb97   : > { %v5025_v61 = vsel %vm5023_vm10, %v5020_v41, %v4949_v29 }
 0xb99   : > { %v4973_v53 = vpop.permute.xlu0 %4972 }
 0xb9a   : > { %v10838_v43 = vpop.permute.xlu1 %4950  ;;  %v5045_v25 = vsel %vm1903_vm4, %v5041_v33, %v4973_v53 }
 0xb9d   : > { %v10836_v4 = vpop.permute.xlu0 %5283 }
 0xb9e   : > { %v10840_v42 = vpop.permute.xlu1 %5261 }
 0xba1   : > { %v4975_v2 = vpop.permute.xlu0 %4974 }
 0xba2   : > { %v10850_v17 = vpop.permute.xlu1 %5265 }
 0xba6   : > { %v5244_v46 = vpop.permute.xlu1 %5243 }
 0xba9   : > { %v4979_v35 = vpop.permute.xlu0 %4978 }
 0xbaa   : > { %v5049_v14 = vsel %vm5013_vm8, %v5045_v25, %v4979_v35  ;;  %v5248_v48 = vpop.permute.xlu1 %5247 }
 0xbad   : > { %v5288_v1 = vpop.permute.xlu0 %5287 }
 0xbae   : > { %v5252_v47 = vpop.permute.xlu1 %5251 }
 0xbb1   : > { %v4981_v52 = vpop.permute.xlu0 %4980 }
 0xbb9   : > { %v4985_v36 = vpop.permute.xlu0 %4984 }
 0xbba   : > { %v5053_v40 = vsel %vm5018_vm9, %v5049_v14, %v4985_v36 }
 0xbc1   : > { %v4987_v8 = vpop.permute.xlu0 %4986 }
 0xbc9   : > { %v4991_v20 = vpop.permute.xlu0 %4990 }
 0xbca   : > { %v5057_v39 = vsel %vm5023_vm10, %v5053_v40, %v4991_v20 }
 0xbcb   : > { %5222 = vmatprep.mubr.bf16.mxu1 %v5057_v39 }
 0xbcc   : > { %5223 = vmatmul.mubr.bf16.vlgmr.msra.gmra.mxu1 %v5025_v61 }
 0xbcd   : > { %7992 = vmatpush3.bf16.msra.mxu1 %v10637_v32  ;;  %v5292_v26 = vpop.permute.xlu0 %5291 }
 0xbce   : > { %7993 = vmatprep.subr.bf16.mxu1 %v10647_v57  ;;  %v5333_v57 = vsel %vm2385_vm6, %v10809_v27, %v10678_v59 }
 0xbd1   : > { %7994 = vmatpush3.bf16.msra.mxu1 %v10655_v13  ;;  %v5274_v50 = vpop.permute.xlu0 %5273  ;;  %v5256_v13 = vpop.permute.xlu1 %5255 }
 0xbd2   : > { %7995 = vmatprep.subr.bf16.mxu1 %v10676_v44  ;;  %v5043_v44 = vsel %vm5004_vm7, %v10823_v7, %v4969_v12 }
 0xbd5   : > { %7996 = vmatpush3.bf16.msra.mxu1 %v10684_v3  ;;  %v5278_v53 = vpop.permute.xlu0 %5277  ;;  %v5008_v3 = vsel %vm5004_vm7, %v10707_v23, %v10826_v18 }
 0xbd6   : > { %7997 = vmatprep.subr.bf16.mxu1 %v10713_v58  ;;  %v5338_v58 = vsel %vm2954_vm5, %v5333_v57, %v10818_v0 }
 0xbd7   : > { %v5342_v59 = vsel %vm5004_vm7, %v5338_v58, %v10830_v34 }
 0xbd9   : > { %7998 = vmatpush3.bf16.msra.mxu1 %v10718_v10  ;;  %v5282_v35 = vpop.permute.xlu0 %5281  ;;  %v5047_v10 = vsel %vm1903_vm4, %v5043_v44, %v4975_v2 }
 0xbda   : > { %7999 = vmatprep.subr.bf16.mxu1 %v10741_v37  ;;  %v5012_v37 = vsel %vm1903_vm4, %v5008_v3, %v10832_v15 }
 0xbdb   : > { %v5017_v27 = vsel %vm5013_vm8, %v5012_v37, %v4939_v28 }
 0xbdc   : > { %v5022_v7 = vsel %vm5018_vm9, %v5017_v27, %v4945_v24 }
 0xbdd   : > { %8000 = vmatpush3.bf16.msra.mxu1 %v10746_v30  ;;  %v5296_v32 = vpop.permute.xlu0 %5295  ;;  %v5051_v30 = vsel %vm5013_vm8, %v5047_v10, %v4981_v52  ;;  %v5028_v12 = vsel %vm5023_vm10, %v5022_v7, %v10838_v43 }
 0xbde   : > { %8001 = vmatprep.subr.bf16.mxu1 %v10759_v63  ;;  %v5346_v63 = vsel %vm1903_vm4, %v5342_v59, %v10836_v4  ;;  %v5055_v23 = vsel %vm5018_vm9, %v5051_v30, %v4987_v8  ;;  %v5260_v4 = vpop.permute.xlu1 %5259 }
 0xbdf   : > { %v5350_v18 = vsel %vm5013_vm8, %v5346_v63, %v5288_v1 }
 0xbe0   : > { %v5354_v34 = vsel %vm5018_vm9, %v5350_v18, %v5292_v26 }
 0xbe1   : > { %8002 = vmatpush3.bf16.msra.mxu1 %v10764_v45  ;;  %v4993_v0 = vpop.permute.xlu0 %4992  ;;  %v5358_v28 = vsel %vm5023_vm10, %v5354_v34, %v5296_v32 }
 0xbe2   : > { %v5060_v15 = vsel %vm5023_vm10, %v5055_v23, %v4993_v0  ;;  %8003 = vmatprep.subr.bf16.mxu1 %v10774_v38  ;;  %v5314_v38 = vsel %vm1903_vm4, %v10734_v5, %v10828_v16  ;;  %v5264_v1 = vpop.permute.xlu1 %5263  ;;  %v5304_v5 = vsel %vm2385_vm6, %v5244_v46, %v10593_v6 }
 0xbe3   : > { %5230 = vmatprep.mubr.bf16.mxu1 %v5060_v15  ;;  %v5318_v2 = vsel %vm5013_vm8, %v5314_v38, %v10834_v19  ;;  %v5462_v38 = vld [vmem:[%s10942_s27 + $0x10] sm:$0xff] }
 0xbe4   : > { %5231 = vmatmul.mubr.bf16.gmra.mxu1 %v5028_v12  ;;  %v5322_v29 = vsel %vm5018_vm9, %v5318_v2, %v10840_v42  ;;  %v5466_v2 = vld [vmem:[%s10949_s26 + $0x10] sm:$0xff] }
 0xbe5   : > { %8004 = vmatpush3.bf16.msra.mxu1 %v10779_v31  ;;  %5395 = vmatprep.mubr.bf16.mxu1 %v5358_v28  ;;  %v5286_v45 = vpop.permute.xlu0 %5285  ;;  %v5326_v31 = vsel %vm5023_vm10, %v5322_v29, %v10850_v17  ;;  %v5463_v29 = vld [vmem:[%s10942_s27 + $0x18] sm:$0xff] }
 0xbe6   : > { %8005 = vmatprep.subr.bf16.mxu1 %v10789_v11  ;;  %v5336_v11 = vsel %vm2385_vm6, %v5274_v50, %v10695_v49  ;;  %v5268_v60 = vpop.permute.xlu1 %5267 }
 0xbe7   : > { %v5340_v16 = vsel %vm2954_vm5, %v5336_v11, %v5278_v53 }
 0xbe8   : > { %v5344_v43 = vsel %vm5004_vm7, %v5340_v16, %v5282_v35 }
 0xbe9   : > { %8006 = vmatpush3.bf16.msra.mxu1 %v10794_v54  ;;  %v5290_v24 = vpop.permute.xlu0 %5289  ;;  %v5308_v54 = vsel %vm2954_vm5, %v5304_v5, %v5248_v48  ;;  %v5348_v42 = vsel %vm1903_vm4, %v5344_v43, %v5286_v45 }
 0xbea   : > { %v5312_v52 = vsel %vm5004_vm7, %v5308_v54, %v5252_v47  ;;  %v5352_v49 = vsel %vm5013_vm8, %v5348_v42, %v5290_v24  ;;  %v5454_v37 = vpop.permute.xlu1 %5453  ;;  %v5467_v24 = vld [vmem:[%s10949_s26 + $0x18] sm:$0xff] }
 0xbeb   : > { %v5316_v36 = vsel %vm1903_vm4, %v5312_v52, %v5256_v13 }
 0xbec   : > { %5396 = vmatmul.mubr.bf16.vlgmr.msra.gmra.mxu1 %v5326_v31  ;;  %v5320_v56 = vsel %vm5013_vm8, %v5316_v36, %v5260_v4 }
 0xbed   : > { %v5294_v19 = vpop.permute.xlu0 %5293  ;;  %v5324_v8 = vsel %vm5018_vm9, %v5320_v56, %v5264_v1 }
 0xbee   : > { %v5356_v6 = vsel %vm5018_vm9, %v5352_v49, %v5294_v19  ;;  %v5329_v17 = vsel %vm5023_vm10, %v5324_v8, %v5268_v60  ;;  %v5444_v30 = vpop.permute.xlu1 %5443  ;;  %v5461_v8 = vld [vmem:[%s10942_s27 + $0x8] sm:$0xff] }
 0xbf1   : > { %v5298_v51 = vpop.permute.xlu0 %5297 }
 0xbf2   : > { %v5361_v62 = vsel %vm5023_vm10, %v5356_v6, %v5298_v51 }
 0xbf3   : > { %5403 = vmatprep.mubr.bf16.mxu1 %v5361_v62  ;;  %v5465_v62 = vld [vmem:[%s10949_s26 + $0x8] sm:$0xff] }
 0xbf4   : > { %5404 = vmatmul.mubr.bf16.gmra.mxu1 %v5329_v17  ;;  %v5460_v17 = vld [vmem:[%s10942_s27] sm:$0xff] }
 0xbfe   : > { %v5449_v10 = vpop.permute.xlu0 %5448 }
 0xc02   : > { %v5439_v59 = vpop.permute.xlu0 %5438 }
 0xc8c   : > { %v7979_v33 = vpop.f32.mrf.mxu1 }
 0xc8e   : > { %v7980_v22 = vpop.f32.mrf.mxu1 }
 0xc8f   : > { %v7981_v25 = vadd.f32 %v7980_v22, %v7979_v33  ;;  %v5464_v33 = vld [vmem:[%s10949_s26] sm:$0xff] }
 0xc90   : > { %v7982_v9 = vpop.f32.mrf.mxu1  ;;  %v8408_v22 = vld [vmem:[%s10962_s6] sm:$0xff]  }
 0xc91   : > { %8075 = vmatprep.mubr.msk.bf16.mxu1 %vm2954_vm5, %v8408_v22  ;;  %v11098_v22 = vld [vmem:[%s12042_s22 + $0x40] ss:$8 sps:$4 sm:$0xff]  }
 0xc92   : > { %v7983_v14 = vpop.f32.mrf.mxu1 }
 0xc93   : > { %v7984_v21 = vadd.f32 %v7983_v14, %v7982_v9 }
 0xca4   : > { %v7985_v40 = vpop.f32.mrf.mxu1 }
 0xca6   : > { %v7986_v20 = vpop.f32.mrf.mxu1 }
 0xca7   : > { %v7987_v41 = vadd.f32 %v7986_v20, %v7985_v40 }
 0xca8   : > { %v7988_v39 = vpop.f32.mrf.mxu1 }
 0xcaa   : > { %v7989_v61 = vpop.f32.mrf.mxu1 }
 0xcab   : > { %v7990_v46 = vadd.f32 %v7989_v61, %v7988_v39 }
 0xcac   : > { %v8007_v26 = vpop.f32.mrf.mxu1 }
 0xcae   : > { %v8008_v50 = vpop.f32.mrf.mxu1 }
 0xcaf   : > { %v8009_v44 = vadd.f32 %v8008_v50, %v8007_v26 }
 0xcb0   : > { %v8010_v48 = vpop.f32.mrf.mxu1 }
 0xcb2   : > { %v8011_v53 = vpop.f32.mrf.mxu1 }
 0xcb3   : > { %v8012_v58 = vadd.f32 %v8011_v53, %v8010_v48 }
 0xcb4   : > { %v8013_v47 = vpop.f32.mrf.mxu1 }
 0xcb6   : > { %v8014_v35 = vpop.f32.mrf.mxu1 }
 0xcb7   : > { %v8015_v32 = vadd.f32 %v8014_v35, %v8013_v47 }
 0xcb8   : > { %v8016_v57 = vpop.f32.mrf.mxu1 }
 0xcb9   : > { %5420 = vrot.lane.b32.xlu0 %v8015_v32, %s12257_s2 }
 0xcba   : > { %v8017_v13 = vpop.f32.mrf.mxu1 }
 0xcbb   : > { %v8018_v3 = vadd.f32 %v8017_v13, %v8016_v57 }
 0xcbd   : > { %5422 = vrot.lane.b32.xlu1 %v8018_v3, %s12257_s2  ;;  %5416 = vrot.lane.b32.xlu0 %v8009_v44, %s12257_s2 }
 0xcc1   : > { %5418 = vrot.lane.b32.xlu1 %v8012_v58, %s12257_s2 }
 0xd2b   : > { %v5421_v27 = vpop.permute.xlu0 %5420 }
 0xd2c   : > { %v5430_v63 = vsel %vm1903_vm4, %v7987_v41, %v5421_v27 }
 0xd2d   : > { %v5458_v23 = vadd.f32 %v5449_v10, %v5430_v63 }
 0xd2f   : > { %v5423_v0 = vpop.permute.xlu1 %5422  ;;  %5472 = vadd.xlane.f32.xlu0 %v5458_v23  ;;  %v5417_v7 = vpop.permute.xlu0 %5416 }
 0xd30   : > { %v5431_v18 = vsel %vm1903_vm4, %v7990_v46, %v5423_v0  ;;  %v5428_v15 = vsel %vm1903_vm4, %v7981_v25, %v5417_v7 }
 0xd31   : > { %v5459_v34 = vadd.f32 %v5454_v37, %v5431_v18  ;;  %v5456_v12 = vadd.f32 %v5439_v59, %v5428_v15 }
 0xd33   : > { %5474 = vadd.xlane.f32.xlu1 %v5459_v34  ;;  %v5419_v4 = vpop.permute.xlu1 %5418  ;;  %5468 = vadd.xlane.f32.xlu0 %v5456_v12 }
 0xd34   : > { %v5429_v28 = vsel %vm1903_vm4, %v7984_v21, %v5419_v4 }
 0xd35   : > { %v5457_v45 = vadd.f32 %v5444_v30, %v5429_v28 }
 0xd37   : > { %5470 = vadd.xlane.f32.xlu0 %v5457_v45 }
 0xd44   : > { %5524 = vperm.xlu1 %8102, %v5462_v38   ;;  %v8409_v38 = vld [vmem:[%s10962_s6 + $0x8] sm:$0xff]  }
 0xd48   : > { %5548 = vperm.xlu1 %8102, %v5466_v2   ;;  %v8410_v2 = vld [vmem:[%s10962_s6 + $0x10] sm:$0xff]  }
 0xd4c   : > { %5553 = vperm.xlu1 %8102, %v5467_v24   ;;  %v8411_v24 = vld [vmem:[%s10962_s6 + $0x18] sm:$0xff]   ;;  %s1047_s6 = scalar_lea.vmem %s12043_s23, %s11413_s25 }
 0xd4d   : > { %5529 = vperm.xlu0 %8103, %v5463_v29   ;;  %v10975_v29 = vld [vmem:[%s12042_s22 + $0x270] ss:$8 sps:$4 sm:$0xff]  }
 0xdb8   : > { %v5473_v1 = vpop.xlane.xlu0 %5472 }
 0xdb9   : > { %v5478_v11 = vmul.f32 0.0078125, %v5473_v1  ;;  %v10980_v1 = vld [vmem:[%s12042_s22 + $0x274] ss:$8 sps:$4 sm:$0xff]  }
 0xdba   : > { %6585 = vmatprep.subr.bf16.mxu0 %v10980_v1 }
 0xdbb   : > { %v5482_v43 = vsub.f32 %v5458_v23, %v5478_v11  ;;  %6586 = vmatpush1.bf16.msra.mxu0 %v10975_v29  ;;  %v10992_v11 = vld [vmem:[%s12042_s22 + $0x264] ss:$8 sps:$4 sm:$0xff]  }
 0xdbc   : > { %v5469_v31 = vpop.xlane.xlu0 %5468  ;;  %v5475_v16 = vpop.xlane.xlu1 %5474  ;;  %6587 = vmatprep.subr.bf16.mxu0 %v10992_v11 }
 0xdbd   : > { %v5476_v5 = vmul.f32 0.0078125, %v5469_v31  ;;  %v5479_v52 = vmul.f32 0.0078125, %v5475_v16  ;;  %v5486_v56 = vmul.f32 %v5482_v43, %v5482_v43  ;;  %v10987_v31 = vld [vmem:[%s12042_s22 + $0x260] ss:$8 sps:$4 sm:$0xff]   ;;  %v11004_v16 = vld [vmem:[%s12042_s22 + $0x254] ss:$8 sps:$4 sm:$0xff]  }
 0xdbf   : > { %v5480_v19 = vsub.f32 %v5456_v12, %v5476_v5  ;;  %v5483_v49 = vsub.f32 %v5459_v34, %v5479_v52  ;;  %6588 = vmatpush1.bf16.msra.mxu0 %v10987_v31  ;;  %v10999_v5 = vld [vmem:[%s12042_s22 + $0x250] ss:$8 sps:$4 sm:$0xff]   ;;  %v11026_v52 = vld [vmem:[%s12042_s22 + $0x74] ss:$8 sps:$4 sm:$0xff]  }
 0xdc0   : > { %v5471_v54 = vpop.xlane.xlu0 %5470  ;;  %v5525_v25 = vpop.permute.xlu1 %5524  ;;  %6589 = vmatprep.subr.bf16.mxu0 %v11004_v16 }
 0xdc1   : > { %v5477_v42 = vmul.f32 0.0078125, %v5471_v54  ;;  %v5484_v36 = vmul.f32 %v5480_v19, %v5480_v19  ;;  %v5487_v51 = vmul.f32 %v5483_v49, %v5483_v49  ;;  %v11016_v54 = vld [vmem:[%s12042_s22 + $0x244] ss:$8 sps:$4 sm:$0xff]  }
 0xdc3   : > { %v5481_v60 = vsub.f32 %v5457_v45, %v5477_v42  ;;  %5488 = vadd.xlane.f32.xlu1 %v5484_v36  ;;  %6590 = vmatpush1.bf16.msra.mxu0 %v10999_v5  ;;  %v11031_v42 = vld [vmem:[%s12042_s22 + $0x64] ss:$8 sps:$4 sm:$0xff]   ;;  %v11037_v36 = vld [vmem:[%s12042_s22 + $0x234] ss:$8 sps:$4 sm:$0xff]  }
 0xdc4   : > { %v5549_v9 = vpop.permute.xlu1 %5548  ;;  %6591 = vmatprep.subr.bf16.mxu0 %v11016_v54 }
 0xdc5   : > { %v5485_v6 = vmul.f32 %v5481_v60, %v5481_v60 }
 0xdc7   : > { %5492 = vadd.xlane.f32.xlu1 %v5486_v56  ;;  %5490 = vadd.xlane.f32.xlu0 %v5485_v6  ;;  %v11057_v56 = vld [vmem:[%s12042_s22 + $0x54] ss:$8 sps:$4 sm:$0xff]   ;;  %v11062_v6 = vld [vmem:[%s12042_s22 + $0x224] ss:$8 sps:$4 sm:$0xff]  }
 0xdc8   : > { %v5554_v14 = vpop.permute.xlu1 %5553  ;;  %v5530_v21 = vpop.permute.xlu0 %5529 }
 0xdcb   : > { %5494 = vadd.xlane.f32.xlu0 %v5487_v51  ;;  %v11068_v51 = vld [vmem:[%s12042_s22 + $0x220] ss:$8 sps:$4 sm:$0xff]  }
 0xdd8   : > { %5519 = vperm.xlu1 %8102, %v5461_v8   ;;  %v11074_v8 = vld [vmem:[%s12042_s22 + $0x50] ss:$8 sps:$4 sm:$0xff]  }
 0xddc   : > { %5543 = vperm.xlu1 %8102, %v5465_v62   ;;  %v11080_v62 = vld [vmem:[%s12042_s22 + $0x214] ss:$8 sps:$4 sm:$0xff]  }
 0xde1   : > { %5514 = vperm.xlu0 %8103, %v5460_v17   ;;  %v11086_v17 = vld [vmem:[%s12042_s22 + $0x44] ss:$8 sps:$4 sm:$0xff]  }
 0xde5   : > { %5538 = vperm.xlu0 %8103, %v5464_v33   ;;  %v11092_v33 = vld [vmem:[%s12042_s22 + $0x210] ss:$8 sps:$4 sm:$0xff]  }
 0xe4c   : > { %v5489_v40 = vpop.xlane.xlu1 %5488 }
 0xe4d   : > { %v5496_v20 = vmul.f32 0.0078125, %v5489_v40  ;;  %v11128_v40 = vld [vmem:[%s12042_s22 + $0x2f4] ss:$8 sps:$4 sm:$0xff]  }
 0xe4f   : > { %v5500_v41 = vadd.f32 1e-05, %v5496_v20  ;;  %v11134_v20 = vld [vmem:[%s12042_s22 + $0x24] ss:$8 sps:$4 sm:$0xff]  }
 0xe50   : > { %v5493_v39 = vpop.xlane.xlu1 %5492  ;;  %v5491_v61 = vpop.xlane.xlu0 %5490 }
 0xe51   : > { %v5498_v46 = vmul.f32 0.0078125, %v5493_v39  ;;  %v5497_v26 = vmul.f32 0.0078125, %v5491_v61  ;;  %8676 = vrsqrt.f32 %v5500_v41  ;;  %v11140_v41 = vld [vmem:[%s12042_s22 + $0x2f0] ss:$8 sps:$4 sm:$0xff]   ;;  %v11146_v39 = vld [vmem:[%s12042_s22 + $0x20] ss:$8 sps:$4 sm:$0xff]  }
 0xe52   : > { %12261 = vst [vmem:[#allocation2_spill] sm:$0xff] %v11140_v41  ;;  %v11152_v61 = vld [vmem:[%s12042_s22 + $0x2e4] ss:$8 sps:$4 sm:$0xff]  }
 0xe53   : > { %v5502_v50 = vadd.f32 1e-05, %v5498_v46  ;;  %v5501_v48 = vadd.f32 1e-05, %v5497_v26  ;;  %12262 = vst [vmem:[#allocation4_spill] sm:$0xff] %v11152_v61 }
 0xe54   : > { %v5495_v53 = vpop.xlane.xlu0 %5494  ;;  %v5520_v3 = vpop.permute.xlu1 %5519  ;;  %v11158_v46 = vld [vmem:[%s12042_s22 + $0x14] ss:$8 sps:$4 sm:$0xff]   ;;  %v11164_v26 = vld [vmem:[%s12042_s22 + $0x2e0] ss:$8 sps:$4 sm:$0xff]  }
 0xe55   : > { %8678 = vrsqrt.f32 %v5502_v50  ;;  %v5499_v47 = vmul.f32 0.0078125, %v5495_v53  ;;  %12263 = vst [vmem:[#allocation3_spill] sm:$0xff] %v11164_v26  ;;  %v11170_v50 = vld [vmem:[%s12042_s22 + $0x10] ss:$8 sps:$4 sm:$0xff]   ;;  %v11182_v53 = vld [vmem:[%s12042_s22 + $0x4] ss:$8 sps:$4 sm:$0xff]  }
 0xe56   : > { %8680 = vrsqrt.f32 %v5501_v48  ;;  %v11176_v48 = vld [vmem:[%s12042_s22 + $0x2d4] ss:$8 sps:$4 sm:$0xff]  }
 0xe57   : > { %v5503_v35 = vadd.f32 1e-05, %v5499_v47  ;;  %12264 = vst [vmem:[#allocation5_spill] sm:$0xff] %v11176_v48  ;;  %v11188_v47 = vld [vmem:[%s12042_s22 + $0x2d0] ss:$8 sps:$4 sm:$0xff]  }
 0xe58   : > { %v5544_v7 = vpop.permute.xlu1 %5543  ;;  %12265 = vst [vmem:[#allocation6_spill] sm:$0xff] %v11188_v47 }
 0xe59   : > { %8682 = vrsqrt.f32 %v5503_v35  ;;  %v11194_v35 = vld [vmem:[%s12042_s22] ss:$8 sps:$4 sm:$0xff]  }
 0xe5c   : > { %v5515_v59 = vpop.permute.xlu0 %5514 }
 0xe5e   : > { %v8677_v32 = vpop.eup %8676 }
 0xe5f   : > { %v5508_v10 = vmul.f32 %v8677_v32, %v5480_v19  ;;  %v11011_v19 = vld [vmem:[%s12042_s22 + $0x240] ss:$8 sps:$4 sm:$0xff]   ;;  %v11200_v32 = vld [vmem:[%s12042_s22 + $0x2c4] ss:$8 sps:$4 sm:$0xff]  }
 0xe60   : > { %v5539_v12 = vpop.permute.xlu0 %5538  ;;  %6592 = vmatpush1.bf16.msra.mxu0 %v11011_v19  ;;  %12266 = vst [vmem:[#allocation8_spill] sm:$0xff] %v11200_v32 }
 0xe61   : > { %v5532_v23 = vmul.f32 %v5515_v59, %v5508_v10  ;;  %6593 = vmatprep.subr.bf16.mxu0 %v11037_v36  ;;  %v11236_v10 = vld [vmem:[%s12042_s22 + $0x2b0] ss:$8 sps:$4 sm:$0xff]   ;;  %v11248_v59 = vld [vmem:[%s12042_s22 + $0x2a4] ss:$8 sps:$4 sm:$0xff]  }
 0xe62   : > { %v8679_v57 = vpop.eup %8678  ;;  %12269 = vst [vmem:[#allocation10_spill] sm:$0xff] %v11236_v10  ;;  %12270 = vst [vmem:[#allocation12_spill] sm:$0xff] %v11248_v59 }
 0xe63   : > { %v8681_v13 = vpop.eup %8680  ;;  %v5510_v44 = vmul.f32 %v8679_v57, %v5482_v43  ;;  %v5556_v4 = vadd.f32 %v5539_v12, %v5532_v23  ;;  %v11021_v43 = vld [vmem:[%s12042_s22 + $0x70] ss:$8 sps:$4 sm:$0xff]   ;;  %v11206_v57 = vld [vmem:[%s12042_s22 + $0xf4] ss:$8 sps:$4 sm:$0xff]   ;;  %v11273_v23 = vld [vmem:[%s12042_s22 + $0xc4] ss:$8 sps:$4 sm:$0xff]  }
 0xe64   : > { %v5509_v58 = vmul.f32 %v8681_v13, %v5481_v60  ;;  %v11044_v60 = vld [vmem:[%s12042_s22 + $0x230] ss:$8 sps:$4 sm:$0xff]   ;;  %v11212_v13 = vld [vmem:[%s12042_s22 + $0x2c0] ss:$8 sps:$4 sm:$0xff]   ;;  %v11310_v12 = vld [vmem:[%s12042_s22 + $0x94] ss:$8 sps:$4 sm:$0xff]  }
 0xe65   : > { %v5534_v63 = vmul.f32 %v5525_v25, %v5510_v44  ;;  %6594 = vmatpush1.bf16.msra.mxu0 %v11044_v60  ;;  %v11104_v25 = vld [vmem:[%s12042_s22 + $0x204] ss:$8 sps:$4 sm:$0xff]   ;;  %12267 = vst [vmem:[#allocation7_spill] sm:$0xff] %v11212_v13  ;;  %v11218_v44 = vld [vmem:[%s12042_s22 + $0xf0] ss:$8 sps:$4 sm:$0xff]  }
 0xe66   : > { %v8683_v37 = vpop.eup %8682  ;;  %v5533_v30 = vmul.f32 %v5520_v3, %v5509_v58  ;;  %6595 = vmatprep.subr.bf16.mxu0 %v11062_v6  ;;  %v11224_v3 = vld [vmem:[%s12042_s22 + $0x2b4] ss:$8 sps:$4 sm:$0xff]   ;;  %v11230_v58 = vld [vmem:[%s12042_s22 + $0xe4] ss:$8 sps:$4 sm:$0xff]  }
 0xe67   : > { %v5511_v27 = vmul.f32 %v8683_v37, %v5483_v49  ;;  %v5558_v15 = vadd.f32 %v5549_v9, %v5534_v63  ;;  %v11050_v49 = vld [vmem:[%s12042_s22 + $0x60] ss:$8 sps:$4 sm:$0xff]   ;;  %v11110_v9 = vld [vmem:[%s12042_s22 + $0x34] ss:$8 sps:$4 sm:$0xff]   ;;  %12268 = vst [vmem:[#allocation9_spill] sm:$0xff] %v11224_v3 }
 0xe68   : > { %v5557_v18 = vadd.f32 %v5544_v7, %v5533_v30  ;;  %v11242_v37 = vld [vmem:[%s12042_s22 + $0xe0] ss:$8 sps:$4 sm:$0xff]   ;;  %v11254_v30 = vld [vmem:[%s12042_s22 + $0xd4] ss:$8 sps:$4 sm:$0xff]   ;;  %v11266_v63 = vld [vmem:[%s12042_s22 + $0xd0] ss:$8 sps:$4 sm:$0xff]  }
 0xe69   : > { %v5535_v0 = vmul.f32 %v5530_v21, %v5511_v27  ;;  %6596 = vmatpush1.bf16.msra.mxu0 %v11068_v51  ;;  %v11122_v21 = vld [vmem:[%s12042_s22 + $0x30] ss:$8 sps:$4 sm:$0xff]   ;;  %v11260_v27 = vld [vmem:[%s12042_s22 + $0x2a0] ss:$8 sps:$4 sm:$0xff]   ;;  %v11286_v7 = vld [vmem:[%s12042_s22 + $0xb4] ss:$8 sps:$4 sm:$0xff]  }
 0xe6a   : > { %v5568_v45 = vpack.c.bf16 %v5557_v18, %v5556_v4  ;;  %6597 = vmatprep.subr.bf16.mxu0 %v11080_v62  ;;  %12271 = vst [vmem:[#allocation11_spill] sm:$0xff] %v11260_v27  ;;  %v11292_v18 = vld [vmem:[%s12042_s22 + $0xb0] ss:$8 sps:$4 sm:$0xff]  }
 0xe6b   : > { %v5559_v34 = vadd.f32 %v5554_v14, %v5535_v0  ;;  %v11116_v14 = vld [vmem:[%s12042_s22 + $0x200] ss:$8 sps:$4 sm:$0xff]   ;;  %v11316_v4 = vld [vmem:[%s12042_s22 + $0x90] ss:$8 sps:$4 sm:$0xff]  }
 0xe6c   : > { %v11280_v0 = vld [vmem:[%s12042_s22 + $0xc0] ss:$8 sps:$4 sm:$0xff]  }
 0xe6d   : > { %v5569_v28 = vpack.c.bf16 %v5559_v34, %v5558_v15  ;;  %6598 = vmatpush1.bf16.msra.mxu0 %v11092_v33  ;;  %v11298_v15 = vld [vmem:[%s12042_s22 + $0xa4] ss:$8 sps:$4 sm:$0xff]   ;;  %v11304_v34 = vld [vmem:[%s12042_s22 + $0xa0] ss:$8 sps:$4 sm:$0xff]  }
 0xe6e   : > { %6599 = vmatprep.subr.bf16.mxu0 %v11104_v25 }
 0xe6f   : > { %8071 = vmatprep.subr.bf16.mxu1 %v5569_v28 }
 0xe70   : > { %8072 = vmatpush3.bf16.msra.mxu1 %v5569_v28  ;;  %v11322_v28 = vld [vmem:[%s12042_s22 + $0x84] ss:$8 sps:$4 sm:$0xff]  }
 0xe71   : > { %8073 = vmatprep.subr.bf16.mxu1 %v5568_v45  ;;  %6600 = vmatpush1.bf16.msra.mxu0 %v11116_v14 }
 0xe72   : > { %6601 = vmatprep.subr.bf16.mxu0 %v11128_v40 }
 0xe74   : > { %8074 = vmatpush3.bf16.msra.mxu1 %v5568_v45  ;;  %v11328_v45 = vld [vmem:[%s12042_s22 + $0x80] ss:$8 sps:$4 sm:$0xff]  }
 0xe75   : > { %6503 = vmatprep.subr.bf16.mxu1 %v11026_v52  ;;  %6602 = vmatpush2.bf16.msra.mxu0 %v11140_v41  ;;  %v11447_v41 = vld [vmem:[%s12042_s22 + $0x160] ss:$8 sps:$4 sm:$0xff]  }
 0xe76   : > { %6603 = vmatprep.subr.bf16.mxu0 %v11152_v61 }
 0xe77   : > { %8076 = vmatmul.mubr.msk.bf16.vlgmr.msra.gmra.mxu1 %vm2954_vm5, %v8409_v38  ;;  %v11335_v38 = vld [vmem:[%s12042_s22 + $0x174] ss:$8 sps:$4 sm:$0xff]  }
 0xe78   : > { %8079 = vmatprep.mubr.msk.bf16.mxu1 %vm2954_vm5, %v8410_v2  ;;  %6504 = vmatpush1.bf16.msra.mxu1 %v11021_v43  ;;  %12272 = vst [vmem:[#allocation13_spill] sm:$0xff] %v11335_v38  ;;  %v11340_v2 = vld [vmem:[%s12042_s22 + $0x294] ss:$8 sps:$4 sm:$0xff]  }
 0xe79   : > { %6505 = vmatprep.subr.bf16.mxu1 %v11031_v42  ;;  %6604 = vmatpush2.bf16.msra.mxu0 %v11164_v26  ;;  %12273 = vst [vmem:[#allocation14_spill] sm:$0xff] %v11340_v2 }
 0xe7a   : > { %6605 = vmatprep.subr.bf16.mxu0 %v11176_v48 }
 0xe7c   : > { %6506 = vmatpush1.bf16.msra.mxu1 %v11050_v49 }
 0xe7d   : > { %6507 = vmatprep.subr.bf16.mxu1 %v11057_v56  ;;  %6606 = vmatpush2.bf16.msra.mxu0 %v11188_v47 }
 0xe7e   : > { %6607 = vmatprep.subr.bf16.mxu0 %v11200_v32 }
 0xe7f   : > { %8080 = vmatmul.mubr.msk.bf16.gmra.mxu1 %vm2954_vm5, %v8411_v24  ;;  %v11345_v24 = vld [vmem:[%s12042_s22 + $0x290] ss:$8 sps:$4 sm:$0xff]  }
 0xe80   : > { %6508 = vmatpush1.bf16.msra.mxu1 %v11074_v8  ;;  %12274 = vst [vmem:[#allocation15_spill] sm:$0xff] %v11345_v24 }
 0xe81   : > { %6509 = vmatprep.subr.bf16.mxu1 %v11086_v17  ;;  %6608 = vmatpush2.bf16.msra.mxu0 %v11212_v13 }
 0xe82   : > { %6609 = vmatprep.subr.bf16.mxu0 %v11224_v3 }
 0xe84   : > { %6510 = vmatpush1.bf16.msra.mxu1 %v11098_v22 }
 0xe85   : > { %6511 = vmatprep.subr.bf16.mxu1 %v11110_v9  ;;  %6610 = vmatpush2.bf16.msra.mxu0 %v11236_v10  ;;  %v11358_v10 = vld [vmem:[%s12042_s22 + $0x280] ss:$8 sps:$4 sm:$0xff]  }
 0xe86   : > { %6611 = vmatprep.subr.bf16.mxu0 %v11248_v59  ;;  %v11353_v59 = vld [vmem:[%s12042_s22 + $0x284] ss:$8 sps:$4 sm:$0xff]   ;;  %12276 = vst [vmem:[#allocation17_spill] sm:$0xff] %v11358_v10 }
 0xe87   : > { %12275 = vst [vmem:[#allocation16_spill] sm:$0xff] %v11353_v59 }
 0xe88   : > { %6512 = vmatpush1.bf16.msra.mxu1 %v11122_v21 }
 0xe89   : > { %6513 = vmatprep.subr.bf16.mxu1 %v11134_v20  ;;  %6612 = vmatpush2.bf16.msra.mxu0 %v11260_v27 }
 0xe8a   : > { %6613 = vmatprep.subr.bf16.mxu0 %v11340_v2 }
 0xe8c   : > { %6514 = vmatpush1.bf16.msra.mxu1 %v11146_v39 }
 0xe8d   : > { %6515 = vmatprep.subr.bf16.mxu1 %v11158_v46  ;;  %6614 = vmatpush2.bf16.msra.mxu0 %v11345_v24 }
 0xe8e   : > { %6615 = vmatprep.subr.bf16.mxu0 %v11353_v59 }
 0xe90   : > { %6516 = vmatpush1.bf16.msra.mxu1 %v11170_v50 }
 0xe91   : > { %6517 = vmatprep.subr.bf16.mxu1 %v11182_v53  ;;  %6616 = vmatpush2.bf16.msra.mxu0 %v11358_v10 }
 0xe92   : > { %6715 = vmatprep.subr.bf16.mxu0 %v11026_v52 }
 0xe94   : > { %6518 = vmatpush1.bf16.msra.mxu1 %v11194_v35 }
 0xe95   : > { %6519 = vmatprep.subr.bf16.mxu1 %v11206_v57 }
 0xe98   : > { %6520 = vmatpush2.bf16.msra.mxu1 %v11218_v44 }
 0xe99   : > { %6521 = vmatprep.subr.bf16.mxu1 %v11230_v58 }
 0xe9c   : > { %6522 = vmatpush2.bf16.msra.mxu1 %v11242_v37 }
 0xe9d   : > { %6523 = vmatprep.subr.bf16.mxu1 %v11254_v30 }
 0xea0   : > { %6524 = vmatpush2.bf16.msra.mxu1 %v11266_v63 }
 0xea1   : > { %6525 = vmatprep.subr.bf16.mxu1 %v11273_v23 }
 0xea4   : > { %6526 = vmatpush2.bf16.msra.mxu1 %v11280_v0 }
 0xea5   : > { %6527 = vmatprep.subr.bf16.mxu1 %v11286_v7 }
 0xea8   : > { %6528 = vmatpush2.bf16.msra.mxu1 %v11292_v18 }
 0xea9   : > { %6529 = vmatprep.subr.bf16.mxu1 %v11298_v15 }
 0xeac   : > { %6530 = vmatpush2.bf16.msra.mxu1 %v11304_v34 }
 0xead   : > { %6531 = vmatprep.subr.bf16.mxu1 %v11310_v12 }
 0xeb0   : > { %6532 = vmatpush2.bf16.msra.mxu1 %v11316_v4 }
 0xeb1   : > { %6533 = vmatprep.subr.bf16.mxu1 %v11322_v28 }
 0xeb4   : > { %6534 = vmatpush2.bf16.msra.mxu1 %v11328_v45 }
 0xeb5   : > { %6544 = vmatprep.subr.bf16.mxu1 %v11335_v38 }
 0xf37   : > { %v8077_v55 = vpop.f32.mrf.mxu1 }
 0xf39   : > { %v5636_v27 = vpop.f32.mrf.mxu1 }
 0xf3b   : > { %v8078_v3 = vpop.f32.mrf.mxu1 }
 0xf3c   : > { %v11365_v13 = vpack.c.bf16 %v8078_v3, %v8077_v55 }
 0xf3d   : > { %v5639_v38 = vpop.f32.mrf.mxu1 }
 0xf3e   : > { %v11363_v24 = vpack.c.bf16 %v5639_v38, %v5636_v27  ;;  %v12103_v52 = vrot.slane %v11365_v13, 6  ;;  %v12101_v27 = vrot.slane %v11365_v13, 2 }
 0xf3f   : > { %v8081_v2 = vpop.f32.mrf.mxu1 }
 0xf40   : > { %v12098_v32 = vrot.slane %v11363_v24, 6  ;;  %v12097_v47 = vrot.slane %v11363_v24, 2 }
 0xf41   : > { %v5652_v48 = vpop.f32.mrf.mxu1 }
 0xf42   : > { %5677 = vrot.lane.b32.xlu0 %v12098_v32, %s12257_s2  ;;  %5673 = vrot.lane.b32.xlu1 %v12097_v47, %s12257_s2 }
 0xf43   : > { %v8082_v10 = vpop.f32.mrf.mxu1 }
 0xf44   : > { %v11377_v3 = vpack.c.bf16 %v8082_v10, %v8081_v2  ;;  %v5675_v2 = vrot.slane %v11363_v24, 4 }
 0xf45   : > { %v5655_v55 = vpop.f32.mrf.mxu1 }
 0xf46   : > { %v11379_v38 = vpack.c.bf16 %v5655_v55, %v5652_v48  ;;  %5685 = vrot.lane.b32.xlu0 %v12103_v52, %s12257_s2  ;;  %5681 = vrot.lane.b32.xlu1 %v12101_v27, %s12257_s2  ;;  %v12099_v48 = vrot.slane %v11377_v3, 6  ;;  %v12100_v10 = vrot.slane %v11377_v3, 2  ;;  %v5683_v55 = vrot.slane %v11365_v13, 4  ;;  %v6879_v27 = vld [vmem:[%s1029_s5] sm:$0xf] }
 0xf48   : > { %v12104_v47 = vrot.slane %v11379_v38, 6  ;;  %v12102_v32 = vrot.slane %v11379_v38, 2 }
 0xf4a   : > { %5693 = vrot.lane.b32.xlu0 %v12104_v47, %s12257_s2  ;;  %5689 = vrot.lane.b32.xlu1 %v12102_v32, %s12257_s2  ;;  %v11431_v47 = vld [vmem:[%s12042_s22 + $0x170] ss:$8 sps:$4 sm:$0xff]  }
 0xf4e   : > { %5701 = vrot.lane.b32.xlu0 %v12099_v48, %s12257_s2  ;;  %5697 = vrot.lane.b32.xlu1 %v12100_v10, %s12257_s2  ;;  %v5691_v48 = vrot.slane %v11379_v38, 4  ;;  %v12107_v10 = vrot.slane %v11377_v3, 4 }
 0xf52   : > { %6669 = vrot.lane.b32.xlu0 %v5675_v2, %s12257_s2  ;;  %6667 = vrot.lane.b32.xlu1 %v11363_v24, %s12257_s2 }
 0xf56   : > { %6673 = vrot.lane.b32.xlu0 %v5683_v55, %s12257_s2  ;;  %6671 = vrot.lane.b32.xlu1 %v11365_v13, %s12257_s2 }
 0xf5a   : > { %6677 = vrot.lane.b32.xlu0 %v5691_v48, %s12257_s2  ;;  %6675 = vrot.lane.b32.xlu1 %v11379_v38, %s12257_s2 }
 0xf5e   : > { %6681 = vrot.lane.b32.xlu0 %v12107_v10, %s12257_s2  ;;  %6679 = vrot.lane.b32.xlu1 %v11377_v3, %s12257_s2  ;;  %v11439_v10 = vld [vmem:[%s12042_s22 + $0x164] ss:$8 sps:$4 sm:$0xff]   ;;  %s1033_s2 = scalar_lea.vmem %s12035_s15, %s11413_s25 }
 0xf5f   : > { %12277 = vst [vmem:[#allocation45_spill] sm:$0xff] %v11439_v10 }
 0xf62   : > { %6882 = vperm.xlu0 %8103, %v6879_v27  }
 0xfb4   : > { %v5678_v32 = vpop.permute.xlu0 %5677  ;;  %v5674_v52 = vpop.permute.xlu1 %5673 }
 0xfb5   : > { %v5705_v59 = vsel %vm1903_vm4, %v11363_v24, %v5674_v52  ;;  %v5709_v26 = vsel %vm1903_vm4, %v5675_v2, %v5678_v32  ;;  %v11454_v52 = vld [vmem:[%s12042_s22 + $0x154] ss:$8 sps:$4 sm:$0xff]   ;;  %v11460_v2 = vld [vmem:[%s12042_s22 + $0x150] ss:$8 sps:$4 sm:$0xff]  }
 0xfb6   : > { %6535 = vmatprep.mubr.bf16.mxu1 %v5709_v26 }
 0xfb7   : > { %6536 = vmatmul.mubr.bf16.vlgmr.msra.gmra.mxu1 %v5705_v59 }
 0xfb8   : > { %6545 = vmatpush1.bf16.msra.mxu1 %v11431_v47  ;;  %v5686_v27 = vpop.permute.xlu0 %5685  ;;  %v11442_v61 = vpop.permute.xlu1 %5681 }
 0xfb9   : > { %6546 = vmatprep.subr.bf16.mxu1 %v11439_v10  ;;  %v5717_v32 = vsel %vm1903_vm4, %v5683_v55, %v5686_v27  ;;  %v11469_v27 = vld [vmem:[%s12042_s22 + $0x144] ss:$8 sps:$4 sm:$0xff]  }
 0xfba   : > { %6576 = vmatprep.mubr.bf16.mxu1 %v5717_v32 }
 0xfbc   : > { %6547 = vmatpush1.bf16.msra.mxu1 %v11447_v41  ;;  %v5694_v26 = vpop.permute.xlu0 %5693  ;;  %v5690_v59 = vpop.permute.xlu1 %5689 }
 0xfbd   : > { %v5721_v10 = vsel %vm1903_vm4, %v11379_v38, %v5690_v59  ;;  %6548 = vmatprep.subr.bf16.mxu1 %v11454_v52  ;;  %v5725_v55 = vsel %vm1903_vm4, %v5691_v48, %v5694_v26  ;;  %v11478_v59 = vld [vmem:[%s12042_s22 + $0x140] ss:$8 sps:$4 sm:$0xff]   ;;  %v11485_v48 = vld [vmem:[%s12042_s22 + $0x134] ss:$8 sps:$4 sm:$0xff]  }
 0xfbe   : > { %6617 = vmatprep.mubr.bf16.mxu0 %v5725_v55  ;;  %v11502_v55 = vld [vmem:[%s12042_s22 + $0x124] ss:$8 sps:$4 sm:$0xff]  }
 0xfbf   : > { %6618 = vmatmul.mubr.bf16.vlgmr.msra.gmra.mxu0 %v5721_v10  ;;  %v11492_v10 = vld [vmem:[%s12042_s22 + $0x130] ss:$8 sps:$4 sm:$0xff]  }
 0xfc0   : > { %6549 = vmatpush1.bf16.msra.mxu1 %v11460_v2  ;;  %6716 = vmatpush1.bf16.msra.mxu0 %v11021_v43  ;;  %v11473_v32 = vpop.permute.xlu0 %5701 }
 0xfc1   : > { %6550 = vmatprep.subr.bf16.mxu1 %v11469_v27  ;;  %6717 = vmatprep.subr.bf16.mxu0 %v11031_v42  ;;  %v12278_v42 = vrot.slane %v11363_v24, 6 }
 0xfc4   : > { %6551 = vmatpush1.bf16.msra.mxu1 %v11478_v59  ;;  %6718 = vmatpush1.bf16.msra.mxu0 %v11050_v49  ;;  %v6670_v43 = vpop.permute.xlu0 %6669  ;;  %v11509_v49 = vld [vmem:[%s12042_s22 + $0x120] ss:$8 sps:$4 sm:$0xff]  }
 0xfc5   : > { %6552 = vmatprep.subr.bf16.mxu1 %v11485_v48  ;;  %6719 = vmatprep.subr.bf16.mxu0 %v11057_v56  ;;  %v6689_v26 = vsel %vm1903_vm4, %v6670_v43, %v12278_v42  ;;  %v11516_v56 = vld [vmem:[%s12042_s22 + $0x114] ss:$8 sps:$4 sm:$0xff]   ;;  %v5713_v43 = vsel %vm1903_vm4, %v11365_v13, %v11442_v61  ;;  %v11675_v42 = vpop.permute.xlu1 %5697 }
 0xfc6   : > { %6747 = vmatprep.mubr.bf16.mxu0 %v6689_v26  ;;  %v12280_v26 = vrot.slane %v11377_v3, 4  ;;  %v11694_v61 = vld [vmem:[%s12042_s22 + $0x354] ss:$8 sps:$4 sm:$0xff]  }
 0xfc8   : > { %6553 = vmatpush1.bf16.msra.mxu1 %v11492_v10  ;;  %6720 = vmatpush1.bf16.msra.mxu0 %v11074_v8  ;;  %v11523_v8 = vld [vmem:[%s12042_s22 + $0x110] ss:$8 sps:$4 sm:$0xff]  }
 0xfc9   : > { %6554 = vmatprep.subr.bf16.mxu1 %v11502_v55  ;;  %6721 = vmatprep.subr.bf16.mxu0 %v11086_v17  ;;  %v11530_v17 = vld [vmem:[%s12042_s22 + $0x104] ss:$8 sps:$4 sm:$0xff]  }
 0xfcc   : > { %6555 = vmatpush1.bf16.msra.mxu1 %v11509_v49  ;;  %6722 = vmatpush1.bf16.msra.mxu0 %v11098_v22  ;;  %v11537_v22 = vld [vmem:[%s12042_s22 + $0x100] ss:$8 sps:$4 sm:$0xff]  }
 0xfcd   : > { %6556 = vmatprep.subr.bf16.mxu1 %v11516_v56  ;;  %6723 = vmatprep.subr.bf16.mxu0 %v11110_v9  ;;  %v11544_v9 = vld [vmem:[%s12042_s22 + $0x1f4] ss:$8 sps:$4 sm:$0xff]  }
 0xfd0   : > { %6557 = vmatpush1.bf16.msra.mxu1 %v11523_v8  ;;  %6724 = vmatpush1.bf16.msra.mxu0 %v11122_v21  ;;  %v11551_v21 = vld [vmem:[%s12042_s22 + $0x1f0] ss:$8 sps:$4 sm:$0xff]  }
 0xfd1   : > { %6558 = vmatprep.subr.bf16.mxu1 %v11530_v17  ;;  %6725 = vmatprep.subr.bf16.mxu0 %v11134_v20  ;;  %v11558_v20 = vld [vmem:[%s12042_s22 + $0x1e4] ss:$8 sps:$4 sm:$0xff]  }
 0xfd4   : > { %6559 = vmatpush1.bf16.msra.mxu1 %v11537_v22  ;;  %6726 = vmatpush1.bf16.msra.mxu0 %v11146_v39  ;;  %v11565_v39 = vld [vmem:[%s12042_s22 + $0x1e0] ss:$8 sps:$4 sm:$0xff]  }
 0xfd5   : > { %6560 = vmatprep.subr.bf16.mxu1 %v11544_v9  ;;  %6727 = vmatprep.subr.bf16.mxu0 %v11158_v46  ;;  %v11572_v46 = vld [vmem:[%s12042_s22 + $0x1d4] ss:$8 sps:$4 sm:$0xff]  }
 0xfd8   : > { %6561 = vmatpush2.bf16.msra.mxu1 %v11551_v21  ;;  %6728 = vmatpush1.bf16.msra.mxu0 %v11170_v50  ;;  %v11579_v50 = vld [vmem:[%s12042_s22 + $0x1d0] ss:$8 sps:$4 sm:$0xff]  }
 0xfd9   : > { %6562 = vmatprep.subr.bf16.mxu1 %v11558_v20  ;;  %6729 = vmatprep.subr.bf16.mxu0 %v11182_v53  ;;  %v11586_v53 = vld [vmem:[%s12042_s22 + $0x1c4] ss:$8 sps:$4 sm:$0xff]  }
 0xfdc   : > { %6563 = vmatpush2.bf16.msra.mxu1 %v11565_v39  ;;  %6730 = vmatpush1.bf16.msra.mxu0 %v11194_v35  ;;  %v11593_v35 = vld [vmem:[%s12042_s22 + $0x1c0] ss:$8 sps:$4 sm:$0xff]  }
 0xfdd   : > { %6564 = vmatprep.subr.bf16.mxu1 %v11572_v46  ;;  %6731 = vmatprep.subr.bf16.mxu0 %v11206_v57  ;;  %v11600_v57 = vld [vmem:[%s12042_s22 + $0x1b4] ss:$8 sps:$4 sm:$0xff]  }
 0xfe0   : > { %6565 = vmatpush2.bf16.msra.mxu1 %v11579_v50  ;;  %6732 = vmatpush2.bf16.msra.mxu0 %v11218_v44  ;;  %v11607_v44 = vld [vmem:[%s12042_s22 + $0x1b0] ss:$8 sps:$4 sm:$0xff]  }
 0xfe1   : > { %6566 = vmatprep.subr.bf16.mxu1 %v11586_v53  ;;  %6733 = vmatprep.subr.bf16.mxu0 %v11230_v58  ;;  %v11614_v58 = vld [vmem:[%s12042_s22 + $0x1a4] ss:$8 sps:$4 sm:$0xff]  }
 0xfe4   : > { %6567 = vmatpush2.bf16.msra.mxu1 %v11593_v35  ;;  %6734 = vmatpush2.bf16.msra.mxu0 %v11242_v37  ;;  %v11621_v37 = vld [vmem:[%s12042_s22 + $0x1a0] ss:$8 sps:$4 sm:$0xff]  }
 0xfe5   : > { %6568 = vmatprep.subr.bf16.mxu1 %v11600_v57  ;;  %6735 = vmatprep.subr.bf16.mxu0 %v11254_v30  ;;  %v11628_v30 = vld [vmem:[%s12042_s22 + $0x194] ss:$8 sps:$4 sm:$0xff]  }
 0xfe8   : > { %6569 = vmatpush2.bf16.msra.mxu1 %v11607_v44  ;;  %6736 = vmatpush2.bf16.msra.mxu0 %v11266_v63  ;;  %v11635_v63 = vld [vmem:[%s12042_s22 + $0x190] ss:$8 sps:$4 sm:$0xff]  }
 0xfe9   : > { %6570 = vmatprep.subr.bf16.mxu1 %v11614_v58  ;;  %6737 = vmatprep.subr.bf16.mxu0 %v11273_v23  ;;  %v11642_v23 = vld [vmem:[%s12042_s22 + $0x184] ss:$8 sps:$4 sm:$0xff]  }
 0xfec   : > { %6571 = vmatpush2.bf16.msra.mxu1 %v11621_v37  ;;  %6738 = vmatpush2.bf16.msra.mxu0 %v11280_v0  ;;  %v11649_v0 = vld [vmem:[%s12042_s22 + $0x180] ss:$8 sps:$4 sm:$0xff]  }
 0xfed   : > { %6572 = vmatprep.subr.bf16.mxu1 %v11628_v30  ;;  %6739 = vmatprep.subr.bf16.mxu0 %v11286_v7  ;;  %v11656_v7 = vld [vmem:[%s12042_s22 + $0x374] ss:$8 sps:$4 sm:$0xff]  }
 0xfee   : > { %12279 = vst [vmem:[#allocation19_spill] sm:$0xff] %v11656_v7 }
 0xff0   : > { %6573 = vmatpush2.bf16.msra.mxu1 %v11635_v63  ;;  %6740 = vmatpush2.bf16.msra.mxu0 %v11292_v18  ;;  %v11663_v18 = vld [vmem:[%s12042_s22 + $0x370] ss:$8 sps:$4 sm:$0xff]  }
 0xff1   : > { %6574 = vmatprep.subr.bf16.mxu1 %v11642_v23  ;;  %6741 = vmatprep.subr.bf16.mxu0 %v11298_v15  ;;  %v11670_v15 = vld [vmem:[%s12042_s22 + $0x364] ss:$8 sps:$4 sm:$0xff]  }
 0xff4   : > { %6575 = vmatpush2.bf16.msra.mxu1 %v11649_v0  ;;  %6742 = vmatpush2.bf16.msra.mxu0 %v11304_v34  ;;  %v11677_v34 = vpop.permute.xlu0 %6673 }
 0xff5   : > { %6626 = vmatprep.subr.bf16.mxu1 %v11656_v7  ;;  %6743 = vmatprep.subr.bf16.mxu0 %v11310_v12  ;;  %v5733_v7 = vsel %vm1903_vm4, %v12280_v26, %v11473_v32  ;;  %v11687_v12 = vld [vmem:[%s12042_s22 + $0x360] ss:$8 sps:$4 sm:$0xff]   ;;  %v6668_v32 = vpop.permute.xlu1 %6667 }
 0xff6   : > { %12281 = vst [vmem:[#allocation44_spill] sm:$0xff] %v11687_v12 }
 0xff7   : > { %6577 = vmatmul.mubr.bf16.vlgmr.msra.gmra.mxu1 %v5713_v43 }
 0xff8   : > { %6627 = vmatpush1.bf16.msra.mxu1 %v11663_v18  ;;  %6658 = vmatprep.mubr.bf16.mxu1 %v5733_v7  ;;  %v11701_v7 = vld [vmem:[%s12042_s22 + $0x350] ss:$8 sps:$4 sm:$0xff]   ;;  %v6678_v43 = vpop.permute.xlu0 %6677 }
 0xff9   : > { %6744 = vmatpush2.bf16.msra.mxu0 %v11316_v4  ;;  %6628 = vmatprep.subr.bf16.mxu1 %v11670_v15  ;;  %v11709_v4 = vld [vmem:[%s12042_s22 + $0x344] ss:$8 sps:$4 sm:$0xff]  }
 0xffa   : > { %6745 = vmatprep.subr.bf16.mxu0 %v11322_v28  ;;  %v12282_v28 = vrot.slane %v11363_v24, 2  ;;  %v11727_v24 = vld [vmem:[%s12042_s22 + $0x334] ss:$8 sps:$4 sm:$0xff]  }
 0xffc   : > { %6629 = vmatpush1.bf16.msra.mxu1 %v11687_v12  ;;  %v6685_v26 = vsel %vm1903_vm4, %v6668_v32, %v12282_v28  ;;  %v12283_v12 = vrot.slane %v11379_v38, 6  ;;  %v12286_v32 = vld [vmem:[#allocation2_spill] sm:$0xff]  ;;  %v12290_v28 = vld [vmem:[#allocation3_spill] sm:$0xff] }
 0xffd   : > { %6746 = vmatpush2.bf16.msra.mxu0 %v11328_v45  ;;  %6630 = vmatprep.subr.bf16.mxu1 %v11694_v61 }
 0xffe   : > { %6797 = vmatprep.subr.bf16.mxu0 %v10980_v1  ;;  %v6705_v45 = vsel %vm1903_vm4, %v6678_v43, %v12283_v12  ;;  %v11721_v1 = vld [vmem:[%s12042_s22 + $0x340] ss:$8 sps:$4 sm:$0xff]   ;;  %v11735_v12 = vld [vmem:[%s12042_s22 + $0x330] ss:$8 sps:$4 sm:$0xff]  }
 0xfff   : > { %v12288_v43 = vld [vmem:[#allocation4_spill] sm:$0xff] }
0x1000   : > { %6748 = vmatmul.mubr.bf16.vlgmr.msra.gmra.mxu0 %v6685_v26  ;;  %6631 = vmatpush1.bf16.msra.mxu1 %v11701_v7  ;;  %v11854_v26 = vld [vmem:[%s12042_s22 + $0x3a4] ss:$8 sps:$4 sm:$0xff]  }
0x1001   : > { %6798 = vmatpush1.bf16.msra.mxu0 %v10975_v29  ;;  %6829 = vmatprep.mubr.bf16.mxu0 %v6705_v45  ;;  %v11742_v29 = vld [vmem:[%s12042_s22 + $0x324] ss:$8 sps:$4 sm:$0xff]   ;;  %12291 = vst [vmem:[#allocation20_spill] sm:$0xff] %v11854_v26  ;;  %v12292_v45 = vld [vmem:[#allocation5_spill] sm:$0xff] }
0x1002   : > { %6632 = vmatprep.subr.bf16.mxu1 %v11709_v4  ;;  %6799 = vmatprep.subr.bf16.mxu0 %v10992_v11  ;;  %v11749_v11 = vld [vmem:[%s12042_s22 + $0x320] ss:$8 sps:$4 sm:$0xff]  }
0x1004   : > { %6633 = vmatpush1.bf16.msra.mxu1 %v11721_v1 }
0x1005   : > { %6800 = vmatpush1.bf16.msra.mxu0 %v10987_v31  ;;  %6634 = vmatprep.subr.bf16.mxu1 %v11727_v24  ;;  %v11756_v31 = vld [vmem:[%s12042_s22 + $0x314] ss:$8 sps:$4 sm:$0xff]  }
0x1006   : > { %6801 = vmatprep.subr.bf16.mxu0 %v11004_v16  ;;  %v11763_v16 = vld [vmem:[%s12042_s22 + $0x310] ss:$8 sps:$4 sm:$0xff]  }
0x1008   : > { %6635 = vmatpush1.bf16.msra.mxu1 %v11735_v12 }
0x1009   : > { %6802 = vmatpush1.bf16.msra.mxu0 %v10999_v5  ;;  %6636 = vmatprep.subr.bf16.mxu1 %v11742_v29  ;;  %v11770_v5 = vld [vmem:[%s12042_s22 + $0x304] ss:$8 sps:$4 sm:$0xff]  }
0x100a   : > { %6803 = vmatprep.subr.bf16.mxu0 %v11016_v54  ;;  %v11777_v54 = vld [vmem:[%s12042_s22 + $0x300] ss:$8 sps:$4 sm:$0xff]  }
0x100c   : > { %6637 = vmatpush1.bf16.msra.mxu1 %v11749_v11 }
0x100d   : > { %6804 = vmatpush1.bf16.msra.mxu0 %v11011_v19  ;;  %6638 = vmatprep.subr.bf16.mxu1 %v11756_v31  ;;  %v11784_v19 = vld [vmem:[%s12042_s22 + $0x3f4] ss:$8 sps:$4 sm:$0xff]  }
0x100e   : > { %6805 = vmatprep.subr.bf16.mxu0 %v11037_v36  ;;  %v11791_v36 = vld [vmem:[%s12042_s22 + $0x3f0] ss:$8 sps:$4 sm:$0xff]  }
0x1010   : > { %6639 = vmatpush1.bf16.msra.mxu1 %v11763_v16 }
0x1011   : > { %6806 = vmatpush1.bf16.msra.mxu0 %v11044_v60  ;;  %6640 = vmatprep.subr.bf16.mxu1 %v11770_v5  ;;  %v11798_v60 = vld [vmem:[%s12042_s22 + $0x3e4] ss:$8 sps:$4 sm:$0xff]  }
0x1012   : > { %6807 = vmatprep.subr.bf16.mxu0 %v11062_v6  ;;  %v11805_v6 = vld [vmem:[%s12042_s22 + $0x3e0] ss:$8 sps:$4 sm:$0xff]  }
0x1014   : > { %6641 = vmatpush1.bf16.msra.mxu1 %v11777_v54 }
0x1015   : > { %6808 = vmatpush1.bf16.msra.mxu0 %v11068_v51  ;;  %6642 = vmatprep.subr.bf16.mxu1 %v11784_v19  ;;  %v11812_v51 = vld [vmem:[%s12042_s22 + $0x3d4] ss:$8 sps:$4 sm:$0xff]  }
0x1016   : > { %6809 = vmatprep.subr.bf16.mxu0 %v11080_v62  ;;  %v11819_v62 = vld [vmem:[%s12042_s22 + $0x3d0] ss:$8 sps:$4 sm:$0xff]  }
0x1018   : > { %6643 = vmatpush2.bf16.msra.mxu1 %v11791_v36 }
0x1019   : > { %6810 = vmatpush1.bf16.msra.mxu0 %v11092_v33  ;;  %6644 = vmatprep.subr.bf16.mxu1 %v11798_v60  ;;  %v11826_v33 = vld [vmem:[%s12042_s22 + $0x3c4] ss:$8 sps:$4 sm:$0xff]  }
0x101a   : > { %6811 = vmatprep.subr.bf16.mxu0 %v11104_v25  ;;  %12284 = vst [vmem:[#allocation18_spill] sm:$0xff] %v11826_v33  ;;  %v11833_v25 = vld [vmem:[%s12042_s22 + $0x3c0] ss:$8 sps:$4 sm:$0xff]  }
0x101b   : > { %12285 = vst [vmem:[#allocation22_spill] sm:$0xff] %v11833_v25 }
0x101c   : > { %6645 = vmatpush2.bf16.msra.mxu1 %v11805_v6 }
0x101d   : > { %6812 = vmatpush1.bf16.msra.mxu0 %v11116_v14  ;;  %6646 = vmatprep.subr.bf16.mxu1 %v11812_v51  ;;  %v11840_v14 = vld [vmem:[%s12042_s22 + $0x3b4] ss:$8 sps:$4 sm:$0xff]  }
0x101e   : > { %6813 = vmatprep.subr.bf16.mxu0 %v11128_v40  ;;  %12287 = vst [vmem:[#allocation43_spill] sm:$0xff] %v11840_v14  ;;  %v11847_v40 = vld [vmem:[%s12042_s22 + $0x3b0] ss:$8 sps:$4 sm:$0xff]  }
0x101f   : > { %12289 = vst [vmem:[#allocation21_spill] sm:$0xff] %v11847_v40 }
0x1020   : > { %6647 = vmatpush2.bf16.msra.mxu1 %v11819_v62 }
0x1021   : > { %6814 = vmatpush2.bf16.msra.mxu0 %v12286_v32  ;;  %6648 = vmatprep.subr.bf16.mxu1 %v11826_v33  ;;  %v11861_v32 = vld [vmem:[%s12042_s22 + $0x3a0] ss:$8 sps:$4 sm:$0xff]  }
0x1022   : > { %6815 = vmatprep.subr.bf16.mxu0 %v12288_v43  ;;  %12293 = vst [vmem:[#allocation23_spill] sm:$0xff] %v11861_v32  ;;  %v12294_v43 = vld [vmem:[#allocation6_spill] sm:$0xff] }
0x1023   : > { %v12306_v33 = vld [vmem:[#allocation14_spill] sm:$0xff] }
0x1024   : > { %6649 = vmatpush2.bf16.msra.mxu1 %v11833_v25  ;;  %v12305_v25 = vld [vmem:[#allocation13_spill] sm:$0xff] }
0x1025   : > { %6816 = vmatpush2.bf16.msra.mxu0 %v12290_v28  ;;  %6650 = vmatprep.subr.bf16.mxu1 %v11840_v14  ;;  %v11868_v28 = vld [vmem:[%s12042_s22 + $0x394] ss:$8 sps:$4 sm:$0xff]  }
0x1026   : > { %6817 = vmatprep.subr.bf16.mxu0 %v12292_v45  ;;  %12295 = vst [vmem:[#allocation42_spill] sm:$0xff] %v11868_v28  ;;  %v12296_v14 = vld [vmem:[#allocation8_spill] sm:$0xff] }
0x1027   : > { %v11875_v45 = vld [vmem:[%s12042_s22 + $0x390] ss:$8 sps:$4 sm:$0xff]  }
0x1028   : > { %6651 = vmatpush2.bf16.msra.mxu1 %v11847_v40  ;;  %12297 = vst [vmem:[#allocation24_spill] sm:$0xff] %v11875_v45  ;;  %v12298_v40 = vld [vmem:[#allocation7_spill] sm:$0xff] }
0x1029   : > { %6818 = vmatpush2.bf16.msra.mxu0 %v12294_v43  ;;  %6652 = vmatprep.subr.bf16.mxu1 %v11854_v26  ;;  %v11882_v43 = vld [vmem:[%s12042_s22 + $0x384] ss:$8 sps:$4 sm:$0xff]   ;;  %v12300_v26 = vld [vmem:[#allocation9_spill] sm:$0xff] }
0x102a   : > { %6819 = vmatprep.subr.bf16.mxu0 %v12296_v14  ;;  %12299 = vst [vmem:[#allocation26_spill] sm:$0xff] %v11882_v43  ;;  %v11889_v14 = vld [vmem:[%s12042_s22 + $0x380] ss:$8 sps:$4 sm:$0xff]  }
0x102b   : > { %12301 = vst [vmem:[#allocation41_spill] sm:$0xff] %v11889_v14 }
0x102c   : > { %6653 = vmatpush2.bf16.msra.mxu1 %v11861_v32  ;;  %v12302_v32 = vld [vmem:[#allocation10_spill] sm:$0xff] }
0x102d   : > { %6820 = vmatpush2.bf16.msra.mxu0 %v12298_v40  ;;  %6654 = vmatprep.subr.bf16.mxu1 %v11868_v28  ;;  %v12303_v40 = vld [vmem:[#allocation12_spill] sm:$0xff]  ;;  %v12304_v28 = vld [vmem:[#allocation11_spill] sm:$0xff] }
0x102e   : > { %6821 = vmatprep.subr.bf16.mxu0 %v12300_v26  ;;  %v5729_v26 = vsel %vm1903_vm4, %v11377_v3, %v11675_v42  ;;  %v12311_v42 = vld [vmem:[#allocation17_spill] sm:$0xff] }
0x1030   : > { %6655 = vmatpush2.bf16.msra.mxu1 %v11875_v45  ;;  %v6672_v45 = vpop.permute.xlu1 %6671 }
0x1031   : > { %6822 = vmatpush2.bf16.msra.mxu0 %v12302_v32  ;;  %6656 = vmatprep.subr.bf16.mxu1 %v11882_v43  ;;  %v12307_v32 = vrot.slane %v11365_v13, 6 }
0x1032   : > { %6823 = vmatprep.subr.bf16.mxu0 %v12303_v40  ;;  %v12308_v40 = vld [vmem:[#allocation15_spill] sm:$0xff] }
0x1033   : > { %v6697_v43 = vsel %vm1903_vm4, %v11677_v34, %v12307_v32 }
0x1034   : > { %6657 = vmatpush2.bf16.msra.mxu1 %v11889_v14  ;;  %v6676_v14 = vpop.permute.xlu1 %6675 }
0x1035   : > { %6824 = vmatpush2.bf16.msra.mxu0 %v12304_v28  ;;  %6756 = vmatprep.subr.bf16.mxu1 %v12305_v25  ;;  %v12309_v28 = vld [vmem:[#allocation45_spill] sm:$0xff]  ;;  %v12310_v25 = vld [vmem:[#allocation16_spill] sm:$0xff] }
0x1036   : > { %6825 = vmatprep.subr.bf16.mxu0 %v12306_v33  ;;  %v12312_v33 = vrot.slane %v11379_v38, 2  ;;  %v12314_v38 = vld [vmem:[#allocation19_spill] sm:$0xff] }
0x1037   : > { %6659 = vmatmul.mubr.bf16.vlgmr.msra.gmra.mxu1 %v5729_v26 }
0x1038   : > { %6757 = vmatpush1.bf16.msra.mxu1 %v11431_v47  ;;  %6788 = vmatprep.mubr.bf16.mxu1 %v6697_v43  ;;  %v6701_v34 = vsel %vm1903_vm4, %v6676_v14, %v12312_v33  ;;  %v12313_v47 = vmov 0  }
0x1039   : > { %6826 = vmatpush2.bf16.msra.mxu0 %v12308_v40  ;;  %6758 = vmatprep.subr.bf16.mxu1 %v12309_v28 }
0x103a   : > { %6827 = vmatprep.subr.bf16.mxu0 %v12310_v25 }
0x103c   : > { %6759 = vmatpush1.bf16.msra.mxu1 %v11447_v41  ;;  %v6682_v41 = vpop.permute.xlu0 %6681 }
0x103d   : > { %6828 = vmatpush2.bf16.msra.mxu0 %v12311_v42  ;;  %6760 = vmatprep.subr.bf16.mxu1 %v11454_v52  ;;  %v12315_v52 = vrot.slane %v11365_v13, 2 }
0x1040   : > { %6830 = vmatmul.mubr.bf16.vlgmr.msra.gmra.mxu0 %v6701_v34  ;;  %6761 = vmatpush1.bf16.msra.mxu1 %v11460_v2  ;;  %v6693_v2 = vsel %vm1903_vm4, %v6672_v45, %v12315_v52  ;;  %v6883_v26 = vpop.permute.xlu0 %6882 }
0x1041   : > { %6762 = vmatprep.subr.bf16.mxu1 %v11469_v27  ;;  %7006 = vmatprep.mubr.bf16.mxu0 %v12313_v47 }
0x1044   : > { %6763 = vmatpush1.bf16.msra.mxu1 %v11478_v59  ;;  %v12316_v59 = vrot.slane %v11377_v3, 6 }
0x1045   : > { %6764 = vmatprep.subr.bf16.mxu1 %v11485_v48 }
0x1046   : > { %v6713_v48 = vsel %vm1903_vm4, %v6682_v41, %v12316_v59 }
0x1048   : > { %6765 = vmatpush1.bf16.msra.mxu1 %v11492_v10 }
0x1049   : > { %6766 = vmatprep.subr.bf16.mxu1 %v11502_v55 }
0x104c   : > { %6767 = vmatpush1.bf16.msra.mxu1 %v11509_v49  ;;  %v12317_v49 = vld [vmem:[#allocation44_spill] sm:$0xff] }
0x104d   : > { %6768 = vmatprep.subr.bf16.mxu1 %v11516_v56 }
0x1050   : > { %6769 = vmatpush1.bf16.msra.mxu1 %v11523_v8 }
0x1051   : > { %6770 = vmatprep.subr.bf16.mxu1 %v11530_v17 }
0x1054   : > { %6771 = vmatpush1.bf16.msra.mxu1 %v11537_v22 }
0x1055   : > { %6772 = vmatprep.subr.bf16.mxu1 %v11544_v9  ;;  %v12318_v9 = vld [vmem:[#allocation18_spill] sm:$0xff] }
0x1058   : > { %6773 = vmatpush2.bf16.msra.mxu1 %v11551_v21  ;;  %v12319_v21 = vld [vmem:[#allocation22_spill] sm:$0xff] }
0x1059   : > { %6774 = vmatprep.subr.bf16.mxu1 %v11558_v20  ;;  %v12320_v20 = vld [vmem:[#allocation43_spill] sm:$0xff] }
0x105c   : > { %6775 = vmatpush2.bf16.msra.mxu1 %v11565_v39  ;;  %v12321_v39 = vld [vmem:[#allocation21_spill] sm:$0xff] }
0x105d   : > { %6776 = vmatprep.subr.bf16.mxu1 %v11572_v46  ;;  %v12322_v46 = vld [vmem:[#allocation20_spill] sm:$0xff] }
0x1060   : > { %6777 = vmatpush2.bf16.msra.mxu1 %v11579_v50  ;;  %v12323_v50 = vld [vmem:[#allocation23_spill] sm:$0xff] }
0x1061   : > { %6778 = vmatprep.subr.bf16.mxu1 %v11586_v53  ;;  %v12324_v53 = vld [vmem:[#allocation42_spill] sm:$0xff] }
0x1064   : > { %6779 = vmatpush2.bf16.msra.mxu1 %v11593_v35  ;;  %v12325_v35 = vld [vmem:[#allocation24_spill] sm:$0xff] }
0x1065   : > { %6780 = vmatprep.subr.bf16.mxu1 %v11600_v57  ;;  %v12326_v57 = vld [vmem:[#allocation26_spill] sm:$0xff] }
0x1068   : > { %6781 = vmatpush2.bf16.msra.mxu1 %v11607_v44  ;;  %v6680_v44 = vpop.permute.xlu1 %6679 }
0x1069   : > { %6782 = vmatprep.subr.bf16.mxu1 %v11614_v58  ;;  %v12327_v58 = vld [vmem:[#allocation41_spill] sm:$0xff] }
0x106c   : > { %6783 = vmatpush2.bf16.msra.mxu1 %v11621_v37  ;;  %v12328_v37 = vrot.slane %v11377_v3, 2 }
0x106d   : > { %6784 = vmatprep.subr.bf16.mxu1 %v11628_v30 }
0x106e   : > { %v6709_v30 = vsel %vm1903_vm4, %v6680_v44, %v12328_v37 }
0x1070   : > { %6785 = vmatpush2.bf16.msra.mxu1 %v11635_v63 }
0x1071   : > { %6786 = vmatprep.subr.bf16.mxu1 %v11642_v23 }
0x1074   : > { %6787 = vmatpush2.bf16.msra.mxu1 %v11649_v0 }
0x1075   : > { %6838 = vmatprep.subr.bf16.mxu1 %v12314_v38 }
0x1077   : > { %6789 = vmatmul.mubr.bf16.vlgmr.msra.gmra.mxu1 %v6693_v2  ;;  %v6537_v27 = vpop.f32.mrf.mxu1 }
0x1078   : > { %6839 = vmatpush1.bf16.msra.mxu1 %v11663_v18  ;;  %6870 = vmatprep.mubr.bf16.mxu1 %v6713_v48 }
0x1079   : > { %v6539_v10 = vpop.f32.mrf.mxu1  ;;  %6840 = vmatprep.subr.bf16.mxu1 %v11670_v15 }
0x107b   : > { %v6541_v55 = vpop.f32.mrf.mxu1 }
0x107c   : > { %6841 = vmatpush1.bf16.msra.mxu1 %v12317_v49 }
0x107d   : > { %v6542_v56 = vpop.f32.mrf.mxu1  ;;  %6842 = vmatprep.subr.bf16.mxu1 %v11694_v61 }
0x107f   : > { %v6619_v13 = vpop.f32.mrf.mxu0 }
0x1080   : > { %6843 = vmatpush1.bf16.msra.mxu1 %v11701_v7 }
0x1081   : > { %v6621_v8 = vpop.f32.mrf.mxu0  ;;  %6844 = vmatprep.subr.bf16.mxu1 %v11709_v4 }
0x1083   : > { %v6623_v17 = vpop.f32.mrf.mxu0 }
0x1084   : > { %6845 = vmatpush1.bf16.msra.mxu1 %v11721_v1  ;;  %v6890_v17 = vld [vmem:[%s1037_s1] sm:$0xf] }
0x1085   : > { %v6624_v22 = vpop.f32.mrf.mxu0  ;;  %6846 = vmatprep.subr.bf16.mxu1 %v11727_v24 }
0x1086   : > { %v6948_v22 = vld [vmem:[%s1043_s24] sm:$0x1] }
0x1088   : > { %6847 = vmatpush1.bf16.msra.mxu1 %v11735_v12 }
0x1089   : > { %6848 = vmatprep.subr.bf16.mxu1 %v11742_v29 }
0x108c   : > { %6849 = vmatpush1.bf16.msra.mxu1 %v11749_v11 }
0x108d   : > { %6850 = vmatprep.subr.bf16.mxu1 %v11756_v31 }
0x1090   : > { %6851 = vmatpush1.bf16.msra.mxu1 %v11763_v16 }
0x1091   : > { %6852 = vmatprep.subr.bf16.mxu1 %v11770_v5 }
0x1094   : > { %6853 = vmatpush1.bf16.msra.mxu1 %v11777_v54 }
0x1095   : > { %6854 = vmatprep.subr.bf16.mxu1 %v11784_v19 }
0x1098   : > { %6855 = vmatpush2.bf16.msra.mxu1 %v11791_v36 }
0x1099   : > { %6856 = vmatprep.subr.bf16.mxu1 %v11798_v60 }
0x109c   : > { %6857 = vmatpush2.bf16.msra.mxu1 %v11805_v6 }
0x109d   : > { %6858 = vmatprep.subr.bf16.mxu1 %v11812_v51 }
0x10a0   : > { %6859 = vmatpush2.bf16.msra.mxu1 %v11819_v62 }
0x10a1   : > { %6860 = vmatprep.subr.bf16.mxu1 %v12318_v9 }
0x10a4   : > { %6861 = vmatpush2.bf16.msra.mxu1 %v12319_v21 }
0x10a5   : > { %6862 = vmatprep.subr.bf16.mxu1 %v12320_v20 }
0x10a8   : > { %6863 = vmatpush2.bf16.msra.mxu1 %v12321_v39 }
0x10a9   : > { %6864 = vmatprep.subr.bf16.mxu1 %v12322_v46 }
0x10ac   : > { %6865 = vmatpush2.bf16.msra.mxu1 %v12323_v50 }
0x10ad   : > { %6866 = vmatprep.subr.bf16.mxu1 %v12324_v53 }
0x10b0   : > { %6867 = vmatpush2.bf16.msra.mxu1 %v12325_v35 }
0x10b1   : > { %6868 = vmatprep.subr.bf16.mxu1 %v12326_v57 }
0x10b4   : > { %6869 = vmatpush2.bf16.msra.mxu1 %v12327_v58 }
0x10b7   : > { %v6578_v63 = vpop.f32.mrf.mxu1  ;;  %6871 = vmatmul.mubr.bf16.vlgmr.msra.gmra.mxu1 %v6709_v30 }
0x10b8   : > { %v6579_v23 = vadd.f32 %v6578_v63, %v6537_v27 }
0x10b9   : > { %v6580_v0 = vpop.f32.mrf.mxu1 }
0x10ba   : > { %v6581_v18 = vadd.f32 %v6580_v0, %v6539_v10  ;;  %v6620_v15 = vadd.f32 %v6619_v13, %v6579_v23 }
0x10bb   : > { %v6582_v61 = vpop.f32.mrf.mxu1 }
0x10bc   : > { %v6622_v7 = vadd.f32 %v6621_v8, %v6581_v18 }
0x10bd   : > { %v6583_v4 = vpop.f32.mrf.mxu1 }
0x10c0   : > { %v6749_v1 = vpop.f32.mrf.mxu0 }
0x10c2   : > { %v6751_v24 = vpop.f32.mrf.mxu0 }
0x10c4   : > { %v6753_v12 = vpop.f32.mrf.mxu0 }
0x10c6   : > { %v6754_v29 = vpop.f32.mrf.mxu0 }
0x10f7   : > { %v6660_v11 = vpop.f32.mrf.mxu1 }
0x10f8   : > { %v6661_v31 = vadd.f32 %v6660_v11, %v6620_v15  ;;  %v6889_v15 = vld [vmem:[%s1033_s2] sm:$0xf] }
0x10f9   : > { %v6662_v16 = vpop.f32.mrf.mxu1 }
0x10fa   : > { %v6663_v5 = vadd.f32 %v6662_v16, %v6622_v7  ;;  %v6885_v28 = vadd.f32 %v6883_v26, %v6661_v31 }
0x10fb   : > { %v6664_v3 = vpop.f32.mrf.mxu1 }
0x10fc   : > { %v6886_v32 = vadd.f32 %v6883_v26, %v6663_v5  ;;  %v6891_v52 = vsel %vm1722_vm1, %v6885_v28, 0.0 }
0x10fd   : > { %v6665_v54 = vpop.f32.mrf.mxu1 }
0x10fe   : > { %v6892_v33 = vsel %vm1722_vm1, %v6886_v32, 0.0 }
0x10ff   : > { %v6893_v59 = vadd.f32 %v6892_v33, %v6891_v52 }
0x1100   : > { %v6831_v19 = vpop.f32.mrf.mxu0 }
0x1102   : > { %v6833_v36 = vpop.f32.mrf.mxu0 }
0x1104   : > { %v6835_v60 = vpop.f32.mrf.mxu0 }
0x1106   : > { %v6836_v6 = vpop.f32.mrf.mxu0 }
0x1137   : > { %v6790_v51 = vpop.f32.mrf.mxu1 }
0x1138   : > { %v6791_v14 = vadd.f32 %v6790_v51, %v6749_v1 }
0x1139   : > { %v6792_v62 = vpop.f32.mrf.mxu1 }
0x113a   : > { %v6793_v40 = vadd.f32 %v6792_v62, %v6751_v24  ;;  %v6832_v25 = vadd.f32 %v6831_v19, %v6791_v14 }
0x113b   : > { %v6794_v45 = vpop.f32.mrf.mxu1 }
0x113c   : > { %v6834_v41 = vadd.f32 %v6833_v36, %v6793_v40 }
0x113d   : > { %v6795_v43 = vpop.f32.mrf.mxu1 }
0x1177   : > { %v6872_v42 = vpop.f32.mrf.mxu1 }
0x1178   : > { %v6873_v34 = vadd.f32 %v6872_v42, %v6832_v25 }
0x1179   : > { %v6874_v38 = vpop.f32.mrf.mxu1 }
0x117a   : > { %v6887_v2 = vadd.f32 %v6883_v26, %v6873_v34  ;;  %v6875_v27 = vadd.f32 %v6874_v38, %v6834_v41  ;;  %v8702_v38 = vmov 1966171168  }
0x117b   : > { %v6876_v48 = vpop.f32.mrf.mxu1  ;;  %v7063_v52 = vunpack.c.l.s4 %v8702_v38 }
0x117c   : > { %v6894_v10 = vsel %vm1722_vm1, %v6887_v2, 0.0  ;;  %v6888_v55 = vadd.f32 %v6883_v26, %v6875_v27 }
0x117d   : > { %v6895_v49 = vadd.f32 %v6894_v10, %v6893_v59  ;;  %v6877_v56 = vpop.f32.mrf.mxu1  ;;  %v7064_v48 = vunpack.c.0.s8 %v7063_v52 }
0x117e   : > { %v6896_v13 = vsel %vm1722_vm1, %v6888_v55, 0.0 }
0x117f   : > { %v6897_v8 = vadd.f32 %v6896_v13, %v6895_v49 }
0x1181   : > { %6898 = vadd.xlane.f32.xlu1 %v6897_v8 }
0x1192   : > { %6936 = vperm.xlu1 %8102, %v6890_v17  }
0x1196   : > { %6951 = vperm.xlu1 %8102, %v6948_v22  }
0x120a   : > { %v6899_v9 = vpop.xlane.xlu1 %6898 }
0x120b   : > { %v6900_v21 = vmul.f32 0.001953125, %v6899_v9 }
0x120d   : > { %v6901_v20 = vsub.f32 %v6885_v28, %v6900_v21  ;;  %v6902_v39 = vsub.f32 %v6886_v32, %v6900_v21  ;;  %v6903_v46 = vsub.f32 %v6887_v2, %v6900_v21  ;;  %v6904_v50 = vsub.f32 %v6888_v55, %v6900_v21  ;;  %v6943_v32 = vld [vmem:[%s1040_s8] sm:$0x1] }
0x120e   : > { %v6937_v19 = vpop.permute.xlu1 %6936  ;;  %v6954_v28 = vlaneseq }
0x120f   : > { %v6905_v53 = vmul.f32 %v6901_v20, %v6901_v20  ;;  %v6906_v35 = vmul.f32 %v6902_v39, %v6902_v39  ;;  %v6907_v57 = vmul.f32 %v6903_v46, %v6903_v46  ;;  %v6908_v44 = vmul.f32 %v6904_v50, %v6904_v50 }
0x1210   : > { %v6955_v25 = vshrl.u32 %v6954_v28, 7  ;;  %vm7087_vm12 = vcmp.lt.s32.totalorder %v6954_v28, 512 }
0x1211   : > { %v6909_v58 = vsel %vm1722_vm1, %v6905_v53, 0.0  ;;  %v6910_v37 = vsel %vm1722_vm1, %v6906_v35, 0.0  ;;  %v6912_v63 = vsel %vm1722_vm1, %v6907_v57, 0.0  ;;  %v6914_v0 = vsel %vm1722_vm1, %v6908_v44, 0.0 }
0x1212   : > { %v6911_v30 = vadd.f32 %v6910_v37, %v6909_v58  ;;  %v6956_v33 = vsub.s32 0, %v6955_v25  ;;  %v6952_v34 = vpop.permute.xlu1 %6951  ;;  %v7067_v13 = vsub.s32 %v7064_v48, %v6955_v25 }
0x1214   : > { %v6913_v23 = vadd.f32 %v6912_v63, %v6911_v30  ;;  %v6957_v27 = vrot.slane %v6952_v34, %v6956_v33 }
0x1216   : > { %v6915_v18 = vadd.f32 %v6914_v0, %v6913_v23 }
0x1218   : > { %6916 = vadd.xlane.f32.xlu0 %v6915_v18 }
0x122e   : > { %6927 = vperm.xlu0 %8103, %v6889_v15  }
0x12a1   : > { %v6917_v61 = vpop.xlane.xlu0 %6916 }
0x12a2   : > { %v6918_v7 = vmul.f32 0.001953125, %v6917_v61 }
0x12a4   : > { %v6919_v4 = vadd.f32 1e-05, %v6918_v7 }
0x12a6   : > { %8684 = vrsqrt.f32 %v6919_v4 }
0x12a9   : > { %v6928_v31 = vpop.permute.xlu0 %6927 }
0x12b3   : > { %v8685_v1 = vpop.eup %8684 }
0x12b4   : > { %v6921_v24 = vmul.f32 %v8685_v1, %v6901_v20  ;;  %v6922_v12 = vmul.f32 %v8685_v1, %v6902_v39  ;;  %v6923_v29 = vmul.f32 %v8685_v1, %v6903_v46  ;;  %v6924_v11 = vmul.f32 %v8685_v1, %v6904_v50 }
0x12b6   : > { %v6930_v16 = vmul.f32 %v6928_v31, %v6921_v24  ;;  %v6931_v5 = vmul.f32 %v6928_v31, %v6922_v12  ;;  %v6932_v3 = vmul.f32 %v6928_v31, %v6923_v29  ;;  %v6933_v54 = vmul.f32 %v6928_v31, %v6924_v11 }
0x12b8   : > { %v6939_v36 = vadd.f32 %v6937_v19, %v6930_v16  ;;  %v6940_v60 = vadd.f32 %v6937_v19, %v6931_v5  ;;  %v6941_v6 = vadd.f32 %v6937_v19, %v6932_v3  ;;  %v6942_v51 = vadd.f32 %v6937_v19, %v6933_v54 }
0x12ba   : > { %v6945_v62 = vpack.c.bf16 %v6940_v60, %v6940_v60  ;;  %v6944_v45 = vpack.c.bf16 %v6939_v36, %v6939_v36  ;;  %v6947_v43 = vpack.c.bf16 %v6942_v51, %v6942_v51  ;;  %v6946_v26 = vpack.c.bf16 %v6941_v6, %v6941_v6 }
0x12bc   : > { %7765 = vmatprep.subr.msk.bf16.mxu0 %vm1718_vm0, %v6945_v62  ;;  %v6963_v14 = vsel %vm1718_vm0, %v6944_v45, 0  ;;  %v6969_v40 = vsel %vm1718_vm0, %v6946_v26, 0 }
0x12bd   : > { %6989 = vmatpush1.bf16.msra.mxu0 %v6963_v14 }
0x12be   : > { %7767 = vmatprep.subr.msk.bf16.mxu0 %vm1718_vm0, %v6947_v43 }
0x12c0   : > { %7766 = vmatmul.mubr.msk.bf16.vlgmr.msra.gmra.mxu0 %vm6958_vm11, %v6943_v32 }
0x12c1   : > { %7030 = vmatpush1.bf16.msra.mxu0 %v6969_v40  ;;  %7047 = vmatprep.mubr.bf16.mxu0 %v12313_v47 }
0x12c8   : > { %7768 = vmatmul.mubr.msk.bf16.vlgmr.msra.gmra.mxu0 %vm6958_vm11, %v6943_v32 }
0x1380   : > { %v7008_v42 = vpop.f32.mrf.mxu0 }
0x1381   : > { %v7009_v49 = vadd.f32 %v7008_v42, %v6957_v27 }
0x1382   : > { %v7010_v41 = vpop.f32.mrf.mxu0 }
0x1383   : > { %v7011_v10 = vadd.f32 %v7010_v41, %v6957_v27 }
0x1384   : > { %v7012_v2 = vpop.f32.mrf.mxu0 }
0x1385   : > { %v7060_v47 = vcombine.low %v7009_v49, %v7011_v10 }
0x1386   : > { %v7013_v59 = vpop.f32.mrf.mxu0 }
0x1387   : > { %v7068_v20 = vrot.slane %v7060_v47, %v7067_v13 }
0x1388   : > { %v7049_v55 = vpop.f32.mrf.mxu0 }
0x1389   : > { %v7050_v8 = vadd.f32 %v7049_v55, %v6957_v27 }
0x138a   : > { %v7051_v56 = vpop.f32.mrf.mxu0 }
0x138b   : > { %v7052_v17 = vadd.f32 %v7051_v56, %v6957_v27 }
0x138c   : > { %v7053_v22 = vpop.f32.mrf.mxu0 }
0x138d   : > { %v7061_v9 = vcombine.low %v7050_v8, %v7052_v17 }
0x138e   : > { %v7054_v21 = vpop.f32.mrf.mxu0 }
0x138f   : > { %v7075_v39 = vrot.slane %v7061_v9, %v7067_v13 }
0x1391   : > { %v7076_v46 = vcombine.low %v7068_v20, %v7075_v39 }
0x1393   : > { %v7083_v50 = vrot.slane %v7076_v46, %v7067_v13 }
0x1395   : > { %7089 = vst.msk [vmem:[%s1047_s6] sm:$0xf] %vm7087_vm12, %v7083_v50 }
0x1396 PF: > { %s33_s4 = sadd.s32 1, %s8692_s4  }
0x1397   : > { %p30_p4 = scmp.ge.s32.totalorder %s33_s4, 4  }
0x1399   :  { %32 = sbr.rel (!%p30_p4) target bundleno = 10 (0xa), region = 196 }

</bundles_post_ra>
